<compile_context>
chip_gen: v7x
topology: tpu7x:2x2x1
jax: 0.10.0
libtpu: 0.0.40
codegen_flags: <defaults>
</compile_context>

<pallas_src>
import math
from functools import partial

import jax
import jax.numpy as jnp
from jax.experimental import pallas as pl
from jax.experimental.pallas import tpu as pltpu

ALPHA = 0.5
BETA = 0.5
SIGMA = 0.5
EPS = 1e-7
SMOOTH_DENOM = 1.0 - SIGMA - math.log(1.0 - SIGMA)
INV_SMOOTH_DENOM = 1.0 / SMOOTH_DENOM


def _smooth_l1(a, b):
    d = jnp.abs(a - b)
    return jnp.where(d < 1.0, 0.5 * d * d, d - 0.5)


def _smooth_ln(x):
    # smooth-ln penalty used by RepGT / RepBox.
    return jnp.where(x > SIGMA,
                     (x - SIGMA) * INV_SMOOTH_DENOM,
                     -jnp.log(jnp.maximum(1.0 - x, EPS)))


def _pairwise_iou(a_x1, a_y1, a_x2, a_y2, b_x1, b_y1, b_x2, b_y2):
    # a_* are (N,1) columns, b_* are (1,M) rows.  Legacy "+1" IoU in [eps, 1].
    w = jnp.maximum(jnp.minimum(a_x2, b_x2) - jnp.maximum(a_x1, b_x1) + 1.0, 0.0)
    h = jnp.maximum(jnp.minimum(a_y2, b_y2) - jnp.maximum(a_y1, b_y1) + 1.0, 0.0)
    overlap = w * h
    area_a = (a_x2 - a_x1 + 1.0) * (a_y2 - a_y1 + 1.0)
    area_b = (b_x2 - b_x1 + 1.0) * (b_y2 - b_y1 + 1.0)
    union = jnp.maximum(area_a + area_b - overlap, EPS)
    # Divide offloaded to the (otherwise idle) EUP; ~1e-3 rel, clamped to [eps, 1].
    return jnp.clip(overlap * pl.reciprocal(union, approx=True), EPS, 1.0)


def _xyxy_rows(xywh_rows):
    # (4, N) xywh -> four (1, N) xyxy rows (lane-dense).
    x, y, w, h = (xywh_rows[0:1, :], xywh_rows[1:2, :],
                  xywh_rows[2:3, :], xywh_rows[3:4, :])
    return x - w * 0.5, y - h * 0.5, x + w * 0.5, y + h * 0.5


def _xyxy_cols(xywh_cols):
    # (N, 4) xywh -> four (N, 1) xyxy columns.
    x, y, w, h = (xywh_cols[:, 0:1], xywh_cols[:, 1:2],
                  xywh_cols[:, 2:3], xywh_cols[:, 3:4])
    return x - w * 0.5, y - h * 0.5, x + w * 0.5, y + h * 0.5


def _rep_loss_kernel(bi_ref, bj_ref, valid_ref, gt_ref, pre_ref, pre_t_ref,
                     out_ref, acc_ref, *, p_real, tile_p, n_gt, nb, has_pad):
    c = pl.program_id(0)          # core shard (parallel axis)
    t = pl.program_id(1)          # sequential step within the shard
    bi = bi_ref[c, t]             # proposal row-block index  (i side of the IoU tile)
    bj = bj_ref[c, t]             # proposal col-block index  (j side of the IoU tile)
    valid = valid_ref[c, t] != 0  # dummy padding slots contribute nothing

    @pl.when(t == 0)
    def _init():
        acc_ref[...] = jnp.zeros_like(acc_ref)

    inv_p = 1.0 / p_real
    n_pairs = max(p_real * (p_real - 1) // 2, 1)   # guard P == 1
    inv_pairs = 1.0 / n_pairs

    # ---- j-block proposals as lane-dense (1, TP) xyxy rows ----
    pj_x1, pj_y1, pj_x2, pj_y2 = _xyxy_rows(pre_t_ref[...].astype(jnp.float32))

    # ================= RepBox: one (TP, TP) proposal-proposal IoU tile =================
    pi_x1, pi_y1, pi_x2, pi_y2 = _xyxy_cols(pre_ref[...].astype(jnp.float32))   # (TP,1)
    ov = _pairwise_iou(pi_x1, pi_y1, pi_x2, pi_y2, pj_x1, pj_y1, pj_x2, pj_y2)  # (TP,TP)
    terms = _smooth_ln(ov)

    # Interior tiles (strictly above the block diagonal, no padded lanes) are fully
    # inside the strict upper triangle -> unmasked fast path (saves the iota/compare/
    # select VALU work on the hot path).
    interior = bi < bj
    if has_pad:
        interior = jnp.logical_and(interior, bj < (nb - 1))

    @pl.when(jnp.logical_and(valid, interior))
    def _repbox_fast():
        s = jnp.sum(jnp.sum(terms, axis=1, keepdims=True), axis=0, keepdims=True)
        acc_ref[...] += (BETA * inv_pairs) * s

    @pl.when(jnp.logical_and(valid, jnp.logical_not(interior)))
    def _repbox_masked():
        ri = bi * tile_p + jax.lax.broadcasted_iota(jnp.int32, (tile_p, 1), 0)   # (TP,1)
        cj = bj * tile_p + jax.lax.broadcasted_iota(jnp.int32, (1, tile_p), 1)   # (1,TP)
        mask = ri < cj                               # strict upper triangle (global i < j)
        if has_pad:
            mask = mask & (ri < p_real) & (cj < p_real)
        s = jnp.sum(jnp.sum(jnp.where(mask, terms, 0.0), axis=1, keepdims=True),
                    axis=0, keepdims=True)                                        # (1,1)
        acc_ref[...] += (BETA * inv_pairs) * s

    # ============ Attr + RepGT: exactly once per column block (the bi == 0 pairs) ============
    @pl.when(jnp.logical_and(valid, bi == 0))
    def _attr_repgt():
        g_x1, g_y1, g_x2, g_y2 = _xyxy_cols(gt_ref[...].astype(jnp.float32))     # (G,1)
        box_iou = _pairwise_iou(g_x1, g_y1, g_x2, g_y2,
                                pj_x1, pj_y1, pj_x2, pj_y2)                       # (G,TP)

        row_iota = jax.lax.broadcasted_iota(jnp.int32, (n_gt, tile_p), 0)

        # argmax over GT (first occurrence) -> one-hot selector per proposal column.
        max_attr = jnp.max(box_iou, axis=0, keepdims=True)                        # (1,TP)
        attr_idx = jnp.min(jnp.where(box_iou == max_attr, row_iota, n_gt),
                           axis=0, keepdims=True)
        onehot_attr = row_iota == attr_idx                                        # (G,TP)

        def gather_gt(onehot):
            # one-hot gather of GT xyxy rows via masked column reductions (G is tiny).
            oh = onehot.astype(jnp.float32)
            sel = lambda col: jnp.sum(oh * col, axis=0, keepdims=True)            # (1,TP)
            return sel(g_x1), sel(g_y1), sel(g_x2), sel(g_y2)

        a_x1, a_y1, a_x2, a_y2 = gather_gt(onehot_attr)

        # box_iou[max_attr_index, range(P)] = 0, then the second (repulsion) argmax.
        iou_masked = jnp.where(onehot_attr, 0.0, box_iou)
        max_rep = jnp.max(iou_masked, axis=0, keepdims=True)
        rep_idx = jnp.min(jnp.where(iou_masked == max_rep, row_iota, n_gt),
                          axis=0, keepdims=True)
        onehot_rep = row_iota == rep_idx
        r_x1, r_y1, r_x2, r_y2 = gather_gt(onehot_rep)

        # ---- Attr: SmoothL1(pre_xyxy, GT_attr), summed over coords ----
        attr_elems = (_smooth_l1(pj_x1, a_x1) + _smooth_l1(pj_y1, a_y1)
                      + _smooth_l1(pj_x2, a_x2) + _smooth_l1(pj_y2, a_y2))        # (1,TP)

        # ---- RepGT: smooth-ln of IoG(pre, GT_rep); no "+1", no area clamp (matches ref) ----
        inter = (jnp.maximum(jnp.minimum(pj_x2, r_x2) - jnp.maximum(pj_x1, r_x1), 0.0)
                 * jnp.maximum(jnp.minimum(pj_y2, r_y2) - jnp.maximum(pj_y1, r_y1), 0.0))
        g_area = jnp.abs(r_x2 - r_x1) * jnp.abs(r_y2 - r_y1)
        iog = inter / g_area    # exact divide (tiny (1,TP) tile; preserves ref numerics)
        repgt_elems = _smooth_ln(iog)                                             # (1,TP)

        if has_pad:
            cj = bj * tile_p + jax.lax.broadcasted_iota(jnp.int32, (1, tile_p), 1)
            col_valid = cj < p_real
            attr_elems = jnp.where(col_valid, attr_elems, 0.0)
            repgt_elems = jnp.where(col_valid, repgt_elems, 0.0)

        attr_sum = jnp.sum(attr_elems, axis=1, keepdims=True)                     # (1,1)
        repgt_sum = jnp.sum(repgt_elems, axis=1, keepdims=True)                   # (1,1)
        acc_ref[...] += inv_p * attr_sum + (ALPHA * inv_p) * repgt_sum

    # Write this shard's (1,1) partial exactly once, at its last grid step.
    @pl.when(t == pl.num_programs(1) - 1)
    def _finalize():
        out_ref[0] = acc_ref[...]


def _round_up(x, m):
    return ((x + m - 1) // m) * m


def _default_tile(p):
    # ~P/8 proposals per tile (keeps >= ~8 blocks at large P so diagonal-block waste
    # stays small), rounded to a lane multiple and clamped to [256, 1024].
    t = _round_up(max(p // 8, 1), 128)
    return max(256, min(1024, t))


def rep_loss(gt_boxes, pre_boxes, *, tile_p=None, vmem_limit_bytes=None):
    """gt_boxes: (G,4) xywh, pre_boxes: (P,4) xywh.  Returns scalar f32 loss.

    tile_p: proposal tile size (multiple of 128).  Default scales with P
      (clamp(round128(P/8), 256, 1024)).  v6e can go to 1024-2048 (pass a larger
      vmem_limit_bytes); v5e / v7x should stay at 256-1024 (16-32 MiB scoped /
      64 MiB physical VMEM on v7x).
    """
    G = int(gt_boxes.shape[0])
    P = int(pre_boxes.shape[0])
    if tile_p is None:
        tile_p = _default_tile(P)
    assert tile_p % 128 == 0, "tile_p must be a multiple of 128"

    gt = gt_boxes.astype(jnp.float32)
    pre = pre_boxes.astype(jnp.float32)

    # Pad proposals to a multiple of the tile (padded rows/cols masked in-kernel).
    p_pad = _round_up(P, tile_p)
    if p_pad != P:
        pre_p = jnp.zeros((p_pad, 4), jnp.float32).at[:P].set(pre)
    else:
        pre_p = pre
    pre_t = pre_p.T                      # (4, P_pad) lane-dense layout (layout plumbing only)

    nb = p_pad // tile_p
    has_pad = p_pad != P

    # Enumerate only upper-triangle block pairs (bi <= bj): ~2x fewer IoU/log tiles.
    pairs = [(i, j) for i in range(nb) for j in range(i, nb)]
    nt = len(pairs)

    # Shard the pair list round-robin over a size-2 "parallel" leading grid axis:
    # ~2x on v7x (2 TensorCores); on 1-TC chips the axis just iterates sequentially.
    n_cores = 2
    nt_shard = -(-nt // n_cores)
    bi_np = [[0] * nt_shard for _ in range(n_cores)]
    bj_np = [[0] * nt_shard for _ in range(n_cores)]
    vl_np = [[0] * nt_shard for _ in range(n_cores)]
    for k, (i, j) in enumerate(pairs):
        bi_np[k % n_cores][k // n_cores] = i
        bj_np[k % n_cores][k // n_cores] = j
        vl_np[k % n_cores][k // n_cores] = 1
    bi_arr = jnp.asarray(bi_np, dtype=jnp.int32)      # (2, nt_shard)
    bj_arr = jnp.asarray(bj_np, dtype=jnp.int32)
    vl_arr = jnp.asarray(vl_np, dtype=jnp.int32)

    if vmem_limit_bytes is None:
        # ~10 live (TP,TP) f32 equivalents of headroom, clamped to stay within v7x's
        # 64 MiB physical VMEM at the default tile cap.
        vmem_limit_bytes = int(min(100 * 2**20,
                                   max(32 * 2**20, 10 * tile_p * tile_p * 4)))

    kernel = partial(_rep_loss_kernel, p_real=P, tile_p=tile_p, n_gt=G,
                     nb=nb, has_pad=has_pad)

    cost = pl.CostEstimate(
        flops=int(35 * nt * tile_p * tile_p + 120 * G * p_pad),
        transcendentals=int(2 * nt * tile_p * tile_p + 3 * G * p_pad),
        bytes_accessed=int(n_cores * nt_shard * (G * 16 + 32 * tile_p) + 8 * n_cores),
    )

    out = pl.pallas_call(
        kernel,
        out_shape=jax.ShapeDtypeStruct((n_cores, 1, 1), jnp.float32),
        grid_spec=pltpu.PrefetchScalarGridSpec(
            num_scalar_prefetch=3,             # bi / bj / valid shard tables in SMEM
            grid=(n_cores, nt_shard),
            in_specs=[
                pl.BlockSpec((G, 4), lambda c, t, bi, bj, v: (0, 0)),            # GT, resident
                pl.BlockSpec((tile_p, 4), lambda c, t, bi, bj, v: (bi[c, t], 0)),  # i-block (cols)
                pl.BlockSpec((4, tile_p), lambda c, t, bi, bj, v: (0, bj[c, t])),  # j-block (rows)
            ],
            out_specs=pl.BlockSpec((1, 1, 1), lambda c, t, bi, bj, v: (c, 0, 0)),
            scratch_shapes=[pltpu.VMEM((1, 1), jnp.float32)],                    # per-core acc
        ),
        compiler_params=pltpu.CompilerParams(
            # Leading axis shards block-pairs across cores; inner axis carries the
            # per-core scalar accumulator (reduction -> "arbitrary").
            dimension_semantics=("parallel", "arbitrary"),
            vmem_limit_bytes=vmem_limit_bytes,
        ),
        cost_estimate=cost,
    )(bi_arr, bj_arr, vl_arr, gt, pre_p, pre_t)
    return jnp.sum(out)          # combine the per-core partial sums


if __name__ == "__main__":
    key = jax.random.PRNGKey(0)
    k_gc, k_gs, k_pc, k_ps = jax.random.split(key, 4)

    G, P = 8, 16
    # Boxes in xywh with strictly positive widths/heights (GT area > 0 for IoG).
    gt_centers = jax.random.uniform(k_gc, (G, 2), minval=8.0, maxval=56.0)
    gt_sizes = jax.random.uniform(k_gs, (G, 2), minval=6.0, maxval=24.0)
    gt_boxes = jnp.concatenate([gt_centers, gt_sizes], axis=-1)          # (G, 4)

    pre_centers = jax.random.uniform(k_pc, (P, 2), minval=8.0, maxval=56.0)
    pre_sizes = jax.random.uniform(k_ps, (P, 2), minval=6.0, maxval=24.0)
    pre_boxes = jnp.concatenate([pre_centers, pre_sizes], axis=-1)       # (P, 4)

    loss = rep_loss(gt_boxes, pre_boxes)
    jax.block_until_ready(loss)
    assert jnp.isfinite(loss)
    print("KERNEL_OK")
</pallas_src>

<mosaic_0001>
module attributes {stable_mosaic.version = 11 : i64} {
  func.func @_rep_loss_kernel(%arg0: i32, %arg1: i32, %arg2: memref<2x1xi32, #tpu.memory_space<smem>>, %arg3: memref<2x1xi32, #tpu.memory_space<smem>>, %arg4: memref<2x1xi32, #tpu.memory_space<smem>>, %arg5: memref<8x4xf32, #tpu.memory_space<vmem>>, %arg6: memref<256x4xf32, #tpu.memory_space<vmem>>, %arg7: memref<4x256xf32, #tpu.memory_space<vmem>>, %arg8: memref<1x1x1xf32, #tpu.memory_space<vmem>>, %arg9: memref<1x1xf32, #tpu.memory_space<vmem>>) attributes {dimension_semantics = [#tpu.dimension_semantics<parallel>, #tpu.dimension_semantics<arbitrary>], iteration_bounds = array<i64: 2, 1>, scalar_prefetch = 3 : i64, scratch_operands = 1 : i64, tpu.core_type = #tpu.core_type<tc>, window_params = [{pipeline_mode = #tpu.pipeline_mode<synchronous>, transform_indices = @transform_0, window_bounds = array<i64: 8, 4>}, {transform_indices = @transform_1, window_bounds = array<i64: 256, 4>}, {transform_indices = @transform_2, window_bounds = array<i64: 4, 256>}, {transform_indices = @transform_3, window_bounds = array<i64: 1, 1, 1>}]} {
    %0 = arith.index_cast %arg0 : i32 to index
    %1 = arith.index_cast %arg1 : i32 to index
    %2 = memref.load %arg2[%0, %1] : memref<2x1xi32, #tpu.memory_space<smem>>
    %3 = arith.index_cast %arg0 : i32 to index
    %4 = arith.index_cast %arg1 : i32 to index
    %5 = memref.load %arg3[%3, %4] : memref<2x1xi32, #tpu.memory_space<smem>>
    %6 = arith.index_cast %arg0 : i32 to index
    %7 = arith.index_cast %arg1 : i32 to index
    %8 = memref.load %arg4[%6, %7] : memref<2x1xi32, #tpu.memory_space<smem>>
    %c0_i32 = arith.constant 0 : i32
    %9 = arith.cmpi ne, %8, %c0_i32 : i32
    %c0_i32_0 = arith.constant 0 : i32
    %10 = arith.cmpi eq, %arg1, %c0_i32_0 : i32
    %11 = arith.extui %10 : i1 to i32
    %c0_i32_1 = arith.constant 0 : i32
    %12 = arith.cmpi ne, %11, %c0_i32_1 : i32
    scf.if %12 {
      %cst_36 = arith.constant 0.000000e+00 : f32
      %127 = vector.broadcast %cst_36 : f32 to vector<1x1xf32>
      %c0_37 = arith.constant 0 : index
      %c0_38 = arith.constant 0 : index
      %128 = vector.load %arg9[%c0_37, %c0_38] : memref<1x1xf32, #tpu.memory_space<vmem>>, vector<1x1xf32>
      tpu.vector_store %arg9[%c0_37, %c0_38], %127 {strides = array<i32>} : memref<1x1xf32, #tpu.memory_space<vmem>>, vector<1x1xf32>,
    } else {
    }
    %c0 = arith.constant 0 : index
    %c0_2 = arith.constant 0 : index
    %13 = vector.load %arg7[%c0, %c0_2] : memref<4x256xf32, #tpu.memory_space<vmem>>, vector<4x256xf32>
    %14 = vector.extract_strided_slice %13 {offsets = [0, 0], sizes = [1, 256], strides = [1, 1]} : vector<4x256xf32> to vector<1x256xf32>
    %15 = vector.extract_strided_slice %13 {offsets = [1, 0], sizes = [1, 256], strides = [1, 1]} : vector<4x256xf32> to vector<1x256xf32>
    %16 = vector.extract_strided_slice %13 {offsets = [2, 0], sizes = [1, 256], strides = [1, 1]} : vector<4x256xf32> to vector<1x256xf32>
    %17 = vector.extract_strided_slice %13 {offsets = [3, 0], sizes = [1, 256], strides = [1, 1]} : vector<4x256xf32> to vector<1x256xf32>
    %cst = arith.constant 5.000000e-01 : f32
    %18 = vector.broadcast %cst : f32 to vector<1x256xf32>
    %19 = arith.mulf %16, %18 : vector<1x256xf32>
    %20 = arith.subf %14, %19 : vector<1x256xf32>
    %cst_3 = arith.constant 5.000000e-01 : f32
    %21 = vector.broadcast %cst_3 : f32 to vector<1x256xf32>
    %22 = arith.mulf %17, %21 : vector<1x256xf32>
    %23 = arith.subf %15, %22 : vector<1x256xf32>
    %cst_4 = arith.constant 5.000000e-01 : f32
    %24 = vector.broadcast %cst_4 : f32 to vector<1x256xf32>
    %25 = arith.mulf %16, %24 : vector<1x256xf32>
    %26 = arith.addf %14, %25 : vector<1x256xf32>
    %cst_5 = arith.constant 5.000000e-01 : f32
    %27 = vector.broadcast %cst_5 : f32 to vector<1x256xf32>
    %28 = arith.mulf %17, %27 : vector<1x256xf32>
    %29 = arith.addf %15, %28 : vector<1x256xf32>
    %c0_6 = arith.constant 0 : index
    %c0_7 = arith.constant 0 : index
    %30 = vector.load %arg6[%c0_6, %c0_7] : memref<256x4xf32, #tpu.memory_space<vmem>>, vector<256x4xf32>
    %31 = vector.extract_strided_slice %30 {offsets = [0, 0], sizes = [256, 1], strides = [1, 1]} : vector<256x4xf32> to vector<256x1xf32>
    %32 = vector.extract_strided_slice %30 {offsets = [0, 1], sizes = [256, 1], strides = [1, 1]} : vector<256x4xf32> to vector<256x1xf32>
    %33 = vector.extract_strided_slice %30 {offsets = [0, 2], sizes = [256, 1], strides = [1, 1]} : vector<256x4xf32> to vector<256x1xf32>
    %34 = vector.extract_strided_slice %30 {offsets = [0, 3], sizes = [256, 1], strides = [1, 1]} : vector<256x4xf32> to vector<256x1xf32>
    %cst_8 = arith.constant 5.000000e-01 : f32
    %35 = vector.broadcast %cst_8 : f32 to vector<256x1xf32>
    %36 = arith.mulf %33, %35 : vector<256x1xf32>
    %37 = arith.subf %31, %36 : vector<256x1xf32>
    %cst_9 = arith.constant 5.000000e-01 : f32
    %38 = vector.broadcast %cst_9 : f32 to vector<256x1xf32>
    %39 = arith.mulf %34, %38 : vector<256x1xf32>
    %40 = arith.subf %32, %39 : vector<256x1xf32>
    %cst_10 = arith.constant 5.000000e-01 : f32
    %41 = vector.broadcast %cst_10 : f32 to vector<256x1xf32>
    %42 = arith.mulf %33, %41 : vector<256x1xf32>
    %43 = arith.addf %31, %42 : vector<256x1xf32>
    %cst_11 = arith.constant 5.000000e-01 : f32
    %44 = vector.broadcast %cst_11 : f32 to vector<256x1xf32>
    %45 = arith.mulf %34, %44 : vector<256x1xf32>
    %46 = arith.addf %32, %45 : vector<256x1xf32>
    %47 = vector.broadcast %43 : vector<256x1xf32> to vector<256x256xf32>
    %48 = vector.broadcast %26 : vector<1x256xf32> to vector<256x256xf32>
    %49 = arith.minimumf %47, %48 : vector<256x256xf32>
    %50 = vector.broadcast %37 : vector<256x1xf32> to vector<256x256xf32>
    %51 = vector.broadcast %20 : vector<1x256xf32> to vector<256x256xf32>
    %52 = arith.maximumf %50, %51 : vector<256x256xf32>
    %53 = arith.subf %49, %52 : vector<256x256xf32>
    %cst_12 = arith.constant 1.000000e+00 : f32
    %54 = vector.broadcast %cst_12 : f32 to vector<256x256xf32>
    %55 = arith.addf %53, %54 : vector<256x256xf32>
    %cst_13 = arith.constant 0.000000e+00 : f32
    %56 = vector.broadcast %cst_13 : f32 to vector<256x256xf32>
    %57 = arith.maximumf %55, %56 : vector<256x256xf32>
    %58 = vector.broadcast %46 : vector<256x1xf32> to vector<256x256xf32>
    %59 = vector.broadcast %29 : vector<1x256xf32> to vector<256x256xf32>
    %60 = arith.minimumf %58, %59 : vector<256x256xf32>
    %61 = vector.broadcast %40 : vector<256x1xf32> to vector<256x256xf32>
    %62 = vector.broadcast %23 : vector<1x256xf32> to vector<256x256xf32>
    %63 = arith.maximumf %61, %62 : vector<256x256xf32>
    %64 = arith.subf %60, %63 : vector<256x256xf32>
    %cst_14 = arith.constant 1.000000e+00 : f32
    %65 = vector.broadcast %cst_14 : f32 to vector<256x256xf32>
    %66 = arith.addf %64, %65 : vector<256x256xf32>
    %cst_15 = arith.constant 0.000000e+00 : f32
    %67 = vector.broadcast %cst_15 : f32 to vector<256x256xf32>
    %68 = arith.maximumf %66, %67 : vector<256x256xf32>
    %69 = arith.mulf %57, %68 : vector<256x256xf32>
    %70 = arith.subf %43, %37 : vector<256x1xf32>
    %cst_16 = arith.constant 1.000000e+00 : f32
    %71 = vector.broadcast %cst_16 : f32 to vector<256x1xf32>
    %72 = arith.addf %70, %71 : vector<256x1xf32>
    %73 = arith.subf %46, %40 : vector<256x1xf32>
    %cst_17 = arith.constant 1.000000e+00 : f32
    %74 = vector.broadcast %cst_17 : f32 to vector<256x1xf32>
    %75 = arith.addf %73, %74 : vector<256x1xf32>
    %76 = arith.mulf %72, %75 : vector<256x1xf32>
    %77 = arith.subf %26, %20 : vector<1x256xf32>
    %cst_18 = arith.constant 1.000000e+00 : f32
    %78 = vector.broadcast %cst_18 : f32 to vector<1x256xf32>
    %79 = arith.addf %77, %78 : vector<1x256xf32>
    %80 = arith.subf %29, %23 : vector<1x256xf32>
    %cst_19 = arith.constant 1.000000e+00 : f32
    %81 = vector.broadcast %cst_19 : f32 to vector<1x256xf32>
    %82 = arith.addf %80, %81 : vector<1x256xf32>
    %83 = arith.mulf %79, %82 : vector<1x256xf32>
    %84 = vector.broadcast %76 : vector<256x1xf32> to vector<256x256xf32>
    %85 = vector.broadcast %83 : vector<1x256xf32> to vector<256x256xf32>
    %86 = arith.addf %84, %85 : vector<256x256xf32>
    %87 = arith.subf %86, %69 : vector<256x256xf32>
    %cst_20 = arith.constant 1.000000e-07 : f32
    %88 = vector.broadcast %cst_20 : f32 to vector<256x256xf32>
    %89 = arith.maximumf %87, %88 : vector<256x256xf32>
    %90 = tpu.reciprocal %89 {approx = true} : vector<256x256xf32> -> vector<256x256xf32>
    %91 = arith.mulf %69, %90 : vector<256x256xf32>
    %cst_21 = arith.constant 1.000000e-07 : f32
    %cst_22 = arith.constant 1.000000e+00 : f32
    %92 = vector.broadcast %cst_21 : f32 to vector<256x256xf32>
    %93 = arith.maximumf %92, %91 : vector<256x256xf32>
    %94 = vector.broadcast %cst_22 : f32 to vector<256x256xf32>
    %95 = arith.minimumf %94, %93 : vector<256x256xf32>
    %cst_23 = arith.constant 5.000000e-01 : f32
    %96 = vector.broadcast %cst_23 : f32 to vector<256x256xf32>
    %97 = arith.cmpf ogt, %95, %96 : vector<256x256xf32>
    %cst_24 = arith.constant 5.000000e-01 : f32
    %98 = vector.broadcast %cst_24 : f32 to vector<256x256xf32>
    %99 = arith.subf %95, %98 : vector<256x256xf32>
    %cst_25 = arith.constant 0.838119566 : f32
    %100 = vector.broadcast %cst_25 : f32 to vector<256x256xf32>
    %101 = arith.mulf %99, %100 : vector<256x256xf32>
    %cst_26 = arith.constant 1.000000e+00 : f32
    %102 = vector.broadcast %cst_26 : f32 to vector<256x256xf32>
    %103 = arith.subf %102, %95 : vector<256x256xf32>
    %cst_27 = arith.constant 1.000000e-07 : f32
    %104 = vector.broadcast %cst_27 : f32 to vector<256x256xf32>
    %105 = arith.maximumf %103, %104 : vector<256x256xf32>
    %106 = math.log %105 : vector<256x256xf32>
    %cst_28 = arith.constant 0.000000e+00 : f32
    %107 = vector.broadcast %cst_28 : f32 to vector<256x256xf32>
    %108 = arith.subf %107, %106 : vector<256x256xf32>
    %109 = arith.select %97, %101, %108 : vector<256x256xi1>, vector<256x256xf32>
    %110 = arith.cmpi slt, %2, %5 : i32
    %c0_i32_29 = arith.constant 0 : i32
    %111 = arith.cmpi slt, %5, %c0_i32_29 : i32
    %112 = arith.andi %110, %111 : i1
    %113 = arith.andi %9, %112 : i1
    %114 = arith.extui %113 : i1 to i32
    %c0_i32_30 = arith.constant 0 : i32
    %115 = arith.cmpi ne, %114, %c0_i32_30 : i32
    scf.if %115 {
      %cst_36 = arith.constant dense<0.000000e+00> : vector<256xf32>
      %127 = vector.multi_reduction <add>, %109, %cst_36 [1] : vector<256x256xf32> to vector<256xf32>
      %128 = vector.shape_cast %127 : vector<256xf32> to vector<256x1xf32>
      %cst_37 = arith.constant dense<0.000000e+00> : vector<1xf32>
      %129 = vector.multi_reduction <add>, %128, %cst_37 [0] : vector<256x1xf32> to vector<1xf32>
      %130 = vector.shape_cast %129 : vector<1xf32> to vector<1x1xf32>
      %c0_38 = arith.constant 0 : index
      %c0_39 = arith.constant 0 : index
      %131 = vector.load %arg9[%c0_38, %c0_39] : memref<1x1xf32, #tpu.memory_space<vmem>>, vector<1x1xf32>
      %cst_40 = arith.constant 0.00416666688 : f32
      %132 = vector.broadcast %cst_40 : f32 to vector<1x1xf32>
      %133 = arith.mulf %132, %130 : vector<1x1xf32>
      %134 = arith.addf %131, %133 : vector<1x1xf32>
      %c0_41 = arith.constant 0 : index
      %c0_42 = arith.constant 0 : index
      %135 = vector.load %arg9[%c0_41, %c0_42] : memref<1x1xf32, #tpu.memory_space<vmem>>, vector<1x1xf32>
      tpu.vector_store %arg9[%c0_41, %c0_42], %134 {strides = array<i32>} : memref<1x1xf32, #tpu.memory_space<vmem>>, vector<1x1xf32>,
    } else {
    }
    %true = arith.constant true
    %116 = arith.xori %112, %true : i1
    %117 = arith.andi %9, %116 : i1
    %118 = arith.extui %117 : i1 to i32
    %c0_i32_31 = arith.constant 0 : i32
    %119 = arith.cmpi ne, %118, %c0_i32_31 : i32
    scf.if %119 {
      %c256_i32 = arith.constant 256 : i32
      %127 = arith.muli %2, %c256_i32 : i32
      %128 = tpu.iota {dimensions = array<i32: 0>} : vector<256x1xi32>
      %129 = vector.broadcast %127 : i32 to vector<256x1xi32>
      %130 = arith.addi %129, %128 : vector<256x1xi32>
      %c256_i32_36 = arith.constant 256 : i32
      %131 = arith.muli %5, %c256_i32_36 : i32
      %132 = tpu.iota {dimensions = array<i32: 1>} : vector<1x256xi32>
      %133 = vector.broadcast %131 : i32 to vector<1x256xi32>
      %134 = arith.addi %133, %132 : vector<1x256xi32>
      %135 = vector.broadcast %130 : vector<256x1xi32> to vector<256x256xi32>
      %136 = vector.broadcast %134 : vector<1x256xi32> to vector<256x256xi32>
      %137 = arith.cmpi slt, %135, %136 : vector<256x256xi32>
      %c16_i32 = arith.constant 16 : i32
      %138 = vector.broadcast %c16_i32 : i32 to vector<256x1xi32>
      %139 = arith.cmpi slt, %130, %138 : vector<256x1xi32>
      %140 = vector.broadcast %139 : vector<256x1xi1> to vector<256x256xi1>
      %141 = arith.andi %137, %140 : vector<256x256xi1>
      %c16_i32_37 = arith.constant 16 : i32
      %142 = vector.broadcast %c16_i32_37 : i32 to vector<1x256xi32>
      %143 = arith.cmpi slt, %134, %142 : vector<1x256xi32>
      %144 = vector.broadcast %143 : vector<1x256xi1> to vector<256x256xi1>
      %145 = arith.andi %141, %144 : vector<256x256xi1>
      %cst_38 = arith.constant 0.000000e+00 : f32
      %146 = vector.broadcast %cst_38 : f32 to vector<256x256xf32>
      %147 = arith.select %145, %109, %146 : vector<256x256xi1>, vector<256x256xf32>
      %cst_39 = arith.constant dense<0.000000e+00> : vector<256xf32>
      %148 = vector.multi_reduction <add>, %147, %cst_39 [1] : vector<256x256xf32> to vector<256xf32>
      %149 = vector.shape_cast %148 : vector<256xf32> to vector<256x1xf32>
      %cst_40 = arith.constant dense<0.000000e+00> : vector<1xf32>
      %150 = vector.multi_reduction <add>, %149, %cst_40 [0] : vector<256x1xf32> to vector<1xf32>
      %151 = vector.shape_cast %150 : vector<1xf32> to vector<1x1xf32>
      %c0_41 = arith.constant 0 : index
      %c0_42 = arith.constant 0 : index
      %152 = vector.load %arg9[%c0_41, %c0_42] : memref<1x1xf32, #tpu.memory_space<vmem>>, vector<1x1xf32>
      %cst_43 = arith.constant 0.00416666688 : f32
      %153 = vector.broadcast %cst_43 : f32 to vector<1x1xf32>
      %154 = arith.mulf %153, %151 : vector<1x1xf32>
      %155 = arith.addf %152, %154 : vector<1x1xf32>
      %c0_44 = arith.constant 0 : index
      %c0_45 = arith.constant 0 : index
      %156 = vector.load %arg9[%c0_44, %c0_45] : memref<1x1xf32, #tpu.memory_space<vmem>>, vector<1x1xf32>
      tpu.vector_store %arg9[%c0_44, %c0_45], %155 {strides = array<i32>} : memref<1x1xf32, #tpu.memory_space<vmem>>, vector<1x1xf32>,
    } else {
    }
    %c0_i32_32 = arith.constant 0 : i32
    %120 = arith.cmpi eq, %2, %c0_i32_32 : i32
    %121 = arith.andi %9, %120 : i1
    %122 = arith.extui %121 : i1 to i32
    %c0_i32_33 = arith.constant 0 : i32
    %123 = arith.cmpi ne, %122, %c0_i32_33 : i32
    scf.if %123 {
      %c0_36 = arith.constant 0 : index
      %c0_37 = arith.constant 0 : index
      %127 = vector.load %arg5[%c0_36, %c0_37] : memref<8x4xf32, #tpu.memory_space<vmem>>, vector<8x4xf32>
      %128 = vector.extract_strided_slice %127 {offsets = [0, 0], sizes = [8, 1], strides = [1, 1]} : vector<8x4xf32> to vector<8x1xf32>
      %129 = vector.extract_strided_slice %127 {offsets = [0, 1], sizes = [8, 1], strides = [1, 1]} : vector<8x4xf32> to vector<8x1xf32>
      %130 = vector.extract_strided_slice %127 {offsets = [0, 2], sizes = [8, 1], strides = [1, 1]} : vector<8x4xf32> to vector<8x1xf32>
      %131 = vector.extract_strided_slice %127 {offsets = [0, 3], sizes = [8, 1], strides = [1, 1]} : vector<8x4xf32> to vector<8x1xf32>
      %cst_38 = arith.constant 5.000000e-01 : f32
      %132 = vector.broadcast %cst_38 : f32 to vector<8x1xf32>
      %133 = arith.mulf %130, %132 : vector<8x1xf32>
      %134 = arith.subf %128, %133 : vector<8x1xf32>
      %cst_39 = arith.constant 5.000000e-01 : f32
      %135 = vector.broadcast %cst_39 : f32 to vector<8x1xf32>
      %136 = arith.mulf %131, %135 : vector<8x1xf32>
      %137 = arith.subf %129, %136 : vector<8x1xf32>
      %cst_40 = arith.constant 5.000000e-01 : f32
      %138 = vector.broadcast %cst_40 : f32 to vector<8x1xf32>
      %139 = arith.mulf %130, %138 : vector<8x1xf32>
      %140 = arith.addf %128, %139 : vector<8x1xf32>
      %cst_41 = arith.constant 5.000000e-01 : f32
      %141 = vector.broadcast %cst_41 : f32 to vector<8x1xf32>
      %142 = arith.mulf %131, %141 : vector<8x1xf32>
      %143 = arith.addf %129, %142 : vector<8x1xf32>
      %144 = vector.broadcast %140 : vector<8x1xf32> to vector<8x256xf32>
      %145 = vector.broadcast %26 : vector<1x256xf32> to vector<8x256xf32>
      %146 = arith.minimumf %144, %145 : vector<8x256xf32>
      %147 = vector.broadcast %134 : vector<8x1xf32> to vector<8x256xf32>
      %148 = vector.broadcast %20 : vector<1x256xf32> to vector<8x256xf32>
      %149 = arith.maximumf %147, %148 : vector<8x256xf32>
      %150 = arith.subf %146, %149 : vector<8x256xf32>
      %cst_42 = arith.constant 1.000000e+00 : f32
      %151 = vector.broadcast %cst_42 : f32 to vector<8x256xf32>
      %152 = arith.addf %150, %151 : vector<8x256xf32>
      %cst_43 = arith.constant 0.000000e+00 : f32
      %153 = vector.broadcast %cst_43 : f32 to vector<8x256xf32>
      %154 = arith.maximumf %152, %153 : vector<8x256xf32>
      %155 = vector.broadcast %143 : vector<8x1xf32> to vector<8x256xf32>
      %156 = vector.broadcast %29 : vector<1x256xf32> to vector<8x256xf32>
      %157 = arith.minimumf %155, %156 : vector<8x256xf32>
      %158 = vector.broadcast %137 : vector<8x1xf32> to vector<8x256xf32>
      %159 = vector.broadcast %23 : vector<1x256xf32> to vector<8x256xf32>
      %160 = arith.maximumf %158, %159 : vector<8x256xf32>
      %161 = arith.subf %157, %160 : vector<8x256xf32>
      %cst_44 = arith.constant 1.000000e+00 : f32
      %162 = vector.broadcast %cst_44 : f32 to vector<8x256xf32>
      %163 = arith.addf %161, %162 : vector<8x256xf32>
      %cst_45 = arith.constant 0.000000e+00 : f32
      %164 = vector.broadcast %cst_45 : f32 to vector<8x256xf32>
      %165 = arith.maximumf %163, %164 : vector<8x256xf32>
      %166 = arith.mulf %154, %165 : vector<8x256xf32>
      %167 = arith.subf %140, %134 : vector<8x1xf32>
      %cst_46 = arith.constant 1.000000e+00 : f32
      %168 = vector.broadcast %cst_46 : f32 to vector<8x1xf32>
      %169 = arith.addf %167, %168 : vector<8x1xf32>
      %170 = arith.subf %143, %137 : vector<8x1xf32>
      %cst_47 = arith.constant 1.000000e+00 : f32
      %171 = vector.broadcast %cst_47 : f32 to vector<8x1xf32>
      %172 = arith.addf %170, %171 : vector<8x1xf32>
      %173 = arith.mulf %169, %172 : vector<8x1xf32>
      %174 = arith.subf %26, %20 : vector<1x256xf32>
      %cst_48 = arith.constant 1.000000e+00 : f32
      %175 = vector.broadcast %cst_48 : f32 to vector<1x256xf32>
      %176 = arith.addf %174, %175 : vector<1x256xf32>
      %177 = arith.subf %29, %23 : vector<1x256xf32>
      %cst_49 = arith.constant 1.000000e+00 : f32
      %178 = vector.broadcast %cst_49 : f32 to vector<1x256xf32>
      %179 = arith.addf %177, %178 : vector<1x256xf32>
      %180 = arith.mulf %176, %179 : vector<1x256xf32>
      %181 = vector.broadcast %173 : vector<8x1xf32> to vector<8x256xf32>
      %182 = vector.broadcast %180 : vector<1x256xf32> to vector<8x256xf32>
      %183 = arith.addf %181, %182 : vector<8x256xf32>
      %184 = arith.subf %183, %166 : vector<8x256xf32>
      %cst_50 = arith.constant 1.000000e-07 : f32
      %185 = vector.broadcast %cst_50 : f32 to vector<8x256xf32>
      %186 = arith.maximumf %184, %185 : vector<8x256xf32>
      %187 = tpu.reciprocal %186 {approx = true} : vector<8x256xf32> -> vector<8x256xf32>
      %188 = arith.mulf %166, %187 : vector<8x256xf32>
      %cst_51 = arith.constant 1.000000e-07 : f32
      %cst_52 = arith.constant 1.000000e+00 : f32
      %189 = vector.broadcast %cst_51 : f32 to vector<8x256xf32>
      %190 = arith.maximumf %189, %188 : vector<8x256xf32>
      %191 = vector.broadcast %cst_52 : f32 to vector<8x256xf32>
      %192 = arith.minimumf %191, %190 : vector<8x256xf32>
      %193 = tpu.iota {dimensions = array<i32: 0>} : vector<8x256xi32>
      %cst_53 = arith.constant dense<0xFF800000> : vector<256xf32>
      %194 = vector.multi_reduction <maximumf>, %192, %cst_53 [0] : vector<8x256xf32> to vector<256xf32>
      %195 = vector.shape_cast %194 : vector<256xf32> to vector<1x256xf32>
      %196 = vector.broadcast %195 : vector<1x256xf32> to vector<8x256xf32>
      %197 = arith.cmpf oeq, %192, %196 : vector<8x256xf32>
      %c8_i32 = arith.constant 8 : i32
      %198 = vector.broadcast %c8_i32 : i32 to vector<8x256xi32>
      %199 = arith.select %197, %193, %198 : vector<8x256xi1>, vector<8x256xi32>
      %cst_54 = arith.constant dense<2147483647> : vector<256xi32>
      %200 = vector.multi_reduction <minsi>, %199, %cst_54 [0] : vector<8x256xi32> to vector<256xi32>
      %201 = vector.shape_cast %200 : vector<256xi32> to vector<1x256xi32>
      %202 = vector.broadcast %201 : vector<1x256xi32> to vector<8x256xi32>
      %203 = arith.cmpi eq, %193, %202 : vector<8x256xi32>
      %204 = arith.extui %203 : vector<8x256xi1> to vector<8x256xi32>
      %205 = arith.sitofp %204 : vector<8x256xi32> to vector<8x256xf32>
      %206 = vector.broadcast %134 : vector<8x1xf32> to vector<8x256xf32>
      %207 = arith.mulf %205, %206 : vector<8x256xf32>
      %cst_55 = arith.constant dense<0.000000e+00> : vector<256xf32>
      %208 = vector.multi_reduction <add>, %207, %cst_55 [0] : vector<8x256xf32> to vector<256xf32>
      %209 = vector.shape_cast %208 : vector<256xf32> to vector<1x256xf32>
      %210 = vector.broadcast %137 : vector<8x1xf32> to vector<8x256xf32>
      %211 = arith.mulf %205, %210 : vector<8x256xf32>
      %cst_56 = arith.constant dense<0.000000e+00> : vector<256xf32>
      %212 = vector.multi_reduction <add>, %211, %cst_56 [0] : vector<8x256xf32> to vector<256xf32>
      %213 = vector.shape_cast %212 : vector<256xf32> to vector<1x256xf32>
      %214 = vector.broadcast %140 : vector<8x1xf32> to vector<8x256xf32>
      %215 = arith.mulf %205, %214 : vector<8x256xf32>
      %cst_57 = arith.constant dense<0.000000e+00> : vector<256xf32>
      %216 = vector.multi_reduction <add>, %215, %cst_57 [0] : vector<8x256xf32> to vector<256xf32>
      %217 = vector.shape_cast %216 : vector<256xf32> to vector<1x256xf32>
      %218 = vector.broadcast %143 : vector<8x1xf32> to vector<8x256xf32>
      %219 = arith.mulf %205, %218 : vector<8x256xf32>
      %cst_58 = arith.constant dense<0.000000e+00> : vector<256xf32>
      %220 = vector.multi_reduction <add>, %219, %cst_58 [0] : vector<8x256xf32> to vector<256xf32>
      %221 = vector.shape_cast %220 : vector<256xf32> to vector<1x256xf32>
      %cst_59 = arith.constant 0.000000e+00 : f32
      %222 = vector.broadcast %cst_59 : f32 to vector<8x256xf32>
      %223 = arith.select %203, %222, %192 : vector<8x256xi1>, vector<8x256xf32>
      %cst_60 = arith.constant dense<0xFF800000> : vector<256xf32>
      %224 = vector.multi_reduction <maximumf>, %223, %cst_60 [0] : vector<8x256xf32> to vector<256xf32>
      %225 = vector.shape_cast %224 : vector<256xf32> to vector<1x256xf32>
      %226 = vector.broadcast %225 : vector<1x256xf32> to vector<8x256xf32>
      %227 = arith.cmpf oeq, %223, %226 : vector<8x256xf32>
      %c8_i32_61 = arith.constant 8 : i32
      %228 = vector.broadcast %c8_i32_61 : i32 to vector<8x256xi32>
      %229 = arith.select %227, %193, %228 : vector<8x256xi1>, vector<8x256xi32>
      %cst_62 = arith.constant dense<2147483647> : vector<256xi32>
      %230 = vector.multi_reduction <minsi>, %229, %cst_62 [0] : vector<8x256xi32> to vector<256xi32>
      %231 = vector.shape_cast %230 : vector<256xi32> to vector<1x256xi32>
      %232 = vector.broadcast %231 : vector<1x256xi32> to vector<8x256xi32>
      %233 = arith.cmpi eq, %193, %232 : vector<8x256xi32>
      %234 = arith.extui %233 : vector<8x256xi1> to vector<8x256xi32>
      %235 = arith.sitofp %234 : vector<8x256xi32> to vector<8x256xf32>
      %236 = vector.broadcast %134 : vector<8x1xf32> to vector<8x256xf32>
      %237 = arith.mulf %235, %236 : vector<8x256xf32>
      %cst_63 = arith.constant dense<0.000000e+00> : vector<256xf32>
      %238 = vector.multi_reduction <add>, %237, %cst_63 [0] : vector<8x256xf32> to vector<256xf32>
      %239 = vector.shape_cast %238 : vector<256xf32> to vector<1x256xf32>
      %240 = vector.broadcast %137 : vector<8x1xf32> to vector<8x256xf32>
      %241 = arith.mulf %235, %240 : vector<8x256xf32>
      %cst_64 = arith.constant dense<0.000000e+00> : vector<256xf32>
      %242 = vector.multi_reduction <add>, %241, %cst_64 [0] : vector<8x256xf32> to vector<256xf32>
      %243 = vector.shape_cast %242 : vector<256xf32> to vector<1x256xf32>
      %244 = vector.broadcast %140 : vector<8x1xf32> to vector<8x256xf32>
      %245 = arith.mulf %235, %244 : vector<8x256xf32>
      %cst_65 = arith.constant dense<0.000000e+00> : vector<256xf32>
      %246 = vector.multi_reduction <add>, %245, %cst_65 [0] : vector<8x256xf32> to vector<256xf32>
      %247 = vector.shape_cast %246 : vector<256xf32> to vector<1x256xf32>
      %248 = vector.broadcast %143 : vector<8x1xf32> to vector<8x256xf32>
      %249 = arith.mulf %235, %248 : vector<8x256xf32>
      %cst_66 = arith.constant dense<0.000000e+00> : vector<256xf32>
      %250 = vector.multi_reduction <add>, %249, %cst_66 [0] : vector<8x256xf32> to vector<256xf32>
      %251 = vector.shape_cast %250 : vector<256xf32> to vector<1x256xf32>
      %252 = arith.subf %20, %209 : vector<1x256xf32>
      %253 = math.absf %252 : vector<1x256xf32>
      %cst_67 = arith.constant 1.000000e+00 : f32
      %254 = vector.broadcast %cst_67 : f32 to vector<1x256xf32>
      %255 = arith.cmpf olt, %253, %254 : vector<1x256xf32>
      %cst_68 = arith.constant 5.000000e-01 : f32
      %256 = vector.broadcast %cst_68 : f32 to vector<1x256xf32>
      %257 = arith.mulf %256, %253 : vector<1x256xf32>
      %258 = arith.mulf %257, %253 : vector<1x256xf32>
      %cst_69 = arith.constant 5.000000e-01 : f32
      %259 = vector.broadcast %cst_69 : f32 to vector<1x256xf32>
      %260 = arith.subf %253, %259 : vector<1x256xf32>
      %261 = arith.select %255, %258, %260 : vector<1x256xi1>, vector<1x256xf32>
      %262 = arith.subf %23, %213 : vector<1x256xf32>
      %263 = math.absf %262 : vector<1x256xf32>
      %cst_70 = arith.constant 1.000000e+00 : f32
      %264 = vector.broadcast %cst_70 : f32 to vector<1x256xf32>
      %265 = arith.cmpf olt, %263, %264 : vector<1x256xf32>
      %cst_71 = arith.constant 5.000000e-01 : f32
      %266 = vector.broadcast %cst_71 : f32 to vector<1x256xf32>
      %267 = arith.mulf %266, %263 : vector<1x256xf32>
      %268 = arith.mulf %267, %263 : vector<1x256xf32>
      %cst_72 = arith.constant 5.000000e-01 : f32
      %269 = vector.broadcast %cst_72 : f32 to vector<1x256xf32>
      %270 = arith.subf %263, %269 : vector<1x256xf32>
      %271 = arith.select %265, %268, %270 : vector<1x256xi1>, vector<1x256xf32>
      %272 = arith.addf %261, %271 : vector<1x256xf32>
      %273 = arith.subf %26, %217 : vector<1x256xf32>
      %274 = math.absf %273 : vector<1x256xf32>
      %cst_73 = arith.constant 1.000000e+00 : f32
      %275 = vector.broadcast %cst_73 : f32 to vector<1x256xf32>
      %276 = arith.cmpf olt, %274, %275 : vector<1x256xf32>
      %cst_74 = arith.constant 5.000000e-01 : f32
      %277 = vector.broadcast %cst_74 : f32 to vector<1x256xf32>
      %278 = arith.mulf %277, %274 : vector<1x256xf32>
      %279 = arith.mulf %278, %274 : vector<1x256xf32>
      %cst_75 = arith.constant 5.000000e-01 : f32
      %280 = vector.broadcast %cst_75 : f32 to vector<1x256xf32>
      %281 = arith.subf %274, %280 : vector<1x256xf32>
      %282 = arith.select %276, %279, %281 : vector<1x256xi1>, vector<1x256xf32>
      %283 = arith.addf %272, %282 : vector<1x256xf32>
      %284 = arith.subf %29, %221 : vector<1x256xf32>
      %285 = math.absf %284 : vector<1x256xf32>
      %cst_76 = arith.constant 1.000000e+00 : f32
      %286 = vector.broadcast %cst_76 : f32 to vector<1x256xf32>
      %287 = arith.cmpf olt, %285, %286 : vector<1x256xf32>
      %cst_77 = arith.constant 5.000000e-01 : f32
      %288 = vector.broadcast %cst_77 : f32 to vector<1x256xf32>
      %289 = arith.mulf %288, %285 : vector<1x256xf32>
      %290 = arith.mulf %289, %285 : vector<1x256xf32>
      %cst_78 = arith.constant 5.000000e-01 : f32
      %291 = vector.broadcast %cst_78 : f32 to vector<1x256xf32>
      %292 = arith.subf %285, %291 : vector<1x256xf32>
      %293 = arith.select %287, %290, %292 : vector<1x256xi1>, vector<1x256xf32>
      %294 = arith.addf %283, %293 : vector<1x256xf32>
      %295 = arith.minimumf %26, %247 : vector<1x256xf32>
      %296 = arith.maximumf %20, %239 : vector<1x256xf32>
      %297 = arith.subf %295, %296 : vector<1x256xf32>
      %cst_79 = arith.constant 0.000000e+00 : f32
      %298 = vector.broadcast %cst_79 : f32 to vector<1x256xf32>
      %299 = arith.maximumf %297, %298 : vector<1x256xf32>
      %300 = arith.minimumf %29, %251 : vector<1x256xf32>
      %301 = arith.maximumf %23, %243 : vector<1x256xf32>
      %302 = arith.subf %300, %301 : vector<1x256xf32>
      %cst_80 = arith.constant 0.000000e+00 : f32
      %303 = vector.broadcast %cst_80 : f32 to vector<1x256xf32>
      %304 = arith.maximumf %302, %303 : vector<1x256xf32>
      %305 = arith.mulf %299, %304 : vector<1x256xf32>
      %306 = arith.subf %247, %239 : vector<1x256xf32>
      %307 = math.absf %306 : vector<1x256xf32>
      %308 = arith.subf %251, %243 : vector<1x256xf32>
      %309 = math.absf %308 : vector<1x256xf32>
      %310 = arith.mulf %307, %309 : vector<1x256xf32>
      %311 = arith.divf %305, %310 : vector<1x256xf32>
      %cst_81 = arith.constant 5.000000e-01 : f32
      %312 = vector.broadcast %cst_81 : f32 to vector<1x256xf32>
      %313 = arith.cmpf ogt, %311, %312 : vector<1x256xf32>
      %cst_82 = arith.constant 5.000000e-01 : f32
      %314 = vector.broadcast %cst_82 : f32 to vector<1x256xf32>
      %315 = arith.subf %311, %314 : vector<1x256xf32>
      %cst_83 = arith.constant 0.838119566 : f32
      %316 = vector.broadcast %cst_83 : f32 to vector<1x256xf32>
      %317 = arith.mulf %315, %316 : vector<1x256xf32>
      %cst_84 = arith.constant 1.000000e+00 : f32
      %318 = vector.broadcast %cst_84 : f32 to vector<1x256xf32>
      %319 = arith.subf %318, %311 : vector<1x256xf32>
      %cst_85 = arith.constant 1.000000e-07 : f32
      %320 = vector.broadcast %cst_85 : f32 to vector<1x256xf32>
      %321 = arith.maximumf %319, %320 : vector<1x256xf32>
      %322 = math.log %321 : vector<1x256xf32>
      %cst_86 = arith.constant 0.000000e+00 : f32
      %323 = vector.broadcast %cst_86 : f32 to vector<1x256xf32>
      %324 = arith.subf %323, %322 : vector<1x256xf32>
      %325 = arith.select %313, %317, %324 : vector<1x256xi1>, vector<1x256xf32>
      %c256_i32 = arith.constant 256 : i32
      %326 = arith.muli %5, %c256_i32 : i32
      %327 = tpu.iota {dimensions = array<i32: 1>} : vector<1x256xi32>
      %328 = vector.broadcast %326 : i32 to vector<1x256xi32>
      %329 = arith.addi %328, %327 : vector<1x256xi32>
      %c16_i32 = arith.constant 16 : i32
      %330 = vector.broadcast %c16_i32 : i32 to vector<1x256xi32>
      %331 = arith.cmpi slt, %329, %330 : vector<1x256xi32>
      %cst_87 = arith.constant 0.000000e+00 : f32
      %332 = vector.broadcast %cst_87 : f32 to vector<1x256xf32>
      %333 = arith.select %331, %294, %332 : vector<1x256xi1>, vector<1x256xf32>
      %cst_88 = arith.constant 0.000000e+00 : f32
      %334 = vector.broadcast %cst_88 : f32 to vector<1x256xf32>
      %335 = arith.select %331, %325, %334 : vector<1x256xi1>, vector<1x256xf32>
      %cst_89 = arith.constant dense<0.000000e+00> : vector<1xf32>
      %336 = vector.multi_reduction <add>, %333, %cst_89 [1] : vector<1x256xf32> to vector<1xf32>
      %337 = vector.shape_cast %336 : vector<1xf32> to vector<1x1xf32>
      %cst_90 = arith.constant dense<0.000000e+00> : vector<1xf32>
      %338 = vector.multi_reduction <add>, %335, %cst_90 [1] : vector<1x256xf32> to vector<1xf32>
      %339 = vector.shape_cast %338 : vector<1xf32> to vector<1x1xf32>
      %c0_91 = arith.constant 0 : index
      %c0_92 = arith.constant 0 : index
      %340 = vector.load %arg9[%c0_91, %c0_92] : memref<1x1xf32, #tpu.memory_space<vmem>>, vector<1x1xf32>
      %cst_93 = arith.constant 6.250000e-02 : f32
      %341 = vector.broadcast %cst_93 : f32 to vector<1x1xf32>
      %342 = arith.mulf %341, %337 : vector<1x1xf32>
      %cst_94 = arith.constant 3.125000e-02 : f32
      %343 = vector.broadcast %cst_94 : f32 to vector<1x1xf32>
      %344 = arith.mulf %343, %339 : vector<1x1xf32>
      %345 = arith.addf %342, %344 : vector<1x1xf32>
      %346 = arith.addf %340, %345 : vector<1x1xf32>
      %c0_95 = arith.constant 0 : index
      %c0_96 = arith.constant 0 : index
      %347 = vector.load %arg9[%c0_95, %c0_96] : memref<1x1xf32, #tpu.memory_space<vmem>>, vector<1x1xf32>
      tpu.vector_store %arg9[%c0_95, %c0_96], %346 {strides = array<i32>} : memref<1x1xf32, #tpu.memory_space<vmem>>, vector<1x1xf32>,
    } else {
    }
    %c0_i32_34 = arith.constant 0 : i32
    %124 = arith.cmpi eq, %arg1, %c0_i32_34 : i32
    %125 = arith.extui %124 : i1 to i32
    %c0_i32_35 = arith.constant 0 : i32
    %126 = arith.cmpi ne, %125, %c0_i32_35 : i32
    scf.if %126 {
      %c0_36 = arith.constant 0 : index
      %c0_37 = arith.constant 0 : index
      %127 = vector.load %arg9[%c0_36, %c0_37] : memref<1x1xf32, #tpu.memory_space<vmem>>, vector<1x1xf32>
      %c0_38 = arith.constant 0 : index
      %c0_39 = arith.constant 0 : index
      %c0_40 = arith.constant 0 : index
      %128 = vector.load %arg8[%c0_38, %c0_39, %c0_40] : memref<1x1x1xf32, #tpu.memory_space<vmem>>, vector<1x1x1xf32>
      %129 = vector.shape_cast %128 : vector<1x1x1xf32> to vector<1x1xf32>
      %130 = vector.shape_cast %127 : vector<1x1xf32> to vector<1x1x1xf32>
      tpu.vector_store %arg8[%c0_38, %c0_39, %c0_40], %130 {strides = array<i32>} : memref<1x1x1xf32, #tpu.memory_space<vmem>>, vector<1x1x1xf32>,
    } else {
    }
    return
  }
  func.func @transform_0(%arg0: i32, %arg1: i32, %arg2: memref<2x1xi32, #tpu.memory_space<smem>>, %arg3: memref<2x1xi32, #tpu.memory_space<smem>>, %arg4: memref<2x1xi32, #tpu.memory_space<smem>>) -> (i32, i32) {
    %c0_i32 = arith.constant 0 : i32
    %c0_i32_0 = arith.constant 0 : i32
    %c0_i32_1 = arith.constant 0 : i32
    return %c0_i32, %c0_i32_0 : i32, i32
  }
  func.func @transform_1(%arg0: i32, %arg1: i32, %arg2: memref<2x1xi32, #tpu.memory_space<smem>>, %arg3: memref<2x1xi32, #tpu.memory_space<smem>>, %arg4: memref<2x1xi32, #tpu.memory_space<smem>>) -> (i32, i32) {
    %0 = arith.index_cast %arg0 : i32 to index
    %1 = arith.index_cast %arg1 : i32 to index
    %2 = memref.load %arg2[%0, %1] : memref<2x1xi32, #tpu.memory_space<smem>>
    %c0_i32 = arith.constant 0 : i32
    %c0_i32_0 = arith.constant 0 : i32
    return %2, %c0_i32 : i32, i32
  }
  func.func @transform_2(%arg0: i32, %arg1: i32, %arg2: memref<2x1xi32, #tpu.memory_space<smem>>, %arg3: memref<2x1xi32, #tpu.memory_space<smem>>, %arg4: memref<2x1xi32, #tpu.memory_space<smem>>) -> (i32, i32) {
    %0 = arith.index_cast %arg0 : i32 to index
    %1 = arith.index_cast %arg1 : i32 to index
    %2 = memref.load %arg3[%0, %1] : memref<2x1xi32, #tpu.memory_space<smem>>
    %c0_i32 = arith.constant 0 : i32
    %c0_i32_0 = arith.constant 0 : i32
    return %c0_i32, %2 : i32, i32
  }
  func.func @transform_3(%arg0: i32, %arg1: i32, %arg2: memref<2x1xi32, #tpu.memory_space<smem>>, %arg3: memref<2x1xi32, #tpu.memory_space<smem>>, %arg4: memref<2x1xi32, #tpu.memory_space<smem>>) -> (i32, i32, i32) {
    %c0_i32 = arith.constant 0 : i32
    %c0_i32_0 = arith.constant 0 : i32
    %c0_i32_1 = arith.constant 0 : i32
    return %arg0, %c0_i32, %c0_i32_0 : i32, i32, i32
  }
}

</mosaic_0001>

<bundles_post_ra>
// kernel: tpu_custom_call.1
= control target key start
LH: loop header
LB: loop body
LE: loop exit
PB: predicated region body
PF: predicated region fallthrough
CT: control target
= control target key end

     0   :  { %s9397_s0 = inlined_call_operand.vmem [shape: s32[2,1], index: 0, kind: input, shape index: {}]   ;;  %s9398_s3 = inlined_call_operand.vmem [shape: f32[8,4], index: 3, kind: input, shape index: {}]   ;;  %s9399_s4 = inlined_call_operand.vmem [shape: f32[256,4], index: 4, kind: input, shape index: {}]   ;;  %s9400_s5 = inlined_call_operand.vmem [shape: f32[4,256], index: 5, kind: input, shape index: {}]   ;;  %s9401_s6 = inlined_call_operand.vmem [shape: f32[2,1,1], index: 6, kind: output, shape index: {}]   ;;  %s9402_s1 = inlined_call_operand.vmem [shape: s32[2,1], index: 1, kind: input, shape index: {}]   ;;  %s9403_s2 = inlined_call_operand.vmem [shape: s32[2,1], index: 2, kind: input, shape index: {}]  }
   0x1   :  { %s11_s23 = sshll.u32 %s9397_s0, 4  ;;  %s15_s26 = sshll.u32 %s9402_s1, 4  ;;  %s12_s23 = int_to_ptr.vmem [resolvable:$true] %s11_s23  ;;  %s16_s26 = int_to_ptr.vmem [resolvable:$true] %s15_s26 }
   0x2   :  { %s5045_s27 = scalar_lea.vmem %s12_s23, 32  ;;  %p5050_p1 = scmp.lt.s32.totalorder %s12_s23, %s12_s23 }
   0x3   :  { %p5046_p0 = scmp.ne.s32.totalorder %s12_s23, %s5045_s27  ;;  %p5051_p2 = scmp.lt.s32.totalorder %s5045_s27, %s5045_s27 }
   0x5   :  { %p5052_p3 = por %p5051_p2, %p5050_p1 }
   0x7   :  { %p5053_p4 = pnand %p5052_p3, %p5046_p0 }
   0x9   :  { %5056 = shalt.err (!%p5053_p4)  }
   0xa   :  { %s5107_s28 = smov [#allocation4]   ;;  %s5057_s29 = scalar_lea.vmem %s16_s26, 32 }
   0xb   :  { %14 = dma.vmem_to_smem %s12_s23, 32, %s5107_s28, [#allocation3] }
   0xc   :  { %p5058_p5 = scmp.ne.s32.totalorder %s16_s26, %s5057_s29  ;;  %p5062_p6 = scmp.lt.s32.totalorder %s16_s26, %s16_s26 }
   0xd   :  { %p5063_p7 = scmp.lt.s32.totalorder %s5057_s29, %s5057_s29 }
   0xf   :  { %p5064_p8 = por %p5063_p7, %p5062_p6 }
  0x11   :  { %p5065_p9 = pnand %p5064_p8, %p5058_p5 }
  0x13   :  { %5068 = shalt.err (!%p5065_p9)  }
  0x14   :  { %s5108_s0 = smov [#allocation5]   ;;  %s19_s7 = sshll.u32 %s9403_s2, 4  ;;  %s20_s7 = int_to_ptr.vmem [resolvable:$true] %s19_s7 }
  0x15   :  { %18 = dma.vmem_to_smem %s16_s26, 32, %s5108_s0, [#allocation3] }
  0x16   :  { %s5069_s8 = scalar_lea.vmem %s20_s7, 32  ;;  %p5074_p11 = scmp.lt.s32.totalorder %s20_s7, %s20_s7 }
  0x17   :  { %p5070_p10 = scmp.ne.s32.totalorder %s20_s7, %s5069_s8  ;;  %p5075_p12 = scmp.lt.s32.totalorder %s5069_s8, %s5069_s8 }
  0x19   :  { %p5076_p13 = por %p5075_p12, %p5074_p11 }
  0x1b   :  { %p5077_p0 = pnand %p5076_p13, %p5070_p10 }
  0x1d   :  { %5080 = shalt.err (!%p5077_p0)  }
  0x1e   :  { %s5109_s9 = smov [#allocation6]  }
  0x1f   :  { %22 = dma.vmem_to_smem %s20_s7, 32, %s5109_s9, [#allocation3] }
  0x20   :  { %5093 = dma.done.wait [#allocation3], 96 }
  0x21   :  { %5094 = vsyncadd [#allocation3], 4294967200 }
  0x22   :  { %24 = sfence }
  0x23   :  { %s5164_s10 = smov 0   ;;  %s5166_s11 = smov 0  }
  0x24   :  { %s5168_s12 = smov 0  }
  0x25 LB: > { %s42_s2 = sadd.s32 1, %s5101_s11  ;;  %p4644_p1 = scmp.ge.s32.totalorder %s5105_s12, 1  ;;  %s5105_s12 = sphi %s5168_s12, %s30_s12   ;;  %s5101_s11 = sphi %s5166_s11, %s10420_s11   ;;  %s5097_s10 = sphi %s5164_s10, %s10419_s10  }
  0x26   : > { %p44_p2 = scmp.ge.s32.totalorder %s42_s2, 2  ;;  %p242_p3 = scmp.lt.s32.totalorder %s5105_s12, 3 }
  0x28   : > { %s10422_s2 = smov (%p44_p2, %s42_s2), 0  ;;  %p243_p4 = pnand %p4644_p1, %p242_p3 }
  0x2a   : > { %246 = sbr.rel (%p243_p4) target bundleno = 2207 (0x89f), region = 32 }
  0x31   : > { %s5185_s13 = sshll.u32 %s5097_s10, 7  ;;  %v9404_v0 = vmov 1   ;;  %v9405_v1 = vmov 0   ;;  %s5112_s24 = smov 126  }
  0x32   : > { %s292_s14 = sld [smem:[#allocation4 + %s5185_s13]]  ;;  %4773 = vset.pattern.permute.xlu0 %v9404_v0  ;;  %4771 = vset.pattern.permute.xlu1 %v9405_v1  ;;  %s5113_s26 = smov 127  }
  0x33   : > { %s5189_s15 = sld [smem:[#allocation4 + %s5185_s13]]  ;;  %p329_p13 = scmp.lt.s32.totalorder %s5097_s10, 1 }
  0x34   : > { %s5192_s16 = sld [smem:[#allocation5 + %s5185_s13]] }
  0x35   : > { %s5195_s17 = sld [smem:[#allocation6 + %s5185_s13]]  ;;  %s10428_s10 = smov (!%p329_p13, %s5097_s10), 1 }
  0x36   : > { %s5965_s27 = sld [smem:[#allocation5 + %s5185_s13]]  ;;  %s331_s9 = scalar_lea.vmem %s9401_s6, %s10428_s10 }
  0x38   : > { %s4646_s18 = sshll.u32 %s292_s14, 5 }
  0x39   : > { %p294_p5 = scmp.lt.s32.totalorder %s4646_s18, 31 }
  0x3a   : > { %p3401_p6 = scmp.lt.s32.totalorder %s5189_s15, %s5192_s16  ;;  %p3402_p7 = scmp.lt.s32.totalorder %s5192_s16, 0 }
  0x3b   : > { %s10424_s18 = smov (!%p294_p5, %s4646_s18), 31  ;;  %p342_p8 = scmp.ne.s32.totalorder %s5195_s17, 0 }
  0x3c   : > { %s4647_s19 = sshll.u32 %s10424_s18, 3  ;;  %p5211_p9 = pnand %p3402_p7, %p3401_p6 }
  0x3d   : > { %s5205_s22 = scalar_lea.vmem %s9399_s4, %s4647_s19  ;;  %s4649_s28 = sshll.u32 %s5965_s27, 1 }
  0x3e   : > { %v5209_v2 = vld [vmem:[%s5205_s22] sm:$0xff]  ;;  %v5216_v3 = vld [vmem:[%s5205_s22 + $0x8] sm:$0xff]  ;;  %v5219_v4 = vld [vmem:[%s5205_s22 + $0x10] sm:$0xff]  ;;  %p3404_p10 = pneg %p5211_p9  ;;  %p316_p12 = scmp.lt.s32.totalorder %s4649_s28, 1 }
  0x3f   : > { %v389_v5 = vmul.f32 0.5, %v5209_v2  ;;  %v391_v6 = vmul.f32 0.5, %v5219_v4  ;;  %v390_v7 = vmul.f32 0.5, %v5216_v3  ;;  %v5235_v8 = vld [vmem:[%s5205_s22 + $0x20] sm:$0xff]  ;;  %v5238_v9 = vld [vmem:[%s5205_s22 + $0x18] sm:$0xff]  ;;  %v5241_v10 = vld [vmem:[%s5205_s22 + $0x28] sm:$0xff] }
  0x40   : > { %p5230_p11 = pnand %p3404_p10, %p342_p8  ;;  %v393_v11 = vmul.f32 0.5, %v5235_v8  ;;  %v392_v12 = vmul.f32 0.5, %v5238_v9  ;;  %v5247_v13 = vld [vmem:[%s5205_s22 + $0x30] sm:$0xff]  ;;  %v394_v14 = vmul.f32 0.5, %v5241_v10  ;;  %v5252_v15 = vld [vmem:[%s5205_s22 + $0x38] sm:$0xff]  ;;  %v5257_v17 = vld [vmem:[%s5205_s22 + $0x40] sm:$0xff] }
  0x41   : > { %453 = vrot.lane.b32.xlu0 %v389_v5, %s5112_s24  ;;  %457 = vrot.lane.b32.xlu1 %v391_v6, %s5112_s24  ;;  %v395_v16 = vmul.f32 0.5, %v5247_v13  ;;  %v396_v18 = vmul.f32 0.5, %v5252_v15  ;;  %v5262_v19 = vld [vmem:[%s5205_s22 + $0x48] sm:$0xff]  ;;  %v397_v20 = vmul.f32 0.5, %v5257_v17  ;;  %v5267_v21 = vld [vmem:[%s5205_s22 + $0x50] sm:$0xff]  ;;  %s10426_s28 = smov (!%p316_p12, %s4649_s28), 1 }
  0x42   : > { %v398_v22 = vmul.f32 0.5, %v5262_v19  ;;  %v5272_v23 = vld [vmem:[%s5205_s22 + $0x58] sm:$0xff]  ;;  %v399_v24 = vmul.f32 0.5, %v5267_v21  ;;  %v5277_v25 = vld [vmem:[%s5205_s22 + $0x60] sm:$0xff]  ;;  %v5282_v27 = vld [vmem:[%s5205_s22 + $0x68] sm:$0xff]  ;;  %s4650_s29 = sshll.u32 %s10426_s28, 2 }
  0x43   : > { %v400_v26 = vmul.f32 0.5, %v5272_v23  ;;  %v401_v28 = vmul.f32 0.5, %v5277_v25  ;;  %v5287_v29 = vld [vmem:[%s5205_s22 + $0x70] sm:$0xff]  ;;  %v402_v30 = vmul.f32 0.5, %v5282_v27  ;;  %v5292_v31 = vld [vmem:[%s5205_s22 + $0x78] sm:$0xff]  ;;  %v5297_v33 = vld [vmem:[%s5205_s22 + $0x80] sm:$0xff]  ;;  %s319_s30 = scalar_lea.vmem %s9400_s5, %s4650_s29 }
  0x44   : > { %v403_v32 = vmul.f32 0.5, %v5287_v29  ;;  %v404_v34 = vmul.f32 0.5, %v5292_v31  ;;  %v5302_v35 = vld [vmem:[%s5205_s22 + $0x88] sm:$0xff]  ;;  %v405_v36 = vmul.f32 0.5, %v5297_v33  ;;  %v5307_v37 = vld [vmem:[%s5205_s22 + $0x90] sm:$0xff]  ;;  %v5312_v39 = vld [vmem:[%s5205_s22 + $0x98] sm:$0xff] }
  0x45   : > { %455 = vrot.lane.b32.xlu0 %v390_v7, %s5112_s24  ;;  %459 = vrot.lane.b32.xlu1 %v392_v12, %s5112_s24  ;;  %v406_v38 = vmul.f32 0.5, %v5302_v35  ;;  %v407_v40 = vmul.f32 0.5, %v5307_v37  ;;  %v5317_v41 = vld [vmem:[%s5205_s22 + $0xa0] sm:$0xff]  ;;  %v408_v42 = vmul.f32 0.5, %v5312_v39  ;;  %v5322_v43 = vld [vmem:[%s5205_s22 + $0xa8] sm:$0xff] }
  0x46   : > { %v409_v44 = vmul.f32 0.5, %v5317_v41  ;;  %v5327_v45 = vld [vmem:[%s5205_s22 + $0xb0] sm:$0xff]  ;;  %v410_v46 = vmul.f32 0.5, %v5322_v43  ;;  %v5332_v47 = vld [vmem:[%s5205_s22 + $0xb8] sm:$0xff]  ;;  %v5337_v49 = vld [vmem:[%s5205_s22 + $0xc0] sm:$0xff] }
  0x47   : > { %v411_v48 = vmul.f32 0.5, %v5327_v45  ;;  %v412_v50 = vmul.f32 0.5, %v5332_v47  ;;  %v5342_v51 = vld [vmem:[%s5205_s22 + $0xc8] sm:$0xff]  ;;  %v413_v52 = vmul.f32 0.5, %v5337_v49  ;;  %v5347_v53 = vld [vmem:[%s5205_s22 + $0xd0] sm:$0xff]  ;;  %v5352_v55 = vld [vmem:[%s5205_s22 + $0xd8] sm:$0xff] }
  0x48   : > { %v414_v54 = vmul.f32 0.5, %v5342_v51  ;;  %v415_v56 = vmul.f32 0.5, %v5347_v53  ;;  %v5357_v57 = vld [vmem:[%s5205_s22 + $0xe0] sm:$0xff]  ;;  %v416_v58 = vmul.f32 0.5, %v5352_v55  ;;  %v5362_v59 = vld [vmem:[%s5205_s22 + $0xe8] sm:$0xff]  ;;  %v5367_v61 = vld [vmem:[%s5205_s22 + $0xf0] sm:$0xff] }
  0x49   : > { %461 = vrot.lane.b32.xlu0 %v393_v11, %s5112_s24  ;;  %463 = vrot.lane.b32.xlu1 %v394_v14, %s5112_s24  ;;  %v417_v60 = vmul.f32 0.5, %v5357_v57  ;;  %v418_v62 = vmul.f32 0.5, %v5362_v59  ;;  %v5372_v63 = vld [vmem:[%s5205_s22 + $0xf8] sm:$0xff]  ;;  %v419_v5 = vmul.f32 0.5, %v5367_v61 }
  0x4a   : > { %v420_v6 = vmul.f32 0.5, %v5372_v63 }
  0x4d   : > { %465 = vrot.lane.b32.xlu0 %v395_v16, %s5112_s24  ;;  %467 = vrot.lane.b32.xlu1 %v396_v18, %s5112_s24 }
  0x51   : > { %469 = vrot.lane.b32.xlu0 %v397_v20, %s5112_s24  ;;  %471 = vrot.lane.b32.xlu1 %v398_v22, %s5112_s24 }
  0x55   : > { %473 = vrot.lane.b32.xlu0 %v399_v24, %s5112_s24  ;;  %475 = vrot.lane.b32.xlu1 %v400_v26, %s5112_s24 }
  0x59   : > { %477 = vrot.lane.b32.xlu0 %v401_v28, %s5112_s24  ;;  %479 = vrot.lane.b32.xlu1 %v402_v30, %s5112_s24 }
  0x5d   : > { %481 = vrot.lane.b32.xlu0 %v403_v32, %s5112_s24  ;;  %483 = vrot.lane.b32.xlu1 %v404_v34, %s5112_s24 }
  0x61   : > { %485 = vrot.lane.b32.xlu0 %v405_v36, %s5112_s24  ;;  %487 = vrot.lane.b32.xlu1 %v406_v38, %s5112_s24 }
  0x65   : > { %489 = vrot.lane.b32.xlu0 %v407_v40, %s5112_s24  ;;  %491 = vrot.lane.b32.xlu1 %v408_v42, %s5112_s24 }
  0x69   : > { %493 = vrot.lane.b32.xlu0 %v409_v44, %s5112_s24  ;;  %495 = vrot.lane.b32.xlu1 %v410_v46, %s5112_s24 }
  0x6d   : > { %497 = vrot.lane.b32.xlu0 %v411_v48, %s5112_s24  ;;  %499 = vrot.lane.b32.xlu1 %v412_v50, %s5112_s24 }
  0x71   : > { %501 = vrot.lane.b32.xlu0 %v413_v52, %s5112_s24  ;;  %503 = vrot.lane.b32.xlu1 %v414_v54, %s5112_s24 }
  0x75   : > { %505 = vrot.lane.b32.xlu0 %v415_v56, %s5112_s24  ;;  %507 = vrot.lane.b32.xlu1 %v416_v58, %s5112_s24 }
  0x79   : > { %509 = vrot.lane.b32.xlu0 %v417_v60, %s5112_s24  ;;  %511 = vrot.lane.b32.xlu1 %v418_v62, %s5112_s24 }
  0x7d   : > { %513 = vrot.lane.b32.xlu0 %v419_v5, %s5112_s24  ;;  %515 = vrot.lane.b32.xlu1 %v420_v6, %s5112_s24 }
  0xb3   : > { %v5380_v7 = vpop.permute.xlu0 %453  ;;  %v5384_v12 = vpop.permute.xlu1 %457 }
  0xb4   : > { %v5394_v16 = vadd.f32 %v5384_v12, %v5219_v4 }
  0xb7   : > { %v5382_v11 = vpop.permute.xlu0 %455  ;;  %v5474_v58 = vpop.permute.xlu1 %459 }
  0xb8   : > { %v5388_v14 = vadd.f32 %v5382_v11, %v5216_v3 }
  0xba   : > { %1296 = vperm.xlu0 %4773, %v5388_v14   ;;  %620 = vperm.xlu1 %4771, %v5388_v14  }
  0xbb   : > { %v5396_v18 = vpop.permute.xlu0 %461  ;;  %v5486_v6 = vpop.permute.xlu1 %463 }
  0xbc   : > { %v5400_v20 = vadd.f32 %v5396_v18, %v5235_v8 }
  0xbe   : > { %625 = vperm.xlu1 %4771, %v5394_v16   ;;  %1308 = vperm.xlu0 %4773, %v5400_v20  }
  0xbf   : > { %v5404_v22 = vpop.permute.xlu0 %465 }
  0xc0   : > { %v5408_v24 = vadd.f32 %v5404_v22, %v5247_v13 }
  0xc2   : > { %635 = vperm.xlu1 %4771, %v5400_v20   ;;  %1316 = vperm.xlu0 %4773, %v5408_v24  }
  0xc3   : > { %v5412_v26 = vpop.permute.xlu0 %469 }
  0xc4   : > { %v5416_v28 = vadd.f32 %v5412_v26, %v5257_v17 }
  0xc6   : > { %645 = vperm.xlu1 %4771, %v5408_v24   ;;  %1324 = vperm.xlu0 %4773, %v5416_v28  }
  0xc7   : > { %v5420_v30 = vpop.permute.xlu0 %473 }
  0xc8   : > { %v5424_v32 = vadd.f32 %v5420_v30, %v5267_v21 }
  0xca   : > { %9634 = vst [vmem:[#allocation8_spill] sm:$0xff] %v5424_v32  ;;  %655 = vperm.xlu1 %4771, %v5416_v28   ;;  %1332 = vperm.xlu0 %4773, %v5424_v32  }
  0xcb   : > { %v5428_v34 = vpop.permute.xlu0 %477 }
  0xcc   : > { %v5432_v36 = vadd.f32 %v5428_v34, %v5277_v25 }
  0xce   : > { %9635 = vst [vmem:[#allocation9_spill] sm:$0xff] %v5432_v36  ;;  %665 = vperm.xlu1 %4771, %v5424_v32   ;;  %1340 = vperm.xlu0 %4773, %v5432_v36  }
  0xcf   : > { %v5436_v38 = vpop.permute.xlu0 %481 }
  0xd0   : > { %v5440_v40 = vadd.f32 %v5436_v38, %v5287_v29 }
  0xd2   : > { %9636 = vst [vmem:[#allocation10_spill] sm:$0xff] %v5440_v40  ;;  %675 = vperm.xlu1 %4771, %v5432_v36   ;;  %1348 = vperm.xlu0 %4773, %v5440_v40  }
  0xd3   : > { %v5444_v42 = vpop.permute.xlu0 %485 }
  0xd4   : > { %v5448_v44 = vadd.f32 %v5444_v42, %v5297_v33 }
  0xd6   : > { %9637 = vst [vmem:[#allocation11_spill] sm:$0xff] %v5448_v44  ;;  %685 = vperm.xlu1 %4771, %v5440_v40   ;;  %1356 = vperm.xlu0 %4773, %v5448_v44   ;;  %v5509_v40 = vsub.f32 %v5209_v2, %v5380_v7 }
  0xd7   : > { %v5452_v46 = vpop.permute.xlu0 %489 }
  0xd8   : > { %v5456_v48 = vadd.f32 %v5452_v46, %v5307_v37 }
  0xda   : > { %9638 = vst [vmem:[#allocation12_spill] sm:$0xff] %v5456_v48  ;;  %695 = vperm.xlu1 %4771, %v5448_v44   ;;  %1364 = vperm.xlu0 %4773, %v5456_v48  }
  0xdb   : > { %v5460_v50 = vpop.permute.xlu0 %493 }
  0xdc   : > { %v5464_v52 = vadd.f32 %v5460_v50, %v5317_v41 }
  0xde   : > { %9639 = vst [vmem:[#allocation13_spill] sm:$0xff] %v5464_v52  ;;  %705 = vperm.xlu1 %4771, %v5456_v48   ;;  %1372 = vperm.xlu0 %4773, %v5464_v52   ;;  %v5496_v48 = vpop.permute.xlu1 %467 }
  0xdf   : > { %v5468_v54 = vpop.permute.xlu0 %497 }
  0xe0   : > { %v5472_v56 = vadd.f32 %v5468_v54, %v5327_v45 }
  0xe2   : > { %9640 = vst [vmem:[#allocation14_spill] sm:$0xff] %v5472_v56  ;;  %715 = vperm.xlu1 %4771, %v5464_v52   ;;  %1380 = vperm.xlu0 %4773, %v5472_v56  }
  0xe3   : > { %v5478_v60 = vpop.permute.xlu0 %501 }
  0xe4   : > { %v5482_v62 = vadd.f32 %v5478_v60, %v5337_v49 }
  0xe6   : > { %9641 = vst [vmem:[#allocation15_spill] sm:$0xff] %v5482_v62  ;;  %725 = vperm.xlu1 %4771, %v5472_v56   ;;  %1388 = vperm.xlu0 %4773, %v5482_v62  }
  0xe7   : > { %v506_v5 = vpop.permute.xlu0 %505 }
  0xe8   : > { %v5489_v0 = vadd.f32 %v506_v5, %v5347_v53 }
  0xea   : > { %9642 = vst [vmem:[#allocation16_spill] sm:$0xff] %v5489_v0  ;;  %735 = vperm.xlu1 %4771, %v5482_v62   ;;  %1396 = vperm.xlu0 %4773, %v5489_v0   ;;  %v5505_v62 = vpop.permute.xlu1 %471 }
  0xeb   : > { %v510_v1 = vpop.permute.xlu0 %509 }
  0xec   : > { %v5494_v52 = vadd.f32 %v510_v1, %v5357_v57 }
  0xee   : > { %9643 = vst [vmem:[#allocation17_spill] sm:$0xff] %v5494_v52  ;;  %745 = vperm.xlu1 %4771, %v5489_v0   ;;  %1404 = vperm.xlu0 %4773, %v5494_v52   ;;  %v5515_v0 = vsub.f32 %v5219_v4, %v5384_v12  ;;  %v5517_v36 = vpop.permute.xlu1 %475  ;;  %v5531_v4 = vsub.f32 %v5247_v13, %v5404_v22 }
  0xef   : > { %v514_v56 = vpop.permute.xlu0 %513  ;;  %v5537_v12 = vsub.f32 %v5257_v17, %v5412_v26  ;;  %v5553_v17 = vsub.f32 %v5277_v25, %v5428_v34  ;;  %v5559_v22 = vsub.f32 %v5287_v29, %v5436_v38  ;;  %v5567_v26 = vsub.f32 %v5297_v33, %v5444_v42 }
  0xf0   : > { %v5501_v44 = vadd.f32 %v514_v56, %v5367_v61  ;;  %v5575_v29 = vsub.f32 %v5307_v37, %v5452_v46  ;;  %v5589_v34 = vsub.f32 %v5327_v45, %v5468_v54  ;;  %v5602_v38 = vsub.f32 %v5347_v53, %v506_v5 }
  0xf1   : > { %v5609_v45 = vsub.f32 %v5357_v57, %v510_v1  ;;  %v5616_v46 = vsub.f32 %v5367_v61, %v514_v56  ;;  %v5622_v53 = vadd.f32 %v5380_v7, %v5209_v2  ;;  %v9652_v1 = vmov 0  }
  0xf2   : > { %9644 = vst [vmem:[#allocation18_spill] sm:$0xff] %v5501_v44  ;;  %755 = vperm.xlu1 %4771, %v5494_v52   ;;  %1412 = vperm.xlu0 %4773, %v5501_v44   ;;  %v5523_v52 = vsub.f32 %v5235_v8, %v5396_v18  ;;  %v5527_v32 = vpop.permute.xlu1 %479  ;;  %v5545_v18 = vsub.f32 %v5267_v21, %v5420_v30  ;;  %9645 = vst [vmem:[#allocation19_spill] sm:$0xff] %v5575_v29  ;;  %v9655_v56 = vmov 1  }
  0xf3   : > { %v5581_v30 = vsub.f32 %v5317_v41, %v5460_v50  ;;  %9647 = vst [vmem:[#allocation21_spill] sm:$0xff] %v5589_v34  ;;  %v5597_v41 = vsub.f32 %v5337_v49, %v5478_v60  ;;  %9649 = vst [vmem:[#allocation23_spill] sm:$0xff] %v5602_v38  ;;  %v5631_v57 = vadd.f32 %v5474_v58, %v5238_v9 }
  0xf4   : > { %9650 = vst [vmem:[#allocation24_spill] sm:$0xff] %v5609_v45  ;;  %9651 = vst [vmem:[#allocation25_spill] sm:$0xff] %v5616_v46  ;;  %v5642_v2 = vadd.f32 %v5486_v6, %v5241_v10  ;;  %v5652_v5 = vadd.f32 %v5496_v48, %v5252_v15 }
  0xf5   : > { %9646 = vst [vmem:[#allocation20_spill] sm:$0xff] %v5581_v30  ;;  %9648 = vst [vmem:[#allocation22_spill] sm:$0xff] %v5597_v41 }
  0xf6   : > { %1502 = vperm.xlu0 %4773, %v5509_v40   ;;  %765 = vperm.xlu1 %4771, %v5501_v44   ;;  %v5539_v8 = vpop.permute.xlu1 %483 }
  0xfa   : > { %1510 = vperm.xlu0 %4773, %v5515_v0   ;;  %858 = vperm.xlu1 %4771, %v5509_v40   ;;  %v5549_v13 = vpop.permute.xlu1 %487 }
  0xfe   : > { %1518 = vperm.xlu0 %4773, %v5523_v52   ;;  %868 = vperm.xlu1 %4771, %v5515_v0   ;;  %v5561_v21 = vpop.permute.xlu1 %491 }
 0x102   : > { %1526 = vperm.xlu0 %4773, %v5531_v4   ;;  %878 = vperm.xlu1 %4771, %v5523_v52   ;;  %v5571_v25 = vpop.permute.xlu1 %495 }
 0x106   : > { %1534 = vperm.xlu0 %4773, %v5537_v12   ;;  %888 = vperm.xlu1 %4771, %v5531_v4   ;;  %v5583_v33 = vpop.permute.xlu1 %499 }
 0x10a   : > { %1542 = vperm.xlu0 %4773, %v5545_v18   ;;  %898 = vperm.xlu1 %4771, %v5537_v12   ;;  %v5593_v37 = vpop.permute.xlu1 %503 }
 0x10e   : > { %1550 = vperm.xlu0 %4773, %v5553_v17   ;;  %908 = vperm.xlu1 %4771, %v5545_v18   ;;  %v5604_v42 = vpop.permute.xlu1 %507 }
 0x112   : > { %1558 = vperm.xlu0 %4773, %v5559_v22   ;;  %918 = vperm.xlu1 %4771, %v5553_v17   ;;  %v5613_v49 = vpop.permute.xlu1 %511 }
 0x116   : > { %1566 = vperm.xlu0 %4773, %v5567_v26   ;;  %928 = vperm.xlu1 %4771, %v5559_v22   ;;  %v5624_v50 = vpop.permute.xlu1 %515 }
 0x11a   : > { %1574 = vperm.xlu0 %4773, %v5575_v29   ;;  %938 = vperm.xlu1 %4771, %v5567_v26  }
 0x11e   : > { %1582 = vperm.xlu0 %4773, %v5581_v30   ;;  %948 = vperm.xlu1 %4771, %v5575_v29  }
 0x122   : > { %1590 = vperm.xlu0 %4773, %v5589_v34   ;;  %958 = vperm.xlu1 %4771, %v5581_v30  }
 0x126   : > { %1598 = vperm.xlu0 %4773, %v5597_v41   ;;  %968 = vperm.xlu1 %4771, %v5589_v34  }
 0x12a   : > { %1606 = vperm.xlu0 %4773, %v5602_v38   ;;  %978 = vperm.xlu1 %4771, %v5597_v41  }
 0x12e   : > { %1614 = vperm.xlu0 %4773, %v5609_v45   ;;  %988 = vperm.xlu1 %4771, %v5602_v38  }
 0x132   : > { %998 = vperm.xlu1 %4771, %v5609_v45   ;;  %1622 = vperm.xlu0 %4773, %v5616_v46  }
 0x136   : > { %4774 = vset.pattern.permute.xlu0 %v9652_v1  ;;  %1008 = vperm.xlu1 %4771, %v5616_v46  }
 0x137   : > { %615 = vperm.xlu0 %4774, %v5622_v53  }
 0x139   : > { %v5633_v61 = vpop.permute.xlu1 %620  ;;  %v5635_v54 = vpop.permute.xlu0 %1296 }
 0x13a   : > { %9653 = vst [vmem:[#allocation26_spill] sm:$0xff] %v5633_v61  ;;  %9654 = vst [vmem:[#allocation27_spill] sm:$0xff] %v5635_v54  ;;  %4772 = vset.pattern.permute.xlu1 %v9655_v56 }
 0x13b   : > { %630 = vperm.xlu0 %4774, %v5631_v57   ;;  %1292 = vperm.xlu1 %4772, %v5622_v53  }
 0x13d   : > { %v5644_v7 = vpop.permute.xlu1 %625  ;;  %v5646_v60 = vpop.permute.xlu0 %1308 }
 0x13e   : > { %9656 = vst [vmem:[#allocation28_spill] sm:$0xff] %v5644_v7  ;;  %9657 = vst [vmem:[#allocation29_spill] sm:$0xff] %v5646_v60  ;;  %v5662_v7 = vadd.f32 %v5505_v62, %v5262_v19 }
 0x13f   : > { %640 = vperm.xlu0 %4774, %v5642_v2   ;;  %1300 = vperm.xlu1 %4772, %v5394_v16  }
 0x141   : > { %v5654_v56 = vpop.permute.xlu1 %635  ;;  %v5656_v54 = vpop.permute.xlu0 %1316 }
 0x142   : > { %9658 = vst [vmem:[#allocation30_spill] sm:$0xff] %v5654_v56  ;;  %9659 = vst [vmem:[#allocation31_spill] sm:$0xff] %v5656_v54  ;;  %v5672_v56 = vadd.f32 %v5517_v36, %v5272_v23 }
 0x143   : > { %650 = vperm.xlu0 %4774, %v5652_v5   ;;  %1304 = vperm.xlu1 %4772, %v5631_v57  }
 0x145   : > { %v5664_v60 = vpop.permute.xlu1 %645  ;;  %v5666_v61 = vpop.permute.xlu0 %1324 }
 0x146   : > { %9660 = vst [vmem:[#allocation32_spill] sm:$0xff] %v5664_v60  ;;  %9661 = vst [vmem:[#allocation33_spill] sm:$0xff] %v5666_v61  ;;  %v5682_v60 = vadd.f32 %v5527_v32, %v5282_v27 }
 0x147   : > { %660 = vperm.xlu0 %4774, %v5662_v7   ;;  %1312 = vperm.xlu1 %4772, %v5642_v2  }
 0x149   : > { %v5674_v54 = vpop.permute.xlu1 %655  ;;  %v5676_v44 = vpop.permute.xlu0 %1332 }
 0x14a   : > { %9662 = vst [vmem:[#allocation34_spill] sm:$0xff] %v5674_v54  ;;  %9663 = vst [vmem:[#allocation35_spill] sm:$0xff] %v5676_v44  ;;  %v5692_v54 = vadd.f32 %v5539_v8, %v5292_v31 }
 0x14b   : > { %670 = vperm.xlu0 %4774, %v5672_v56   ;;  %1320 = vperm.xlu1 %4772, %v5652_v5  }
 0x14d   : > { %v5684_v61 = vpop.permute.xlu1 %665  ;;  %v5686_v46 = vpop.permute.xlu0 %1340 }
 0x14e   : > { %9664 = vst [vmem:[#allocation36_spill] sm:$0xff] %v5684_v61  ;;  %9665 = vst [vmem:[#allocation37_spill] sm:$0xff] %v5686_v46  ;;  %v5702_v61 = vadd.f32 %v5549_v13, %v5302_v35 }
 0x14f   : > { %680 = vperm.xlu0 %4774, %v5682_v60   ;;  %1328 = vperm.xlu1 %4772, %v5662_v7  }
 0x150   : > { %9668 = vst [vmem:[#allocation40_spill] sm:$0xff] %v5702_v61 }
 0x151   : > { %v5694_v44 = vpop.permute.xlu1 %675  ;;  %v5696_v45 = vpop.permute.xlu0 %1348 }
 0x152   : > { %9666 = vst [vmem:[#allocation38_spill] sm:$0xff] %v5694_v44  ;;  %9667 = vst [vmem:[#allocation39_spill] sm:$0xff] %v5696_v45  ;;  %v5712_v44 = vadd.f32 %v5561_v21, %v5312_v39 }
 0x153   : > { %690 = vperm.xlu0 %4774, %v5692_v54   ;;  %1336 = vperm.xlu1 %4772, %v5672_v56  }
 0x154   : > { %9671 = vst [vmem:[#allocation43_spill] sm:$0xff] %v5712_v44 }
 0x155   : > { %v5704_v46 = vpop.permute.xlu1 %685  ;;  %v5706_v38 = vpop.permute.xlu0 %1356 }
 0x156   : > { %9669 = vst [vmem:[#allocation41_spill] sm:$0xff] %v5704_v46  ;;  %9670 = vst [vmem:[#allocation42_spill] sm:$0xff] %v5706_v38  ;;  %v5722_v46 = vadd.f32 %v5571_v25, %v5322_v43 }
 0x157   : > { %700 = vperm.xlu0 %4774, %v5702_v61   ;;  %1344 = vperm.xlu1 %4772, %v5682_v60  }
 0x158   : > { %9674 = vst [vmem:[#allocation46_spill] sm:$0xff] %v5722_v46 }
 0x159   : > { %v5714_v45 = vpop.permute.xlu1 %695  ;;  %v5716_v41 = vpop.permute.xlu0 %1364 }
 0x15a   : > { %9672 = vst [vmem:[#allocation44_spill] sm:$0xff] %v5714_v45  ;;  %9673 = vst [vmem:[#allocation45_spill] sm:$0xff] %v5716_v41  ;;  %v5732_v45 = vadd.f32 %v5583_v33, %v5332_v47 }
 0x15b   : > { %710 = vperm.xlu0 %4774, %v5712_v44   ;;  %1352 = vperm.xlu1 %4772, %v5692_v54  }
 0x15c   : > { %9677 = vst [vmem:[#allocation49_spill] sm:$0xff] %v5732_v45 }
 0x15d   : > { %v5724_v38 = vpop.permute.xlu1 %705  ;;  %v5726_v34 = vpop.permute.xlu0 %1372 }
 0x15e   : > { %9675 = vst [vmem:[#allocation47_spill] sm:$0xff] %v5724_v38  ;;  %9676 = vst [vmem:[#allocation48_spill] sm:$0xff] %v5726_v34  ;;  %v5742_v38 = vadd.f32 %v5593_v37, %v5342_v51 }
 0x15f   : > { %720 = vperm.xlu0 %4774, %v5722_v46   ;;  %1360 = vperm.xlu1 %4772, %v5702_v61  }
 0x160   : > { %9680 = vst [vmem:[#allocation52_spill] sm:$0xff] %v5742_v38 }
 0x161   : > { %v5734_v41 = vpop.permute.xlu1 %715  ;;  %v5736_v30 = vpop.permute.xlu0 %1380 }
 0x162   : > { %9678 = vst [vmem:[#allocation50_spill] sm:$0xff] %v5734_v41  ;;  %9679 = vst [vmem:[#allocation51_spill] sm:$0xff] %v5736_v30  ;;  %v5752_v41 = vadd.f32 %v5604_v42, %v5352_v55 }
 0x163   : > { %730 = vperm.xlu0 %4774, %v5732_v45   ;;  %1368 = vperm.xlu1 %4772, %v5712_v44  }
 0x165   : > { %v5744_v34 = vpop.permute.xlu1 %725  ;;  %v5746_v29 = vpop.permute.xlu0 %1388 }
 0x166   : > { %9681 = vst [vmem:[#allocation53_spill] sm:$0xff] %v5744_v34  ;;  %9682 = vst [vmem:[#allocation54_spill] sm:$0xff] %v5746_v29  ;;  %v5762_v34 = vadd.f32 %v5613_v49, %v5362_v59 }
 0x167   : > { %740 = vperm.xlu0 %4774, %v5742_v38   ;;  %1376 = vperm.xlu1 %4772, %v5722_v46  }
 0x169   : > { %v5754_v30 = vpop.permute.xlu1 %735  ;;  %v5756_v61 = vpop.permute.xlu0 %1396 }
 0x16a   : > { %9683 = vst [vmem:[#allocation55_spill] sm:$0xff] %v5754_v30  ;;  %9684 = vst [vmem:[#allocation56_spill] sm:$0xff] %v5756_v61  ;;  %v5772_v30 = vadd.f32 %v5624_v50, %v5372_v63 }
 0x16b   : > { %750 = vperm.xlu0 %4774, %v5752_v41   ;;  %1384 = vperm.xlu1 %4772, %v5732_v45  }
 0x16d   : > { %v5764_v29 = vpop.permute.xlu1 %745  ;;  %v5766_v44 = vpop.permute.xlu0 %1404 }
 0x16e   : > { %9685 = vst [vmem:[#allocation57_spill] sm:$0xff] %v5764_v29  ;;  %9686 = vst [vmem:[#allocation58_spill] sm:$0xff] %v5766_v44  ;;  %v5782_v29 = vsub.f32 %v5216_v3, %v5382_v11  ;;  %v5802_v3 = vsub.f32 %v5241_v10, %v5486_v6 }
 0x16f   : > { %760 = vperm.xlu0 %4774, %v5762_v34   ;;  %1392 = vperm.xlu1 %4772, %v5742_v38  }
 0x171   : > { %v5774_v61 = vpop.permute.xlu1 %755  ;;  %v5776_v46 = vpop.permute.xlu0 %1412 }
 0x172   : > { %9687 = vst [vmem:[#allocation59_spill] sm:$0xff] %v5774_v61  ;;  %9688 = vst [vmem:[#allocation60_spill] sm:$0xff] %v5776_v46  ;;  %v5792_v61 = vsub.f32 %v5238_v9, %v5474_v58 }
 0x173   : > { %770 = vperm.xlu0 %4774, %v5772_v30   ;;  %1400 = vperm.xlu1 %4772, %v5752_v41  }
 0x175   : > { %v5784_v44 = vpop.permute.xlu1 %765  ;;  %v5786_v45 = vpop.permute.xlu0 %1502 }
 0x176   : > { %9689 = vst [vmem:[#allocation61_spill] sm:$0xff] %v5784_v44  ;;  %9690 = vst [vmem:[#allocation62_spill] sm:$0xff] %v5786_v45 }
 0x177   : > { %863 = vperm.xlu0 %4774, %v5782_v29   ;;  %1408 = vperm.xlu1 %4772, %v5762_v34  }
 0x179   : > { %v5794_v46 = vpop.permute.xlu1 %858  ;;  %v5796_v38 = vpop.permute.xlu0 %1510 }
 0x17a   : > { %9691 = vst [vmem:[#allocation63_spill] sm:$0xff] %v5794_v46  ;;  %9692 = vst [vmem:[#allocation64_spill] sm:$0xff] %v5796_v38  ;;  %v5816_v38 = vsub.f32 %v5252_v15, %v5496_v48  ;;  %v5826_v46 = vsub.f32 %v5262_v19, %v5505_v62  ;;  %v5836_v48 = vsub.f32 %v5272_v23, %v5517_v36 }
 0x17b   : > { %873 = vperm.xlu0 %4774, %v5792_v61   ;;  %1416 = vperm.xlu1 %4772, %v5772_v30   ;;  %v5846_v62 = vsub.f32 %v5282_v27, %v5527_v32  ;;  %v5856_v36 = vsub.f32 %v5292_v31, %v5539_v8  ;;  %v5866_v32 = vsub.f32 %v5302_v35, %v5549_v13 }
 0x17c   : > { %v5876_v8 = vsub.f32 %v5312_v39, %v5561_v21  ;;  %v5886_v13 = vsub.f32 %v5322_v43, %v5571_v25  ;;  %v5896_v21 = vsub.f32 %v5332_v47, %v5583_v33  ;;  %v5906_v25 = vsub.f32 %v5342_v51, %v5593_v37 }
 0x17d   : > { %v5804_v11 = vpop.permute.xlu1 %868  ;;  %v5806_v45 = vpop.permute.xlu0 %1518  ;;  %v5916_v33 = vsub.f32 %v5352_v55, %v5604_v42  ;;  %v5926_v37 = vsub.f32 %v5362_v59, %v5613_v49  ;;  %v5936_v42 = vsub.f32 %v5372_v63, %v5624_v50  ;;  %v1968_v63 = vsub.f32 %v5388_v14, %v5782_v29 }
 0x17e   : > { %9693 = vst [vmem:[#allocation65_spill] sm:$0xff] %v5804_v11  ;;  %9694 = vst [vmem:[#allocation66_spill] sm:$0xff] %v5806_v45  ;;  %v1970_v14 = vsub.f32 %v5631_v57, %v5792_v61  ;;  %v1972_v57 = vsub.f32 %v5642_v2, %v5802_v3 }
 0x17f   : > { %1506 = vperm.xlu1 %4772, %v5782_v29   ;;  %883 = vperm.xlu0 %4774, %v5802_v3  }
 0x181   : > { %v5810_v9 = vpop.permute.xlu1 %878  ;;  %v5812_v58 = vpop.permute.xlu0 %1526 }
 0x182   : > { %9695 = vst [vmem:[#allocation67_spill] sm:$0xff] %v5810_v9  ;;  %9696 = vst [vmem:[#allocation68_spill] sm:$0xff] %v5812_v58  ;;  %v9761_v9 = vld [vmem:[#allocation15_spill] sm:$0xff] }
 0x183   : > { %1514 = vperm.xlu1 %4772, %v5792_v61   ;;  %893 = vperm.xlu0 %4774, %v5816_v38  }
 0x185   : > { %v5820_v10 = vpop.permute.xlu1 %888  ;;  %v5822_v6 = vpop.permute.xlu0 %1534 }
 0x186   : > { %9697 = vst [vmem:[#allocation69_spill] sm:$0xff] %v5820_v10  ;;  %9698 = vst [vmem:[#allocation70_spill] sm:$0xff] %v5822_v6 }
 0x187   : > { %1522 = vperm.xlu1 %4772, %v5802_v3   ;;  %903 = vperm.xlu0 %4774, %v5826_v46  }
 0x189   : > { %v5830_v58 = vpop.permute.xlu1 %898  ;;  %v5832_v15 = vpop.permute.xlu0 %1542 }
 0x18a   : > { %9699 = vst [vmem:[#allocation71_spill] sm:$0xff] %v5830_v58  ;;  %9700 = vst [vmem:[#allocation72_spill] sm:$0xff] %v5832_v15 }
 0x18b   : > { %1530 = vperm.xlu1 %4772, %v5816_v38   ;;  %913 = vperm.xlu0 %4774, %v5836_v48  }
 0x18d   : > { %v5840_v6 = vpop.permute.xlu1 %908  ;;  %v5842_v19 = vpop.permute.xlu0 %1550 }
 0x18e   : > { %9701 = vst [vmem:[#allocation73_spill] sm:$0xff] %v5840_v6  ;;  %9702 = vst [vmem:[#allocation74_spill] sm:$0xff] %v5842_v19 }
 0x18f   : > { %1538 = vperm.xlu1 %4772, %v5826_v46   ;;  %923 = vperm.xlu0 %4774, %v5846_v62  }
 0x191   : > { %v5850_v15 = vpop.permute.xlu1 %918  ;;  %v5852_v23 = vpop.permute.xlu0 %1558 }
 0x192   : > { %9703 = vst [vmem:[#allocation75_spill] sm:$0xff] %v5850_v15  ;;  %9704 = vst [vmem:[#allocation76_spill] sm:$0xff] %v5852_v23 }
 0x193   : > { %1546 = vperm.xlu1 %4772, %v5836_v48   ;;  %933 = vperm.xlu0 %4774, %v5856_v36  }
 0x195   : > { %v5860_v19 = vpop.permute.xlu1 %928  ;;  %v5862_v27 = vpop.permute.xlu0 %1566 }
 0x196   : > { %9705 = vst [vmem:[#allocation77_spill] sm:$0xff] %v5860_v19  ;;  %9706 = vst [vmem:[#allocation78_spill] sm:$0xff] %v5862_v27  ;;  %v9494_v19 = vlaneseq }
 0x197   : > { %1554 = vperm.xlu1 %4772, %v5846_v62   ;;  %943 = vperm.xlu0 %4774, %v5866_v32  }
 0x198   : > { %v6117_v10 = vshrl.u32 %v9494_v19, 7 }
 0x199   : > { %v5870_v23 = vpop.permute.xlu1 %938  ;;  %v5872_v31 = vpop.permute.xlu0 %1574 }
 0x19a   : > { %9707 = vst [vmem:[#allocation79_spill] sm:$0xff] %v5870_v23  ;;  %9708 = vst [vmem:[#allocation80_spill] sm:$0xff] %v5872_v31 }
 0x19b   : > { %1562 = vperm.xlu1 %4772, %v5856_v36   ;;  %953 = vperm.xlu0 %4774, %v5876_v8  }
 0x19d   : > { %v5880_v27 = vpop.permute.xlu1 %948  ;;  %v5882_v35 = vpop.permute.xlu0 %1582 }
 0x19e   : > { %9709 = vst [vmem:[#allocation81_spill] sm:$0xff] %v5880_v27  ;;  %9710 = vst [vmem:[#allocation82_spill] sm:$0xff] %v5882_v35  ;;  %v9749_v27 = vld [vmem:[#allocation20_spill] sm:$0xff] }
 0x19f   : > { %1570 = vperm.xlu1 %4772, %v5866_v32   ;;  %963 = vperm.xlu0 %4774, %v5886_v13  }
 0x1a1   : > { %v5890_v31 = vpop.permute.xlu1 %958  ;;  %v5892_v39 = vpop.permute.xlu0 %1590 }
 0x1a2   : > { %9711 = vst [vmem:[#allocation83_spill] sm:$0xff] %v5890_v31  ;;  %9712 = vst [vmem:[#allocation84_spill] sm:$0xff] %v5892_v39 }
 0x1a3   : > { %1578 = vperm.xlu1 %4772, %v5876_v8   ;;  %973 = vperm.xlu0 %4774, %v5896_v21  }
 0x1a5   : > { %v5900_v35 = vpop.permute.xlu1 %968  ;;  %v5902_v43 = vpop.permute.xlu0 %1598 }
 0x1a6   : > { %9713 = vst [vmem:[#allocation85_spill] sm:$0xff] %v5900_v35  ;;  %9714 = vst [vmem:[#allocation86_spill] sm:$0xff] %v5902_v43 }
 0x1a7   : > { %1586 = vperm.xlu1 %4772, %v5886_v13   ;;  %983 = vperm.xlu0 %4774, %v5906_v25  }
 0x1a9   : > { %v5910_v39 = vpop.permute.xlu1 %978  ;;  %v5912_v47 = vpop.permute.xlu0 %1606 }
 0x1aa   : > { %9715 = vst [vmem:[#allocation87_spill] sm:$0xff] %v5910_v39  ;;  %9716 = vst [vmem:[#allocation88_spill] sm:$0xff] %v5912_v47  ;;  %v9744_v39 = vld [vmem:[#allocation19_spill] sm:$0xff] }
 0x1ab   : > { %1594 = vperm.xlu1 %4772, %v5896_v21   ;;  %993 = vperm.xlu0 %4774, %v5916_v33  }
 0x1ad   : > { %v5920_v43 = vpop.permute.xlu1 %988  ;;  %v5922_v51 = vpop.permute.xlu0 %1614 }
 0x1ae   : > { %9717 = vst [vmem:[#allocation89_spill] sm:$0xff] %v5920_v43  ;;  %9718 = vst [vmem:[#allocation90_spill] sm:$0xff] %v5922_v51  ;;  %v1967_v43 = vsub.f32 %v5622_v53, %v5509_v40 }
 0x1af   : > { %1602 = vperm.xlu1 %4772, %v5906_v25   ;;  %1003 = vperm.xlu0 %4774, %v5926_v37  }
 0x1b0   : > { %v5946_v51 = vadd.f32 1.0, %v1967_v43  ;;  %v1971_v43 = vsub.f32 %v5400_v20, %v5523_v52  ;;  %v1973_v20 = vsub.f32 %v5408_v24, %v5531_v4  ;;  %v5986_v52 = vadd.f32 1.0, %v1970_v14 }
 0x1b1   : > { %v5930_v47 = vpop.permute.xlu1 %998  ;;  %v5932_v55 = vpop.permute.xlu0 %1622  ;;  %v1975_v24 = vsub.f32 %v5416_v28, %v5537_v12  ;;  %v6003_v4 = vadd.f32 1.0, %v1972_v57  ;;  %v9732_v28 = vld [vmem:[#allocation8_spill] sm:$0xff] }
 0x1b2   : > { %9719 = vst [vmem:[#allocation91_spill] sm:$0xff] %v5930_v47  ;;  %9720 = vst [vmem:[#allocation92_spill] sm:$0xff] %v5932_v55  ;;  %v1969_v55 = vsub.f32 %v5394_v16, %v5515_v0  ;;  %v5969_v0 = vadd.f32 1.0, %v1968_v63  ;;  %v1977_v12 = vsub.f32 %v9732_v28, %v5545_v18  ;;  %v9735_v18 = vld [vmem:[#allocation9_spill] sm:$0xff] }
 0x1b3   : > { %1610 = vperm.xlu1 %4772, %v5916_v33   ;;  %1013 = vperm.xlu0 %4774, %v5936_v42   ;;  %9728 = vst [vmem:[#allocation100_spill] sm:$0xff] %v5986_v52  ;;  %9730 = vst [vmem:[#allocation102_spill] sm:$0xff] %v6003_v4  ;;  %v6011_v14 = vadd.f32 1.0, %v1975_v24  ;;  %v1979_v28 = vsub.f32 %v9735_v18, %v5553_v17  ;;  %v9738_v17 = vld [vmem:[#allocation10_spill] sm:$0xff] }
 0x1b4   : > { %v5959_v50 = vadd.f32 1.0, %v1969_v55  ;;  %9725 = vst [vmem:[#allocation97_spill] sm:$0xff] %v5969_v0  ;;  %v5977_v55 = vadd.f32 1.0, %v1971_v43  ;;  %v5994_v43 = vadd.f32 1.0, %v1973_v20  ;;  %v6027_v24 = vadd.f32 1.0, %v1977_v12 }
 0x1b5   : > { %v5942_v59 = vpop.permute.xlu1 %1008  ;;  %9731 = vst [vmem:[#allocation103_spill] sm:$0xff] %v6011_v14  ;;  %v6043_v12 = vadd.f32 1.0, %v1979_v28  ;;  %v1981_v18 = vsub.f32 %v9738_v17, %v5559_v22  ;;  %v9741_v17 = vld [vmem:[#allocation11_spill] sm:$0xff] }
 0x1b6   : > { %9721 = vst [vmem:[#allocation93_spill] sm:$0xff] %v5942_v59  ;;  %v5944_v49 = vpop.permute.xlu0 %615  ;;  %9724 = vst [vmem:[#allocation96_spill] sm:$0xff] %v5959_v50  ;;  %v1983_v47 = vsub.f32 %v9741_v17, %v5567_v26  ;;  %v9745_v26 = vld [vmem:[#allocation12_spill] sm:$0xff] }
 0x1b7   : > { %9722 = vst [vmem:[#allocation94_spill] sm:$0xff] %v5944_v49  ;;  %1618 = vperm.xlu1 %4772, %v5926_v37   ;;  %2063 = vrot.lane.b32.xlu0 %v5946_v51, %s5113_s26  ;;  %9727 = vst [vmem:[#allocation99_spill] sm:$0xff] %v5977_v55  ;;  %v6062_v22 = vadd.f32 1.0, %v1981_v18  ;;  %v1985_v17 = vsub.f32 %v9745_v26, %v9744_v39  ;;  %v9750_v39 = vld [vmem:[#allocation13_spill] sm:$0xff] }
 0x1b8   : > { %9729 = vst [vmem:[#allocation101_spill] sm:$0xff] %v5994_v43  ;;  %9734 = vst [vmem:[#allocation104_spill] sm:$0xff] %v6027_v24  ;;  %v6078_v18 = vadd.f32 1.0, %v1983_v47  ;;  %v1987_v26 = vsub.f32 %v9750_v39, %v9749_v27  ;;  %v9754_v27 = vld [vmem:[#allocation21_spill] sm:$0xff]  ;;  %v9755_v39 = vld [vmem:[#allocation14_spill] sm:$0xff] }
 0x1b9   : > { %9737 = vst [vmem:[#allocation105_spill] sm:$0xff] %v6043_v12  ;;  %9740 = vst [vmem:[#allocation106_spill] sm:$0xff] %v6062_v22  ;;  %v6094_v47 = vadd.f32 1.0, %v1985_v17  ;;  %v1989_v58 = vsub.f32 %v9755_v39, %v9754_v27  ;;  %v9760_v39 = vld [vmem:[#allocation22_spill] sm:$0xff] }
 0x1ba   : > { %v5955_v40 = vpop.permute.xlu1 %1292  ;;  %v5957_v53 = vpop.permute.xlu0 %630  ;;  %9743 = vst [vmem:[#allocation107_spill] sm:$0xff] %v6078_v18  ;;  %v6110_v6 = vadd.f32 1.0, %v1987_v26  ;;  %9756 = vst [vmem:[#allocation13_spill] sm:$0xff] %v6117_v10 }
 0x1bb   : > { %9723 = vst [vmem:[#allocation95_spill] sm:$0xff] %v5955_v40  ;;  %1626 = vperm.xlu1 %4772, %v5936_v42   ;;  %2067 = vrot.lane.b32.xlu0 %v5959_v50, %s5113_s26  ;;  %9748 = vst [vmem:[#allocation12_spill] sm:$0xff] %v6094_v47  ;;  %v6129_v27 = vadd.f32 1.0, %v1989_v58 }
 0x1bc   : > { %9753 = vst [vmem:[#allocation20_spill] sm:$0xff] %v6110_v6 }
 0x1bd   : > { %9759 = vst [vmem:[#allocation21_spill] sm:$0xff] %v6129_v27 }
 0x1be   : > { %v5973_v16 = vpop.permute.xlu1 %1300  ;;  %v5975_v29 = vpop.permute.xlu0 %640 }
 0x1bf   : > { %9726 = vst [vmem:[#allocation98_spill] sm:$0xff] %v5973_v16  ;;  %2065 = vrot.lane.b32.xlu1 %v5969_v0, %s5113_s26  ;;  %2071 = vrot.lane.b32.xlu0 %v5977_v55, %s5113_s26 }
 0x1c0   : > { %4775 = vset.pattern.permute.xlu1 %v9652_v1  ;;  %v1974_v1 = vsub.f32 %v5652_v5, %v5816_v38  ;;  %v1976_v38 = vsub.f32 %v5662_v7, %v5826_v46  ;;  %v1978_v46 = vsub.f32 %v5672_v56, %v5836_v48  ;;  %v1980_v56 = vsub.f32 %v5682_v60, %v5846_v62  ;;  %v349_v60 = vld [vmem:[%s319_s30] sm:$0xff] }
 0x1c1   : > { %v350_v40 = vmul.f32 0.5, %v349_v60 }
 0x1c2   : > { %v5990_v61 = vpop.permute.xlu1 %1304  ;;  %v5992_v63 = vpop.permute.xlu0 %650  ;;  %v6019_v20 = vadd.f32 1.0, %v1974_v1  ;;  %v6035_v1 = vadd.f32 1.0, %v1976_v38  ;;  %v6051_v38 = vadd.f32 1.0, %v1978_v46  ;;  %v6070_v62 = vadd.f32 1.0, %v1980_v56 }
 0x1c3   : > { %2069 = vrot.lane.b32.xlu1 %v5986_v52, %s5113_s26  ;;  %2075 = vrot.lane.b32.xlu0 %v5994_v43, %s5113_s26  ;;  %v1982_v46 = vsub.f32 %v5692_v54, %v5856_v36  ;;  %v9747_v54 = vld [vmem:[#allocation40_spill] sm:$0xff]  ;;  %v352_v23 = vrot.slane %v350_v40, 6 }
 0x1c4   : > { %9733 = vst [vmem:[#allocation8_spill] sm:$0xff] %v6019_v20  ;;  %9736 = vst [vmem:[#allocation9_spill] sm:$0xff] %v6035_v1  ;;  %v1984_v36 = vsub.f32 %v9747_v54, %v5866_v32  ;;  %v9752_v32 = vld [vmem:[#allocation43_spill] sm:$0xff] }
 0x1c5   : > { %9739 = vst [vmem:[#allocation10_spill] sm:$0xff] %v6051_v38  ;;  %9742 = vst [vmem:[#allocation11_spill] sm:$0xff] %v6070_v62  ;;  %v6086_v56 = vadd.f32 1.0, %v1982_v46  ;;  %v1986_v54 = vsub.f32 %v9752_v32, %v5876_v8  ;;  %v353_v40 = vrot.slane %v352_v23, 4  ;;  %v1991_v23 = vsub.f32 %v9761_v9, %v9760_v39  ;;  %v9767_v39 = vld [vmem:[#allocation23_spill] sm:$0xff] }
 0x1c6   : > { %v6007_v2 = vpop.permute.xlu1 %1312  ;;  %v6009_v3 = vpop.permute.xlu0 %660  ;;  %v6102_v46 = vadd.f32 1.0, %v1984_v36  ;;  %v9758_v36 = vld [vmem:[#allocation46_spill] sm:$0xff] }
 0x1c7   : > { %2073 = vrot.lane.b32.xlu1 %v6003_v4, %s5113_s26  ;;  %2079 = vrot.lane.b32.xlu0 %v6011_v14, %s5113_s26  ;;  %9746 = vst [vmem:[#allocation19_spill] sm:$0xff] %v6086_v56  ;;  %v6121_v8 = vadd.f32 1.0, %v1986_v54  ;;  %v1988_v32 = vsub.f32 %v9758_v36, %v5886_v13  ;;  %v6135_v19 = vadd.f32 %v353_v40, %v349_v60  ;;  %v6138_v54 = vsub.s32 0, %v6117_v10  ;;  %v9765_v36 = vld [vmem:[#allocation49_spill] sm:$0xff] }
 0x1c8   : > { %9751 = vst [vmem:[#allocation40_spill] sm:$0xff] %v6102_v46  ;;  %v1990_v58 = vsub.f32 %v9765_v36, %v5896_v21  ;;  %v6150_v9 = vadd.f32 1.0, %v1991_v23  ;;  %v9770_v23 = vld [vmem:[#allocation52_spill] sm:$0xff] }
 0x1c9   : > { %9757 = vst [vmem:[#allocation43_spill] sm:$0xff] %v6121_v8  ;;  %9762 = vst [vmem:[#allocation14_spill] sm:$0xff] %v6135_v19  ;;  %v6142_v13 = vadd.f32 1.0, %v1988_v32  ;;  %v777_v21 = vrot.slane %v6135_v19, %v6138_v54  ;;  %v1425_v32 = vsub.s32 5, %v6117_v10  ;;  %v1992_v36 = vsub.f32 %v9770_v23, %v5906_v25  ;;  %v9779_v23 = vld [vmem:[#allocation18_spill] sm:$0xff] }
 0x1ca   : > { %v6023_v5 = vpop.permute.xlu1 %1320  ;;  %v6025_v57 = vpop.permute.xlu0 %670  ;;  %9763 = vst [vmem:[#allocation46_spill] sm:$0xff] %v6138_v54  ;;  %9766 = vst [vmem:[#allocation15_spill] sm:$0xff] %v6150_v9 }
 0x1cb   : > { %2077 = vrot.lane.b32.xlu1 %v6019_v20, %s5113_s26  ;;  %2083 = vrot.lane.b32.xlu0 %v6027_v24, %s5113_s26  ;;  %9764 = vst [vmem:[#allocation22_spill] sm:$0xff] %v6142_v13  ;;  %v6185_v25 = vrot.slane %v777_v21, %v6138_v54  ;;  %v1996_v21 = vsub.f32 %v5762_v34, %v5926_v37 }
 0x1ce   : > { %v6039_v7 = vpop.permute.xlu1 %1328  ;;  %v6041_v59 = vpop.permute.xlu0 %680 }
 0x1cf   : > { %2081 = vrot.lane.b32.xlu1 %v6035_v1, %s5113_s26  ;;  %2087 = vrot.lane.b32.xlu0 %v6043_v12, %s5113_s26 }
 0x1d2   : > { %v6058_v48 = vpop.permute.xlu1 %1336  ;;  %v6060_v28 = vpop.permute.xlu0 %690 }
 0x1d3   : > { %2085 = vrot.lane.b32.xlu1 %v6051_v38, %s5113_s26  ;;  %2091 = vrot.lane.b32.xlu0 %v6062_v22, %s5113_s26  ;;  %v9775_v22 = vld [vmem:[#allocation17_spill] sm:$0xff] }
 0x1d6   : > { %v6074_v16 = vpop.permute.xlu1 %1344  ;;  %v6076_v49 = vpop.permute.xlu0 %700 }
 0x1d7   : > { %2089 = vrot.lane.b32.xlu1 %v6070_v62, %s5113_s26  ;;  %2095 = vrot.lane.b32.xlu0 %v6078_v18, %s5113_s26 }
 0x1da   : > { %v6090_v35 = vpop.permute.xlu1 %1352  ;;  %v6092_v31 = vpop.permute.xlu0 %710 }
 0x1db   : > { %2093 = vrot.lane.b32.xlu1 %v6086_v56, %s5113_s26  ;;  %2099 = vrot.lane.b32.xlu0 %v6094_v47, %s5113_s26  ;;  %v6155_v47 = vsub.s32 4, %v6117_v10  ;;  %v9774_v56 = vld [vmem:[#allocation24_spill] sm:$0xff] }
 0x1dc   : > { %v1995_v62 = vsub.f32 %v9775_v22, %v9774_v56  ;;  %9776 = vst [vmem:[#allocation24_spill] sm:$0xff] %v6185_v25  ;;  %v1994_v22 = vsub.f32 %v5752_v41, %v5916_v33  ;;  %v1998_v33 = vsub.f32 %v5772_v30, %v5936_v42  ;;  %v9789_v42 = vld [vmem:[#allocation26_spill] sm:$0xff] }
 0x1dd   : > { %9769 = vst [vmem:[#allocation49_spill] sm:$0xff] %v6155_v47 }
 0x1de   : > { %v6106_v15 = vpop.permute.xlu1 %1360  ;;  %v6108_v17 = vpop.permute.xlu0 %720  ;;  %v6208_v41 = vadd.f32 1.0, %v1995_v62  ;;  %v6223_v37 = vadd.f32 1.0, %v1994_v22 }
 0x1df   : > { %2097 = vrot.lane.b32.xlu1 %v6102_v46, %s5113_s26  ;;  %2103 = vrot.lane.b32.xlu0 %v6110_v6, %s5113_s26  ;;  %v9768_v6 = vld [vmem:[#allocation16_spill] sm:$0xff]  ;;  %v1421_v46 = vsub.s32 1, %v6117_v10  ;;  %v781_v10 = vrot.slane %v6135_v19, %v6155_v47 }
 0x1e0   : > { %9784 = vst [vmem:[#allocation110_spill] sm:$0xff] %v6223_v37 }
 0x1e2   : > { %v6125_v26 = vpop.permute.xlu1 %1368  ;;  %v6127_v44 = vpop.permute.xlu0 %730 }
 0x1e3   : > { %2101 = vrot.lane.b32.xlu1 %v6121_v8, %s5113_s26  ;;  %2107 = vrot.lane.b32.xlu0 %v6129_v27, %s5113_s26  ;;  %v1993_v8 = vsub.f32 %v9768_v6, %v9767_v39  ;;  %v6167_v6 = vsub.f32 %v349_v60, %v353_v40  ;;  %v6169_v39 = vadd.f32 1.0, %v1990_v58  ;;  %v1426_v60 = vrot.slane %v6135_v19, %v1425_v32  ;;  %v9778_v58 = vld [vmem:[#allocation25_spill] sm:$0xff] }
 0x1e4   : > { %v6190_v40 = vadd.f32 1.0, %v1992_v36  ;;  %9780 = vst [vmem:[#allocation25_spill] sm:$0xff] %v6208_v41 }
 0x1e5   : > { %9771 = vst [vmem:[#allocation23_spill] sm:$0xff] %v6167_v6  ;;  %9772 = vst [vmem:[#allocation16_spill] sm:$0xff] %v6169_v39  ;;  %v1632_v56 = vrot.slane %v6167_v6, %v1421_v46  ;;  %v1024_v36 = vrot.slane %v6167_v6, %v6155_v47  ;;  %v6219_v34 = vrot.slane %v1426_v60, %v1421_v46 }
 0x1e6   : > { %v6146_v45 = vpop.permute.xlu1 %1376  ;;  %v6148_v11 = vpop.permute.xlu0 %740  ;;  %9777 = vst [vmem:[#allocation17_spill] sm:$0xff] %v6190_v40 }
 0x1e7   : > { %2105 = vrot.lane.b32.xlu1 %v6142_v13, %s5113_s26  ;;  %2111 = vrot.lane.b32.xlu0 %v6150_v9, %s5113_s26  ;;  %v6175_v13 = vadd.f32 1.0, %v1993_v8  ;;  %v1422_v9 = vrot.slane %v6135_v19, %v1421_v46  ;;  %v1636_v8 = vrot.slane %v6167_v6, %v1425_v32  ;;  %v1020_v19 = vrot.slane %v6167_v6, %v6138_v54 }
 0x1e8   : > { %v6213_v32 = vrot.slane %v781_v10, %v6138_v54  ;;  %9783 = vst [vmem:[#allocation109_spill] sm:$0xff] %v6219_v34  ;;  %v6225_v62 = vrot.slane %v1632_v56, %v1421_v46  ;;  %v6231_v10 = vadd.f32 1.0, %v1996_v21  ;;  %v6239_v60 = vrot.slane %v1024_v36, %v6138_v54 }
 0x1e9   : > { %9773 = vst [vmem:[#allocation52_spill] sm:$0xff] %v6175_v13  ;;  %v6236_v47 = vrot.slane %v1020_v19, %v6138_v54  ;;  %v6245_v56 = vadd.f32 1.0, %v1998_v33  ;;  %v798_v33 = vmin.f32 %v5957_v53, %v6185_v25 }
 0x1ea   : > { %v6171_v27 = vpop.permute.xlu1 %1384  ;;  %v6173_v18 = vpop.permute.xlu0 %750  ;;  %9781 = vst [vmem:[#allocation18_spill] sm:$0xff] %v6213_v32  ;;  %9785 = vst [vmem:[#allocation111_spill] sm:$0xff] %v6225_v62  ;;  %v803_v19 = vmin.f32 %v5975_v29, %v6213_v32 }
 0x1eb   : > { %2109 = vrot.lane.b32.xlu1 %v6169_v39, %s5113_s26  ;;  %2115 = vrot.lane.b32.xlu0 %v6175_v13, %s5113_s26  ;;  %v1997_v39 = vsub.f32 %v9779_v23, %v9778_v58  ;;  %v6215_v58 = vrot.slane %v1422_v9, %v1421_v46  ;;  %v6227_v23 = vrot.slane %v1636_v8, %v1421_v46 }
 0x1ec   : > { %9788 = vst [vmem:[#allocation114_spill] sm:$0xff] %v6231_v10  ;;  %v794_v9 = vmin.f32 %v9789_v42, %v6185_v25  ;;  %9790 = vst [vmem:[#allocation26_spill] sm:$0xff] %v6236_v47  ;;  %v795_v46 = vmin.f32 %v9789_v42, %v6213_v32  ;;  %v799_v42 = vmin.f32 %v5957_v53, %v6213_v32 }
 0x1ed   : > { %9782 = vst [vmem:[#allocation108_spill] sm:$0xff] %v6215_v58  ;;  %9786 = vst [vmem:[#allocation112_spill] sm:$0xff] %v6227_v23  ;;  %v6229_v30 = vadd.f32 1.0, %v1997_v39  ;;  %v9793_v39 = vld [vmem:[#allocation27_spill] sm:$0xff]  ;;  %v802_v8 = vmin.f32 %v5975_v29, %v6185_v25 }
 0x1ee   : > { %v6204_v13 = vpop.permute.xlu1 %1392  ;;  %v6206_v12 = vpop.permute.xlu0 %760  ;;  %9791 = vst [vmem:[#allocation115_spill] sm:$0xff] %v6239_v60  ;;  %9792 = vst [vmem:[#allocation116_spill] sm:$0xff] %v6245_v56  ;;  %v1440_v36 = vmin.f32 %v9793_v39, %v6219_v34 }
 0x1ef   : > { %2113 = vrot.lane.b32.xlu1 %v6190_v40, %s5113_s26  ;;  %2119 = vrot.lane.b32.xlu0 %v6208_v41, %s5113_s26  ;;  %9787 = vst [vmem:[#allocation113_spill] sm:$0xff] %v6229_v30 }
 0x1f2   : > { %v6241_v6 = vpop.permute.xlu1 %1400  ;;  %v6243_v22 = vpop.permute.xlu0 %770 }
 0x1f3   : > { %2117 = vrot.lane.b32.xlu1 %v6223_v37, %s5113_s26  ;;  %2123 = vrot.lane.b32.xlu0 %v6229_v30, %s5113_s26  ;;  %v9796_v30 = vmin.f32 %v5990_v61, %v6219_v34 }
 0x1f6   : > { %v6283_v40 = vpop.permute.xlu1 %1408  ;;  %v864_v21 = vpop.permute.xlu0 %863 }
 0x1f7   : > { %v1037_v53 = vmax.f32 %v864_v21, %v6236_v47  ;;  %v1038_v38 = vmax.f32 %v864_v21, %v6239_v60  ;;  %2121 = vrot.lane.b32.xlu1 %v6231_v10, %s5113_s26 }
 0x1f9   : > { %v1101_v24 = vsub.f32 %v794_v9, %v1037_v53  ;;  %v6305_v10 = vsub.f32 %v795_v46, %v1038_v38 }
 0x1fa   : > { %v6315_v1 = vpop.permute.xlu1 %1416  ;;  %v874_v41 = vpop.permute.xlu0 %873 }
 0x1fb   : > { %2125 = vrot.lane.b32.xlu1 %v6245_v56, %s5113_s26  ;;  %v1041_v9 = vmax.f32 %v874_v41, %v6236_v47  ;;  %v1042_v29 = vmax.f32 %v874_v41, %v6239_v60 }
 0x1fd   : > { %v1105_v21 = vsub.f32 %v798_v33, %v1041_v9  ;;  %v1106_v41 = vsub.f32 %v799_v42, %v1042_v29  ;;  %v1165_v42 = vadd.f32 1.0, %v1101_v24  ;;  %v9794_v29 = vmin.f32 %v9793_v39, %v6215_v58 }
 0x1fe   : > { %v1507_v56 = vpop.permute.xlu1 %1506  ;;  %v884_v14 = vpop.permute.xlu0 %883  ;;  %v9798_v24 = vmin.f32 %v5992_v63, %v6213_v32 }
 0x1ff   : > { %v1649_v38 = vmax.f32 %v1507_v56, %v6225_v62  ;;  %v1650_v46 = vmax.f32 %v1507_v56, %v6227_v23  ;;  %v1045_v20 = vmax.f32 %v884_v14, %v6236_v47  ;;  %v1046_v53 = vmax.f32 %v884_v14, %v6239_v60 }
 0x200   : > { %v9797_v14 = vmin.f32 %v5992_v63, %v6185_v25 }
 0x201   : > { %v1713_v9 = vsub.f32 %v9794_v29, %v1649_v38  ;;  %v1714_v37 = vsub.f32 %v1440_v36, %v1650_v46  ;;  %v1109_v56 = vsub.f32 %v802_v8, %v1045_v20  ;;  %v6358_v43 = vsub.f32 %v803_v19, %v1046_v53 }
 0x202   : > { %v1515_v33 = vpop.permute.xlu1 %1514  ;;  %v894_v36 = vpop.permute.xlu0 %893  ;;  %v1229_v20 = vmax.f32 %v1165_v42, 0.0  ;;  %v9809_v42 = vmin.f32 %v6025_v57, %v6213_v32 }
 0x203   : > { %v1777_v19 = vadd.f32 1.0, %v1713_v9  ;;  %v1653_v38 = vmax.f32 %v1515_v33, %v6225_v62  ;;  %v1654_v46 = vmax.f32 %v1515_v33, %v6227_v23  ;;  %v1049_v53 = vmax.f32 %v894_v36, %v6236_v47 }
 0x204   : > { %v1050_v29 = vmax.f32 %v894_v36, %v6239_v60  ;;  %v9795_v9 = vmin.f32 %v5990_v61, %v6215_v58 }
 0x205   : > { %v1841_v54 = vmax.f32 %v1777_v19, 0.0  ;;  %v1718_v33 = vsub.f32 %v9796_v30, %v1654_v46  ;;  %v1113_v36 = vsub.f32 %v9797_v14, %v1049_v53  ;;  %v6421_v14 = vadd.f32 1.0, %v6305_v10 }
 0x206   : > { %v1717_v8 = vsub.f32 %v9795_v9, %v1653_v38  ;;  %v1114_v4 = vsub.f32 %v9798_v24, %v1050_v29  ;;  %v1523_v55 = vpop.permute.xlu1 %1522  ;;  %v904_v9 = vpop.permute.xlu0 %903  ;;  %v9800_v24 = vmin.f32 %v6007_v2, %v6215_v58  ;;  %v6423_v30 = vadd.f32 1.0, %v1105_v21 }
 0x207   : > { %v1657_v19 = vmax.f32 %v1523_v55, %v6225_v62  ;;  %v1658_v38 = vmax.f32 %v1523_v55, %v6227_v23  ;;  %v6398_v39 = vmul.f32 %v1841_v54, %v1229_v20  ;;  %v9801_v55 = vmin.f32 %v6007_v2, %v6219_v34 }
 0x208   : > { %v1053_v20 = vmax.f32 %v904_v9, %v6236_v47  ;;  %v1054_v53 = vmax.f32 %v904_v9, %v6239_v60  ;;  %v6427_v2 = vadd.f32 1.0, %v1714_v37  ;;  %v6485_v0 = vadd.f32 1.0, %v1114_v4 }
 0x209   : > { %9799 = vst [vmem:[#allocation27_spill] sm:$0xff] %v6398_v39  ;;  %v1721_v46 = vsub.f32 %v9800_v24, %v1657_v19  ;;  %v1722_v54 = vsub.f32 %v9801_v55, %v1658_v38  ;;  %v6425_v24 = vadd.f32 1.0, %v1106_v41  ;;  %v9803_v38 = vmin.f32 %v6009_v3, %v6185_v25 }
 0x20a   : > { %v1531_v19 = vpop.permute.xlu1 %1530  ;;  %v9804_v55 = vmin.f32 %v6009_v3, %v6213_v32  ;;  %v914_v61 = vpop.permute.xlu0 %913  ;;  %v6445_v3 = vadd.f32 1.0, %v1109_v56  ;;  %9813 = vst [vmem:[#allocation120_spill] sm:$0xff] %v6485_v0 }
 0x20b   : > { %9802 = vst [vmem:[#allocation117_spill] sm:$0xff] %v6425_v24  ;;  %v1117_v9 = vsub.f32 %v9803_v38, %v1053_v20  ;;  %v1661_v63 = vmax.f32 %v1531_v19, %v6225_v62  ;;  %v1662_v10 = vmax.f32 %v1531_v19, %v6227_v23  ;;  %v1057_v21 = vmax.f32 %v914_v61, %v6236_v47 }
 0x20c   : > { %v1118_v29 = vsub.f32 %v9804_v55, %v1054_v53  ;;  %v1058_v41 = vmax.f32 %v914_v61, %v6239_v60  ;;  %9805 = vst [vmem:[#allocation118_spill] sm:$0xff] %v6445_v3  ;;  %v9806_v53 = vmin.f32 %v6023_v5, %v6215_v58  ;;  %v9807_v19 = vmin.f32 %v6023_v5, %v6219_v34 }
 0x20d   : > { %v9808_v61 = vmin.f32 %v6025_v57, %v6185_v25  ;;  %v6468_v57 = vadd.f32 1.0, %v6358_v43  ;;  %v6483_v43 = vadd.f32 1.0, %v1113_v36  ;;  %v6502_v3 = vadd.f32 1.0, %v1117_v9 }
 0x20e   : > { %v1725_v38 = vsub.f32 %v9806_v53, %v1661_v63  ;;  %v1726_v55 = vsub.f32 %v9807_v19, %v1662_v10  ;;  %v1122_v39 = vsub.f32 %v9809_v42, %v1058_v41  ;;  %v1539_v52 = vpop.permute.xlu1 %1538  ;;  %v924_v5 = vpop.permute.xlu0 %923  ;;  %v9811_v42 = vmin.f32 %v6039_v7, %v6215_v58 }
 0x20f   : > { %v1121_v37 = vsub.f32 %v9808_v61, %v1057_v21  ;;  %v1665_v63 = vmax.f32 %v1539_v52, %v6225_v62  ;;  %v1666_v53 = vmax.f32 %v1539_v52, %v6227_v23  ;;  %9810 = vst [vmem:[#allocation119_spill] sm:$0xff] %v6468_v57  ;;  %v9812_v61 = vmin.f32 %v6039_v7, %v6219_v34 }
 0x210   : > { %v1061_v52 = vmax.f32 %v924_v5, %v6236_v47  ;;  %v1062_v56 = vmax.f32 %v924_v5, %v6239_v60  ;;  %v6479_v19 = vadd.f32 1.0, %v1717_v8  ;;  %v6481_v21 = vadd.f32 1.0, %v1718_v33  ;;  %9816 = vst [vmem:[#allocation121_spill] sm:$0xff] %v6502_v3 }
 0x211   : > { %v1729_v41 = vsub.f32 %v9811_v42, %v1665_v63  ;;  %v1730_v20 = vsub.f32 %v9812_v61, %v1666_v53  ;;  %v6487_v63 = vadd.f32 1.0, %v1721_v46  ;;  %v9814_v7 = vmin.f32 %v6041_v59, %v6185_v25 }
 0x212   : > { %v1547_v50 = vpop.permute.xlu1 %1546  ;;  %v9815_v5 = vmin.f32 %v6041_v59, %v6213_v32  ;;  %v934_v61 = vpop.permute.xlu0 %933  ;;  %v6500_v10 = vadd.f32 1.0, %v1722_v54  ;;  %v9818_v59 = vmin.f32 %v6058_v48, %v6215_v58  ;;  %v9821_v54 = vmin.f32 %v6060_v28, %v6213_v32 }
 0x213   : > { %v1125_v53 = vsub.f32 %v9814_v7, %v1061_v52  ;;  %v1669_v8 = vmax.f32 %v1547_v50, %v6225_v62  ;;  %v1670_v33 = vmax.f32 %v1547_v50, %v6227_v23  ;;  %v1065_v36 = vmax.f32 %v934_v61, %v6236_v47 }
 0x214   : > { %v1126_v42 = vsub.f32 %v9815_v5, %v1062_v56  ;;  %v1066_v4 = vmax.f32 %v934_v61, %v6239_v60  ;;  %v6504_v52 = vadd.f32 1.0, %v1118_v29  ;;  %v9819_v7 = vmin.f32 %v6058_v48, %v6219_v34 }
 0x215   : > { %v1733_v56 = vsub.f32 %v9818_v59, %v1669_v8  ;;  %v9820_v5 = vmin.f32 %v6060_v28, %v6185_v25  ;;  %v9823_v28 = vmin.f32 %v6074_v16, %v6215_v58  ;;  %v6540_v0 = vadd.f32 1.0, %v1121_v37 }
 0x216   : > { %9817 = vst [vmem:[#allocation122_spill] sm:$0xff] %v6504_v52  ;;  %v1734_v50 = vsub.f32 %v9819_v7, %v1670_v33  ;;  %v1130_v46 = vsub.f32 %v9821_v54, %v1066_v4  ;;  %v1555_v9 = vpop.permute.xlu1 %1554  ;;  %v944_v59 = vpop.permute.xlu0 %943  ;;  %v6525_v7 = vadd.f32 1.0, %v1725_v38  ;;  %v6538_v38 = vadd.f32 1.0, %v1726_v55 }
 0x217   : > { %v1129_v61 = vsub.f32 %v9820_v5, %v1065_v36  ;;  %v1673_v24 = vmax.f32 %v1555_v9, %v6225_v62  ;;  %v1674_v8 = vmax.f32 %v1555_v9, %v6227_v23  ;;  %v9824_v5 = vmin.f32 %v6074_v16, %v6219_v34 }
 0x218   : > { %9822 = vst [vmem:[#allocation123_spill] sm:$0xff] %v6525_v7  ;;  %v1069_v57 = vmax.f32 %v944_v59, %v6236_v47  ;;  %v1070_v9 = vmax.f32 %v944_v59, %v6239_v60  ;;  %v9826_v16 = vmin.f32 %v6076_v49, %v6185_v25  ;;  %v9827_v59 = vmin.f32 %v6076_v49, %v6213_v32 }
 0x219   : > { %v1737_v4 = vsub.f32 %v9823_v28, %v1673_v24  ;;  %v1738_v54 = vsub.f32 %v9824_v5, %v1674_v8  ;;  %v6542_v24 = vadd.f32 1.0, %v1122_v39  ;;  %v6555_v48 = vadd.f32 1.0, %v1729_v41 }
 0x21a   : > { %v1563_v29 = vpop.permute.xlu1 %1562  ;;  %v1133_v8 = vsub.f32 %v9826_v16, %v1069_v57  ;;  %v1134_v28 = vsub.f32 %v9827_v59, %v1070_v9  ;;  %v954_v5 = vpop.permute.xlu0 %953  ;;  %v6557_v52 = vadd.f32 1.0, %v1730_v20  ;;  %v6559_v57 = vadd.f32 1.0, %v1125_v53 }
 0x21b   : > { %9825 = vst [vmem:[#allocation124_spill] sm:$0xff] %v6542_v24  ;;  %v1677_v33 = vmax.f32 %v1563_v29, %v6225_v62  ;;  %v1678_v36 = vmax.f32 %v1563_v29, %v6227_v23  ;;  %v1073_v55 = vmax.f32 %v954_v5, %v6236_v47  ;;  %v1074_v37 = vmax.f32 %v954_v5, %v6239_v60 }
 0x21c   : > { %9828 = vst [vmem:[#allocation125_spill] sm:$0xff] %v6559_v57  ;;  %v9829_v49 = vmin.f32 %v6090_v35, %v6215_v58  ;;  %v9830_v16 = vmin.f32 %v6090_v35, %v6219_v34  ;;  %v9831_v59 = vmin.f32 %v6092_v31, %v6185_v25  ;;  %v9832_v41 = vmin.f32 %v6092_v31, %v6213_v32 }
 0x21d   : > { %v9835_v31 = vmin.f32 %v6106_v15, %v6215_v58  ;;  %v6597_v24 = vadd.f32 1.0, %v1130_v46 }
 0x21e   : > { %v1741_v9 = vsub.f32 %v9829_v49, %v1677_v33  ;;  %v1742_v29 = vsub.f32 %v9830_v16, %v1678_v36  ;;  %v1137_v5 = vsub.f32 %v9831_v59, %v1073_v55  ;;  %v1138_v39 = vsub.f32 %v9832_v41, %v1074_v37  ;;  %v1571_v20 = vpop.permute.xlu1 %1570  ;;  %v964_v49 = vpop.permute.xlu0 %963 }
 0x21f   : > { %v1681_v7 = vmax.f32 %v1571_v20, %v6225_v62  ;;  %v1682_v33 = vmax.f32 %v1571_v20, %v6227_v23  ;;  %v6578_v36 = vadd.f32 1.0, %v1126_v42  ;;  %v6580_v16 = vadd.f32 1.0, %v1733_v56  ;;  %9838 = vst [vmem:[#allocation129_spill] sm:$0xff] %v6597_v24 }
 0x220   : > { %v6582_v55 = vadd.f32 1.0, %v1734_v50  ;;  %v9836_v59 = vmin.f32 %v6106_v15, %v6219_v34  ;;  %v1077_v3 = vmax.f32 %v964_v49, %v6236_v47  ;;  %v1078_v20 = vmax.f32 %v964_v49, %v6239_v60 }
 0x221   : > { %9833 = vst [vmem:[#allocation126_spill] sm:$0xff] %v6578_v36  ;;  %v1745_v37 = vsub.f32 %v9835_v31, %v1681_v7  ;;  %v6595_v50 = vadd.f32 1.0, %v1129_v61  ;;  %v6599_v7 = vadd.f32 1.0, %v1737_v4  ;;  %v9839_v15 = vmin.f32 %v6108_v17, %v6185_v25 }
 0x222   : > { %9834 = vst [vmem:[#allocation127_spill] sm:$0xff] %v6582_v55  ;;  %v1746_v41 = vsub.f32 %v9836_v59, %v1682_v33  ;;  %v1579_v53 = vpop.permute.xlu1 %1578  ;;  %v9840_v49 = vmin.f32 %v6108_v17, %v6213_v32  ;;  %v974_v59 = vpop.permute.xlu0 %973  ;;  %v9841_v17 = vmin.f32 %v6125_v26, %v6215_v58  ;;  %v9844_v4 = vmin.f32 %v6127_v44, %v6213_v32 }
 0x223   : > { %9837 = vst [vmem:[#allocation128_spill] sm:$0xff] %v6595_v50  ;;  %v1141_v33 = vsub.f32 %v9839_v15, %v1077_v3  ;;  %v1685_v42 = vmax.f32 %v1579_v53, %v6225_v62  ;;  %v1686_v56 = vmax.f32 %v1579_v53, %v6227_v23  ;;  %v1081_v61 = vmax.f32 %v974_v59, %v6236_v47 }
 0x224   : > { %v1142_v31 = vsub.f32 %v9840_v49, %v1078_v20  ;;  %v1082_v46 = vmax.f32 %v974_v59, %v6239_v60  ;;  %v6614_v3 = vadd.f32 1.0, %v1738_v54  ;;  %v9842_v15 = vmin.f32 %v6125_v26, %v6219_v34 }
 0x225   : > { %v1749_v20 = vsub.f32 %v9841_v17, %v1685_v42  ;;  %v9843_v49 = vmin.f32 %v6127_v44, %v6185_v25  ;;  %v9847_v44 = vmin.f32 %v6146_v45, %v6215_v58  ;;  %v6654_v24 = vadd.f32 1.0, %v1745_v37 }
 0x226   : > { %v1750_v53 = vsub.f32 %v9842_v15, %v1686_v56  ;;  %v1146_v35 = vsub.f32 %v9844_v4, %v1082_v46  ;;  %v1587_v36 = vpop.permute.xlu1 %1586  ;;  %v984_v17 = vpop.permute.xlu0 %983  ;;  %v6633_v56 = vadd.f32 1.0, %v1133_v8  ;;  %v6635_v15 = vadd.f32 1.0, %v1134_v28 }
 0x227   : > { %v1145_v59 = vsub.f32 %v9843_v49, %v1081_v61  ;;  %v1689_v55 = vmax.f32 %v1587_v36, %v6225_v62  ;;  %v1690_v42 = vmax.f32 %v1587_v36, %v6227_v23  ;;  %v6637_v61 = vadd.f32 1.0, %v1741_v9 }
 0x228   : > { %9845 = vst [vmem:[#allocation130_spill] sm:$0xff] %v6633_v56  ;;  %9846 = vst [vmem:[#allocation131_spill] sm:$0xff] %v6635_v15  ;;  %v9848_v4 = vmin.f32 %v6146_v45, %v6219_v34  ;;  %v1085_v57 = vmax.f32 %v984_v17, %v6236_v47  ;;  %v1086_v36 = vmax.f32 %v984_v17, %v6239_v60  ;;  %v6648_v8 = vadd.f32 1.0, %v1742_v29 }
 0x229   : > { %v1753_v46 = vsub.f32 %v9847_v44, %v1689_v55  ;;  %v6650_v28 = vadd.f32 1.0, %v1137_v5  ;;  %v6652_v9 = vadd.f32 1.0, %v1138_v39  ;;  %v6656_v55 = vadd.f32 1.0, %v1746_v41 }
 0x22a   : > { %v1754_v49 = vsub.f32 %v9848_v4, %v1690_v42  ;;  %v1595_v26 = vpop.permute.xlu1 %1594  ;;  %v9850_v45 = vmin.f32 %v6148_v11, %v6185_v25  ;;  %v9851_v17 = vmin.f32 %v6148_v11, %v6213_v32  ;;  %v994_v4 = vpop.permute.xlu0 %993  ;;  %v9852_v11 = vmin.f32 %v6171_v27, %v6215_v58 }
 0x22b   : > { %9849 = vst [vmem:[#allocation132_spill] sm:$0xff] %v6652_v9  ;;  %v1693_v29 = vmax.f32 %v1595_v26, %v6225_v62  ;;  %v1694_v5 = vmax.f32 %v1595_v26, %v6227_v23  ;;  %v1089_v39 = vmax.f32 %v994_v4, %v6236_v47  ;;  %v1090_v37 = vmax.f32 %v994_v4, %v6239_v60 }
 0x22c   : > { %v1149_v42 = vsub.f32 %v9850_v45, %v1085_v57  ;;  %v1150_v44 = vsub.f32 %v9851_v17, %v1086_v36  ;;  %v6671_v57 = vadd.f32 1.0, %v1141_v33  ;;  %v9853_v45 = vmin.f32 %v6171_v27, %v6219_v34 }
 0x22d   : > { %v1757_v36 = vsub.f32 %v9852_v11, %v1693_v29  ;;  %v9854_v17 = vmin.f32 %v6173_v18, %v6185_v25  ;;  %v9855_v41 = vmin.f32 %v6173_v18, %v6213_v32  ;;  %v9856_v18 = vmin.f32 %v6204_v13, %v6215_v58 }
 0x22e   : > { %v1758_v26 = vsub.f32 %v9853_v45, %v1694_v5  ;;  %v1603_v15 = vpop.permute.xlu1 %1602  ;;  %v1004_v11 = vpop.permute.xlu0 %1003  ;;  %v6692_v45 = vadd.f32 1.0, %v1142_v31  ;;  %v6703_v33 = vadd.f32 1.0, %v1749_v20  ;;  %v6705_v5 = vadd.f32 1.0, %v1750_v53 }
 0x22f   : > { %v1153_v4 = vsub.f32 %v9854_v17, %v1089_v39  ;;  %v1154_v54 = vsub.f32 %v9855_v41, %v1090_v37  ;;  %v1697_v56 = vmax.f32 %v1603_v15, %v6225_v62  ;;  %v1698_v29 = vmax.f32 %v1603_v15, %v6227_v23 }
 0x230   : > { %v9857_v41 = vmin.f32 %v6204_v13, %v6219_v34  ;;  %v1093_v50 = vmax.f32 %v1004_v11, %v6236_v47  ;;  %v1094_v15 = vmax.f32 %v1004_v11, %v6239_v60  ;;  %v6707_v31 = vadd.f32 1.0, %v1145_v59 }
 0x231   : > { %v1761_v37 = vsub.f32 %v9856_v18, %v1697_v56  ;;  %v6709_v9 = vadd.f32 1.0, %v1146_v35  ;;  %v6711_v56 = vadd.f32 1.0, %v1753_v46  ;;  %v9858_v13 = vmin.f32 %v6206_v12, %v6185_v25 }
 0x232   : > { %v1762_v17 = vsub.f32 %v9857_v41, %v1698_v29  ;;  %v1611_v39 = vpop.permute.xlu1 %1610  ;;  %v9859_v11 = vmin.f32 %v6206_v12, %v6213_v32  ;;  %v1014_v20 = vpop.permute.xlu0 %1013  ;;  %v6728_v27 = vadd.f32 1.0, %v1754_v49  ;;  %v9860_v12 = vmin.f32 %v6241_v6, %v6215_v58 }
 0x233   : > { %v6716_v29 = vsub.f32 %v9858_v13, %v1093_v50  ;;  %v1701_v53 = vmax.f32 %v1611_v39, %v6225_v62  ;;  %v1702_v59 = vmax.f32 %v1611_v39, %v6227_v23  ;;  %v1097_v35 = vmax.f32 %v1014_v20, %v6236_v47 }
 0x234   : > { %v6721_v18 = vsub.f32 %v9859_v11, %v1094_v15  ;;  %v1098_v46 = vmax.f32 %v1014_v20, %v6239_v60  ;;  %v6730_v50 = vadd.f32 1.0, %v1149_v42  ;;  %v6732_v13 = vadd.f32 1.0, %v1150_v44 }
 0x235   : > { %v1765_v15 = vsub.f32 %v9860_v12, %v1701_v53  ;;  %v9861_v11 = vmin.f32 %v6241_v6, %v6219_v34  ;;  %v9862_v47 = vmin.f32 %v6243_v22, %v6185_v25  ;;  %v9863_v49 = vmin.f32 %v6243_v22, %v6213_v32 }
 0x236   : > { %v1619_v44 = vpop.permute.xlu1 %1618  ;;  %v1877_v41 = vmax.f32 %v6703_v33, 0.0  ;;  %v1878_v60 = vmax.f32 %v6705_v5, 0.0  ;;  %v1822_v22 = vadd.f32 1.0, %v1758_v26  ;;  %v9866_v33 = vmin.f32 %v6283_v40, %v6219_v34 }
 0x237   : > { %v1766_v39 = vsub.f32 %v9861_v11, %v1702_v59  ;;  %v6743_v20 = vsub.f32 %v9862_v47, %v1097_v35  ;;  %v6748_v42 = vsub.f32 %v9863_v49, %v1098_v46  ;;  %v1705_v53 = vmax.f32 %v1619_v44, %v6225_v62  ;;  %v2064_v59 = vpop.permute.xlu0 %2063 }
 0x238   : > { %v1706_v6 = vmax.f32 %v1619_v44, %v6227_v23  ;;  %v1881_v35 = vmax.f32 %v6711_v56, 0.0  ;;  %v1821_v11 = vadd.f32 1.0, %v1757_v36  ;;  %v9865_v46 = vmin.f32 %v6283_v40, %v6215_v58 }
 0x239   : > { %9864 = vst [vmem:[#allocation133_spill] sm:$0xff] %v6748_v42  ;;  %v2159_v44 = vmul.f32 %v2064_v59, %v5946_v51  ;;  %v1882_v12 = vmax.f32 %v6728_v27, 0.0  ;;  %v1277_v47 = vmax.f32 %v6730_v50, 0.0  ;;  %v1278_v56 = vmax.f32 %v6732_v13, 0.0 }
 0x23a   : > { %v6760_v49 = vsub.f32 %v9865_v46, %v1705_v53  ;;  %v6765_v5 = vsub.f32 %v9866_v33, %v1706_v6  ;;  %v1217_v36 = vadd.f32 1.0, %v1153_v4  ;;  %v1627_v26 = vpop.permute.xlu1 %1626  ;;  %v1825_v32 = vadd.f32 1.0, %v1761_v37 }
 0x23b   : > { %v1826_v25 = vadd.f32 1.0, %v1762_v17  ;;  %2200 = vperm.xlu0 %4774, %v2159_v44   ;;  %v1709_v53 = vmax.f32 %v1627_v26, %v6225_v62  ;;  %v1710_v46 = vmax.f32 %v1627_v26, %v6227_v23  ;;  %v2068_v40 = vpop.permute.xlu0 %2067  ;;  %v1885_v6 = vmax.f32 %v1821_v11, 0.0 }
 0x23c   : > { %v1218_v33 = vadd.f32 1.0, %v1154_v54  ;;  %v1829_v42 = vadd.f32 1.0, %v1765_v15  ;;  %v9867_v51 = vmax.f32 %v6421_v14, 0.0  ;;  %v9868_v27 = vmax.f32 %v6427_v2, 0.0 }
 0x23d   : > { %v1886_v13 = vmax.f32 %v1822_v22, 0.0  ;;  %v1830_v4 = vadd.f32 1.0, %v1766_v39  ;;  %v9870_v37 = vmin.f32 %v6315_v1, %v6215_v58  ;;  %v9871_v59 = vmin.f32 %v6315_v1, %v6219_v34  ;;  %v9874_v22 = vld [vmem:[#allocation117_spill] sm:$0xff] }
 0x23e   : > { %v6777_v50 = vmul.f32 %v9868_v27, %v9867_v51  ;;  %v1281_v54 = vmax.f32 %v1217_v36, 0.0  ;;  %v2066_v15 = vpop.permute.xlu1 %2065  ;;  %v9872_v14 = vmax.f32 %v6423_v30, 0.0  ;;  %v9873_v2 = vmax.f32 %v6479_v19, 0.0  ;;  %v9883_v19 = vld [vmem:[#allocation119_spill] sm:$0xff] }
 0x23f   : > { %v6782_v17 = vsub.f32 %v9870_v37, %v1709_v53  ;;  %v6787_v44 = vsub.f32 %v9871_v59, %v1710_v46  ;;  %v9875_v39 = vmax.f32 %v9874_v22, 0.0  ;;  %v9876_v26 = vmax.f32 %v6481_v21, 0.0  ;;  %v9878_v53 = vld [vmem:[#allocation118_spill] sm:$0xff]  ;;  %v9882_v59 = vld [vmem:[#allocation97_spill] sm:$0xff] }
 0x240   : > { %9869 = vst [vmem:[#allocation134_spill] sm:$0xff] %v6777_v50  ;;  %v6793_v11 = vmul.f32 %v9873_v2, %v9872_v14  ;;  %v9879_v27 = vmax.f32 %v9878_v53, 0.0  ;;  %v9880_v1 = vmax.f32 %v6487_v63, 0.0  ;;  %v1889_v36 = vmax.f32 %v1825_v32, 0.0  ;;  %v2072_v50 = vpop.permute.xlu0 %2071  ;;  %v9891_v63 = vld [vmem:[#allocation120_spill] sm:$0xff] }
 0x241   : > { %v6799_v51 = vmul.f32 %v9876_v26, %v9875_v39  ;;  %v1890_v37 = vmax.f32 %v1826_v25, 0.0  ;;  %v2160_v30 = vmul.f32 %v2066_v15, %v9882_v59  ;;  %v9884_v14 = vmax.f32 %v9883_v19, 0.0  ;;  %v9888_v26 = vld [vmem:[#allocation123_spill] sm:$0xff]  ;;  %v9895_v15 = vld [vmem:[#allocation121_spill] sm:$0xff] }
 0x242   : > { %v6805_v46 = vmul.f32 %v9880_v1, %v9879_v27  ;;  %v9885_v2 = vmax.f32 %v6500_v10, 0.0  ;;  %v1893_v21 = vmax.f32 %v1829_v42, 0.0  ;;  %v9887_v39 = vmax.f32 %v6483_v43, 0.0  ;;  %v9899_v42 = vld [vmem:[#allocation96_spill] sm:$0xff]  ;;  %v9900_v43 = vld [vmem:[#allocation122_spill] sm:$0xff] }
 0x243   : > { %9877 = vst [vmem:[#allocation117_spill] sm:$0xff] %v6799_v51  ;;  %v9889_v53 = vmax.f32 %v9888_v26, 0.0  ;;  %v9892_v27 = vmax.f32 %v9891_v63, 0.0  ;;  %v9893_v25 = vmax.f32 %v6538_v38, 0.0  ;;  %v9896_v1 = vmax.f32 %v9895_v15, 0.0  ;;  %2205 = vperm.xlu1 %4775, %v2160_v30   ;;  %v9909_v15 = vld [vmem:[#allocation127_spill] sm:$0xff] }
 0x244   : > { %9881 = vst [vmem:[#allocation118_spill] sm:$0xff] %v6805_v46  ;;  %v6812_v22 = vmul.f32 %v9885_v2, %v9884_v14  ;;  %v9897_v59 = vmax.f32 %v6555_v48, 0.0  ;;  %v1894_v19 = vmax.f32 %v1830_v4, 0.0  ;;  %v2161_v14 = vmul.f32 %v2068_v40, %v9899_v42  ;;  %v9907_v48 = vld [vmem:[#allocation124_spill] sm:$0xff]  ;;  %v9912_v40 = vld [vmem:[#allocation125_spill] sm:$0xff]  ;;  %v9916_v42 = vld [vmem:[#allocation126_spill] sm:$0xff] }
 0x245   : > { %v6818_v51 = vmul.f32 %v9889_v53, %v9887_v39  ;;  %v6824_v32 = vmul.f32 %v9893_v25, %v9892_v27  ;;  %v9901_v2 = vmax.f32 %v9900_v43, 0.0  ;;  %v9902_v39 = vmax.f32 %v6557_v52, 0.0  ;;  %v2070_v27 = vpop.permute.xlu1 %2069  ;;  %v10053_v46 = vld [vmem:[#allocation75_spill] sm:$0xff] }
 0x246   : > { %9886 = vst [vmem:[#allocation97_spill] sm:$0xff] %v6812_v22  ;;  %v6830_v10 = vmul.f32 %v9897_v59, %v9896_v1  ;;  %v9904_v38 = vmax.f32 %v6540_v0, 0.0  ;;  %v9905_v53 = vmax.f32 %v6580_v16, 0.0  ;;  %v9908_v25 = vmax.f32 %v9907_v48, 0.0  ;;  %v9924_v48 = vld [vmem:[#allocation100_spill] sm:$0xff] }
 0x247   : > { %9890 = vst [vmem:[#allocation119_spill] sm:$0xff] %v6818_v51  ;;  %9894 = vst [vmem:[#allocation123_spill] sm:$0xff] %v6824_v32  ;;  %v6837_v26 = vmul.f32 %v9902_v39, %v9901_v2  ;;  %v9910_v4 = vmax.f32 %v9909_v15, 0.0  ;;  %v9913_v30 = vmax.f32 %v9912_v40, 0.0  ;;  %v9914_v59 = vmax.f32 %v6599_v7, 0.0  ;;  %v9920_v2 = vld [vmem:[#allocation128_spill] sm:$0xff]  ;;  %v2076_v15 = vpop.permute.xlu0 %2075  ;;  %2210 = vperm.xlu1 %4775, %v2161_v14  }
 0x248   : > { %9898 = vst [vmem:[#allocation120_spill] sm:$0xff] %v6830_v10  ;;  %v6843_v63 = vmul.f32 %v9905_v53, %v9904_v38  ;;  %v9917_v43 = vmax.f32 %v9916_v42, 0.0  ;;  %v9918_v0 = vmax.f32 %v6614_v3, 0.0  ;;  %v9921_v39 = vmax.f32 %v9920_v2, 0.0 }
 0x249   : > { %9903 = vst [vmem:[#allocation121_spill] sm:$0xff] %v6837_v26  ;;  %v6849_v1 = vmul.f32 %v9910_v4, %v9908_v25  ;;  %v6855_v52 = vmul.f32 %v9914_v59, %v9913_v30  ;;  %v9922_v38 = vmax.f32 %v6637_v61, 0.0  ;;  %v2162_v25 = vmul.f32 %v2070_v27, %v9924_v48  ;;  %v9925_v4 = vld [vmem:[#allocation129_spill] sm:$0xff]  ;;  %v9929_v59 = vld [vmem:[#allocation130_spill] sm:$0xff] }
 0x24a   : > { %9906 = vst [vmem:[#allocation96_spill] sm:$0xff] %v6843_v63  ;;  %v6861_v16 = vmul.f32 %v9918_v0, %v9917_v43  ;;  %v9926_v40 = vmax.f32 %v9925_v4, 0.0  ;;  %v9927_v7 = vmax.f32 %v6648_v8, 0.0  ;;  %v9930_v42 = vmax.f32 %v9929_v59, 0.0  ;;  %v9933_v0 = vld [vmem:[#allocation131_spill] sm:$0xff]  ;;  %v9939_v8 = vld [vmem:[#allocation132_spill] sm:$0xff] }
 0x24b   : > { %9911 = vst [vmem:[#allocation122_spill] sm:$0xff] %v6849_v1  ;;  %9915 = vst [vmem:[#allocation124_spill] sm:$0xff] %v6855_v52  ;;  %v6867_v53 = vmul.f32 %v9922_v38, %v9921_v39  ;;  %v9931_v3 = vmax.f32 %v6654_v24, 0.0  ;;  %v9934_v2 = vmax.f32 %v9933_v0, 0.0  ;;  %v9935_v61 = vmax.f32 %v6656_v55, 0.0  ;;  %2215 = vperm.xlu0 %4774, %v2162_v25   ;;  %v9955_v25 = vld [vmem:[#allocation102_spill] sm:$0xff] }
 0x24c   : > { %9919 = vst [vmem:[#allocation127_spill] sm:$0xff] %v6861_v16  ;;  %v6874_v30 = vmul.f32 %v9927_v7, %v9926_v40  ;;  %v1282_v27 = vmax.f32 %v1218_v33, 0.0  ;;  %v9937_v38 = vmax.f32 %v6650_v28, 0.0  ;;  %v9940_v4 = vmax.f32 %v9939_v8, 0.0  ;;  %v9961_v8 = vld [vmem:[#allocation10_spill] sm:$0xff] }
 0x24d   : > { %9923 = vst [vmem:[#allocation125_spill] sm:$0xff] %v6867_v53  ;;  %v6880_v43 = vmul.f32 %v9931_v3, %v9930_v42  ;;  %v6886_v39 = vmul.f32 %v9935_v61, %v9934_v2  ;;  %v9942_v7 = vmax.f32 %v6671_v57, 0.0  ;;  %v9944_v59 = vmax.f32 %v6692_v45, 0.0  ;;  %v9954_v45 = vld [vmem:[#allocation99_spill] sm:$0xff]  ;;  %v9957_v2 = vld [vmem:[#allocation8_spill] sm:$0xff] }
 0x24e   : > { %9928 = vst [vmem:[#allocation126_spill] sm:$0xff] %v6874_v30  ;;  %v6890_v48 = vmul.f32 %v1877_v41, %v9937_v38  ;;  %v6894_v40 = vmul.f32 %v1878_v60, %v9940_v4  ;;  %v9946_v33 = vmax.f32 %v6707_v31, 0.0  ;;  %v9948_v28 = vmax.f32 %v6709_v9, 0.0  ;;  %v2074_v60 = vpop.permute.xlu1 %2073  ;;  %v2080_v31 = vpop.permute.xlu0 %2079  ;;  %v9956_v9 = vld [vmem:[#allocation101_spill] sm:$0xff] }
 0x24f   : > { %9932 = vst [vmem:[#allocation128_spill] sm:$0xff] %v6880_v43  ;;  %9936 = vst [vmem:[#allocation100_spill] sm:$0xff] %v6886_v39  ;;  %v6898_v24 = vmul.f32 %v1881_v35, %v9942_v7  ;;  %v6902_v55 = vmul.f32 %v1882_v12, %v9944_v59  ;;  %v6912_v3 = vmul.f32 %v1889_v36, %v1277_v47  ;;  %v1833_v59 = vadd.f32 1.0, %v6760_v49 }
 0x250   : > { %9938 = vst [vmem:[#allocation129_spill] sm:$0xff] %v6890_v48  ;;  %9941 = vst [vmem:[#allocation130_spill] sm:$0xff] %v6894_v40  ;;  %v6906_v42 = vmul.f32 %v1885_v6, %v9946_v33  ;;  %v6910_v41 = vmul.f32 %v1886_v13, %v9948_v28  ;;  %v6914_v57 = vmul.f32 %v1890_v37, %v1278_v56  ;;  %v9959_v37 = vld [vmem:[#allocation9_spill] sm:$0xff]  ;;  %v1834_v33 = vadd.f32 1.0, %v6765_v5 }
 0x251   : > { %9943 = vst [vmem:[#allocation131_spill] sm:$0xff] %v6898_v24  ;;  %9945 = vst [vmem:[#allocation132_spill] sm:$0xff] %v6902_v55  ;;  %v6916_v35 = vmul.f32 %v1893_v21, %v1281_v54  ;;  %v6918_v14 = vmul.f32 %v1894_v19, %v1282_v27  ;;  %v2163_v12 = vmul.f32 %v2072_v50, %v9954_v45  ;;  %v9958_v54 = vld [vmem:[#allocation103_spill] sm:$0xff]  ;;  %v9960_v27 = vld [vmem:[#allocation104_spill] sm:$0xff] }
 0x252   : > { %9947 = vst [vmem:[#allocation135_spill] sm:$0xff] %v6906_v42  ;;  %9949 = vst [vmem:[#allocation136_spill] sm:$0xff] %v6910_v41  ;;  %v2164_v0 = vmul.f32 %v2074_v60, %v9955_v25  ;;  %v2078_v6 = vpop.permute.xlu1 %2077  ;;  %v2165_v13 = vmul.f32 %v2076_v15, %v9956_v9  ;;  %v2084_v47 = vpop.permute.xlu0 %2083  ;;  %v2167_v36 = vmul.f32 %v2080_v31, %v9958_v54  ;;  %v9962_v28 = vld [vmem:[#allocation105_spill] sm:$0xff]  ;;  %v9963_v45 = vld [vmem:[#allocation11_spill] sm:$0xff]  ;;  %v1222_v31 = vadd.f32 1.0, %v6721_v18 }
 0x253   : > { %9950 = vst [vmem:[#allocation137_spill] sm:$0xff] %v6912_v3  ;;  %9951 = vst [vmem:[#allocation138_spill] sm:$0xff] %v6914_v57  ;;  %2220 = vperm.xlu1 %4775, %v2163_v12   ;;  %v2166_v61 = vmul.f32 %v2078_v6, %v9957_v2  ;;  %v2169_v38 = vmul.f32 %v2084_v47, %v9960_v27  ;;  %v1897_v9 = vmax.f32 %v1833_v59, 0.0  ;;  %v9964_v2 = vld [vmem:[#allocation106_spill] sm:$0xff]  ;;  %v9965_v47 = vld [vmem:[#allocation19_spill] sm:$0xff] }
 0x254   : > { %9952 = vst [vmem:[#allocation139_spill] sm:$0xff] %v6916_v35  ;;  %9953 = vst [vmem:[#allocation140_spill] sm:$0xff] %v6918_v14  ;;  %2225 = vperm.xlu0 %4774, %v2164_v0   ;;  %v1221_v0 = vadd.f32 1.0, %v6716_v29  ;;  %v1286_v54 = vmax.f32 %v1222_v31, 0.0  ;;  %v1838_v29 = vadd.f32 1.0, %v6787_v44  ;;  %v9966_v18 = vld [vmem:[#allocation107_spill] sm:$0xff] }
 0x255   : > { %v9971_v44 = vld [vmem:[#allocation12_spill] sm:$0xff]  ;;  %v10011_v14 = vld [vmem:[#allocation55_spill] sm:$0xff]  ;;  %v10014_v3 = vld [vmem:[#allocation65_spill] sm:$0xff] }
 0x256   : > { %v2082_v56 = vpop.permute.xlu1 %2081  ;;  %v2088_v19 = vpop.permute.xlu0 %2087  ;;  %v1285_v5 = vmax.f32 %v1221_v0, 0.0  ;;  %v10012_v35 = vld [vmem:[#allocation56_spill] sm:$0xff]  ;;  %v10018_v42 = vld [vmem:[#allocation58_spill] sm:$0xff] }
 0x257   : > { %2230 = vperm.xlu1 %4775, %v2165_v13   ;;  %v2168_v21 = vmul.f32 %v2082_v56, %v9959_v37  ;;  %v2171_v60 = vmul.f32 %v2088_v19, %v9962_v28  ;;  %v1898_v13 = vmax.f32 %v1834_v33, 0.0  ;;  %v9967_v19 = vld [vmem:[#allocation40_spill] sm:$0xff]  ;;  %v1902_v33 = vmax.f32 %v1838_v29, 0.0 }
 0x258   : > { %2235 = vperm.xlu0 %4774, %v2166_v61   ;;  %v10021_v57 = vld [vmem:[#allocation60_spill] sm:$0xff] }
 0x259   : > { %v10027_v55 = vld [vmem:[#allocation68_spill] sm:$0xff] }
 0x25a   : > { %v2086_v50 = vpop.permute.xlu1 %2085  ;;  %v2092_v7 = vpop.permute.xlu0 %2091  ;;  %v1659_v16 = vmax.f32 %v10027_v55, %v6225_v62 }
 0x25b   : > { %2240 = vperm.xlu1 %4775, %v2167_v36   ;;  %v2170_v4 = vmul.f32 %v2086_v50, %v9961_v8  ;;  %v2173_v61 = vmul.f32 %v2092_v7, %v9964_v2  ;;  %v1837_v36 = vadd.f32 1.0, %v6782_v17  ;;  %v6942_v8 = vmul.f32 %v1898_v13, %v1286_v54  ;;  %v9970_v7 = vld [vmem:[#allocation133_spill] sm:$0xff]  ;;  %v9978_v54 = vld [vmem:[#allocation16_spill] sm:$0xff] }
 0x25c   : > { %2245 = vperm.xlu0 %4774, %v2168_v21  }
 0x25d   : > { %9969 = vst [vmem:[#allocation102_spill] sm:$0xff] %v6942_v8  ;;  %v1901_v17 = vmax.f32 %v1837_v36, 0.0 }
 0x25e   : > { %v2090_v15 = vpop.permute.xlu1 %2089  ;;  %v2096_v25 = vpop.permute.xlu0 %2095 }
 0x25f   : > { %2250 = vperm.xlu1 %4775, %v2169_v38   ;;  %v2172_v12 = vmul.f32 %v2090_v15, %v9963_v45  ;;  %v2175_v21 = vmul.f32 %v2096_v25, %v9966_v18  ;;  %v6940_v38 = vmul.f32 %v1897_v9, %v1285_v5  ;;  %v1226_v15 = vadd.f32 1.0, %v9970_v7  ;;  %v9980_v18 = vld [vmem:[#allocation28_spill] sm:$0xff]  ;;  %v10002_v7 = vld [vmem:[#allocation45_spill] sm:$0xff] }
 0x260   : > { %2255 = vperm.xlu0 %4774, %v2170_v4   ;;  %v1225_v4 = vadd.f32 1.0, %v6743_v20  ;;  %v9974_v20 = vld [vmem:[#allocation22_spill] sm:$0xff] }
 0x261   : > { %9968 = vst [vmem:[#allocation99_spill] sm:$0xff] %v6940_v38  ;;  %v1290_v0 = vmax.f32 %v1226_v15, 0.0  ;;  %v10001_v15 = vld [vmem:[#allocation114_spill] sm:$0xff]  ;;  %v10010_v38 = vld [vmem:[#allocation116_spill] sm:$0xff] }
 0x262   : > { %v2094_v6 = vpop.permute.xlu1 %2093  ;;  %v2100_v56 = vpop.permute.xlu0 %2099  ;;  %v1289_v25 = vmax.f32 %v1225_v4, 0.0  ;;  %v9982_v4 = vld [vmem:[#allocation29_spill] sm:$0xff] }
 0x263   : > { %2260 = vperm.xlu1 %4775, %v2171_v60   ;;  %v2174_v49 = vmul.f32 %v2094_v6, %v9965_v47  ;;  %v2177_v28 = vmul.f32 %v2100_v56, %v9971_v44  ;;  %v9972_v60 = vld [vmem:[#allocation43_spill] sm:$0xff]  ;;  %v9973_v6 = vld [vmem:[#allocation20_spill] sm:$0xff]  ;;  %v6952_v47 = vmul.f32 %v1902_v33, %v1290_v0  ;;  %v9977_v56 = vld [vmem:[#allocation21_spill] sm:$0xff]  ;;  %v10025_v40 = vmin.f32 %v9982_v4, %v6215_v58 }
 0x264   : > { %2265 = vperm.xlu0 %4774, %v2172_v12   ;;  %v9984_v33 = vld [vmem:[#allocation17_spill] sm:$0xff]  ;;  %v9998_v0 = vld [vmem:[#allocation42_spill] sm:$0xff] }
 0x265   : > { %9976 = vst [vmem:[#allocation8_spill] sm:$0xff] %v6952_v47  ;;  %v10004_v47 = vld [vmem:[#allocation48_spill] sm:$0xff] }
 0x266   : > { %v2098_v37 = vpop.permute.xlu1 %2097  ;;  %v2104_v27 = vpop.permute.xlu0 %2103 }
 0x267   : > { %2270 = vperm.xlu1 %4775, %v2173_v61   ;;  %v2176_v50 = vmul.f32 %v2098_v37, %v9967_v19  ;;  %v2179_v9 = vmul.f32 %v2104_v27, %v9973_v6  ;;  %v6950_v61 = vmul.f32 %v1901_v17, %v1289_v25  ;;  %v9979_v37 = vld [vmem:[#allocation24_spill] sm:$0xff]  ;;  %v9981_v19 = vld [vmem:[#allocation18_spill] sm:$0xff] }
 0x268   : > { %2275 = vperm.xlu0 %4774, %v2174_v49   ;;  %v9995_v25 = vld [vmem:[#allocation38_spill] sm:$0xff]  ;;  %v10024_v43 = vmin.f32 %v9980_v18, %v9981_v19 }
 0x269   : > { %9975 = vst [vmem:[#allocation101_spill] sm:$0xff] %v6950_v61 }
 0x26a   : > { %v2102_v59 = vpop.permute.xlu1 %2101  ;;  %v2108_v12 = vpop.permute.xlu0 %2107 }
 0x26b   : > { %2280 = vperm.xlu1 %4775, %v2175_v21   ;;  %v2178_v45 = vmul.f32 %v2102_v59, %v9972_v60  ;;  %v2181_v5 = vmul.f32 %v2108_v12, %v9977_v56  ;;  %v9983_v59 = vld [vmem:[#allocation15_spill] sm:$0xff]  ;;  %v10017_v21 = vld [vmem:[#allocation57_spill] sm:$0xff] }
 0x26c   : > { %2285 = vperm.xlu0 %4774, %v2176_v50   ;;  %v9986_v12 = vld [vmem:[#allocation31_spill] sm:$0xff] }
 0x26d   : > { %v10003_v50 = vld [vmem:[#allocation47_spill] sm:$0xff]  ;;  %v10034_v26 = vmin.f32 %v9986_v12, %v6215_v58 }
 0x26e   : > { %v2106_v31 = vpop.permute.xlu1 %2105  ;;  %v2112_v2 = vpop.permute.xlu0 %2111 }
 0x26f   : > { %2290 = vperm.xlu1 %4775, %v2177_v28   ;;  %v2180_v13 = vmul.f32 %v2106_v31, %v9974_v20  ;;  %v2183_v17 = vmul.f32 %v2112_v2, %v9983_v59  ;;  %v9985_v28 = vld [vmem:[#allocation30_spill] sm:$0xff]  ;;  %v9987_v31 = vld [vmem:[#allocation32_spill] sm:$0xff]  ;;  %v9988_v20 = vld [vmem:[#allocation33_spill] sm:$0xff]  ;;  %v1723_v10 = vsub.f32 %v10034_v26, %v1659_v16 }
 0x270   : > { %2295 = vperm.xlu0 %4774, %v2178_v45   ;;  %v9993_v2 = vld [vmem:[#allocation110_spill] sm:$0xff]  ;;  %v10039_v16 = vmin.f32 %v9988_v20, %v6215_v58 }
 0x272   : > { %v2110_v49 = vpop.permute.xlu1 %2109  ;;  %v2116_v29 = vpop.permute.xlu0 %2115 }
 0x273   : > { %2300 = vperm.xlu1 %4775, %v2179_v9   ;;  %v2182_v36 = vmul.f32 %v2110_v49, %v9978_v54  ;;  %v9989_v49 = vld [vmem:[#allocation34_spill] sm:$0xff]  ;;  %v9990_v54 = vld [vmem:[#allocation35_spill] sm:$0xff] }
 0x274   : > { %2305 = vperm.xlu0 %4774, %v2180_v13   ;;  %v9992_v13 = vld [vmem:[#allocation52_spill] sm:$0xff] }
 0x275   : > { %v2185_v9 = vmul.f32 %v2116_v29, %v9992_v13  ;;  %v9999_v29 = vld [vmem:[#allocation44_spill] sm:$0xff] }
 0x276   : > { %v2114_v27 = vpop.permute.xlu1 %2113 }
 0x277   : > { %2310 = vperm.xlu1 %4775, %v2181_v5   ;;  %v2184_v44 = vmul.f32 %v2114_v27, %v9984_v33  ;;  %v2120_v27 = vpop.permute.xlu0 %2119  ;;  %v9994_v5 = vld [vmem:[#allocation37_spill] sm:$0xff]  ;;  %v10006_v33 = vld [vmem:[#allocation51_spill] sm:$0xff] }
 0x278   : > { %2315 = vperm.xlu0 %4774, %v2182_v36   ;;  %v10007_v36 = vld [vmem:[#allocation53_spill] sm:$0xff]  ;;  %v10059_v22 = vmin.f32 %v9994_v5, %v6219_v34 }
 0x27a   : > { %v2118_v59 = vpop.permute.xlu1 %2117 }
 0x27b   : > { %2320 = vperm.xlu1 %4775, %v2183_v17   ;;  %v2186_v6 = vmul.f32 %v2118_v59, %v9993_v2  ;;  %v9996_v17 = vld [vmem:[#allocation39_spill] sm:$0xff]  ;;  %v9997_v2 = vld [vmem:[#allocation41_spill] sm:$0xff]  ;;  %v2124_v60 = vpop.permute.xlu0 %2123 }
 0x27c   : > { %2325 = vperm.xlu0 %4774, %v2184_v44   ;;  %v9991_v44 = vld [vmem:[#allocation36_spill] sm:$0xff] }
 0x27e   : > { %v2122_v56 = vpop.permute.xlu1 %2121 }
 0x27f   : > { %2330 = vperm.xlu1 %4775, %v2185_v9   ;;  %v10000_v9 = vld [vmem:[#allocation25_spill] sm:$0xff]  ;;  %v2188_v59 = vmul.f32 %v2122_v56, %v10001_v15  ;;  %v10005_v15 = vld [vmem:[#allocation50_spill] sm:$0xff] }
 0x280   : > { %2335 = vperm.xlu0 %4774, %v2186_v6   ;;  %v2187_v13 = vmul.f32 %v2120_v27, %v10000_v9  ;;  %v10008_v56 = vld [vmem:[#allocation54_spill] sm:$0xff] }
 0x281   : > { %v10013_v27 = vld [vmem:[#allocation26_spill] sm:$0xff] }
 0x282   : > { %v2126_v61 = vpop.permute.xlu1 %2125  ;;  %v1039_v41 = vmax.f32 %v10014_v3, %v10013_v27 }
 0x283   : > { %2340 = vperm.xlu1 %4775, %v2187_v13   ;;  %v10009_v13 = vld [vmem:[#allocation113_spill] sm:$0xff]  ;;  %v2190_v9 = vmul.f32 %v2126_v61, %v10010_v38  ;;  %v10016_v38 = vld [vmem:[#allocation66_spill] sm:$0xff] }
 0x284   : > { %2345 = vperm.xlu0 %4774, %v2188_v59   ;;  %v2189_v8 = vmul.f32 %v2124_v60, %v10009_v13  ;;  %v10015_v59 = vld [vmem:[#allocation115_spill] sm:$0xff]  ;;  %v1655_v61 = vmax.f32 %v10016_v38, %v6225_v62  ;;  %v1656_v45 = vmax.f32 %v10016_v38, %v6227_v23  ;;  %v10026_v38 = vmin.f32 %v9982_v4, %v6219_v34 }
 0x285   : > { %v1040_v60 = vmax.f32 %v10014_v3, %v10015_v59  ;;  %v10020_v13 = vld [vmem:[#allocation67_spill] sm:$0xff]  ;;  %v10022_v3 = vld [vmem:[#allocation61_spill] sm:$0xff] }
 0x286   : > { %v1043_v24 = vmax.f32 %v10020_v13, %v10013_v27  ;;  %v1719_v30 = vsub.f32 %v10025_v40, %v1655_v61  ;;  %v1720_v53 = vsub.f32 %v10026_v38, %v1656_v45  ;;  %v1044_v48 = vmax.f32 %v10020_v13, %v10015_v59  ;;  %v10030_v45 = vld [vmem:[#allocation69_spill] sm:$0xff]  ;;  %v10031_v13 = vld [vmem:[#allocation63_spill] sm:$0xff] }
 0x287   : > { %2350 = vperm.xlu1 %4775, %v2189_v8   ;;  %v10019_v8 = vld [vmem:[#allocation59_spill] sm:$0xff]  ;;  %v1104_v6 = vsub.f32 %v10024_v43, %v1040_v60  ;;  %v10029_v40 = vmin.f32 %v9985_v28, %v9979_v37  ;;  %v1047_v61 = vmax.f32 %v10030_v45, %v10013_v27  ;;  %v1048_v38 = vmax.f32 %v10030_v45, %v10015_v59 }
 0x288   : > { %2355 = vperm.xlu0 %4774, %v2190_v9   ;;  %v10023_v9 = vmin.f32 %v9980_v18, %v9979_v37  ;;  %v10028_v18 = vld [vmem:[#allocation62_spill] sm:$0xff]  ;;  %v7133_v63 = vadd.f32 1.0, %v1720_v53  ;;  %v10033_v45 = vmin.f32 %v9985_v28, %v9981_v19  ;;  %v10037_v28 = vmin.f32 %v9987_v31, %v9979_v37 }
 0x289   : > { %v1107_v4 = vsub.f32 %v10029_v40, %v1043_v24  ;;  %v7129_v24 = vadd.f32 1.0, %v1104_v6  ;;  %v7131_v40 = vadd.f32 1.0, %v1719_v30  ;;  %v10041_v30 = vld [vmem:[#allocation71_spill] sm:$0xff] }
 0x28a   : > { %v1103_v39 = vsub.f32 %v10023_v9, %v1039_v41  ;;  %v1660_v41 = vmax.f32 %v10027_v55, %v6227_v23  ;;  %v10032_v55 = vld [vmem:[#allocation70_spill] sm:$0xff]  ;;  %v1108_v9 = vsub.f32 %v10033_v45, %v1044_v48  ;;  %v1111_v48 = vsub.f32 %v10037_v28, %v1047_v61  ;;  %v10049_v61 = vld [vmem:[#allocation73_spill] sm:$0xff] }
 0x28b   : > { %v1663_v52 = vmax.f32 %v10032_v55, %v6225_v62  ;;  %v1664_v43 = vmax.f32 %v10032_v55, %v6227_v23  ;;  %v10035_v55 = vmin.f32 %v9986_v12, %v6219_v34  ;;  %v7148_v53 = vadd.f32 1.0, %v1107_v4 }
 0x28c   : > { %v7127_v1 = vadd.f32 1.0, %v1103_v39  ;;  %v10036_v39 = vld [vmem:[#allocation64_spill] sm:$0xff]  ;;  %v10038_v45 = vmin.f32 %v9987_v31, %v9981_v19  ;;  %v1051_v4 = vmax.f32 %v10041_v30, %v10013_v27  ;;  %v1052_v31 = vmax.f32 %v10041_v30, %v10015_v59 }
 0x28d   : > { %v1724_v60 = vsub.f32 %v10035_v55, %v1660_v41  ;;  %v1727_v12 = vsub.f32 %v10039_v16, %v1663_v52  ;;  %v10040_v41 = vmin.f32 %v9988_v20, %v6219_v34  ;;  %v7170_v28 = vadd.f32 1.0, %v1108_v9  ;;  %v10043_v16 = vld [vmem:[#allocation72_spill] sm:$0xff] }
 0x28e   : > { %v1112_v26 = vsub.f32 %v10038_v45, %v1048_v38  ;;  %v7172_v52 = vadd.f32 1.0, %v1723_v10  ;;  %v7177_v45 = vadd.f32 1.0, %v1111_v48  ;;  %v1668_v32 = vmax.f32 %v10043_v16, %v6227_v23 }
 0x28f   : > { %v1728_v55 = vsub.f32 %v10040_v41, %v1664_v43  ;;  %v7174_v20 = vadd.f32 1.0, %v1724_v60  ;;  %v1667_v41 = vmax.f32 %v10043_v16, %v6225_v62  ;;  %v7185_v30 = vadd.f32 1.0, %v1727_v12 }
 0x290   : > { %v7183_v6 = vadd.f32 1.0, %v1112_v26  ;;  %v10047_v10 = vmin.f32 %v9989_v49, %v9979_v37  ;;  %v10048_v48 = vmin.f32 %v9989_v49, %v9981_v19  ;;  %v1055_v43 = vmax.f32 %v10049_v61, %v10013_v27  ;;  %v10050_v26 = vld [vmem:[#allocation74_spill] sm:$0xff] }
 0x291   : > { %10042 = vst [vmem:[#allocation103_spill] sm:$0xff] %v7174_v20  ;;  %10045 = vst [vmem:[#allocation104_spill] sm:$0xff] %v7185_v30  ;;  %v7187_v9 = vadd.f32 1.0, %v1728_v55  ;;  %v1056_v16 = vmax.f32 %v10049_v61, %v10015_v59  ;;  %v1671_v12 = vmax.f32 %v10050_v26, %v6225_v62  ;;  %v10052_v61 = vmin.f32 %v9990_v54, %v6219_v34 }
 0x292   : > { %10044 = vst [vmem:[#allocation9_spill] sm:$0xff] %v7183_v6  ;;  %v1115_v60 = vsub.f32 %v10047_v10, %v1051_v4  ;;  %v1116_v38 = vsub.f32 %v10048_v48, %v1052_v31  ;;  %v1672_v4 = vmax.f32 %v10050_v26, %v6227_v23  ;;  %v10051_v31 = vmin.f32 %v9990_v54, %v6215_v58 }
 0x293   : > { %10046 = vst [vmem:[#allocation10_spill] sm:$0xff] %v7187_v9  ;;  %v1732_v48 = vsub.f32 %v10052_v61, %v1668_v32  ;;  %v1059_v55 = vmax.f32 %v10053_v46, %v10013_v27  ;;  %v10057_v32 = vmin.f32 %v9991_v44, %v9981_v19  ;;  %v10058_v61 = vmin.f32 %v9994_v5, %v6215_v58  ;;  %v10062_v5 = vld [vmem:[#allocation77_spill] sm:$0xff] }
 0x294   : > { %v1731_v10 = vsub.f32 %v10051_v31, %v1667_v41  ;;  %v7218_v26 = vadd.f32 1.0, %v1115_v60  ;;  %v7220_v49 = vadd.f32 1.0, %v1116_v38  ;;  %v10056_v41 = vmin.f32 %v9991_v44, %v9979_v37  ;;  %v10060_v60 = vld [vmem:[#allocation76_spill] sm:$0xff] }
 0x295   : > { %v1120_v54 = vsub.f32 %v10057_v32, %v1056_v16  ;;  %v1735_v51 = vsub.f32 %v10058_v61, %v1671_v12  ;;  %v1736_v20 = vsub.f32 %v10059_v22, %v1672_v4  ;;  %v1060_v38 = vmax.f32 %v10053_v46, %v10015_v59  ;;  %v10063_v32 = vld [vmem:[#allocation78_spill] sm:$0xff] }
 0x296   : > { %10054 = vst [vmem:[#allocation105_spill] sm:$0xff] %v7218_v26  ;;  %10055 = vst [vmem:[#allocation11_spill] sm:$0xff] %v7220_v49  ;;  %v1119_v31 = vsub.f32 %v10056_v41, %v1055_v43  ;;  %v1675_v9 = vmax.f32 %v10060_v60, %v6225_v62  ;;  %v1676_v43 = vmax.f32 %v10060_v60, %v6227_v23  ;;  %v7240_v41 = vadd.f32 1.0, %v1731_v10 }
 0x297   : > { %v7242_v44 = vadd.f32 1.0, %v1732_v48  ;;  %v10061_v16 = vmin.f32 %v9995_v25, %v9979_v37  ;;  %v1063_v22 = vmax.f32 %v10062_v5, %v10013_v27  ;;  %v1064_v46 = vmax.f32 %v10062_v5, %v10015_v59 }
 0x298   : > { %v1679_v61 = vmax.f32 %v10063_v32, %v6225_v62  ;;  %v1680_v10 = vmax.f32 %v10063_v32, %v6227_v23  ;;  %v7257_v60 = vadd.f32 1.0, %v1119_v31  ;;  %v7259_v30 = vadd.f32 1.0, %v1120_v54 }
 0x299   : > { %v1123_v12 = vsub.f32 %v10061_v16, %v1059_v55  ;;  %v7261_v55 = vadd.f32 1.0, %v1735_v51  ;;  %v7263_v16 = vadd.f32 1.0, %v1736_v20  ;;  %v10066_v4 = vmin.f32 %v9995_v25, %v9981_v19 }
 0x29a   : > { %v10067_v26 = vmin.f32 %v9996_v17, %v6215_v58  ;;  %v10068_v32 = vmin.f32 %v9996_v17, %v6219_v34  ;;  %v10069_v20 = vmin.f32 %v9997_v2, %v9979_v37  ;;  %v10070_v25 = vmin.f32 %v9997_v2, %v9981_v19 }
 0x29b   : > { %10064 = vst [vmem:[#allocation106_spill] sm:$0xff] %v7261_v55  ;;  %10065 = vst [vmem:[#allocation19_spill] sm:$0xff] %v7263_v16  ;;  %v1124_v5 = vsub.f32 %v10066_v4, %v1060_v38  ;;  %v7276_v51 = vadd.f32 1.0, %v1123_v12  ;;  %v10072_v17 = vmin.f32 %v9998_v0, %v6219_v34  ;;  %v10073_v4 = vld [vmem:[#allocation79_spill] sm:$0xff]  ;;  %v10092_v16 = vmin.f32 %v10004_v47, %v6219_v34 }
 0x29c   : > { %v1739_v6 = vsub.f32 %v10067_v26, %v1675_v9  ;;  %v1740_v48 = vsub.f32 %v10068_v32, %v1676_v43  ;;  %v1127_v49 = vsub.f32 %v10069_v20, %v1063_v22  ;;  %v1128_v38 = vsub.f32 %v10070_v25, %v1064_v46  ;;  %v10087_v55 = vld [vmem:[#allocation83_spill] sm:$0xff] }
 0x29d   : > { %v10071_v9 = vmin.f32 %v9998_v0, %v6215_v58  ;;  %v1744_v43 = vsub.f32 %v10072_v17, %v1680_v10  ;;  %v1067_v12 = vmax.f32 %v10073_v4, %v10013_v27  ;;  %v1068_v2 = vmax.f32 %v10073_v4, %v10015_v59  ;;  %v10083_v10 = vld [vmem:[#allocation81_spill] sm:$0xff] }
 0x29e   : > { %v7298_v20 = vadd.f32 1.0, %v1124_v5  ;;  %v7302_v0 = vadd.f32 1.0, %v1740_v48  ;;  %v7305_v25 = vadd.f32 1.0, %v1127_v49  ;;  %v7311_v54 = vadd.f32 1.0, %v1128_v38  ;;  %v10084_v38 = vld [vmem:[#allocation82_spill] sm:$0xff] }
 0x29f   : > { %v1743_v26 = vsub.f32 %v10071_v9, %v1679_v61  ;;  %v7300_v61 = vadd.f32 1.0, %v1739_v6  ;;  %v10077_v9 = vld [vmem:[#allocation80_spill] sm:$0xff]  ;;  %v7315_v5 = vadd.f32 1.0, %v1744_v43  ;;  %v10081_v6 = vmin.f32 %v9999_v29, %v9979_v37 }
 0x2a0   : > { %10075 = vst [vmem:[#allocation40_spill] sm:$0xff] %v7302_v0  ;;  %10076 = vst [vmem:[#allocation133_spill] sm:$0xff] %v7305_v25  ;;  %v1683_v17 = vmax.f32 %v10077_v9, %v6225_v62  ;;  %v1684_v22 = vmax.f32 %v10077_v9, %v6227_v23  ;;  %v10082_v49 = vmin.f32 %v9999_v29, %v9981_v19 }
 0x2a1   : > { %10074 = vst [vmem:[#allocation107_spill] sm:$0xff] %v7300_v61  ;;  %10078 = vst [vmem:[#allocation12_spill] sm:$0xff] %v7311_v54  ;;  %v7313_v4 = vadd.f32 1.0, %v1743_v26  ;;  %v1131_v48 = vsub.f32 %v10081_v6, %v1067_v12  ;;  %v1071_v31 = vmax.f32 %v10083_v10, %v10013_v27  ;;  %v1072_v9 = vmax.f32 %v10083_v10, %v10015_v59 }
 0x2a2   : > { %10080 = vst [vmem:[#allocation20_spill] sm:$0xff] %v7315_v5  ;;  %v1132_v46 = vsub.f32 %v10082_v49, %v1068_v2  ;;  %v1687_v26 = vmax.f32 %v10084_v38, %v6225_v62  ;;  %v1688_v12 = vmax.f32 %v10084_v38, %v6227_v23  ;;  %v10085_v2 = vmin.f32 %v10002_v7, %v6215_v58 }
 0x2a3   : > { %10079 = vst [vmem:[#allocation43_spill] sm:$0xff] %v7313_v4  ;;  %v10086_v10 = vmin.f32 %v10002_v7, %v6219_v34  ;;  %v1075_v43 = vmax.f32 %v10087_v55, %v10013_v27  ;;  %v7346_v38 = vadd.f32 1.0, %v1131_v48  ;;  %v10090_v7 = vmin.f32 %v10003_v50, %v9981_v19  ;;  %v10093_v48 = vld [vmem:[#allocation84_spill] sm:$0xff]  ;;  %v10098_v4 = vld [vmem:[#allocation86_spill] sm:$0xff] }
 0x2a4   : > { %v1747_v6 = vsub.f32 %v10085_v2, %v1683_v17  ;;  %v7348_v29 = vadd.f32 1.0, %v1132_v46  ;;  %v10089_v17 = vmin.f32 %v10003_v50, %v9979_v37  ;;  %v1752_v0 = vsub.f32 %v10092_v16, %v1688_v12  ;;  %v10097_v12 = vld [vmem:[#allocation85_spill] sm:$0xff] }
 0x2a5   : > { %v1748_v49 = vsub.f32 %v10086_v10, %v1684_v22  ;;  %10088 = vst [vmem:[#allocation22_spill] sm:$0xff] %v7346_v38  ;;  %v1136_v22 = vsub.f32 %v10090_v7, %v1072_v9  ;;  %v10091_v10 = vmin.f32 %v10004_v47, %v6215_v58  ;;  %v1076_v46 = vmax.f32 %v10087_v55, %v10015_v59  ;;  %v10095_v7 = vld [vmem:[#allocation23_spill] sm:$0xff]  ;;  %v10096_v47 = vld [vmem:[#allocation14_spill] sm:$0xff] }
 0x2a6   : > { %v1135_v2 = vsub.f32 %v10089_v17, %v1071_v31  ;;  %v1691_v5 = vmax.f32 %v10093_v48, %v6225_v62  ;;  %v1692_v31 = vmax.f32 %v10093_v48, %v6227_v23  ;;  %v7368_v17 = vadd.f32 1.0, %v1747_v6 }
 0x2a7   : > { %v1751_v32 = vsub.f32 %v10091_v10, %v1687_v26  ;;  %v7370_v50 = vadd.f32 1.0, %v1748_v49  ;;  %v10094_v9 = vmin.f32 %v10005_v15, %v9979_v37  ;;  %v2191_v16 = vsub.f32 %v10096_v47, %v10095_v7 }
 0x2a8   : > { %v1079_v55 = vmax.f32 %v10097_v12, %v10013_v27  ;;  %v1080_v10 = vmax.f32 %v10097_v12, %v10015_v59  ;;  %v1695_v48 = vmax.f32 %v10098_v4, %v6225_v62  ;;  %v1696_v6 = vmax.f32 %v10098_v4, %v6227_v23 }
 0x2a9   : > { %v1139_v26 = vsub.f32 %v10094_v9, %v1075_v43  ;;  %v7386_v54 = vadd.f32 1.0, %v1135_v2  ;;  %v7388_v43 = vadd.f32 1.0, %v1136_v22  ;;  %v7390_v9 = vadd.f32 1.0, %v1751_v32 }
 0x2aa   : > { %v7392_v7 = vadd.f32 1.0, %v1752_v0  ;;  %v10101_v47 = vmin.f32 %v10005_v15, %v9981_v19  ;;  %v10102_v61 = vmin.f32 %v10006_v33, %v6215_v58  ;;  %v10103_v4 = vmin.f32 %v10006_v33, %v6219_v34 }
 0x2ab   : > { %10099 = vst [vmem:[#allocation21_spill] sm:$0xff] %v7390_v9  ;;  %v7405_v32 = vadd.f32 1.0, %v1139_v26  ;;  %v2192_v0 = vadd.f32 1.0, %v2191_v16  ;;  %v10105_v38 = vmin.f32 %v10007_v36, %v9979_v37  ;;  %v10120_v9 = vmax.f32 %v10028_v18, %v6227_v23 }
 0x2ac   : > { %10100 = vst [vmem:[#allocation16_spill] sm:$0xff] %v7392_v7  ;;  %v1140_v12 = vsub.f32 %v10101_v47, %v1076_v46  ;;  %v1755_v25 = vsub.f32 %v10102_v61, %v1691_v5  ;;  %v1756_v49 = vsub.f32 %v10103_v4, %v1692_v31  ;;  %v10106_v46 = vmin.f32 %v10007_v36, %v9981_v19  ;;  %v10117_v4 = vld [vmem:[#allocation94_spill] sm:$0xff] }
 0x2ad   : > { %10104 = vst [vmem:[#allocation28_spill] sm:$0xff] %v7405_v32  ;;  %v1143_v15 = vsub.f32 %v10105_v38, %v1079_v55  ;;  %v10107_v61 = vmin.f32 %v10008_v56, %v6215_v58  ;;  %v10108_v5 = vmin.f32 %v10008_v56, %v6219_v34  ;;  %v10111_v56 = vld [vmem:[#allocation95_spill] sm:$0xff]  ;;  %v792_v22 = vmin.f32 %v10117_v4, %v9979_v37 }
 0x2ae   : > { %v1144_v47 = vsub.f32 %v10106_v46, %v1080_v10  ;;  %v7424_v36 = vadd.f32 1.0, %v1140_v12  ;;  %v7426_v10 = vadd.f32 1.0, %v1755_v25  ;;  %v7428_v46 = vadd.f32 1.0, %v1756_v49  ;;  %v10116_v25 = vld [vmem:[#allocation87_spill] sm:$0xff] }
 0x2af   : > { %v1759_v33 = vsub.f32 %v10107_v61, %v1695_v48  ;;  %v1760_v31 = vsub.f32 %v10108_v5, %v1696_v6  ;;  %v1437_v6 = vmin.f32 %v10111_v56, %v6215_v58  ;;  %v1438_v61 = vmin.f32 %v10111_v56, %v6219_v34 }
 0x2b0   : > { %10109 = vst [vmem:[#allocation29_spill] sm:$0xff] %v7426_v10  ;;  %10110 = vst [vmem:[#allocation15_spill] sm:$0xff] %v7428_v46  ;;  %v4652_v5 = vrot.slane %v2192_v0, 9  ;;  %v7435_v26 = vadd.f32 1.0, %v1143_v15  ;;  %v7437_v38 = vadd.f32 1.0, %v1144_v47  ;;  %v1083_v49 = vmax.f32 %v10116_v25, %v10013_v27  ;;  %v10127_v47 = vld [vmem:[#allocation46_spill] sm:$0xff] }
 0x2b1   : > { %v7439_v55 = vadd.f32 1.0, %v1759_v33  ;;  %v7441_v12 = vadd.f32 1.0, %v1760_v31  ;;  %v1084_v48 = vmax.f32 %v10116_v25, %v10015_v59  ;;  %v793_v56 = vmin.f32 %v10117_v4, %v9981_v19  ;;  %v10118_v31 = vld [vmem:[#allocation88_spill] sm:$0xff] }
 0x2b2   : > { %10112 = vst [vmem:[#allocation17_spill] sm:$0xff] %v7435_v26  ;;  %10113 = vst [vmem:[#allocation30_spill] sm:$0xff] %v7437_v38  ;;  %v1699_v16 = vmax.f32 %v10118_v31, %v6225_v62  ;;  %v1700_v2 = vmax.f32 %v10118_v31, %v6227_v23  ;;  %v10119_v25 = vmax.f32 %v10028_v18, %v6225_v62 }
 0x2b3   : > { %10114 = vst [vmem:[#allocation31_spill] sm:$0xff] %v7439_v55  ;;  %10115 = vst [vmem:[#allocation32_spill] sm:$0xff] %v7441_v12  ;;  %v1712_v4 = vsub.f32 %v1438_v61, %v10120_v9  ;;  %v2197_v32 = vmul.f32 %v4652_v5, %v2192_v0  ;;  %v10121_v31 = vmin.f32 %v10011_v14, %v9979_v37  ;;  %v10125_v5 = vld [vmem:[#allocation89_spill] sm:$0xff]  ;;  %v10131_v12 = vld [vmem:[#allocation98_spill] sm:$0xff] }
 0x2b4   : > { %v1711_v7 = vsub.f32 %v1437_v6, %v10119_v25  ;;  %v10122_v6 = vmin.f32 %v10011_v14, %v9981_v19  ;;  %v10123_v18 = vmax.f32 %v10031_v13, %v10013_v27  ;;  %v10124_v0 = vmax.f32 %v10031_v13, %v10015_v59 }
 0x2b5   : > { %v1147_v10 = vsub.f32 %v10121_v31, %v1083_v49  ;;  %v1087_v33 = vmax.f32 %v10125_v5, %v10013_v27  ;;  %v1088_v46 = vmax.f32 %v10125_v5, %v10015_v59  ;;  %v10126_v49 = vld [vmem:[#allocation90_spill] sm:$0xff]  ;;  %v10129_v13 = vmin.f32 %v10012_v35, %v6215_v58 }
 0x2b6   : > { %v1148_v25 = vsub.f32 %v10122_v6, %v1084_v48  ;;  %v1099_v9 = vsub.f32 %v792_v22, %v10123_v18  ;;  %v1100_v61 = vsub.f32 %v793_v56, %v10124_v0  ;;  %v1703_v31 = vmax.f32 %v10126_v49, %v6225_v62  ;;  %v10128_v18 = vld [vmem:[#allocation49_spill] sm:$0xff] }
 0x2b7   : > { %v1704_v14 = vmax.f32 %v10126_v49, %v6227_v23  ;;  %v1775_v48 = vadd.f32 1.0, %v1711_v7  ;;  %v1776_v6 = vadd.f32 1.0, %v1712_v4  ;;  %v2362_v22 = vrot.slane %v2197_v32, %v10127_v47 }
 0x2b8   : > { %v2366_v15 = vrot.slane %v2197_v32, %v10128_v18  ;;  %v1763_v56 = vsub.f32 %v10129_v13, %v1699_v16  ;;  %v10130_v0 = vmin.f32 %v10012_v35, %v6219_v34  ;;  %v1441_v55 = vmin.f32 %v10131_v12, %v6215_v58 }
 0x2b9   : > { %v1442_v49 = vmin.f32 %v10131_v12, %v6219_v34  ;;  %v7500_v7 = vadd.f32 1.0, %v1147_v10  ;;  %v7502_v4 = vadd.f32 1.0, %v1148_v25  ;;  %v1163_v38 = vadd.f32 1.0, %v1099_v9 }
 0x2ba   : > { %v1764_v5 = vsub.f32 %v10130_v0, %v1700_v2  ;;  %v1164_v32 = vadd.f32 1.0, %v1100_v61  ;;  %v10132_v18 = vmin.f32 %v10017_v21, %v9979_v37  ;;  %v10133_v35 = vmin.f32 %v10017_v21, %v9981_v19 }
 0x2bb   : > { %v10134_v13 = vmin.f32 %v10018_v42, %v6215_v58  ;;  %v10135_v10 = vmin.f32 %v10018_v42, %v6219_v34  ;;  %v1839_v25 = vmax.f32 %v1775_v48, 0.0  ;;  %v1840_v26 = vmax.f32 %v1776_v6, 0.0 }
 0x2bc   : > { %v1151_v16 = vsub.f32 %v10132_v18, %v1087_v33  ;;  %v1152_v2 = vsub.f32 %v10133_v35, %v1088_v46  ;;  %v7517_v9 = vrot.slane %v2362_v22, %v10127_v47  ;;  %v7520_v61 = vrot.slane %v2366_v15, %v10127_v47  ;;  %v2201_v35 = vpop.permute.xlu0 %2200 }
 0x2bd   : > { %v1767_v0 = vsub.f32 %v10134_v13, %v1703_v31  ;;  %v1768_v12 = vsub.f32 %v10135_v10, %v1704_v14  ;;  %v7522_v33 = vadd.f32 1.0, %v1763_v56  ;;  %v7524_v21 = vadd.f32 1.0, %v1764_v5 }
 0x2be   : > { %10136 = vst [vmem:[#allocation33_spill] sm:$0xff] %v7517_v9  ;;  %10137 = vst [vmem:[#allocation34_spill] sm:$0xff] %v7520_v61  ;;  %v10139_v46 = vmax.f32 %v10036_v39, %v6225_v62  ;;  %v10140_v42 = vmax.f32 %v10036_v39, %v6227_v23  ;;  %v1227_v22 = vmax.f32 %v1163_v38, 0.0  ;;  %v1228_v18 = vmax.f32 %v1164_v32, 0.0  ;;  %v10144_v38 = vld [vmem:[#allocation91_spill] sm:$0xff] }
 0x2bf   : > { %10138 = vst [vmem:[#allocation35_spill] sm:$0xff] %v7524_v21  ;;  %v7534_v15 = vadd.f32 1.0, %v1151_v16  ;;  %v7536_v47 = vadd.f32 1.0, %v1152_v2  ;;  %v7538_v56 = vadd.f32 1.0, %v1767_v0  ;;  %v7540_v5 = vadd.f32 1.0, %v1768_v12  ;;  %v10145_v12 = vld [vmem:[#allocation92_spill] sm:$0xff] }
 0x2c0   : > { %v1715_v31 = vsub.f32 %v1441_v55, %v10139_v46  ;;  %v1716_v14 = vsub.f32 %v1442_v49, %v10140_v42  ;;  %v7542_v55 = vmul.f32 %v1839_v25, %v1227_v22  ;;  %v7544_v13 = vmul.f32 %v1840_v26, %v1228_v18 }
 0x2c1   : > { %10141 = vst [vmem:[#allocation36_spill] sm:$0xff] %v7536_v47  ;;  %10142 = vst [vmem:[#allocation52_spill] sm:$0xff] %v7538_v56  ;;  %v2377_v39 = vadd.f32 %v7517_v9, %v2201_v35  ;;  %v2378_v49 = vadd.f32 %v7520_v61, %v2201_v35  ;;  %v1091_v32 = vmax.f32 %v10144_v38, %v10013_v27 }
 0x2c2   : > { %10143 = vst [vmem:[#allocation110_spill] sm:$0xff] %v7540_v5  ;;  %v1092_v16 = vmax.f32 %v10144_v38, %v10015_v59  ;;  %v1779_v2 = vadd.f32 1.0, %v1715_v31  ;;  %v1780_v0 = vadd.f32 1.0, %v1716_v14  ;;  %v1707_v25 = vmax.f32 %v10145_v12, %v6225_v62  ;;  %v2206_v18 = vpop.permute.xlu1 %2205 }
 0x2c3   : > { %v2441_v26 = vsub.f32 %v2377_v39, %v7542_v55  ;;  %v2442_v46 = vsub.f32 %v2378_v49, %v7544_v13  ;;  %v1708_v35 = vmax.f32 %v10145_v12, %v6227_v23  ;;  %v10146_v39 = vmin.f32 %v10019_v8, %v9979_v37 }
 0x2c4   : > { %v10147_v49 = vmin.f32 %v10019_v8, %v9981_v19  ;;  %v1843_v22 = vmax.f32 %v1779_v2, 0.0  ;;  %v1844_v48 = vmax.f32 %v1780_v0, 0.0  ;;  %v10148_v12 = vmin.f32 %v10021_v57, %v6215_v58  ;;  %v10151_v2 = vld [vmem:[#allocation27_spill] sm:$0xff] }
 0x2c5   : > { %v2505_v38 = vmax.f32 %v2441_v26, 1e-07  ;;  %v2506_v10 = vmax.f32 %v2442_v46, 1e-07  ;;  %v1155_v6 = vsub.f32 %v10146_v39, %v1091_v32  ;;  %v2379_v14 = vadd.f32 %v7517_v9, %v2206_v18  ;;  %v10150_v39 = vld [vmem:[#allocation93_spill] sm:$0xff]  ;;  %v10170_v58 = vld [vmem:[#allocation103_spill] sm:$0xff] }
 0x2c6   : > { %v1156_v42 = vsub.f32 %v10147_v49, %v1092_v16  ;;  %v1771_v23 = vsub.f32 %v10148_v12, %v1707_v25  ;;  %v2380_v26 = vadd.f32 %v7520_v61, %v2206_v18  ;;  %v10149_v46 = vmin.f32 %v10021_v57, %v6219_v34  ;;  %v10152_v49 = vld [vmem:[#allocation134_spill] sm:$0xff] }
 0x2c7   : > { %4776 = vrcp.f32 %v2505_v38  ;;  %v1095_v8 = vmax.f32 %v10150_v39, %v10013_v27  ;;  %v1096_v16 = vmax.f32 %v10150_v39, %v10015_v59  ;;  %v2443_v0 = vsub.f32 %v2379_v14, %v10151_v2 }
 0x2c8   : > { %v1772_v32 = vsub.f32 %v10149_v46, %v1708_v35  ;;  %4778 = vrcp.f32 %v2506_v10  ;;  %v2444_v25 = vsub.f32 %v2380_v26, %v10152_v49  ;;  %v10153_v38 = vmax.f32 %v7148_v53, 0.0 }
 0x2c9   : > { %v10154_v12 = vmax.f32 %v7131_v40, 0.0  ;;  %v10155_v57 = vmax.f32 %v7170_v28, 0.0  ;;  %v10156_v35 = vmax.f32 %v7133_v63, 0.0  ;;  %v7596_v27 = vadd.f32 1.0, %v1155_v6  ;;  %v2211_v40 = vpop.permute.xlu1 %2210 }
 0x2ca   : > { %v7598_v59 = vadd.f32 1.0, %v1156_v42  ;;  %v10159_v10 = vmax.f32 %v7127_v1, 0.0  ;;  %v10160_v53 = vmax.f32 %v7129_v24, 0.0  ;;  %v2216_v39 = vpop.permute.xlu0 %2215  ;;  %v2508_v28 = vmax.f32 %v2444_v25, 1e-07 }
 0x2cb   : > { %v7588_v18 = vmul.f32 %v10154_v12, %v10153_v38  ;;  %v7594_v46 = vmul.f32 %v10156_v35, %v10155_v57  ;;  %10157 = vst [vmem:[#allocation37_spill] sm:$0xff] %v7596_v27  ;;  %v2507_v38 = vmax.f32 %v2443_v0, 1e-07  ;;  %v2381_v63 = vadd.f32 %v7517_v9, %v2211_v40  ;;  %v10163_v35 = vld [vmem:[#allocation117_spill] sm:$0xff] }
 0x2cc   : > { %10158 = vst [vmem:[#allocation38_spill] sm:$0xff] %v7598_v59  ;;  %v7602_v14 = vmul.f32 %v1843_v22, %v10159_v10  ;;  %v7606_v26 = vmul.f32 %v1844_v48, %v10160_v53  ;;  %v2382_v12 = vadd.f32 %v7520_v61, %v2211_v40  ;;  %v7610_v6 = vadd.f32 1.0, %v1771_v23 }
 0x2cd   : > { %v7612_v42 = vadd.f32 1.0, %v1772_v32  ;;  %v2383_v1 = vadd.f32 %v7517_v9, %v2216_v39  ;;  %v2384_v22 = vadd.f32 %v7520_v61, %v2216_v39  ;;  %v10161_v24 = vmin.f32 %v10022_v3, %v9979_v37 }
 0x2ce   : > { %4780 = vrcp.f32 %v2507_v38  ;;  %v2445_v0 = vsub.f32 %v2381_v63, %v7602_v14  ;;  %v2446_v25 = vsub.f32 %v2382_v12, %v7606_v26  ;;  %v10162_v57 = vmin.f32 %v10022_v3, %v9981_v19 }
 0x2cf   : > { %v1159_v48 = vsub.f32 %v10161_v24, %v1095_v8  ;;  %4782 = vrcp.f32 %v2508_v28  ;;  %v2447_v32 = vsub.f32 %v2383_v1, %v6793_v11  ;;  %v2448_v10 = vsub.f32 %v2384_v22, %v10163_v35 }
 0x2d0   : > { %v1160_v23 = vsub.f32 %v10162_v57, %v1096_v16  ;;  %v2509_v39 = vmax.f32 %v2445_v0, 1e-07  ;;  %v2510_v31 = vmax.f32 %v2446_v25, 1e-07  ;;  %v10164_v0 = vld [vmem:[#allocation118_spill] sm:$0xff]  ;;  %v10165_v57 = vld [vmem:[#allocation97_spill] sm:$0xff] }
 0x2d1   : > { %v2511_v38 = vmax.f32 %v2447_v32, 1e-07  ;;  %v2512_v63 = vmax.f32 %v2448_v10, 1e-07  ;;  %v4777_v3 = vpop.eup %4776 }
 0x2d2   : > { %v2221_v53 = vpop.permute.xlu1 %2220  ;;  %4784 = vrcp.f32 %v2509_v39  ;;  %v4779_v22 = vpop.eup %4778  ;;  %v2633_v24 = vmul.f32 %v4777_v3, %v7542_v55  ;;  %v10168_v3 = vld [vmem:[#allocation9_spill] sm:$0xff] }
 0x2d3   : > { %v2226_v40 = vpop.permute.xlu0 %2225  ;;  %v2385_v37 = vadd.f32 %v7517_v9, %v2221_v53  ;;  %v2386_v8 = vadd.f32 %v7520_v61, %v2221_v53  ;;  %4786 = vrcp.f32 %v2510_v31  ;;  %v2634_v53 = vmul.f32 %v4779_v22, %v7544_v13 }
 0x2d4   : > { %v2387_v12 = vadd.f32 %v7517_v9, %v2226_v40  ;;  %v2388_v19 = vadd.f32 %v7520_v61, %v2226_v40  ;;  %4788 = vrcp.f32 %v2511_v38  ;;  %v2697_v16 = vmax.f32 %v2633_v24, 1e-07 }
 0x2d5   : > { %v2449_v28 = vsub.f32 %v2385_v37, %v7588_v18  ;;  %v2450_v1 = vsub.f32 %v2386_v8, %v7594_v46  ;;  %4790 = vrcp.f32 %v2512_v63  ;;  %v10166_v37 = vmax.f32 %v7177_v45, 0.0  ;;  %v10173_v45 = vld [vmem:[#allocation105_spill] sm:$0xff] }
 0x2d6   : > { %v2451_v25 = vsub.f32 %v2387_v12, %v10164_v0  ;;  %v2452_v32 = vsub.f32 %v2388_v19, %v10165_v57  ;;  %v10167_v8 = vmax.f32 %v7172_v52, 0.0  ;;  %v7644_v31 = vadd.f32 1.0, %v1159_v48  ;;  %v10175_v52 = vld [vmem:[#allocation104_spill] sm:$0xff]  ;;  %v10177_v48 = vld [vmem:[#allocation11_spill] sm:$0xff] }
 0x2d7   : > { %v2513_v40 = vmax.f32 %v2449_v28, 1e-07  ;;  %v2514_v39 = vmax.f32 %v2450_v1, 1e-07  ;;  %v2236_v55 = vpop.permute.xlu0 %2235  ;;  %v2698_v12 = vmax.f32 %v2634_v53, 1e-07 }
 0x2d8   : > { %v7642_v34 = vmul.f32 %v10167_v8, %v10166_v37  ;;  %v2515_v19 = vmax.f32 %v2451_v25, 1e-07  ;;  %v10169_v10 = vmax.f32 %v10168_v3, 0.0  ;;  %v10171_v13 = vmax.f32 %v10170_v58, 0.0  ;;  %v10179_v53 = vld [vmem:[#allocation10_spill] sm:$0xff]  ;;  %v4781_v3 = vpop.eup %4780 }
 0x2d9   : > { %v7652_v28 = vadd.f32 1.0, %v1160_v23  ;;  %v7654_v63 = vmin.f32 %v2697_v16, 1.0  ;;  %v10174_v1 = vmax.f32 %v10173_v45, 0.0  ;;  %v10176_v22 = vmax.f32 %v10175_v52, 0.0  ;;  %v2231_v23 = vpop.permute.xlu1 %2230 }
 0x2da   : > { %v7650_v38 = vmul.f32 %v10171_v13, %v10169_v10  ;;  %v10178_v37 = vmax.f32 %v10177_v48, 0.0  ;;  %v10180_v25 = vmax.f32 %v10179_v53, 0.0  ;;  %v7668_v58 = vmin.f32 %v2698_v12, 1.0  ;;  %v10186_v53 = vld [vmem:[#allocation106_spill] sm:$0xff] }
 0x2db   : > { %10172 = vst [vmem:[#allocation39_spill] sm:$0xff] %v7652_v28  ;;  %v7660_v24 = vmul.f32 %v10176_v22, %v10174_v1  ;;  %4792 = vrcp.f32 %v2513_v40  ;;  %v7671_v16 = vadd.f32 %v7517_v9, %v2236_v55  ;;  %v10181_v10 = vmax.f32 %v7257_v60, 0.0  ;;  %v4783_v1 = vpop.eup %4782 }
 0x2dc   : > { %v7666_v8 = vmul.f32 %v10180_v25, %v10178_v37  ;;  %v10182_v13 = vmax.f32 %v7240_v41, 0.0  ;;  %v3017_v52 = vsub.f32 1.0, %v7654_v63  ;;  %v2635_v22 = vmul.f32 %v4781_v3, %v10151_v2 }
 0x2dd   : > { %4794 = vrcp.f32 %v2514_v39  ;;  %v10183_v12 = vmax.f32 %v7259_v30, 0.0  ;;  %v10184_v40 = vmax.f32 %v7242_v44, 0.0  ;;  %v3018_v37 = vsub.f32 1.0, %v7668_v58  ;;  %v10189_v44 = vld [vmem:[#allocation19_spill] sm:$0xff] }
 0x2de   : > { %v7677_v45 = vmul.f32 %v10182_v13, %v10181_v10  ;;  %v2636_v60 = vmul.f32 %v4783_v1, %v10152_v49  ;;  %4796 = vrcp.f32 %v2515_v19  ;;  %v10185_v41 = vmax.f32 %v7276_v51, 0.0  ;;  %v10191_v51 = vld [vmem:[#allocation119_spill] sm:$0xff] }
 0x2df   : > { %v7685_v48 = vmul.f32 %v10184_v40, %v10183_v12  ;;  %v10187_v25 = vmax.f32 %v10186_v53, 0.0  ;;  %v3081_v13 = vmax.f32 %v3017_v52, 1e-07  ;;  %v2699_v2 = vmax.f32 %v2635_v22, 1e-07  ;;  %v4785_v40 = vpop.eup %4784  ;;  %v10192_v53 = vld [vmem:[#allocation133_spill] sm:$0xff] }
 0x2e0   : > { %v2389_v39 = vadd.f32 %v7517_v9, %v2231_v23  ;;  %v10188_v30 = vmax.f32 %v7298_v20, 0.0  ;;  %v10190_v3 = vmax.f32 %v10189_v44, 0.0  ;;  %v3082_v62 = vmax.f32 %v3018_v37, 1e-07 }
 0x2e1   : > { %v7693_v10 = vmul.f32 %v10187_v25, %v10185_v41  ;;  %v2700_v49 = vmax.f32 %v2636_v60, 1e-07  ;;  %v2390_v19 = vadd.f32 %v7520_v61, %v2231_v23  ;;  %v4787_v41 = vpop.eup %4786  ;;  %4798 = vlog2.f32 %v3081_v13  ;;  %v10194_v25 = vld [vmem:[#allocation107_spill] sm:$0xff] }
 0x2e2   : > { %v7700_v12 = vmul.f32 %v10190_v3, %v10188_v30  ;;  %v7705_v52 = vmin.f32 %v2699_v2, 1.0  ;;  %v2637_v22 = vmul.f32 %v4785_v40, %v7602_v14  ;;  %v10193_v20 = vmax.f32 %v10192_v53, 0.0  ;;  %v4789_v3 = vpop.eup %4788 }
 0x2e3   : > { %v10195_v44 = vmax.f32 %v10194_v25, 0.0  ;;  %4800 = vlog2.f32 %v3082_v62  ;;  %v7714_v37 = vmin.f32 %v2700_v49, 1.0  ;;  %v2638_v23 = vmul.f32 %v4787_v41, %v7606_v26  ;;  %v4791_v1 = vpop.eup %4790 }
 0x2e4   : > { %v2516_v60 = vmax.f32 %v2452_v32, 1e-07  ;;  %v4653_v13 = vadd.f32 -0.5, %v7654_v63  ;;  %v4654_v2 = vadd.f32 -0.5, %v7668_v58  ;;  %v3019_v14 = vsub.f32 1.0, %v7705_v52 }
 0x2e5   : > { %v7712_v30 = vmul.f32 %v10195_v44, %v10193_v20  ;;  %v2701_v40 = vmax.f32 %v2637_v22, 1e-07  ;;  %v3020_v53 = vsub.f32 1.0, %v7714_v37  ;;  %v2702_v25 = vmax.f32 %v2638_v23, 1e-07  ;;  %v4793_v41 = vpop.eup %4792 }
 0x2e6   : > { %v2453_v20 = vsub.f32 %v2389_v39, %v7642_v34  ;;  %v2454_v62 = vsub.f32 %v2390_v19, %v7650_v38  ;;  %v3083_v49 = vmax.f32 %v3019_v14, 1e-07  ;;  %v2639_v26 = vmul.f32 %v4789_v3, %v6793_v11 }
 0x2e7   : > { %v7723_v44 = vmin.f32 %v2701_v40, 1.0  ;;  %v7727_v32 = vadd.f32 %v7520_v61, %v2236_v55  ;;  %v3084_v5 = vmax.f32 %v3020_v53, 1e-07  ;;  %v7729_v59 = vmin.f32 %v2702_v25, 1.0  ;;  %v4795_v23 = vpop.eup %4794 }
 0x2e8   : > { %v2640_v22 = vmul.f32 %v4791_v1, %v10163_v35  ;;  %4802 = vrcp.f32 %v2516_v60  ;;  %vm2825_vm0 = vcmp.gt.f32.partialorder %v7654_v63, 0.5  ;;  %v2953_v39 = vmul.f32 0.83811957, %v4653_v13  ;;  %v4797_v40 = vpop.eup %4796 }
 0x2e9   : > { %v2954_v19 = vmul.f32 0.83811957, %v4654_v2  ;;  %4804 = vlog2.f32 %v3083_v49  ;;  %v3021_v14 = vsub.f32 1.0, %v7723_v44  ;;  %vm2826_vm1 = vcmp.gt.f32.partialorder %v7668_v58, 0.5 }
 0x2ea   : > { %4806 = vlog2.f32 %v3084_v5  ;;  %v3022_v11 = vsub.f32 1.0, %v7729_v59  ;;  %v2517_v55 = vmax.f32 %v2453_v20, 1e-07  ;;  %v7736_v3 = vmax.f32 %v2454_v62, 1e-07 }
 0x2eb   : > { %v4655_v35 = vadd.f32 -0.5, %v7705_v52  ;;  %v3085_v1 = vmax.f32 %v3021_v14, 1e-07  ;;  %v2703_v60 = vmax.f32 %v2639_v26, 1e-07  ;;  %v2641_v53 = vmul.f32 %v4793_v41, %v7588_v18  ;;  %v4799_v56 = vpop.eup %4798 }
 0x2ec   : > { %v4656_v13 = vadd.f32 -0.5, %v7714_v37  ;;  %v3086_v2 = vmax.f32 %v3022_v11, 1e-07  ;;  %v2704_v25 = vmax.f32 %v2640_v22, 1e-07  ;;  %v2642_v49 = vmul.f32 %v4795_v23, %v7594_v46 }
 0x2ed   : > { %4808 = vlog2.f32 %v3085_v1  ;;  %v7742_v5 = vmin.f32 %v2703_v60, 1.0  ;;  %v2705_v27 = vmax.f32 %v2641_v53, 1e-07  ;;  %v2643_v20 = vmul.f32 %v4797_v40, %v10164_v0  ;;  %v4801_v62 = vpop.eup %4800 }
 0x2ee   : > { %v3146_v28 = vmul.f32 0.6931472, %v4799_v56  ;;  %4810 = vlog2.f32 %v3086_v2  ;;  %v7745_v14 = vmin.f32 %v2704_v25, 1.0  ;;  %v2706_v26 = vmax.f32 %v2642_v49, 1e-07 }
 0x2ef   : > { %v3148_v18 = vmul.f32 0.6931472, %v4801_v62  ;;  %v4657_v41 = vadd.f32 -0.5, %v7723_v44  ;;  %v4658_v22 = vadd.f32 -0.5, %v7729_v59  ;;  %v3023_v46 = vsub.f32 1.0, %v7742_v5 }
 0x2f0   : > { %v3273_v23 = vsub.f32 0.0, %v3146_v28  ;;  %vm2827_vm2 = vcmp.gt.f32.partialorder %v7705_v52, 0.5  ;;  %vm2828_vm3 = vcmp.gt.f32.partialorder %v7714_v37, 0.5  ;;  %v3024_v0 = vsub.f32 1.0, %v7745_v14  ;;  %v2241_v37 = vpop.permute.xlu1 %2240 }
 0x2f1   : > { %v3274_v40 = vsub.f32 0.0, %v3148_v18  ;;  %v2955_v56 = vmul.f32 0.83811957, %v4655_v35  ;;  %v3087_v11 = vmax.f32 %v3023_v46, 1e-07  ;;  %v7753_v1 = vmin.f32 %v2705_v27, 1.0 }
 0x2f2   : > { %v4803_v60 = vpop.eup %4802  ;;  %v7757_v53 = vsel %vm2825_vm0, %v2953_v39, %v3273_v23  ;;  %v2956_v2 = vmul.f32 0.83811957, %v4656_v13  ;;  %v3088_v25 = vmax.f32 %v3024_v0, 1e-07  ;;  %v7759_v49 = vmin.f32 %v2706_v26, 1.0 }
 0x2f3   : > { %10196 = vst [vmem:[#allocation41_spill] sm:$0xff] %v7757_v53  ;;  %v4805_v28 = vpop.eup %4804  ;;  %v7763_v62 = vsel %vm2826_vm1, %v2954_v19, %v3274_v40  ;;  %vm2829_vm4 = vcmp.gt.f32.partialorder %v7723_v44, 0.5  ;;  %v2957_v35 = vmul.f32 0.83811957, %v4657_v41  ;;  %v2958_v18 = vmul.f32 0.83811957, %v4658_v22 }
 0x2f4   : > { %10197 = vst [vmem:[#allocation42_spill] sm:$0xff] %v7763_v62  ;;  %4812 = vlog2.f32 %v3087_v11  ;;  %v4807_v27 = vpop.eup %4806  ;;  %v3150_v46 = vmul.f32 0.6931472, %v4805_v28  ;;  %vm2830_vm5 = vcmp.gt.f32.partialorder %v7729_v59, 0.5  ;;  %v4659_v63 = vadd.f32 -0.5, %v7742_v5 }
 0x2f5   : > { %v4660_v39 = vadd.f32 -0.5, %v7745_v14  ;;  %4814 = vlog2.f32 %v3088_v25  ;;  %v3152_v13 = vmul.f32 0.6931472, %v4807_v27  ;;  %v4661_v26 = vadd.f32 -0.5, %v7753_v1 }
 0x2f6   : > { %v3025_v58 = vsub.f32 1.0, %v7753_v1  ;;  %v3026_v19 = vsub.f32 1.0, %v7759_v49  ;;  %v3275_v23 = vsub.f32 0.0, %v3150_v46  ;;  %v4662_v41 = vadd.f32 -0.5, %v7759_v49 }
 0x2f7   : > { %v2644_v22 = vmul.f32 %v4803_v60, %v10165_v57  ;;  %v2707_v0 = vmax.f32 %v2643_v20, 1e-07  ;;  %v4809_v40 = vpop.eup %4808  ;;  %v3276_v11 = vsub.f32 0.0, %v3152_v13  ;;  %4816 = vrcp.f32 %v2517_v55  ;;  %v10198_v20 = vld [vmem:[#allocation123_spill] sm:$0xff] }
 0x2f8   : > { %v3089_v28 = vmax.f32 %v3025_v58, 1e-07  ;;  %v3090_v62 = vmax.f32 %v3026_v19, 1e-07  ;;  %v4811_v53 = vpop.eup %4810  ;;  %v7776_v25 = vsel %vm2827_vm2, %v2955_v56, %v3275_v23  ;;  %v3154_v27 = vmul.f32 0.6931472, %v4809_v40 }
 0x2f9   : > { %v2708_v21 = vmax.f32 %v2644_v22, 1e-07  ;;  %v7778_v47 = vmin.f32 %v2707_v0, 1.0  ;;  %v7782_v46 = vsel %vm2828_vm3, %v2956_v2, %v3276_v11  ;;  %v3156_v57 = vmul.f32 0.6931472, %v4811_v53  ;;  %v2246_v0 = vpop.permute.xlu0 %2245 }
 0x2fa   : > { %vm2831_vm6 = vcmp.gt.f32.partialorder %v7742_v5, 0.5  ;;  %4818 = vlog2.f32 %v3089_v28  ;;  %v2456_v55 = vsub.f32 %v7727_v32, %v10198_v20  ;;  %v3277_v60 = vsub.f32 0.0, %v3154_v27 }
 0x2fb   : > { %vm2832_vm7 = vcmp.gt.f32.partialorder %v7745_v14, 0.5  ;;  %4820 = vlog2.f32 %v3090_v62  ;;  %v7788_v52 = vmin.f32 %v2708_v21, 1.0  ;;  %v3278_v56 = vsub.f32 0.0, %v3156_v57 }
 0x2fc   : > { %v2959_v13 = vmul.f32 0.83811957, %v4659_v63  ;;  %v3027_v58 = vsub.f32 1.0, %v7778_v47  ;;  %4822 = vrcp.f32 %v7736_v3  ;;  %v7794_v53 = vsel %vm2829_vm4, %v2957_v35, %v3277_v60 }
 0x2fd   : > { %v2960_v2 = vmul.f32 0.83811957, %v4660_v39  ;;  %v2961_v19 = vmul.f32 0.83811957, %v4661_v26  ;;  %v3028_v32 = vsub.f32 1.0, %v7788_v52  ;;  %v7799_v21 = vsel %vm2830_vm5, %v2958_v18, %v3278_v56 }
 0x2fe   : > { %v4813_v23 = vpop.eup %4812  ;;  %v2962_v62 = vmul.f32 0.83811957, %v4662_v41  ;;  %v3091_v63 = vmax.f32 %v3027_v58, 1e-07  ;;  %v10199_v22 = vsub.f32 %v7671_v16, %v10191_v51  ;;  %v4663_v35 = vadd.f32 -0.5, %v7778_v47  ;;  %v2251_v58 = vpop.permute.xlu1 %2250 }
 0x2ff   : > { %v4815_v40 = vpop.eup %4814  ;;  %v3158_v44 = vmul.f32 0.6931472, %v4813_v23  ;;  %v3092_v39 = vmax.f32 %v3028_v32, 1e-07  ;;  %v2393_v26 = vadd.f32 %v7517_v9, %v2241_v37  ;;  %vm2833_vm8 = vcmp.gt.f32.partialorder %v7753_v1, 0.5 }
 0x300   : > { %v2519_v3 = vmax.f32 %v10199_v22, 1e-07  ;;  %v3160_v11 = vmul.f32 0.6931472, %v4815_v40  ;;  %4824 = vlog2.f32 %v3091_v63  ;;  %v2520_v59 = vmax.f32 %v2456_v55, 1e-07 }
 0x301   : > { %v2394_v18 = vadd.f32 %v7520_v61, %v2241_v37  ;;  %v3279_v41 = vsub.f32 0.0, %v3158_v44  ;;  %4826 = vlog2.f32 %v3092_v39  ;;  %v2457_v16 = vsub.f32 %v2393_v26, %v7660_v24  ;;  %v4817_v27 = vpop.eup %4816  ;;  %v10202_v44 = vld [vmem:[#allocation121_spill] sm:$0xff] }
 0x302   : > { %v2395_v28 = vadd.f32 %v7517_v9, %v2246_v0  ;;  %v3280_v57 = vsub.f32 0.0, %v3160_v11  ;;  %4828 = vrcp.f32 %v2519_v3  ;;  %v2396_v56 = vadd.f32 %v7520_v61, %v2246_v0  ;;  %v10201_v3 = vld [vmem:[#allocation120_spill] sm:$0xff] }
 0x303   : > { %v2458_v60 = vsub.f32 %v2394_v18, %v7666_v8  ;;  %v7814_v32 = vsel %vm2831_vm6, %v2959_v13, %v3279_v41  ;;  %v2645_v55 = vmul.f32 %v4817_v27, %v7642_v34  ;;  %4830 = vrcp.f32 %v2520_v59  ;;  %v2256_v13 = vpop.permute.xlu0 %2255 }
 0x304   : > { %v2521_v37 = vmax.f32 %v2457_v16, 1e-07  ;;  %v4819_v23 = vpop.eup %4818  ;;  %v7819_v63 = vsel %vm2832_vm7, %v2960_v2, %v3280_v57  ;;  %v2459_v40 = vsub.f32 %v2395_v28, %v10201_v3  ;;  %v2460_v39 = vsub.f32 %v2396_v56, %v10202_v44 }
 0x305   : > { %10200 = vst [vmem:[#allocation44_spill] sm:$0xff] %v7819_v63  ;;  %v2522_v22 = vmax.f32 %v2458_v60, 1e-07  ;;  %v4821_v0 = vpop.eup %4820  ;;  %v3162_v26 = vmul.f32 0.6931472, %v4819_v23  ;;  %v2397_v5 = vadd.f32 %v7517_v9, %v2251_v58  ;;  %v2398_v28 = vadd.f32 %v7520_v61, %v2251_v58 }
 0x306   : > { %v2709_v11 = vmax.f32 %v2645_v55, 1e-07  ;;  %4832 = vrcp.f32 %v2521_v37  ;;  %v4823_v34 = vpop.eup %4822  ;;  %v3164_v59 = vmul.f32 0.6931472, %v4821_v0  ;;  %v2523_v18 = vmax.f32 %v2459_v40, 1e-07 }
 0x307   : > { %4834 = vrcp.f32 %v2522_v22  ;;  %v2524_v41 = vmax.f32 %v2460_v39, 1e-07  ;;  %v3281_v14 = vsub.f32 0.0, %v3162_v26  ;;  %v2646_v2 = vmul.f32 %v4823_v34, %v7650_v38 }
 0x308   : > { %v7825_v16 = vmin.f32 %v2709_v11, 1.0  ;;  %v3282_v27 = vsub.f32 0.0, %v3164_v59  ;;  %v4664_v57 = vadd.f32 -0.5, %v7788_v52  ;;  %4836 = vrcp.f32 %v2523_v18 }
 0x309   : > { %v7830_v60 = vadd.f32 %v7517_v9, %v2256_v13  ;;  %vm2834_vm9 = vcmp.gt.f32.partialorder %v7759_v49, 0.5  ;;  %v7835_v56 = vsel %vm2833_vm8, %v2961_v19, %v3281_v14  ;;  %v2710_v55 = vmax.f32 %v2646_v2, 1e-07 }
 0x30a   : > { %10203 = vst [vmem:[#allocation25_spill] sm:$0xff] %v7835_v56  ;;  %v2461_v38 = vsub.f32 %v2397_v5, %v7677_v45  ;;  %v4825_v37 = vpop.eup %4824  ;;  %v7838_v23 = vsel %vm2834_vm9, %v2962_v62, %v3282_v27  ;;  %vm2835_vm10 = vcmp.gt.f32.partialorder %v7778_v47, 0.5  ;;  %v3029_v58 = vsub.f32 1.0, %v7825_v16  ;;  %v10205_v5 = vld [vmem:[#allocation96_spill] sm:$0xff] }
 0x30b   : > { %10204 = vst [vmem:[#allocation114_spill] sm:$0xff] %v7838_v23  ;;  %4838 = vrcp.f32 %v2524_v41  ;;  %v4827_v22 = vpop.eup %4826  ;;  %v2963_v40 = vmul.f32 0.83811957, %v4663_v35  ;;  %v3166_v39 = vmul.f32 0.6931472, %v4825_v37  ;;  %v7842_v0 = vmin.f32 %v2710_v55, 1.0 }
 0x30c   : > { %v2462_v1 = vsub.f32 %v2398_v28, %v7685_v48  ;;  %v4829_v49 = vpop.eup %4828  ;;  %v2964_v19 = vmul.f32 0.83811957, %v4664_v57  ;;  %v3168_v26 = vmul.f32 0.6931472, %v4827_v22  ;;  %v3093_v11 = vmax.f32 %v3029_v58, 1e-07 }
 0x30d   : > { %v2463_v62 = vsub.f32 %v7830_v60, %v10205_v5  ;;  %v4831_v34 = vpop.eup %4830  ;;  %v3283_v59 = vsub.f32 0.0, %v3166_v39  ;;  %v3030_v18 = vsub.f32 1.0, %v7842_v0  ;;  %v2525_v14 = vmax.f32 %v2461_v38, 1e-07  ;;  %v10208_v39 = vld [vmem:[#allocation122_spill] sm:$0xff] }
 0x30e   : > { %v2400_v41 = vadd.f32 %v7520_v61, %v2256_v13  ;;  %v3284_v35 = vsub.f32 0.0, %v3168_v26  ;;  %4840 = vlog2.f32 %v3093_v11  ;;  %v2647_v2 = vmul.f32 %v4829_v49, %v10191_v51  ;;  %v10209_v11 = vld [vmem:[#allocation12_spill] sm:$0xff] }
 0x30f   : > { %v2648_v28 = vmul.f32 %v4831_v34, %v10198_v20  ;;  %vm2836_vm11 = vcmp.gt.f32.partialorder %v7788_v52, 0.5  ;;  %v7854_v57 = vsel %vm2835_vm10, %v2963_v40, %v3283_v59  ;;  %v3094_v60 = vmax.f32 %v3030_v18, 1e-07  ;;  %v10211_v34 = vld [vmem:[#allocation40_spill] sm:$0xff] }
 0x310   : > { %v4833_v27 = vpop.eup %4832  ;;  %10206 = vst [vmem:[#allocation45_spill] sm:$0xff] %v7854_v57  ;;  %v2526_v55 = vmax.f32 %v2462_v1, 1e-07  ;;  %v7856_v58 = vsel %vm2836_vm11, %v2964_v19, %v3284_v35  ;;  %v2711_v38 = vmax.f32 %v2647_v2, 1e-07  ;;  %v4665_v51 = vadd.f32 -0.5, %v7825_v16 }
 0x311   : > { %v4835_v37 = vpop.eup %4834  ;;  %10207 = vst [vmem:[#allocation47_spill] sm:$0xff] %v7856_v58  ;;  %v2712_v13 = vmax.f32 %v2648_v28, 1e-07  ;;  %v2649_v22 = vmul.f32 %v4833_v27, %v7660_v24  ;;  %4842 = vlog2.f32 %v3094_v60  ;;  %v2464_v52 = vsub.f32 %v2400_v41, %v10208_v39  ;;  %v10213_v35 = vld [vmem:[#allocation22_spill] sm:$0xff]  ;;  %v10215_v2 = vld [vmem:[#allocation43_spill] sm:$0xff] }
 0x312   : > { %v2650_v20 = vmul.f32 %v4835_v37, %v7666_v8  ;;  %v4837_v49 = vpop.eup %4836  ;;  %v7862_v47 = vmin.f32 %v2711_v38, 1.0  ;;  %4844 = vrcp.f32 %v2525_v14  ;;  %v10210_v24 = vmax.f32 %v10209_v11, 0.0  ;;  %v10218_v14 = vld [vmem:[#allocation20_spill] sm:$0xff] }
 0x313   : > { %v7864_v40 = vmin.f32 %v2712_v13, 1.0  ;;  %v2713_v1 = vmax.f32 %v2649_v22, 1e-07  ;;  %v2651_v26 = vmul.f32 %v4837_v49, %v10201_v3  ;;  %4846 = vrcp.f32 %v2526_v55 }
 0x314   : > { %v2714_v19 = vmax.f32 %v2650_v20, 1e-07  ;;  %v10212_v59 = vmax.f32 %v10211_v34, 0.0  ;;  %v10214_v41 = vmax.f32 %v10213_v35, 0.0  ;;  %v10216_v28 = vmax.f32 %v10215_v2, 0.0 }
 0x315   : > { %v4839_v8 = vpop.eup %4838  ;;  %v10217_v60 = vmax.f32 %v7348_v29, 0.0  ;;  %v10219_v37 = vmax.f32 %v10218_v14, 0.0  ;;  %v10220_v3 = vmax.f32 %v7386_v54, 0.0  ;;  %v10221_v55 = vmax.f32 %v7368_v17, 0.0 }
 0x316   : > { %v7871_v18 = vmul.f32 %v10212_v59, %v10210_v24  ;;  %v7877_v27 = vmul.f32 %v10216_v28, %v10214_v41  ;;  %v10222_v22 = vmax.f32 %v7388_v43, 0.0  ;;  %v10223_v20 = vmax.f32 %v7370_v50, 0.0 }
 0x317   : > { %v7883_v38 = vmul.f32 %v10219_v37, %v10217_v60  ;;  %v7889_v13 = vmul.f32 %v10221_v55, %v10220_v3  ;;  %v3031_v11 = vsub.f32 1.0, %v7862_v47  ;;  %v3032_v29 = vsub.f32 1.0, %v7864_v40 }
 0x318   : > { %v7895_v49 = vmul.f32 %v10223_v20, %v10222_v22  ;;  %v7899_v24 = vmin.f32 %v2713_v1, 1.0  ;;  %v7901_v34 = vmin.f32 %v2714_v19, 1.0  ;;  %v4666_v54 = vadd.f32 -0.5, %v7842_v0  ;;  %v4841_v41 = vpop.eup %4840 }
 0x319   : > { %v2965_v59 = vmul.f32 0.83811957, %v4665_v51  ;;  %v2652_v17 = vmul.f32 %v4839_v8, %v10202_v44  ;;  %v2715_v35 = vmax.f32 %v2651_v26, 1e-07  ;;  %vm2837_vm12 = vcmp.gt.f32.partialorder %v7825_v16, 0.5 }
 0x31a   : > { %vm2838_vm13 = vcmp.gt.f32.partialorder %v7842_v0, 0.5  ;;  %v3095_v50 = vmax.f32 %v3031_v11, 1e-07  ;;  %v3096_v43 = vmax.f32 %v3032_v29, 1e-07  ;;  %v4667_v2 = vadd.f32 -0.5, %v7862_v47 }
 0x31b   : > { %v4668_v1 = vadd.f32 -0.5, %v7864_v40  ;;  %v3033_v19 = vsub.f32 1.0, %v7899_v24  ;;  %v3034_v28 = vsub.f32 1.0, %v7901_v34  ;;  %v3170_v60 = vmul.f32 0.6931472, %v4841_v41  ;;  %v4843_v37 = vpop.eup %4842 }
 0x31c   : > { %4848 = vlog2.f32 %v3095_v50  ;;  %v2716_v51 = vmax.f32 %v2652_v17, 1e-07  ;;  %v7911_v44 = vmin.f32 %v2715_v35, 1.0  ;;  %v2966_v26 = vmul.f32 0.83811957, %v4666_v54  ;;  %v4845_v11 = vpop.eup %4844  ;;  %v2261_v35 = vpop.permute.xlu1 %2260 }
 0x31d   : > { %4850 = vlog2.f32 %v3096_v43  ;;  %v3097_v8 = vmax.f32 %v3033_v19, 1e-07  ;;  %v2527_v14 = vmax.f32 %v2463_v62, 1e-07  ;;  %v3285_v3 = vsub.f32 0.0, %v3170_v60  ;;  %v4847_v50 = vpop.eup %4846 }
 0x31e   : > { %v3098_v55 = vmax.f32 %v3034_v28, 1e-07  ;;  %v7913_v22 = vmin.f32 %v2716_v51, 1.0  ;;  %v2528_v20 = vmax.f32 %v2464_v52, 1e-07  ;;  %v3035_v41 = vsub.f32 1.0, %v7911_v44 }
 0x31f   : > { %v3172_v29 = vmul.f32 0.6931472, %v4843_v37  ;;  %v2967_v58 = vmul.f32 0.83811957, %v4667_v2  ;;  %4852 = vlog2.f32 %v3097_v8  ;;  %v7918_v17 = vsel %vm2837_vm12, %v2965_v59, %v3285_v3  ;;  %v2266_v59 = vpop.permute.xlu0 %2265 }
 0x320   : > { %10224 = vst [vmem:[#allocation48_spill] sm:$0xff] %v7918_v17  ;;  %v2968_v54 = vmul.f32 0.83811957, %v4668_v1  ;;  %v4669_v62 = vadd.f32 -0.5, %v7899_v24  ;;  %4854 = vlog2.f32 %v3098_v55  ;;  %v4670_v19 = vadd.f32 -0.5, %v7901_v34 }
 0x321   : > { %v3286_v43 = vsub.f32 0.0, %v3172_v29  ;;  %v3036_v52 = vsub.f32 1.0, %v7913_v22  ;;  %v3099_v28 = vmax.f32 %v3035_v41, 1e-07  ;;  %vm2839_vm14 = vcmp.gt.f32.partialorder %v7862_v47, 0.5 }
 0x322   : > { %v4671_v2 = vadd.f32 -0.5, %v7911_v44  ;;  %v2653_v60 = vmul.f32 %v4845_v11, %v7677_v45  ;;  %v2654_v16 = vmul.f32 %v4847_v50, %v7685_v48  ;;  %4856 = vrcp.f32 %v2527_v14 }
 0x323   : > { %v7929_v1 = vsel %vm2838_vm13, %v2966_v26, %v3286_v43  ;;  %vm2840_vm15 = vcmp.gt.f32.partialorder %v7864_v40, 0.5  ;;  %v3100_v51 = vmax.f32 %v3036_v52, 1e-07  ;;  %4858 = vlog2.f32 %v3099_v28  ;;  %v10227_v52 = vld [vmem:[#allocation127_spill] sm:$0xff] }
 0x324   : > { %10225 = vst [vmem:[#allocation50_spill] sm:$0xff] %v7929_v1  ;;  %v2401_v8 = vadd.f32 %v7517_v9, %v2261_v35  ;;  %v2717_v37 = vmax.f32 %v2653_v60, 1e-07  ;;  %v2718_v3 = vmax.f32 %v2654_v16, 1e-07  ;;  %4860 = vrcp.f32 %v2528_v20 }
 0x325   : > { %v2402_v55 = vadd.f32 %v7520_v61, %v2261_v35  ;;  %vm2841_vm0 = vcmp.gt.f32.partialorder %v7899_v24, 0.5  ;;  %4862 = vlog2.f32 %v3100_v51  ;;  %v2403_v48 = vadd.f32 %v7517_v9, %v2266_v59  ;;  %v10226_v35 = vld [vmem:[#allocation124_spill] sm:$0xff] }
 0x326   : > { %v2465_v45 = vsub.f32 %v2401_v8, %v7693_v10  ;;  %v2404_v0 = vadd.f32 %v7520_v61, %v2266_v59  ;;  %v4849_v26 = vpop.eup %4848  ;;  %vm2842_vm1 = vcmp.gt.f32.partialorder %v7901_v34, 0.5  ;;  %v4672_v14 = vadd.f32 -0.5, %v7913_v22  ;;  %v2271_v8 = vpop.permute.xlu1 %2270 }
 0x327   : > { %v7940_v11 = vmin.f32 %v2717_v37, 1.0  ;;  %v7942_v29 = vmin.f32 %v2718_v3, 1.0  ;;  %v4851_v20 = vpop.eup %4850  ;;  %v3174_v41 = vmul.f32 0.6931472, %v4849_v26  ;;  %v2467_v43 = vsub.f32 %v2403_v48, %v10226_v35 }
 0x328   : > { %v2529_v50 = vmax.f32 %v2465_v45, 1e-07  ;;  %v2468_v28 = vsub.f32 %v2404_v0, %v10227_v52  ;;  %v3176_v60 = vmul.f32 0.6931472, %v4851_v20  ;;  %v2969_v16 = vmul.f32 0.83811957, %v4669_v62 }
 0x329   : > { %v2970_v51 = vmul.f32 0.83811957, %v4670_v19  ;;  %v2466_v59 = vsub.f32 %v2402_v55, %v7700_v12  ;;  %v4853_v1 = vpop.eup %4852  ;;  %v3287_v17 = vsub.f32 0.0, %v3174_v41  ;;  %vm2843_vm2 = vcmp.gt.f32.partialorder %v7911_v44, 0.5 }
 0x32a   : > { %v2971_v37 = vmul.f32 0.83811957, %v4671_v2  ;;  %v3037_v3 = vsub.f32 1.0, %v7940_v11  ;;  %v3038_v26 = vsub.f32 1.0, %v7942_v29  ;;  %v4855_v45 = vpop.eup %4854  ;;  %v3288_v57 = vsub.f32 0.0, %v3176_v60 }
 0x32b   : > { %v3178_v48 = vmul.f32 0.6931472, %v4853_v1  ;;  %v2972_v23 = vmul.f32 0.83811957, %v4672_v14  ;;  %4864 = vrcp.f32 %v2529_v50  ;;  %v7952_v62 = vsel %vm2839_vm14, %v2967_v58, %v3287_v17 }
 0x32c   : > { %v3180_v19 = vmul.f32 0.6931472, %v4855_v45  ;;  %v3101_v55 = vmax.f32 %v3037_v3, 1e-07  ;;  %v2405_v0 = vadd.f32 %v7517_v9, %v2271_v8  ;;  %v4857_v20 = vpop.eup %4856  ;;  %v7957_v2 = vsel %vm2840_vm15, %v2968_v54, %v3288_v57 }
 0x32d   : > { %v3289_v41 = vsub.f32 0.0, %v3178_v48  ;;  %v3102_v56 = vmax.f32 %v3038_v26, 1e-07  ;;  %v2530_v63 = vmax.f32 %v2466_v59, 1e-07  ;;  %v4859_v60 = vpop.eup %4858  ;;  %v2655_v14 = vmul.f32 %v4857_v20, %v10205_v5  ;;  %v2276_v26 = vpop.permute.xlu0 %2275 }
 0x32e   : > { %v3290_v1 = vsub.f32 0.0, %v3180_v19  ;;  %4866 = vlog2.f32 %v3101_v55  ;;  %v2531_v47 = vmax.f32 %v2467_v43, 1e-07  ;;  %v4861_v58 = vpop.eup %4860  ;;  %v3182_v50 = vmul.f32 0.6931472, %v4859_v60 }
 0x32f   : > { %v7962_v17 = vsel %vm2841_vm0, %v2969_v16, %v3289_v41  ;;  %4868 = vlog2.f32 %v3102_v56  ;;  %v2532_v3 = vmax.f32 %v2468_v28, 1e-07  ;;  %v4863_v40 = vpop.eup %4862  ;;  %v2656_v54 = vmul.f32 %v4861_v58, %v10208_v39 }
 0x330   : > { %v7966_v57 = vsel %vm2842_vm1, %v2970_v51, %v3290_v1  ;;  %v2719_v59 = vmax.f32 %v2655_v14, 1e-07  ;;  %4870 = vrcp.f32 %v2530_v63  ;;  %v3184_v5 = vmul.f32 0.6931472, %v4863_v40  ;;  %v10228_v1 = vld [vmem:[#allocation125_spill] sm:$0xff] }
 0x331   : > { %v3291_v43 = vsub.f32 0.0, %v3182_v50  ;;  %4872 = vrcp.f32 %v2531_v47  ;;  %v2406_v24 = vadd.f32 %v7520_v61, %v2271_v8  ;;  %v2720_v16 = vmax.f32 %v2656_v54, 1e-07  ;;  %v10229_v50 = vld [vmem:[#allocation126_spill] sm:$0xff] }
 0x332   : > { %v7970_v45 = vmin.f32 %v2719_v59, 1.0  ;;  %4874 = vrcp.f32 %v2532_v3  ;;  %v2469_v56 = vsub.f32 %v2405_v0, %v7712_v30  ;;  %v3292_v28 = vsub.f32 0.0, %v3184_v5  ;;  %v2281_v5 = vpop.permute.xlu1 %2280 }
 0x333   : > { %v7975_v34 = vsel %vm2843_vm2, %v2971_v37, %v3291_v43  ;;  %v2470_v39 = vsub.f32 %v2406_v24, %v7871_v18  ;;  %v2407_v63 = vadd.f32 %v7517_v9, %v2276_v26  ;;  %vm2844_vm3 = vcmp.gt.f32.partialorder %v7913_v22, 0.5 }
 0x334   : > { %v4673_v51 = vadd.f32 -0.5, %v7940_v11  ;;  %v7981_v8 = vmin.f32 %v2720_v16, 1.0  ;;  %v3039_v48 = vsub.f32 1.0, %v7970_v45  ;;  %v7984_v55 = vsel %vm2844_vm3, %v2972_v23, %v3292_v28 }
 0x335   : > { %v4865_v19 = vpop.eup %4864  ;;  %v2533_v0 = vmax.f32 %v2469_v56, 1e-07  ;;  %v2534_v20 = vmax.f32 %v2470_v39, 1e-07  ;;  %v2408_v44 = vadd.f32 %v7520_v61, %v2276_v26  ;;  %vm2845_vm4 = vcmp.gt.f32.partialorder %v7940_v11, 0.5 }
 0x336   : > { %vm2846_vm5 = vcmp.gt.f32.partialorder %v7942_v29, 0.5  ;;  %v4674_v37 = vadd.f32 -0.5, %v7942_v29  ;;  %v3040_v22 = vsub.f32 1.0, %v7981_v8  ;;  %v3103_v41 = vmax.f32 %v3039_v48, 1e-07 }
 0x337   : > { %v2657_v60 = vmul.f32 %v4865_v19, %v7693_v10  ;;  %4876 = vrcp.f32 %v2533_v0  ;;  %v2471_v14 = vsub.f32 %v2407_v63, %v10228_v1  ;;  %v2973_v47 = vmul.f32 0.83811957, %v4673_v51 }
 0x338   : > { %v4867_v23 = vpop.eup %4866  ;;  %v3104_v58 = vmax.f32 %v3040_v22, 1e-07  ;;  %4878 = vrcp.f32 %v2534_v20  ;;  %v2472_v3 = vsub.f32 %v2408_v44, %v10229_v50  ;;  %v2974_v24 = vmul.f32 0.83811957, %v4674_v37 }
 0x339   : > { %v4869_v40 = vpop.eup %4868  ;;  %v3186_v54 = vmul.f32 0.6931472, %v4867_v23  ;;  %4880 = vlog2.f32 %v3103_v41  ;;  %v2721_v59 = vmax.f32 %v2657_v60, 1e-07  ;;  %v2535_v26 = vmax.f32 %v2471_v14, 1e-07 }
 0x33a   : > { %v4871_v43 = vpop.eup %4870  ;;  %v3188_v16 = vmul.f32 0.6931472, %v4869_v40  ;;  %4882 = vlog2.f32 %v3104_v58  ;;  %v2536_v10 = vmax.f32 %v2472_v3, 1e-07  ;;  %v2409_v0 = vadd.f32 %v7517_v9, %v2281_v5  ;;  %v10231_v23 = vld [vmem:[#allocation28_spill] sm:$0xff]  ;;  %v10233_v58 = vld [vmem:[#allocation21_spill] sm:$0xff] }
 0x33b   : > { %v4873_v56 = vpop.eup %4872  ;;  %v3293_v28 = vsub.f32 0.0, %v3186_v54  ;;  %v2658_v39 = vmul.f32 %v4871_v43, %v7700_v12  ;;  %v7995_v63 = vmin.f32 %v2721_v59, 1.0  ;;  %4884 = vrcp.f32 %v2535_v26  ;;  %v10236_v54 = vld [vmem:[#allocation16_spill] sm:$0xff] }
 0x33c   : > { %v4875_v51 = vpop.eup %4874  ;;  %v3294_v48 = vsub.f32 0.0, %v3188_v16  ;;  %v2659_v19 = vmul.f32 %v4873_v56, %v10226_v35  ;;  %4886 = vrcp.f32 %v2536_v10  ;;  %v4675_v44 = vadd.f32 -0.5, %v7970_v45  ;;  %v10238_v56 = vld [vmem:[#allocation17_spill] sm:$0xff] }
 0x33d   : > { %v8001_v20 = vsel %vm2845_vm4, %v2973_v47, %v3293_v28  ;;  %v4676_v37 = vadd.f32 -0.5, %v7981_v8  ;;  %v2722_v22 = vmax.f32 %v2658_v39, 1e-07  ;;  %v3041_v41 = vsub.f32 1.0, %v7995_v63 }
 0x33e   : > { %v8007_v12 = vsel %vm2846_vm5, %v2974_v24, %v3294_v48  ;;  %v2660_v35 = vmul.f32 %v4875_v51, %v10227_v52  ;;  %v2723_v60 = vmax.f32 %v2659_v19, 1e-07  ;;  %v8014_v11 = vadd.f32 %v7520_v61, %v2281_v5 }
 0x33f   : > { %10230 = vst [vmem:[#allocation51_spill] sm:$0xff] %v8007_v12  ;;  %v8011_v14 = vmin.f32 %v2722_v22, 1.0  ;;  %v10232_v47 = vmax.f32 %v10231_v23, 0.0  ;;  %v10234_v3 = vmax.f32 %v10233_v58, 0.0  ;;  %v10235_v29 = vmax.f32 %v7424_v36, 0.0  ;;  %v10240_v36 = vld [vmem:[#allocation29_spill] sm:$0xff] }
 0x340   : > { %v10237_v59 = vmax.f32 %v10236_v54, 0.0  ;;  %v3105_v43 = vmax.f32 %v3041_v41, 1e-07  ;;  %v2724_v52 = vmax.f32 %v2660_v35, 1e-07  ;;  %v8028_v24 = vmin.f32 %v2723_v60, 1.0 }
 0x341   : > { %v8020_v40 = vmul.f32 %v10234_v3, %v10232_v47  ;;  %v2473_v16 = vsub.f32 %v2409_v0, %v7877_v27  ;;  %v4877_v5 = vpop.eup %4876  ;;  %vm2847_vm6 = vcmp.gt.f32.partialorder %v7970_v45, 0.5  ;;  %vm2848_vm7 = vcmp.gt.f32.partialorder %v7981_v8, 0.5 }
 0x342   : > { %v8026_v26 = vmul.f32 %v10237_v59, %v10235_v29  ;;  %v3042_v10 = vsub.f32 1.0, %v8011_v14  ;;  %v10239_v28 = vmax.f32 %v10238_v56, 0.0  ;;  %v10241_v39 = vmax.f32 %v10240_v36, 0.0  ;;  %v4879_v48 = vpop.eup %4878 }
 0x343   : > { %v2975_v19 = vmul.f32 0.83811957, %v4675_v44  ;;  %v2976_v22 = vmul.f32 0.83811957, %v4676_v37  ;;  %4888 = vlog2.f32 %v3105_v43  ;;  %v8040_v41 = vmin.f32 %v2724_v52, 1.0  ;;  %v4881_v0 = vpop.eup %4880 }
 0x344   : > { %v8038_v51 = vmul.f32 %v10241_v39, %v10239_v28  ;;  %v4677_v35 = vadd.f32 -0.5, %v7995_v63  ;;  %v3106_v60 = vmax.f32 %v3042_v10, 1e-07  ;;  %v3043_v23 = vsub.f32 1.0, %v8028_v24  ;;  %v4883_v58 = vpop.eup %4882 }
 0x345   : > { %v2661_v47 = vmul.f32 %v4877_v5, %v7712_v30  ;;  %v3190_v3 = vmul.f32 0.6931472, %v4881_v0  ;;  %v4678_v29 = vadd.f32 -0.5, %v8011_v14  ;;  %v2474_v54 = vsub.f32 %v8014_v11, %v7883_v38  ;;  %v4885_v37 = vpop.eup %4884  ;;  %v2286_v11 = vpop.permute.xlu0 %2285 }
 0x346   : > { %v2537_v44 = vmax.f32 %v2473_v16, 1e-07  ;;  %v3192_v59 = vmul.f32 0.6931472, %v4883_v58  ;;  %4890 = vlog2.f32 %v3106_v60  ;;  %v3044_v43 = vsub.f32 1.0, %v8040_v41  ;;  %v4887_v56 = vpop.eup %4886 }
 0x347   : > { %v3107_v52 = vmax.f32 %v3043_v23, 1e-07  ;;  %v3295_v10 = vsub.f32 0.0, %v3190_v3  ;;  %v4679_v28 = vadd.f32 -0.5, %v8028_v24  ;;  %v2662_v30 = vmul.f32 %v4879_v48, %v7871_v18 }
 0x348   : > { %v2725_v5 = vmax.f32 %v2661_v47, 1e-07  ;;  %v3296_v36 = vsub.f32 0.0, %v3192_v59  ;;  %v3108_v39 = vmax.f32 %v3044_v43, 1e-07  ;;  %v2663_v0 = vmul.f32 %v4885_v37, %v10228_v1 }
 0x349   : > { %4892 = vlog2.f32 %v3107_v52  ;;  %v8054_v16 = vsel %vm2847_vm6, %v2975_v19, %v3295_v10  ;;  %vm2849_vm8 = vcmp.gt.f32.partialorder %v7995_v63, 0.5  ;;  %v2726_v60 = vmax.f32 %v2662_v30, 1e-07  ;;  %v2296_v63 = vpop.permute.xlu0 %2295 }
 0x34a   : > { %10242 = vst [vmem:[#allocation53_spill] sm:$0xff] %v8054_v16  ;;  %v8057_v23 = vmin.f32 %v2725_v5, 1.0  ;;  %v2664_v58 = vmul.f32 %v4887_v56, %v10229_v50  ;;  %v8062_v18 = vsel %vm2848_vm7, %v2976_v22, %v3296_v36  ;;  %v2977_v48 = vmul.f32 0.83811957, %v4677_v35 }
 0x34b   : > { %10243 = vst [vmem:[#allocation54_spill] sm:$0xff] %v8062_v18  ;;  %4894 = vlog2.f32 %v3108_v39  ;;  %v2727_v47 = vmax.f32 %v2663_v0, 1e-07  ;;  %v4680_v1 = vadd.f32 -0.5, %v8040_v41  ;;  %v8065_v3 = vmin.f32 %v2726_v60, 1.0 }
 0x34c   : > { %v3045_v45 = vsub.f32 1.0, %v8057_v23  ;;  %v2411_v19 = vadd.f32 %v7517_v9, %v2286_v11  ;;  %v2978_v37 = vmul.f32 0.83811957, %v4678_v29  ;;  %v2728_v59 = vmax.f32 %v2664_v58, 1e-07 }
 0x34d   : > { %v8069_v43 = vmin.f32 %v2727_v47, 1.0  ;;  %4896 = vrcp.f32 %v2537_v44  ;;  %v4889_v50 = vpop.eup %4888  ;;  %v2979_v8 = vmul.f32 0.83811957, %v4679_v28  ;;  %v4681_v22 = vadd.f32 -0.5, %v8057_v23  ;;  %v2291_v47 = vpop.permute.xlu1 %2290 }
 0x34e   : > { %v3046_v35 = vsub.f32 1.0, %v8065_v3  ;;  %v2538_v52 = vmax.f32 %v2474_v54, 1e-07  ;;  %vm2850_vm9 = vcmp.gt.f32.partialorder %v8011_v14, 0.5  ;;  %v3194_v56 = vmul.f32 0.6931472, %v4889_v50 }
 0x34f   : > { %v3109_v10 = vmax.f32 %v3045_v45, 1e-07  ;;  %v8074_v30 = vmin.f32 %v2728_v59, 1.0  ;;  %vm2851_vm10 = vcmp.gt.f32.partialorder %v8028_v24, 0.5  ;;  %v2980_v29 = vmul.f32 0.83811957, %v4680_v1 }
 0x350   : > { %v3110_v5 = vmax.f32 %v3046_v35, 1e-07  ;;  %v3047_v36 = vsub.f32 1.0, %v8069_v43  ;;  %v4891_v44 = vpop.eup %4890  ;;  %v3297_v39 = vsub.f32 0.0, %v3194_v56  ;;  %vm2852_vm11 = vcmp.gt.f32.partialorder %v8040_v41, 0.5  ;;  %v10247_v24 = vld [vmem:[#allocation129_spill] sm:$0xff] }
 0x351   : > { %v4682_v28 = vadd.f32 -0.5, %v8065_v3  ;;  %4898 = vlog2.f32 %v3109_v10  ;;  %v2412_v54 = vadd.f32 %v7520_v61, %v2286_v11  ;;  %v3196_v0 = vmul.f32 0.6931472, %v4891_v44  ;;  %v10244_v11 = vld [vmem:[#allocation128_spill] sm:$0xff] }
 0x352   : > { %v8081_v60 = vmul.f32 0.83811957, %v4681_v22  ;;  %4900 = vlog2.f32 %v3110_v5  ;;  %v3048_v58 = vsub.f32 1.0, %v8074_v30  ;;  %v8086_v45 = vsel %vm2849_vm8, %v2977_v48, %v3297_v39  ;;  %v10245_v5 = vld [vmem:[#allocation100_spill] sm:$0xff] }
 0x353   : > { %v4893_v1 = vpop.eup %4892  ;;  %v4683_v59 = vadd.f32 -0.5, %v8069_v43  ;;  %v3111_v50 = vmax.f32 %v3047_v36, 1e-07  ;;  %4902 = vrcp.f32 %v2538_v52  ;;  %v3298_v35 = vsub.f32 0.0, %v3196_v0 }
 0x354   : > { %v3198_v56 = vmul.f32 0.6931472, %v4893_v1  ;;  %v3112_v10 = vmax.f32 %v3048_v58, 1e-07  ;;  %v2475_v44 = vsub.f32 %v2411_v19, %v10244_v11  ;;  %v2476_v18 = vsub.f32 %v2412_v54, %v10245_v5 }
 0x355   : > { %v4895_v22 = vpop.eup %4894  ;;  %4904 = vlog2.f32 %v3111_v50  ;;  %v2413_v16 = vadd.f32 %v7517_v9, %v2291_v47  ;;  %v2414_v12 = vadd.f32 %v7520_v61, %v2291_v47  ;;  %v8095_v48 = vsel %vm2850_vm9, %v2978_v37, %v3298_v35  ;;  %v2301_v50 = vpop.permute.xlu1 %2300 }
 0x356   : > { %v3200_v36 = vmul.f32 0.6931472, %v4895_v22  ;;  %v3299_v52 = vsub.f32 0.0, %v3198_v56  ;;  %4906 = vlog2.f32 %v3112_v10  ;;  %vm2853_vm12 = vcmp.gt.f32.partialorder %v8057_v23, 0.5 }
 0x357   : > { %v4897_v39 = vpop.eup %4896  ;;  %v2539_v19 = vmax.f32 %v2475_v44, 1e-07  ;;  %v2540_v0 = vmax.f32 %v2476_v18, 1e-07  ;;  %v2477_v58 = vsub.f32 %v2413_v16, %v7889_v13  ;;  %v2478_v54 = vsub.f32 %v2414_v12, %v7895_v49 }
 0x358   : > { %v3300_v1 = vsub.f32 0.0, %v3200_v36  ;;  %v8102_v47 = vsel %vm2851_vm10, %v2979_v8, %v3299_v52  ;;  %vm2854_vm13 = vcmp.gt.f32.partialorder %v8065_v3, 0.5  ;;  %v2665_v14 = vmul.f32 %v4897_v39, %v7877_v27  ;;  %v10248_v27 = vld [vmem:[#allocation130_spill] sm:$0xff] }
 0x359   : > { %v2415_v37 = vadd.f32 %v7517_v9, %v2296_v63  ;;  %4908 = vrcp.f32 %v2539_v19  ;;  %v2541_v35 = vmax.f32 %v2477_v58, 1e-07  ;;  %v2542_v56 = vmax.f32 %v2478_v54, 1e-07 }
 0x35a   : > { %v2416_v18 = vadd.f32 %v7520_v61, %v2296_v63  ;;  %v8110_v12 = vsel %vm2852_vm11, %v2980_v29, %v3300_v1  ;;  %v2729_v16 = vmax.f32 %v2665_v14, 1e-07  ;;  %4910 = vrcp.f32 %v2540_v0 }
 0x35b   : > { %10246 = vst [vmem:[#allocation113_spill] sm:$0xff] %v8110_v12  ;;  %v2479_v8 = vsub.f32 %v2415_v37, %v10247_v24  ;;  %v4899_v10 = vpop.eup %4898  ;;  %vm2855_vm14 = vcmp.gt.f32.partialorder %v8069_v43, 0.5  ;;  %4912 = vrcp.f32 %v2541_v35  ;;  %v2417_v22 = vadd.f32 %v7517_v9, %v2301_v50 }
 0x35c   : > { %v2480_v44 = vsub.f32 %v2416_v18, %v10248_v27  ;;  %v2418_v36 = vadd.f32 %v7520_v61, %v2301_v50  ;;  %v4901_v52 = vpop.eup %4900  ;;  %v3202_v63 = vmul.f32 0.6931472, %v4899_v10  ;;  %v8117_v39 = vmin.f32 %v2729_v16, 1.0 }
 0x35d   : > { %4914 = vrcp.f32 %v2542_v56  ;;  %v2543_v41 = vmax.f32 %v2479_v8, 1e-07  ;;  %v4903_v29 = vpop.eup %4902  ;;  %v2982_v19 = vmul.f32 0.83811957, %v4682_v28  ;;  %v3204_v0 = vmul.f32 0.6931472, %v4901_v52  ;;  %v2306_v52 = vpop.permute.xlu0 %2305 }
 0x35e   : > { %v2544_v58 = vmax.f32 %v2480_v44, 1e-07  ;;  %v2481_v54 = vsub.f32 %v2417_v22, %v8020_v40  ;;  %v3301_v1 = vsub.f32 0.0, %v3202_v63  ;;  %v4684_v14 = vadd.f32 -0.5, %v8074_v30 }
 0x35f   : > { %v2666_v37 = vmul.f32 %v4903_v29, %v7883_v38  ;;  %v2482_v35 = vsub.f32 %v2418_v36, %v8026_v26  ;;  %v4905_v50 = vpop.eup %4904  ;;  %v3302_v18 = vsub.f32 0.0, %v3204_v0  ;;  %v2983_v10 = vmul.f32 0.83811957, %v4683_v59 }
 0x360   : > { %v3049_v16 = vsub.f32 1.0, %v8117_v39  ;;  %4916 = vrcp.f32 %v2543_v41  ;;  %v4907_v56 = vpop.eup %4906  ;;  %v8127_v28 = vsel %vm2853_vm12, %v8081_v60, %v3301_v1  ;;  %v3206_v8 = vmul.f32 0.6931472, %v4905_v50 }
 0x361   : > { %10249 = vst [vmem:[#allocation116_spill] sm:$0xff] %v8127_v28  ;;  %v2730_v44 = vmax.f32 %v2666_v37, 1e-07  ;;  %v2545_v22 = vmax.f32 %v2481_v54, 1e-07  ;;  %v8131_v38 = vsel %vm2854_vm13, %v2982_v19, %v3302_v18  ;;  %4918 = vrcp.f32 %v2544_v58 }
 0x362   : > { %10250 = vst [vmem:[#allocation55_spill] sm:$0xff] %v8131_v38  ;;  %v3208_v36 = vmul.f32 0.6931472, %v4907_v56  ;;  %v3113_v59 = vmax.f32 %v3049_v16, 1e-07  ;;  %v3303_v41 = vsub.f32 0.0, %v3206_v8  ;;  %v2419_v1 = vadd.f32 %v7517_v9, %v2306_v52 }
 0x363   : > { %v2984_v63 = vmul.f32 0.83811957, %v4684_v14  ;;  %v8133_v29 = vmin.f32 %v2730_v44, 1.0  ;;  %v2546_v0 = vmax.f32 %v2482_v35, 1e-07  ;;  %v4909_v23 = vpop.eup %4908  ;;  %v2420_v54 = vadd.f32 %v7520_v61, %v2306_v52  ;;  %v10252_v14 = vld [vmem:[#allocation30_spill] sm:$0xff] }
 0x364   : > { %v3304_v60 = vsub.f32 0.0, %v3208_v36  ;;  %4920 = vlog2.f32 %v3113_v59  ;;  %v4911_v3 = vpop.eup %4910  ;;  %vm2856_vm15 = vcmp.gt.f32.partialorder %v8074_v30, 0.5  ;;  %v8141_v19 = vsel %vm2855_vm14, %v2983_v10, %v3303_v41  ;;  %v10254_v35 = vld [vmem:[#allocation15_spill] sm:$0xff] }
 0x365   : > { %10251 = vst [vmem:[#allocation56_spill] sm:$0xff] %v8141_v19  ;;  %v3050_v58 = vsub.f32 1.0, %v8133_v29  ;;  %v10253_v37 = vmax.f32 %v10252_v14, 0.0  ;;  %v10255_v50 = vmax.f32 %v10254_v35, 0.0  ;;  %v4913_v16 = vpop.eup %4912  ;;  %v2667_v8 = vmul.f32 %v4909_v23, %v10244_v11  ;;  %v10257_v52 = vld [vmem:[#allocation131_spill] sm:$0xff] }
 0x366   : > { %v8150_v56 = vsel %vm2856_vm15, %v2984_v63, %v3304_v60  ;;  %v2668_v44 = vmul.f32 %v4911_v3, %v10245_v5  ;;  %4922 = vrcp.f32 %v2545_v22  ;;  %v2669_v10 = vmul.f32 %v4913_v16, %v7889_v13  ;;  %v10258_v60 = vld [vmem:[#allocation132_spill] sm:$0xff] }
 0x367   : > { %v8148_v18 = vmul.f32 %v10255_v50, %v10253_v37  ;;  %10256 = vst [vmem:[#allocation65_spill] sm:$0xff] %v8150_v56  ;;  %v4915_v43 = vpop.eup %4914  ;;  %v3114_v30 = vmax.f32 %v3050_v58, 1e-07  ;;  %4924 = vrcp.f32 %v2546_v0  ;;  %v2483_v36 = vsub.f32 %v2419_v1, %v10257_v52  ;;  %v10260_v37 = vld [vmem:[#allocation31_spill] sm:$0xff] }
 0x368   : > { %v2731_v59 = vmax.f32 %v2667_v8, 1e-07  ;;  %v2732_v41 = vmax.f32 %v2668_v44, 1e-07  ;;  %v2670_v63 = vmul.f32 %v4915_v43, %v7895_v49  ;;  %v2484_v14 = vsub.f32 %v2420_v54, %v10258_v60  ;;  %v10263_v8 = vld [vmem:[#allocation32_spill] sm:$0xff] }
 0x369   : > { %v4685_v11 = vadd.f32 -0.5, %v8117_v39  ;;  %4926 = vlog2.f32 %v3114_v30  ;;  %v2733_v5 = vmax.f32 %v2669_v10, 1e-07  ;;  %v2547_v22 = vmax.f32 %v2483_v36, 1e-07 }
 0x36a   : > { %v4917_v23 = vpop.eup %4916  ;;  %v4686_v13 = vadd.f32 -0.5, %v8133_v29  ;;  %v8167_v0 = vmin.f32 %v2731_v59, 1.0  ;;  %v8169_v1 = vmin.f32 %v2732_v41, 1.0  ;;  %v2734_v3 = vmax.f32 %v2670_v63, 1e-07 }
 0x36b   : > { %v8171_v49 = vmin.f32 %v2733_v5, 1.0  ;;  %v2671_v54 = vmul.f32 %v4917_v23, %v10247_v24  ;;  %v10259_v58 = vmax.f32 %v7500_v7, 0.0  ;;  %v10261_v35 = vmax.f32 %v10260_v37, 0.0  ;;  %v4919_v30 = vpop.eup %4918  ;;  %v2311_v5 = vpop.permute.xlu1 %2310 }
 0x36c   : > { %v10262_v16 = vmax.f32 %v7502_v4, 0.0  ;;  %v10264_v44 = vmax.f32 %v10263_v8, 0.0  ;;  %4928 = vrcp.f32 %v2547_v22  ;;  %v10265_v10 = vmax.f32 %v7534_v15, 0.0 }
 0x36d   : > { %v8178_v50 = vmul.f32 %v10261_v35, %v10259_v58  ;;  %v10266_v36 = vmax.f32 %v7522_v33, 0.0  ;;  %v3051_v41 = vsub.f32 1.0, %v8167_v0  ;;  %v3052_v4 = vsub.f32 1.0, %v8169_v1 }
 0x36e   : > { %v8184_v43 = vmul.f32 %v10264_v44, %v10262_v16  ;;  %v8196_v63 = vmin.f32 %v2734_v3, 1.0  ;;  %v4921_v22 = vpop.eup %4920  ;;  %vm2857_vm0 = vcmp.gt.f32.partialorder %v8117_v39, 0.5  ;;  %v2985_v15 = vmul.f32 0.83811957, %v4685_v11 }
 0x36f   : > { %v8190_v59 = vmul.f32 %v10266_v36, %v10265_v10  ;;  %v2986_v33 = vmul.f32 0.83811957, %v4686_v13  ;;  %v3053_v58 = vsub.f32 1.0, %v8171_v49  ;;  %vm2858_vm1 = vcmp.gt.f32.partialorder %v8133_v29, 0.5 }
 0x370   : > { %v3210_v37 = vmul.f32 0.6931472, %v4921_v22  ;;  %v3115_v35 = vmax.f32 %v3051_v41, 1e-07  ;;  %v3116_v16 = vmax.f32 %v3052_v4, 1e-07  ;;  %v2672_v8 = vmul.f32 %v4919_v30, %v10248_v27  ;;  %v4923_v44 = vpop.eup %4922 }
 0x371   : > { %v4687_v3 = vadd.f32 -0.5, %v8167_v0  ;;  %v3054_v10 = vsub.f32 1.0, %v8196_v63  ;;  %v2548_v36 = vmax.f32 %v2484_v14, 1e-07  ;;  %v8206_v24 = vadd.f32 %v7517_v9, %v2311_v5  ;;  %v4925_v11 = vpop.eup %4924 }
 0x372   : > { %v3305_v13 = vsub.f32 0.0, %v3210_v37  ;;  %4930 = vlog2.f32 %v3115_v35  ;;  %v3117_v7 = vmax.f32 %v3053_v58, 1e-07  ;;  %v2735_v23 = vmax.f32 %v2671_v54, 1e-07 }
 0x373   : > { %v4688_v22 = vadd.f32 -0.5, %v8169_v1  ;;  %4932 = vlog2.f32 %v3116_v16  ;;  %v3118_v41 = vmax.f32 %v3054_v10, 1e-07  ;;  %v2736_v4 = vmax.f32 %v2672_v8, 1e-07  ;;  %v4927_v27 = vpop.eup %4926 }
 0x374   : > { %v8211_v30 = vsel %vm2857_vm0, %v2985_v15, %v3305_v13  ;;  %4934 = vlog2.f32 %v3117_v7  ;;  %v8213_v14 = vmin.f32 %v2735_v23, 1.0  ;;  %v2673_v56 = vmul.f32 %v4923_v44, %v8020_v40 }
 0x375   : > { %10267 = vst [vmem:[#allocation66_spill] sm:$0xff] %v8211_v30  ;;  %v3212_v19 = vmul.f32 0.6931472, %v4927_v27  ;;  %4936 = vlog2.f32 %v3118_v41  ;;  %v8216_v37 = vmin.f32 %v2736_v4, 1.0  ;;  %v2674_v54 = vmul.f32 %v4925_v11, %v8026_v26 }
 0x376   : > { %v2987_v58 = vmul.f32 0.83811957, %v4687_v3  ;;  %v3055_v35 = vsub.f32 1.0, %v8213_v14  ;;  %v2737_v16 = vmax.f32 %v2673_v56, 1e-07  ;;  %v2422_v8 = vadd.f32 %v7520_v61, %v2311_v5  ;;  %v4929_v39 = vpop.eup %4928 }
 0x377   : > { %v3306_v15 = vsub.f32 0.0, %v3212_v19  ;;  %v2988_v10 = vmul.f32 0.83811957, %v4688_v22  ;;  %v4689_v7 = vadd.f32 -0.5, %v8171_v49  ;;  %v3056_v23 = vsub.f32 1.0, %v8216_v37 }
 0x378   : > { %vm2859_vm2 = vcmp.gt.f32.partialorder %v8167_v0, 0.5  ;;  %v4690_v40 = vadd.f32 -0.5, %v8196_v63  ;;  %v3119_v44 = vmax.f32 %v3055_v35, 1e-07  ;;  %v2738_v13 = vmax.f32 %v2674_v54, 1e-07 }
 0x379   : > { %4938 = vrcp.f32 %v2548_v36  ;;  %v8227_v26 = vsel %vm2858_vm1, %v2986_v33, %v3306_v15  ;;  %vm2860_vm3 = vcmp.gt.f32.partialorder %v8169_v1, 0.5  ;;  %v4691_v19 = vadd.f32 -0.5, %v8213_v14 }
 0x37a   : > { %10268 = vst [vmem:[#allocation57_spill] sm:$0xff] %v8227_v26  ;;  %v3120_v56 = vmax.f32 %v3056_v23, 1e-07  ;;  %v8231_v5 = vmin.f32 %v2737_v16, 1.0  ;;  %vm2861_vm4 = vcmp.gt.f32.partialorder %v8171_v49, 0.5  ;;  %v4692_v3 = vadd.f32 -0.5, %v8216_v37 }
 0x37b   : > { %4940 = vlog2.f32 %v3119_v44  ;;  %v8235_v11 = vmin.f32 %v2738_v13, 1.0  ;;  %v2675_v36 = vmul.f32 %v4929_v39, %v10257_v52  ;;  %vm2862_vm5 = vcmp.gt.f32.partialorder %v8196_v63, 0.5  ;;  %v10269_v44 = vld [vmem:[#allocation36_spill] sm:$0xff]  ;;  %v10271_v39 = vld [vmem:[#allocation35_spill] sm:$0xff] }
 0x37c   : > { %v2989_v29 = vmul.f32 0.83811957, %v4689_v7  ;;  %4942 = vlog2.f32 %v3120_v56  ;;  %v3057_v33 = vsub.f32 1.0, %v8231_v5  ;;  %v4931_v22 = vpop.eup %4930  ;;  %v2990_v41 = vmul.f32 0.83811957, %v4690_v40  ;;  %v10274_v63 = vld [vmem:[#allocation136_spill] sm:$0xff] }
 0x37d   : > { %v3058_v4 = vsub.f32 1.0, %v8235_v11  ;;  %v2739_v27 = vmax.f32 %v2675_v36, 1e-07  ;;  %v2485_v54 = vsub.f32 %v8206_v24, %v8038_v51  ;;  %v4933_v35 = vpop.eup %4932  ;;  %v3214_v16 = vmul.f32 0.6931472, %v4931_v22  ;;  %v2316_v36 = vpop.permute.xlu0 %2315 }
 0x37e   : > { %v2991_v15 = vmul.f32 0.83811957, %v4691_v19  ;;  %v3121_v23 = vmax.f32 %v3057_v33, 1e-07  ;;  %v10270_v52 = vmax.f32 %v10269_v44, 0.0  ;;  %v10272_v13 = vmax.f32 %v10271_v39, 0.0  ;;  %v4935_v56 = vpop.eup %4934 }
 0x37f   : > { %v3216_v26 = vmul.f32 0.6931472, %v4933_v35  ;;  %v2992_v30 = vmul.f32 0.83811957, %v4692_v3  ;;  %v3122_v40 = vmax.f32 %v3058_v4, 1e-07  ;;  %v2486_v38 = vsub.f32 %v2422_v8, %v8148_v18  ;;  %v4937_v28 = vpop.eup %4936 }
 0x380   : > { %v8247_v7 = vmul.f32 %v10272_v13, %v10270_v52  ;;  %v3307_v12 = vsub.f32 0.0, %v3214_v16  ;;  %v3218_v24 = vmul.f32 0.6931472, %v4935_v56  ;;  %4944 = vlog2.f32 %v3121_v23  ;;  %v2321_v23 = vpop.permute.xlu1 %2320 }
 0x381   : > { %v8250_v22 = vmin.f32 %v2739_v27, 1.0  ;;  %v3308_v19 = vsub.f32 0.0, %v3216_v26  ;;  %v3220_v33 = vmul.f32 0.6931472, %v4937_v28  ;;  %vm2863_vm6 = vcmp.gt.f32.partialorder %v8213_v14, 0.5 }
 0x382   : > { %4946 = vlog2.f32 %v3122_v40  ;;  %v2549_v44 = vmax.f32 %v2485_v54, 1e-07  ;;  %v8255_v35 = vsel %vm2859_vm2, %v2987_v58, %v3307_v12  ;;  %v3309_v3 = vsub.f32 0.0, %v3218_v24 }
 0x383   : > { %vm2864_vm7 = vcmp.gt.f32.partialorder %v8216_v37, 0.5  ;;  %v4693_v8 = vadd.f32 -0.5, %v8231_v5  ;;  %v2423_v4 = vadd.f32 %v7517_v9, %v2316_v36  ;;  %v4939_v16 = vpop.eup %4938  ;;  %v8262_v26 = vsel %vm2860_vm3, %v2988_v10, %v3308_v19  ;;  %v2326_v19 = vpop.permute.xlu0 %2325  ;;  %v10277_v37 = vld [vmem:[#allocation137_spill] sm:$0xff] }
 0x384   : > { %v3310_v28 = vsub.f32 0.0, %v3220_v33  ;;  %v3059_v27 = vsub.f32 1.0, %v8250_v22  ;;  %v2550_v54 = vmax.f32 %v2486_v38, 1e-07  ;;  %v8267_v12 = vsel %vm2861_vm4, %v2989_v29, %v3309_v3  ;;  %v10273_v29 = vld [vmem:[#allocation135_spill] sm:$0xff] }
 0x385   : > { %v4694_v0 = vadd.f32 -0.5, %v8235_v11  ;;  %v2676_v58 = vmul.f32 %v4939_v16, %v10258_v60  ;;  %4948 = vrcp.f32 %v2549_v44  ;;  %v4941_v52 = vpop.eup %4940  ;;  %v2424_v39 = vadd.f32 %v7520_v61, %v2316_v36 }
 0x386   : > { %v8273_v1 = vsel %vm2862_vm5, %v2990_v41, %v3310_v28  ;;  %v3123_v10 = vmax.f32 %v3059_v27, 1e-07  ;;  %4950 = vrcp.f32 %v2550_v54  ;;  %v4943_v38 = vpop.eup %4942  ;;  %v3222_v13 = vmul.f32 0.6931472, %v4941_v52 }
 0x387   : > { %vm2865_vm8 = vcmp.gt.f32.partialorder %v8231_v5, 0.5  ;;  %v2740_v49 = vmax.f32 %v2676_v58, 1e-07  ;;  %v2487_v56 = vsub.f32 %v2423_v4, %v10273_v29  ;;  %v2425_v40 = vadd.f32 %v7517_v9, %v2321_v23 }
 0x388   : > { %v3224_v60 = vmul.f32 0.6931472, %v4943_v38  ;;  %vm2866_vm9 = vcmp.gt.f32.partialorder %v8235_v11, 0.5  ;;  %4952 = vlog2.f32 %v3123_v10  ;;  %v2488_v41 = vsub.f32 %v2424_v39, %v10274_v63 }
 0x389   : > { %v2426_v24 = vadd.f32 %v7520_v61, %v2321_v23  ;;  %v3311_v33 = vsub.f32 0.0, %v3222_v13  ;;  %v8282_v36 = vmin.f32 %v2740_v49, 1.0  ;;  %v2551_v44 = vmax.f32 %v2487_v56, 1e-07  ;;  %v2331_v49 = vpop.permute.xlu1 %2330 }
 0x38a   : > { %v2489_v3 = vsub.f32 %v2425_v40, %v8178_v50  ;;  %v3312_v16 = vsub.f32 0.0, %v3224_v60  ;;  %v2993_v28 = vmul.f32 0.83811957, %v4693_v8  ;;  %v2552_v4 = vmax.f32 %v2488_v41, 1e-07  ;;  %v4945_v54 = vpop.eup %4944 }
 0x38b   : > { %v2490_v27 = vsub.f32 %v2426_v24, %v8184_v43  ;;  %v8288_v58 = vsel %vm2863_vm6, %v2991_v15, %v3311_v33  ;;  %v2994_v52 = vmul.f32 0.83811957, %v4694_v0  ;;  %v3060_v23 = vsub.f32 1.0, %v8282_v36 }
 0x38c   : > { %10275 = vst [vmem:[#allocation58_spill] sm:$0xff] %v8288_v58  ;;  %v2427_v10 = vadd.f32 %v7517_v9, %v2326_v19  ;;  %v4947_v39 = vpop.eup %4946  ;;  %v8294_v38 = vsel %vm2864_vm7, %v2992_v30, %v3312_v16  ;;  %v3226_v13 = vmul.f32 0.6931472, %v4945_v54  ;;  %4954 = vrcp.f32 %v2551_v44  ;;  %v2336_v44 = vpop.permute.xlu0 %2335 }
 0x38d   : > { %10276 = vst [vmem:[#allocation59_spill] sm:$0xff] %v8294_v38  ;;  %v2553_v8 = vmax.f32 %v2489_v3, 1e-07  ;;  %v3228_v56 = vmul.f32 0.6931472, %v4947_v39  ;;  %v4695_v40 = vadd.f32 -0.5, %v8250_v22  ;;  %4956 = vrcp.f32 %v2552_v4 }
 0x38e   : > { %v3124_v14 = vmax.f32 %v3060_v23, 1e-07  ;;  %v3313_v15 = vsub.f32 0.0, %v3226_v13  ;;  %v2554_v0 = vmax.f32 %v2490_v27, 1e-07  ;;  %v2428_v60 = vadd.f32 %v7520_v61, %v2326_v19  ;;  %v10279_v27 = vld [vmem:[#allocation138_spill] sm:$0xff] }
 0x38f   : > { %4958 = vrcp.f32 %v2553_v8  ;;  %v4949_v41 = vpop.eup %4948  ;;  %v3314_v24 = vsub.f32 0.0, %v3228_v56  ;;  %v2491_v30 = vsub.f32 %v2427_v10, %v10277_v37  ;;  %v2429_v33 = vadd.f32 %v7517_v9, %v2331_v49 }
 0x390   : > { %4960 = vlog2.f32 %v3124_v14  ;;  %v4951_v3 = vpop.eup %4950  ;;  %v8302_v16 = vsel %vm2865_vm8, %v2993_v28, %v3313_v15  ;;  %v2677_v4 = vmul.f32 %v4949_v41, %v8038_v51  ;;  %v2492_v54 = vsub.f32 %v2428_v60, %v10279_v27 }
 0x391   : > { %10278 = vst [vmem:[#allocation67_spill] sm:$0xff] %v8302_v16  ;;  %4962 = vrcp.f32 %v2554_v0  ;;  %v8308_v19 = vsel %vm2866_vm9, %v2994_v52, %v3314_v24  ;;  %v2678_v23 = vmul.f32 %v4951_v3, %v8148_v18  ;;  %v2555_v10 = vmax.f32 %v2491_v30, 1e-07  ;;  %v10281_v24 = vld [vmem:[#allocation139_spill] sm:$0xff] }
 0x392   : > { %10280 = vst [vmem:[#allocation60_spill] sm:$0xff] %v8308_v19  ;;  %v2430_v39 = vadd.f32 %v7520_v61, %v2331_v49  ;;  %v4953_v13 = vpop.eup %4952  ;;  %v2741_v8 = vmax.f32 %v2677_v4, 1e-07  ;;  %v2556_v56 = vmax.f32 %v2492_v54, 1e-07  ;;  %v2493_v5 = vsub.f32 %v2429_v33, %v8190_v59  ;;  %v10282_v3 = vld [vmem:[#allocation39_spill] sm:$0xff] }
 0x393   : > { %v8314_v28 = vadd.f32 %v7517_v9, %v2336_v44  ;;  %v2995_v51 = vmul.f32 0.83811957, %v4695_v40  ;;  %v3230_v14 = vmul.f32 0.6931472, %v4953_v13  ;;  %v2742_v15 = vmax.f32 %v2678_v23, 1e-07 }
 0x394   : > { %v2494_v11 = vsub.f32 %v2430_v39, %v8247_v7  ;;  %v4696_v52 = vadd.f32 -0.5, %v8282_v36  ;;  %v8318_v0 = vmin.f32 %v2741_v8, 1.0  ;;  %4964 = vrcp.f32 %v2555_v10 }
 0x395   : > { %v2557_v18 = vmax.f32 %v2493_v5, 1e-07  ;;  %v3315_v49 = vsub.f32 0.0, %v3230_v14  ;;  %v8320_v60 = vmin.f32 %v2742_v15, 1.0  ;;  %v2495_v30 = vsub.f32 %v8314_v28, %v10281_v24 }
 0x396   : > { %v2558_v41 = vmax.f32 %v2494_v11, 1e-07  ;;  %v4955_v33 = vpop.eup %4954  ;;  %vm2867_vm10 = vcmp.gt.f32.partialorder %v8250_v22, 0.5  ;;  %v3061_v40 = vsub.f32 1.0, %v8318_v0  ;;  %4966 = vrcp.f32 %v2556_v56 }
 0x397   : > { %v1288_v4 = vmax.f32 %v10282_v3, 0.0  ;;  %v4957_v54 = vpop.eup %4956  ;;  %v8327_v23 = vsel %vm2867_vm10, %v2995_v51, %v3315_v49  ;;  %v3062_v10 = vsub.f32 1.0, %v8320_v60  ;;  %4968 = vrcp.f32 %v2557_v18 }
 0x398   : > { %10283 = vst [vmem:[#allocation61_spill] sm:$0xff] %v8327_v23  ;;  %v2432_v39 = vadd.f32 %v7520_v61, %v2336_v44  ;;  %v2996_v8 = vmul.f32 0.83811957, %v4696_v52  ;;  %v3125_v5 = vmax.f32 %v3061_v40, 1e-07  ;;  %v2679_v28 = vmul.f32 %v4955_v33, %v10273_v29  ;;  %v10284_v40 = vld [vmem:[#allocation140_spill] sm:$0xff] }
 0x399   : > { %v4959_v13 = vpop.eup %4958  ;;  %v2680_v22 = vmul.f32 %v4957_v54, %v10274_v63  ;;  %v4697_v56 = vadd.f32 -0.5, %v8318_v0  ;;  %v3126_v15 = vmax.f32 %v3062_v10, 1e-07  ;;  %4970 = vrcp.f32 %v2558_v41 }
 0x39a   : > { %v4961_v14 = vpop.eup %4960  ;;  %v2681_v11 = vmul.f32 %v4959_v13, %v8178_v50  ;;  %4972 = vlog2.f32 %v3125_v5  ;;  %v2743_v18 = vmax.f32 %v2679_v28, 1e-07  ;;  %v2496_v29 = vsub.f32 %v2432_v39, %v10284_v40  ;;  %v10285_v13 = vld [vmem:[#allocation37_spill] sm:$0xff]  ;;  %v10287_v28 = vld [vmem:[#allocation52_spill] sm:$0xff] }
 0x39b   : > { %v4963_v51 = vpop.eup %4962  ;;  %v3232_v49 = vmul.f32 0.6931472, %v4961_v14  ;;  %v2744_v3 = vmax.f32 %v2680_v22, 1e-07  ;;  %4974 = vlog2.f32 %v3126_v15  ;;  %v4698_v63 = vadd.f32 -0.5, %v8320_v60  ;;  %v10290_v15 = vld [vmem:[#allocation38_spill] sm:$0xff] }
 0x39c   : > { %v2682_v44 = vmul.f32 %v4963_v51, %v8184_v43  ;;  %v2745_v52 = vmax.f32 %v2681_v11, 1e-07  ;;  %v8338_v54 = vmin.f32 %v2743_v18, 1.0  ;;  %vm2868_vm11 = vcmp.gt.f32.partialorder %v8282_v36, 0.5  ;;  %v10292_v51 = vld [vmem:[#allocation110_spill] sm:$0xff] }
 0x39d   : > { %v3316_v33 = vsub.f32 0.0, %v3232_v49  ;;  %v8340_v10 = vmin.f32 %v2744_v3, 1.0  ;;  %v10286_v5 = vmax.f32 %v10285_v13, 0.0  ;;  %v10288_v22 = vmax.f32 %v10287_v28, 0.0 }
 0x39e   : > { %v2746_v50 = vmax.f32 %v2682_v44, 1e-07  ;;  %v8343_v41 = vmin.f32 %v2745_v52, 1.0  ;;  %v4965_v14 = vpop.eup %4964  ;;  %v10291_v11 = vmax.f32 %v10290_v15, 0.0  ;;  %v10293_v49 = vmax.f32 %v10292_v51, 0.0 }
 0x39f   : > { %v8349_v43 = vmul.f32 %v10288_v22, %v10286_v5  ;;  %v8351_v39 = vsel %vm2868_vm11, %v2996_v8, %v3316_v33  ;;  %v10294_v36 = vmax.f32 %v7644_v31, 0.0  ;;  %v10295_v3 = vmax.f32 %v7610_v6, 0.0  ;;  %v8373_v22 = vpop.permute.xlu1 %2340 }
 0x3a0   : > { %10289 = vst [vmem:[#allocation68_spill] sm:$0xff] %v8351_v39  ;;  %v8357_v18 = vmul.f32 %v10293_v49, %v10291_v11  ;;  %v10296_v52 = vmax.f32 %v7612_v42, 0.0  ;;  %v2997_v5 = vmul.f32 0.83811957, %v4697_v56  ;;  %v3063_v8 = vsub.f32 1.0, %v8338_v54  ;;  %v4967_v15 = vpop.eup %4966 }
 0x3a1   : > { %v8363_v44 = vmul.f32 %v10295_v3, %v10294_v36  ;;  %v3064_v33 = vsub.f32 1.0, %v8340_v10  ;;  %v8371_v28 = vmin.f32 %v2746_v50, 1.0  ;;  %vm2869_vm12 = vcmp.gt.f32.partialorder %v8318_v0, 0.5  ;;  %v4969_v51 = vpop.eup %4968 }
 0x3a2   : > { %v8367_v13 = vmul.f32 %v10296_v52, %v1288_v4  ;;  %v2998_v31 = vmul.f32 0.83811957, %v4698_v63  ;;  %v3065_v6 = vsub.f32 1.0, %v8343_v41  ;;  %v2559_v11 = vmax.f32 %v2495_v30, 1e-07 }
 0x3a3   : > { %vm2870_vm13 = vcmp.gt.f32.partialorder %v8320_v60, 0.5  ;;  %v3127_v42 = vmax.f32 %v3063_v8, 1e-07  ;;  %v3128_v4 = vmax.f32 %v3064_v33, 1e-07  ;;  %v2683_v56 = vmul.f32 %v4965_v14, %v10277_v37  ;;  %v4971_v30 = vpop.eup %4970 }
 0x3a4   : > { %v8379_v49 = vmax.f32 %v2496_v29, 1e-07  ;;  %v4699_v50 = vadd.f32 -0.5, %v8338_v54  ;;  %v4700_v36 = vadd.f32 -0.5, %v8340_v10  ;;  %v3066_v3 = vsub.f32 1.0, %v8371_v28  ;;  %v4973_v39 = vpop.eup %4972 }
 0x3a5   : > { %v8386_v63 = vadd.f32 %v7517_v9, %v8373_v22  ;;  %4976 = vlog2.f32 %v3127_v42  ;;  %v3129_v52 = vmax.f32 %v3065_v6, 1e-07  ;;  %v2684_v8 = vmul.f32 %v4967_v15, %v10279_v27  ;;  %v4975_v23 = vpop.eup %4974 }
 0x3a6   : > { %v2747_v33 = vmax.f32 %v2683_v56, 1e-07  ;;  %4978 = vlog2.f32 %v3128_v4  ;;  %v4701_v37 = vadd.f32 -0.5, %v8343_v41  ;;  %v3130_v29 = vmax.f32 %v3066_v3, 1e-07 }
 0x3a7   : > { %v2685_v14 = vmul.f32 %v4969_v51, %v8190_v59  ;;  %v3234_v19 = vmul.f32 0.6931472, %v4973_v39  ;;  %4980 = vlog2.f32 %v3129_v52  ;;  %v2748_v16 = vmax.f32 %v2684_v8, 1e-07 }
 0x3a8   : > { %v8391_v38 = vmin.f32 %v2747_v33, 1.0  ;;  %v3236_v58 = vmul.f32 0.6931472, %v4975_v23  ;;  %4982 = vlog2.f32 %v3130_v29  ;;  %v2686_v6 = vmul.f32 %v4971_v30, %v8247_v7 }
 0x3a9   : > { %v2749_v42 = vmax.f32 %v2685_v14, 1e-07  ;;  %v3317_v27 = vsub.f32 0.0, %v3234_v19  ;;  %v4702_v15 = vadd.f32 -0.5, %v8371_v28  ;;  %v8395_v4 = vmin.f32 %v2748_v16, 1.0 }
 0x3aa   : > { %v4703_v56 = vadd.f32 -0.5, %v8391_v38  ;;  %v3318_v3 = vsub.f32 0.0, %v3236_v58  ;;  %v3067_v59 = vsub.f32 1.0, %v8391_v38  ;;  %v2750_v39 = vmax.f32 %v2686_v6, 1e-07 }
 0x3ab   : > { %v8399_v51 = vmin.f32 %v2749_v42, 1.0  ;;  %v8403_v23 = vsel %vm2869_vm12, %v2997_v5, %v3317_v27  ;;  %vm2871_vm14 = vcmp.gt.f32.partialorder %v8338_v54, 0.5  ;;  %v2999_v7 = vmul.f32 0.83811957, %v4699_v50 }
 0x3ac   : > { %v4704_v19 = vadd.f32 -0.5, %v8395_v4  ;;  %v8409_v16 = vsel %vm2870_vm13, %v2998_v31, %v3318_v3  ;;  %vm2872_vm15 = vcmp.gt.f32.partialorder %v8340_v10, 0.5  ;;  %v3068_v58 = vsub.f32 1.0, %v8395_v4  ;;  %v2346_v31 = vpop.permute.xlu0 %2345 }
 0x3ad   : > { %10297 = vst [vmem:[#allocation62_spill] sm:$0xff] %v8409_v16  ;;  %v3131_v30 = vmax.f32 %v3067_v59, 1e-07  ;;  %v8413_v52 = vmin.f32 %v2750_v39, 1.0  ;;  %v3000_v8 = vmul.f32 0.83811957, %v4700_v36  ;;  %v2497_v39 = vsub.f32 %v8386_v63, %v8349_v43  ;;  %v2351_v16 = vpop.permute.xlu1 %2350 }
 0x3ae   : > { %vm2873_vm0 = vcmp.gt.f32.partialorder %v8343_v41, 0.5  ;;  %v3001_v0 = vmul.f32 0.83811957, %v4701_v37  ;;  %v3069_v5 = vsub.f32 1.0, %v8399_v51  ;;  %vm2874_vm1 = vcmp.gt.f32.partialorder %v8371_v28, 0.5 }
 0x3af   : > { %v3002_v50 = vmul.f32 0.83811957, %v4702_v15  ;;  %v8418_v33 = vmul.f32 0.83811957, %v4703_v56  ;;  %v3132_v60 = vmax.f32 %v3068_v58, 1e-07  ;;  %4984 = vlog2.f32 %v3131_v30  ;;  %v4977_v29 = vpop.eup %4976 }
 0x3b0   : > { %v8420_v14 = vmul.f32 0.83811957, %v4704_v19  ;;  %v3070_v6 = vsub.f32 1.0, %v8413_v52  ;;  %v3133_v42 = vmax.f32 %v3069_v5, 1e-07  ;;  %4986 = vrcp.f32 %v2559_v11  ;;  %v4979_v36 = vpop.eup %4978 }
 0x3b1   : > { %v3238_v27 = vmul.f32 0.6931472, %v4977_v29  ;;  %4988 = vlog2.f32 %v3132_v60  ;;  %v8424_v37 = vadd.f32 -0.5, %v8399_v51  ;;  %v2434_v15 = vadd.f32 %v7520_v61, %v8373_v22  ;;  %v4981_v56 = vpop.eup %4980 }
 0x3b2   : > { %v3240_v3 = vmul.f32 0.6931472, %v4979_v36  ;;  %v3134_v59 = vmax.f32 %v3070_v6, 1e-07  ;;  %4990 = vlog2.f32 %v3133_v42  ;;  %v4983_v19 = vpop.eup %4982  ;;  %v3242_v30 = vmul.f32 0.6931472, %v4981_v56  ;;  %v2356_v36 = vpop.permute.xlu0 %2355 }
 0x3b3   : > { %v3319_v58 = vsub.f32 0.0, %v3238_v27  ;;  %4992 = vrcp.f32 %v8379_v49  ;;  %v2498_v11 = vsub.f32 %v2434_v15, %v8357_v18  ;;  %v3244_v60 = vmul.f32 0.6931472, %v4983_v19 }
 0x3b4   : > { %v3320_v5 = vsub.f32 0.0, %v3240_v3  ;;  %4994 = vlog2.f32 %v3134_v59  ;;  %v2561_v29 = vmax.f32 %v2497_v39, 1e-07  ;;  %v3321_v6 = vsub.f32 0.0, %v3242_v30 }
 0x3b5   : > { %v8434_v22 = vsel %vm2871_vm14, %v2999_v7, %v3319_v58  ;;  %vm2875_vm2 = vcmp.gt.f32.partialorder %v8391_v38, 0.5  ;;  %v2562_v63 = vmax.f32 %v2498_v11, 1e-07  ;;  %v2435_v42 = vadd.f32 %v7517_v9, %v2346_v31  ;;  %v10298_v7 = vld [vmem:[#allocation99_spill] sm:$0xff] }
 0x3b6   : > { %v8440_v49 = vsel %vm2872_vm15, %v3000_v8, %v3320_v5  ;;  %v3322_v27 = vsub.f32 0.0, %v3244_v60  ;;  %4996 = vrcp.f32 %v2561_v29  ;;  %v2436_v15 = vadd.f32 %v7520_v61, %v2346_v31  ;;  %v10299_v8 = vld [vmem:[#allocation102_spill] sm:$0xff]  ;;  %v10300_v60 = vld [vmem:[#allocation101_spill] sm:$0xff] }
 0x3b7   : > { %v8445_v54 = vsel %vm2873_vm0, %v3001_v0, %v3321_v6  ;;  %vm2876_vm3 = vcmp.gt.f32.partialorder %v8395_v4, 0.5  ;;  %4998 = vrcp.f32 %v2562_v63  ;;  %v2499_v56 = vsub.f32 %v2435_v42, %v10298_v7  ;;  %v10301_v42 = vld [vmem:[#allocation8_spill] sm:$0xff] }
 0x3b8   : > { %v2437_v3 = vadd.f32 %v7517_v9, %v2351_v16  ;;  %v8452_v10 = vsel %vm2874_vm1, %v3002_v50, %v3322_v27  ;;  %vm2877_vm4 = vcmp.gt.f32.partialorder %v8399_v51, 0.5  ;;  %v2500_v59 = vsub.f32 %v2436_v15, %v10299_v8 }
 0x3b9   : > { %v2438_v31 = vadd.f32 %v7520_v61, %v2351_v16  ;;  %v2439_v41 = vadd.f32 %v7517_v9, %v2356_v36  ;;  %v4985_v0 = vpop.eup %4984  ;;  %v4706_v39 = vadd.f32 -0.5, %v8413_v52  ;;  %v2563_v19 = vmax.f32 %v2499_v56, 1e-07 }
 0x3ba   : > { %v2501_v58 = vsub.f32 %v2437_v3, %v8363_v44  ;;  %v2440_v30 = vadd.f32 %v7520_v61, %v2356_v36  ;;  %v4987_v11 = vpop.eup %4986  ;;  %v3246_v28 = vmul.f32 0.6931472, %v4985_v0  ;;  %v2564_v50 = vmax.f32 %v2500_v59, 1e-07 }
 0x3bb   : > { %v2502_v5 = vsub.f32 %v2438_v31, %v8367_v13  ;;  %v2503_v29 = vsub.f32 %v2439_v41, %v10300_v60  ;;  %v4989_v6 = vpop.eup %4988  ;;  %v2687_v16 = vmul.f32 %v4987_v11, %v10281_v24  ;;  %5000 = vrcp.f32 %v2563_v19 }
 0x3bc   : > { %v2565_v63 = vmax.f32 %v2501_v58, 1e-07  ;;  %v2504_v27 = vsub.f32 %v2440_v30, %v10301_v42  ;;  %v4991_v15 = vpop.eup %4990  ;;  %v3248_v56 = vmul.f32 0.6931472, %v4989_v6  ;;  %v3323_v9 = vsub.f32 0.0, %v3246_v28 }
 0x3bd   : > { %5002 = vrcp.f32 %v2564_v50  ;;  %v2566_v3 = vmax.f32 %v2502_v5, 1e-07  ;;  %v4993_v36 = vpop.eup %4992  ;;  %v3250_v61 = vmul.f32 0.6931472, %v4991_v15  ;;  %v2751_v0 = vmax.f32 %v2687_v16, 1e-07 }
 0x3be   : > { %5004 = vrcp.f32 %v2565_v63  ;;  %vm9631_vm5 = vcmask 0   ;;  %v4995_v59 = vpop.eup %4994  ;;  %v3324_v31 = vsub.f32 0.0, %v3248_v56  ;;  %v8468_v24 = vsel %vm2875_vm2, %v8418_v33, %v3323_v9 }
 0x3bf   : > { %v2688_v41 = vmul.f32 %v4993_v36, %v10284_v40  ;;  %5006 = vrcp.f32 %v2566_v3  ;;  %v3005_v19 = vmul.f32 0.83811957, %v8424_v37  ;;  %v3252_v58 = vmul.f32 0.6931472, %v4995_v59 }
 0x3c0   : > { %v3325_v30 = vsub.f32 0.0, %v3250_v61  ;;  %v8472_v11 = vmin.f32 %v2751_v0, 1.0  ;;  %v4997_v28 = vpop.eup %4996  ;;  %v8477_v50 = vsel %vm2876_vm3, %v8420_v14, %v3324_v31  ;;  %vm2878_vm6 = vcmp.gt.f32.partialorder %v8413_v52, 0.5 }
 0x3c1   : > { %v2752_v38 = vmax.f32 %v2688_v41, 1e-07  ;;  %v4999_v9 = vpop.eup %4998  ;;  %v3006_v33 = vmul.f32 0.83811957, %v4706_v39  ;;  %v3326_v5 = vsub.f32 0.0, %v3252_v58  ;;  %v5114_v61 = vmov 0.0  }
 0x3c2   : > { %v8482_v40 = vsel %vm2877_vm4, %v3005_v19, %v3325_v30  ;;  %v2567_v37 = vmax.f32 %v2503_v29, 1e-07  ;;  %348 = vst.msk [vmem:[#allocation2] sm:$0x1] %vm9631_vm5, %v5114_v61  ;;  %v3071_v4 = vsub.f32 1.0, %v8472_v11  ;;  %v2689_v14 = vmul.f32 %v4997_v28, %v8349_v43 }
 0x3c3   : > { %v8485_v6 = vmin.f32 %v2752_v38, 1.0  ;;  %v2690_v52 = vmul.f32 %v4999_v9, %v8357_v18  ;;  %v8490_v16 = vsel %vm2878_vm6, %v3006_v33, %v3326_v5  ;;  %v2568_v39 = vmax.f32 %v2504_v27, 1e-07 }
 0x3c4   : > { %v3135_v51 = vmax.f32 %v3071_v4, 1e-07  ;;  %v2753_v56 = vmax.f32 %v2689_v14, 1e-07  ;;  %5008 = vrcp.f32 %v2567_v37  ;;  %vm2879_vm7 = vcmp.gt.f32.partialorder %v8472_v11, 0.5 }
 0x3c5   : > { %v3072_v63 = vsub.f32 1.0, %v8485_v6  ;;  %v5001_v15 = vpop.eup %5000  ;;  %v2754_v29 = vmax.f32 %v2690_v52, 1e-07  ;;  %v4707_v52 = vadd.f32 -0.5, %v8472_v11  ;;  %vm2880_vm8 = vcmp.gt.f32.partialorder %v8485_v6, 0.5 }
 0x3c6   : > { %5010 = vlog2.f32 %v3135_v51  ;;  %v2691_v0 = vmul.f32 %v5001_v15, %v10298_v7  ;;  %v8494_v31 = vmin.f32 %v2753_v56, 1.0  ;;  %v4708_v56 = vadd.f32 -0.5, %v8485_v6 }
 0x3c7   : > { %v5003_v3 = vpop.eup %5002  ;;  %v3136_v36 = vmax.f32 %v3072_v63, 1e-07  ;;  %v8496_v43 = vmin.f32 %v2754_v29, 1.0  ;;  %5012 = vrcp.f32 %v2568_v39 }
 0x3c8   : > { %v5005_v59 = vpop.eup %5004  ;;  %v2692_v18 = vmul.f32 %v5003_v3, %v10299_v8  ;;  %v2755_v41 = vmax.f32 %v2691_v0, 1e-07  ;;  %v3073_v58 = vsub.f32 1.0, %v8494_v31  ;;  %vm2881_vm9 = vcmp.gt.f32.partialorder %v8494_v31, 0.5 }
 0x3c9   : > { %v5007_v27 = vpop.eup %5006  ;;  %5014 = vlog2.f32 %v3136_v36  ;;  %v2693_v19 = vmul.f32 %v5005_v59, %v8363_v44  ;;  %v3074_v30 = vsub.f32 1.0, %v8496_v43  ;;  %v3007_v59 = vmul.f32 0.83811957, %v4707_v52 }
 0x3ca   : > { %v2756_v28 = vmax.f32 %v2692_v18, 1e-07  ;;  %v8502_v38 = vmin.f32 %v2755_v41, 1.0  ;;  %v2694_v7 = vmul.f32 %v5007_v27, %v8367_v13  ;;  %v3137_v33 = vmax.f32 %v3073_v58, 1e-07 }
 0x3cb   : > { %v2757_v9 = vmax.f32 %v2693_v19, 1e-07  ;;  %v3138_v5 = vmax.f32 %v3074_v30, 1e-07  ;;  %vm2882_vm10 = vcmp.gt.f32.partialorder %v8496_v43, 0.5 }
 0x3cc   : > { %v8505_v37 = vmin.f32 %v2756_v28, 1.0  ;;  %v3075_v8 = vsub.f32 1.0, %v8502_v38  ;;  %v2758_v61 = vmax.f32 %v2694_v7, 1e-07  ;;  %5016 = vlog2.f32 %v3137_v33 }
 0x3cd   : > { %v8509_v4 = vmin.f32 %v2757_v9, 1.0  ;;  %5018 = vlog2.f32 %v3138_v5  ;;  %v3008_v28 = vmul.f32 0.83811957, %v4708_v56  ;;  %v4711_v6 = vadd.f32 -0.5, %v8502_v38 }
 0x3ce   : > { %v3076_v44 = vsub.f32 1.0, %v8505_v37  ;;  %v5009_v14 = vpop.eup %5008  ;;  %v3139_v39 = vmax.f32 %v3075_v8, 1e-07  ;;  %v8512_v63 = vmin.f32 %v2758_v61, 1.0  ;;  %v4709_v61 = vadd.f32 -0.5, %v8494_v31 }
 0x3cf   : > { %v3077_v36 = vsub.f32 1.0, %v8509_v4  ;;  %v2695_v41 = vmul.f32 %v5009_v14, %v10300_v60  ;;  %vm2883_vm11 = vcmp.gt.f32.partialorder %v8502_v38, 0.5  ;;  %vm2884_vm12 = vcmp.gt.f32.partialorder %v8505_v37, 0.5 }
 0x3d0   : > { %v5011_v13 = vpop.eup %5010  ;;  %v3140_v51 = vmax.f32 %v3076_v44, 1e-07  ;;  %5020 = vlog2.f32 %v3139_v39  ;;  %v3078_v0 = vsub.f32 1.0, %v8512_v63  ;;  %v4710_v44 = vadd.f32 -0.5, %v8496_v43 }
 0x3d1   : > { %v5013_v15 = vpop.eup %5012  ;;  %v3254_v29 = vmul.f32 0.6931472, %v5011_v13  ;;  %v3141_v19 = vmax.f32 %v3077_v36, 1e-07  ;;  %v2759_v33 = vmax.f32 %v2695_v41, 1e-07 }
 0x3d2   : > { %5022 = vlog2.f32 %v3140_v51  ;;  %v3142_v58 = vmax.f32 %v3078_v0, 1e-07  ;;  %v2696_v30 = vmul.f32 %v5013_v15, %v10301_v42  ;;  %v3009_v56 = vmul.f32 0.83811957, %v4709_v61 }
 0x3d3   : > { %v5015_v3 = vpop.eup %5014  ;;  %v3327_v27 = vsub.f32 0.0, %v3254_v29  ;;  %5024 = vlog2.f32 %v3141_v19  ;;  %v2823_v60 = vmin.f32 %v2759_v33, 1.0  ;;  %vm2885_vm13 = vcmp.gt.f32.partialorder %v8509_v4, 0.5 }
 0x3d4   : > { %v3256_v18 = vmul.f32 0.6931472, %v5015_v3  ;;  %v2760_v5 = vmax.f32 %v2696_v30, 1e-07  ;;  %5026 = vlog2.f32 %v3142_v58  ;;  %v4712_v3 = vadd.f32 -0.5, %v8505_v37 }
 0x3d5   : > { %v8520_v9 = vsel %vm2879_vm7, %v3007_v59, %v3327_v27  ;;  %v3079_v39 = vsub.f32 1.0, %v2823_v60  ;;  %v3010_v59 = vmul.f32 0.83811957, %v4710_v44  ;;  %v3011_v30 = vmul.f32 0.83811957, %v4711_v6 }
 0x3d6   : > { %v3328_v7 = vsub.f32 0.0, %v3256_v18  ;;  %v5017_v11 = vpop.eup %5016  ;;  %v2824_v14 = vmin.f32 %v2760_v5, 1.0  ;;  %v4713_v5 = vadd.f32 -0.5, %v8509_v4  ;;  %vm2886_vm14 = vcmp.gt.f32.partialorder %v8512_v63, 0.5 }
 0x3d7   : > { %v5019_v42 = vpop.eup %5018  ;;  %v3258_v52 = vmul.f32 0.6931472, %v5017_v11  ;;  %v3143_v36 = vmax.f32 %v3079_v39, 1e-07  ;;  %v4714_v11 = vadd.f32 -0.5, %v8512_v63  ;;  %vm2887_vm15 = vcmp.gt.f32.partialorder %v2823_v60, 0.5 }
 0x3d8   : > { %v8523_v8 = vsel %vm2880_vm8, %v3008_v28, %v3328_v7  ;;  %v3260_v13 = vmul.f32 0.6931472, %v5019_v42  ;;  %v3080_v51 = vsub.f32 1.0, %v2824_v14  ;;  %v3012_v7 = vmul.f32 0.83811957, %v4712_v3  ;;  %v10302_v63 = vld [vmem:[#allocation41_spill] sm:$0xff] (!%p5230_p11) }
 0x3d9   : > { %v3329_v29 = vsub.f32 0.0, %v3258_v52  ;;  %5028 = vlog2.f32 %v3143_v36  ;;  %v3013_v38 = vmul.f32 0.83811957, %v4713_v5  ;;  %v3014_v6 = vmul.f32 0.83811957, %v4714_v11  ;;  %v10304_v5 = vld [vmem:[#allocation44_spill] sm:$0xff] (!%p5230_p11) }
 0x3da   : > { %v5021_v15 = vpop.eup %5020  ;;  %v3330_v18 = vsub.f32 0.0, %v3260_v13  ;;  %v3144_v31 = vmax.f32 %v3080_v51, 1e-07  ;;  %v4716_v3 = vadd.f32 -0.5, %v2824_v14  ;;  %vm2888_vm0 = vcmp.gt.f32.partialorder %v2824_v14, 0.5  ;;  %v10305_v14 = vld [vmem:[#allocation25_spill] sm:$0xff] (!%p5230_p11) }
 0x3db   : > { %v3262_v27 = vmul.f32 0.6931472, %v5021_v15  ;;  %v8531_v41 = vsel %vm2881_vm9, %v3009_v56, %v3329_v29  ;;  %v4715_v56 = vadd.f32 -0.5, %v2823_v60  ;;  %v3412_v60 = vadd.f32 (!%p5230_p11), %v7782_v46, %v7776_v25  ;;  %v10306_v11 = vld [vmem:[#allocation114_spill] sm:$0xff] (!%p5230_p11) }
 0x3dc   : > { %v5023_v0 = vpop.eup %5022  ;;  %v8533_v58 = vsel %vm2882_vm10, %v3010_v59, %v3330_v18  ;;  %5030 = vlog2.f32 %v3144_v31 }
 0x3dd   : > { %v3264_v19 = vmul.f32 0.6931472, %v5023_v0  ;;  %v3331_v28 = vsub.f32 0.0, %v3262_v27  ;;  %v5025_v43 = vpop.eup %5024  ;;  %v3015_v59 = vmul.f32 0.83811957, %v4715_v56  ;;  %v3430_v56 = vadd.f32 (!%p5230_p11), %v7957_v2, %v7952_v62 }
 0x3de   : > { %v5027_v44 = vpop.eup %5026  ;;  %v3266_v52 = vmul.f32 0.6931472, %v5025_v43  ;;  %v3418_v43 = vadd.f32 (!%p5230_p11), %v10304_v5, %v7814_v32  ;;  %v10318_v5 = vld [vmem:[#allocation65_spill] sm:$0xff] (!%p5230_p11) }
 0x3df   : > { %v3332_v33 = vsub.f32 0.0, %v3264_v19  ;;  %v8538_v61 = vsel %vm2883_vm11, %v3011_v30, %v3331_v28  ;;  %v3268_v39 = vmul.f32 0.6931472, %v5027_v44  ;;  %v3016_v19 = vmul.f32 0.83811957, %v4716_v3  ;;  %v10303_v28 = vld [vmem:[#allocation42_spill] sm:$0xff] (!%p5230_p11) }
 0x3e0   : > { %v3333_v13 = vsub.f32 0.0, %v3266_v52  ;;  %v3421_v44 = vadd.f32 (!%p5230_p11), %v10306_v11, %v10305_v14  ;;  %v10307_v52 = vld [vmem:[#allocation45_spill] sm:$0xff] (!%p5230_p11)  ;;  %v3436_v3 = vadd.f32 (!%p5230_p11), %v7984_v55, %v7975_v34  ;;  %v10319_v14 = vld [vmem:[#allocation66_spill] sm:$0xff] (!%p5230_p11) }
 0x3e1   : > { %v8541_v42 = vsel %vm2884_vm12, %v3012_v7, %v3332_v33  ;;  %v3334_v51 = vsub.f32 0.0, %v3268_v39  ;;  %v3409_v7 = vadd.f32 (!%p5230_p11), %v10303_v28, %v10302_v63  ;;  %v3415_v33 = vadd.f32 (!%p5230_p11), %v7799_v21, %v7794_v53  ;;  %v10308_v39 = vld [vmem:[#allocation47_spill] sm:$0xff] (!%p5230_p11)  ;;  %v10315_v28 = vld [vmem:[#allocation116_spill] sm:$0xff] (!%p5230_p11)  ;;  %v10320_v11 = vld [vmem:[#allocation57_spill] sm:$0xff] (!%p5230_p11) }
 0x3e2   : > { %v8545_v15 = vsel %vm2885_vm13, %v3013_v38, %v3333_v13  ;;  %v3424_v38 = vadd.f32 (!%p5230_p11), %v10308_v39, %v10307_v52  ;;  %v10309_v13 = vld [vmem:[#allocation48_spill] sm:$0xff] (!%p5230_p11)  ;;  %v3460_v52 = vadd.f32 (!%p5230_p11), %v8262_v26, %v8255_v35  ;;  %v3463_v39 = vadd.f32 (!%p5230_p11), %v8273_v1, %v8267_v12 }
 0x3e3   : > { %v8547_v37 = vsel %vm2886_vm14, %v3014_v6, %v3334_v51  ;;  %v5029_v29 = vpop.eup %5028  ;;  %3410 = vadd.xlane.f32.xlu0 (!%p5230_p11), %v3409_v7  ;;  %3416 = vadd.xlane.f32.xlu1 (!%p5230_p11), %v3415_v33  ;;  %v10310_v6 = vld [vmem:[#allocation50_spill] sm:$0xff] (!%p5230_p11)  ;;  %v10316_v7 = vld [vmem:[#allocation55_spill] sm:$0xff] (!%p5230_p11) }
 0x3e4   : > { %v3270_v36 = vmul.f32 0.6931472, %v5029_v29  ;;  %v3427_v51 = vadd.f32 (!%p5230_p11), %v10310_v6, %v10309_v13  ;;  %v3433_v29 = vadd.f32 (!%p5230_p11), %v7966_v57, %v7962_v17  ;;  %v3451_v33 = vadd.f32 (!%p5230_p11), %v10316_v7, %v10315_v28  ;;  %v10322_v13 = vld [vmem:[#allocation59_spill] sm:$0xff] (!%p5230_p11) }
 0x3e5   : > { %3408 = sbr.rel (%p5230_p11) target bundleno = 1220 (0x4c4), region = 40  ;;  %v3490_v28 = vadd.f32 (!%p5230_p11), %v8523_v8, %v8520_v9  ;;  %v3493_v7 = vadd.f32 (!%p5230_p11), %v8533_v58, %v8531_v41 }
 0x3e6   : > { %v5031_v0 = vpop.eup %5030  ;;  %v3335_v27 = vsub.f32 0.0, %v3270_v36  ;;  %v10311_v36 = vld [vmem:[#allocation51_spill] sm:$0xff] (!%p5230_p11) }
 0x3e7   : > { %v3272_v18 = vmul.f32 0.6931472, %v5031_v0  ;;  %3413 = vadd.xlane.f32.xlu0 (!%p5230_p11), %v3412_v60  ;;  %3419 = vadd.xlane.f32.xlu1 (!%p5230_p11), %v3418_v43  ;;  %v3439_v0 = vadd.f32 (!%p5230_p11), %v10311_v36, %v8001_v20  ;;  %v10317_v60 = vld [vmem:[#allocation56_spill] sm:$0xff] (!%p5230_p11) }
 0x3e8   : > { %v8549_v4 = vsel %vm2887_vm15, %v3015_v59, %v3335_v27  ;;  %v10312_v59 = vld [vmem:[#allocation53_spill] sm:$0xff] (!%p5230_p11)  ;;  %v3454_v43 = vadd.f32 (!%p5230_p11), %v10318_v5, %v10317_v60  ;;  %v10326_v36 = vld [vmem:[#allocation68_spill] sm:$0xff] (!%p5230_p11)  ;;  %v3499_v60 = vadd.f32 (!%p5230_p11), %v8547_v37, %v8545_v15 }
 0x3e9   : > { %v3336_v31 = vsub.f32 0.0, %v3272_v18  ;;  %v10313_v18 = vld [vmem:[#allocation54_spill] sm:$0xff] (!%p5230_p11) }
 0x3ea   : > { %v3442_v27 = vadd.f32 (!%p5230_p11), %v10313_v18, %v10312_v59  ;;  %v10327_v59 = vld [vmem:[#allocation62_spill] sm:$0xff] (!%p5230_p11) }
 0x3eb   : > { %v8551_v30 = vsel %vm2888_vm0, %v3016_v19, %v3336_v31  ;;  %3422 = vadd.xlane.f32.xlu0 (!%p5230_p11), %v3421_v44  ;;  %3425 = vadd.xlane.f32.xlu1 (!%p5230_p11), %v3424_v38  ;;  %v3445_v19 = vadd.f32 (!%p5230_p11), %v8095_v48, %v8086_v45  ;;  %v10314_v31 = vld [vmem:[#allocation113_spill] sm:$0xff] (!%p5230_p11)  ;;  %v3457_v44 = vadd.f32 (!%p5230_p11), %v10320_v11, %v10319_v14  ;;  %v10321_v38 = vld [vmem:[#allocation58_spill] sm:$0xff] (!%p5230_p11) }
 0x3ec   : > { %v3448_v63 = vadd.f32 %v10314_v31, %v8102_v47  ;;  %v3466_v6 = vadd.f32 %v10322_v13, %v10321_v38  ;;  %v3475_v18 = vadd.f32 %v10327_v59, %v8403_v23  ;;  %v3484_v31 = vadd.f32 %v8477_v50, %v8468_v24 }
 0x3ed   : > { %v3502_v5 = vadd.f32 %v8551_v30, %v8549_v4 }
 0x3ef   : > { %3428 = vadd.xlane.f32.xlu0 %v3427_v51  ;;  %3431 = vadd.xlane.f32.xlu1 %v3430_v56  ;;  %v10323_v51 = vld [vmem:[#allocation67_spill] sm:$0xff]  ;;  %v10324_v56 = vld [vmem:[#allocation60_spill] sm:$0xff] }
 0x3f3   : > { %3434 = vadd.xlane.f32.xlu0 %v3433_v29  ;;  %3437 = vadd.xlane.f32.xlu1 %v3436_v3  ;;  %v3469_v29 = vadd.f32 %v10324_v56, %v10323_v51  ;;  %v10325_v3 = vld [vmem:[#allocation61_spill] sm:$0xff] }
 0x3f7   : > { %3440 = vadd.xlane.f32.xlu0 %v3439_v0  ;;  %3443 = vadd.xlane.f32.xlu1 %v3442_v27  ;;  %v3472_v0 = vadd.f32 %v10326_v36, %v10325_v3  ;;  %v3478_v27 = vadd.f32 %v8440_v49, %v8434_v22 }
 0x3fb   : > { %3446 = vadd.xlane.f32.xlu0 %v3445_v19  ;;  %3449 = vadd.xlane.f32.xlu1 %v3448_v63  ;;  %v3481_v19 = vadd.f32 %v8452_v10, %v8445_v54  ;;  %v3487_v63 = vadd.f32 %v8490_v16, %v8482_v40 }
 0x3ff   : > { %3452 = vadd.xlane.f32.xlu0 %v3451_v33  ;;  %3455 = vadd.xlane.f32.xlu1 %v3454_v43  ;;  %v3496_v33 = vadd.f32 %v8541_v42, %v8538_v61 }
 0x403   : > { %3458 = vadd.xlane.f32.xlu0 %v3457_v44  ;;  %3461 = vadd.xlane.f32.xlu1 %v3460_v52 }
 0x407   : > { %3464 = vadd.xlane.f32.xlu0 %v3463_v39  ;;  %3467 = vadd.xlane.f32.xlu1 %v3466_v6 }
 0x40b   : > { %3470 = vadd.xlane.f32.xlu0 %v3469_v29  ;;  %3473 = vadd.xlane.f32.xlu1 %v3472_v0 }
 0x40f   : > { %3476 = vadd.xlane.f32.xlu0 %v3475_v18  ;;  %3479 = vadd.xlane.f32.xlu1 %v3478_v27 }
 0x413   : > { %3482 = vadd.xlane.f32.xlu0 %v3481_v19  ;;  %3485 = vadd.xlane.f32.xlu1 %v3484_v31 }
 0x417   : > { %3488 = vadd.xlane.f32.xlu0 %v3487_v63  ;;  %3491 = vadd.xlane.f32.xlu1 %v3490_v28 }
 0x41b   : > { %3494 = vadd.xlane.f32.xlu0 %v3493_v7  ;;  %3497 = vadd.xlane.f32.xlu1 %v3496_v33 }
 0x41f   : > { %3500 = vadd.xlane.f32.xlu0 %v3499_v60  ;;  %3503 = vadd.xlane.f32.xlu1 %v3502_v5 }
 0x470   : > { %v3411_v43 = vpop.xlane.xlu0 %3410  ;;  %v3417_v14 = vpop.xlane.xlu1 %3416 }
 0x474   : > { %v3414_v11 = vpop.xlane.xlu0 %3413  ;;  %v3420_v44 = vpop.xlane.xlu1 %3419 }
 0x475   : > { %v3505_v52 = vadd.f32 %v3414_v11, %v3411_v43 }
 0x477   : > { %v3506_v39 = vadd.f32 %v3505_v52, %v3417_v14 }
 0x478   : > { %v3423_v38 = vpop.xlane.xlu0 %3422  ;;  %v3426_v13 = vpop.xlane.xlu1 %3425 }
 0x479   : > { %v3507_v6 = vadd.f32 %v3506_v39, %v3420_v44 }
 0x47b   : > { %v3508_v51 = vadd.f32 %v3507_v6, %v3423_v38 }
 0x47c   : > { %v3429_v56 = vpop.xlane.xlu0 %3428  ;;  %v3432_v29 = vpop.xlane.xlu1 %3431 }
 0x47d   : > { %v3509_v3 = vadd.f32 %v3508_v51, %v3426_v13 }
 0x47f   : > { %v3510_v36 = vadd.f32 %v3509_v3, %v3429_v56 }
 0x480   : > { %v3435_v0 = vpop.xlane.xlu0 %3434  ;;  %v3438_v59 = vpop.xlane.xlu1 %3437 }
 0x481   : > { %v3511_v18 = vadd.f32 %v3510_v36, %v3432_v29 }
 0x483   : > { %v3512_v27 = vadd.f32 %v3511_v18, %v3435_v0 }
 0x484   : > { %v3441_v19 = vpop.xlane.xlu0 %3440  ;;  %v3444_v31 = vpop.xlane.xlu1 %3443 }
 0x485   : > { %v3513_v63 = vadd.f32 %v3512_v27, %v3438_v59 }
 0x487   : > { %v3514_v28 = vadd.f32 %v3513_v63, %v3441_v19 }
 0x488   : > { %v3447_v7 = vpop.xlane.xlu0 %3446  ;;  %v3450_v33 = vpop.xlane.xlu1 %3449 }
 0x489   : > { %v3515_v60 = vadd.f32 %v3514_v28, %v3444_v31 }
 0x48b   : > { %v3516_v5 = vadd.f32 %v3515_v60, %v3447_v7 }
 0x48c   : > { %v3453_v43 = vpop.xlane.xlu0 %3452  ;;  %v3456_v14 = vpop.xlane.xlu1 %3455 }
 0x48d   : > { %v3517_v11 = vadd.f32 %v3516_v5, %v3450_v33 }
 0x48f   : > { %v3518_v44 = vadd.f32 %v3517_v11, %v3453_v43 }
 0x490   : > { %v3459_v52 = vpop.xlane.xlu0 %3458  ;;  %v3462_v39 = vpop.xlane.xlu1 %3461 }
 0x491   : > { %v3519_v38 = vadd.f32 %v3518_v44, %v3456_v14 }
 0x493   : > { %v3520_v13 = vadd.f32 %v3519_v38, %v3459_v52 }
 0x494   : > { %v3465_v6 = vpop.xlane.xlu0 %3464  ;;  %v3468_v51 = vpop.xlane.xlu1 %3467 }
 0x495   : > { %v3521_v56 = vadd.f32 %v3520_v13, %v3462_v39 }
 0x497   : > { %v3522_v29 = vadd.f32 %v3521_v56, %v3465_v6 }
 0x498   : > { %v3471_v3 = vpop.xlane.xlu0 %3470  ;;  %v3474_v36 = vpop.xlane.xlu1 %3473 }
 0x499   : > { %v3523_v0 = vadd.f32 %v3522_v29, %v3468_v51 }
 0x49b   : > { %v3524_v59 = vadd.f32 %v3523_v0, %v3471_v3 }
 0x49c   : > { %v3477_v18 = vpop.xlane.xlu0 %3476  ;;  %v3480_v27 = vpop.xlane.xlu1 %3479 }
 0x49d   : > { %v3525_v19 = vadd.f32 %v3524_v59, %v3474_v36 }
 0x49f   : > { %v3526_v31 = vadd.f32 %v3525_v19, %v3477_v18 }
 0x4a0   : > { %v3483_v63 = vpop.xlane.xlu0 %3482  ;;  %v3486_v28 = vpop.xlane.xlu1 %3485 }
 0x4a1   : > { %v3527_v7 = vadd.f32 %v3526_v31, %v3480_v27  ;;  %v3542_v27 = vld [vmem:[#allocation2] sm:$0x1] }
 0x4a3   : > { %v3528_v33 = vadd.f32 %v3527_v7, %v3483_v63 }
 0x4a4   : > { %v3489_v60 = vpop.xlane.xlu0 %3488  ;;  %v3492_v5 = vpop.xlane.xlu1 %3491 }
 0x4a5   : > { %v3529_v43 = vadd.f32 %v3528_v33, %v3486_v28 }
 0x4a7   : > { %v3530_v14 = vadd.f32 %v3529_v43, %v3489_v60 }
 0x4a8   : > { %v3495_v11 = vpop.xlane.xlu0 %3494  ;;  %v3498_v44 = vpop.xlane.xlu1 %3497 }
 0x4a9   : > { %v3531_v52 = vadd.f32 %v3530_v14, %v3492_v5 }
 0x4ab   : > { %v3532_v39 = vadd.f32 %v3531_v52, %v3495_v11 }
 0x4ac   : > { %v3501_v38 = vpop.xlane.xlu0 %3500  ;;  %v3504_v6 = vpop.xlane.xlu1 %3503 }
 0x4ad   : > { %v3533_v13 = vadd.f32 %v3532_v39, %v3498_v44 }
 0x4af   : > { %v3534_v51 = vadd.f32 %v3533_v13, %v3501_v38 }
 0x4b1   : > { %v3535_v56 = vadd.f32 %v3534_v51, %v3504_v6 }
 0x4b3   : > { %v3536_v29 = vrot.slane %v3535_v56, 4 }
 0x4b5   : > { %v3537_v3 = vadd.f32 %v3536_v29, %v3535_v56 }
 0x4b7   : > { %v3538_v36 = vrot.slane %v3537_v3, 2 }
 0x4b9   : > { %v3539_v0 = vadd.f32 %v3538_v36, %v3537_v3 }
 0x4bb   : > { %v3540_v59 = vrot.slane %v3539_v0, 1 }
 0x4bd   : > { %v3541_v18 = vadd.f32 %v3540_v59, %v3539_v0 }
 0x4bf   : > { %v3543_v19 = vmul.f32 0.004166667, %v3541_v18 }
 0x4c1   : > { %v3544_v31 = vadd.f32 %v3543_v19, %v3542_v27 }
 0x4c3   : > { %3546 = vst.msk [vmem:[#allocation2] sm:$0x1] %vm9631_vm5, %v3544_v31 }
 0x4c4 PF: > { %p3548_p0 = pnand %p5211_p9, %p342_p8 }
 0x4c5   : > { %s4717_s13 = sshll.u32 (!%p3548_p0), %s5189_s15, 8  ;;  %s4718_s14 = sshll.u32 (!%p3548_p0), %s5192_s16, 8  ;;  %v10328_v63 = vlaneseq (!%p3548_p0)  ;;  %v10329_v7 = vld [vmem:[#allocation13_spill] sm:$0xff] (!%p3548_p0)  ;;  %v10331_v56 = vld [vmem:[#allocation42_spill] sm:$0xff] (!%p3548_p0) }
 0x4c6   : > { %3551 = sbr.rel (%p3548_p0) target bundleno = 1520 (0x5f0), region = 44  ;;  %v3556_v33 = vadd.s32 (!%p3548_p0), 16, %v10329_v7  ;;  %v8628_v60 = vstv (!%p3548_p0), %s4717_s13  ;;  %v3623_v5 = vstv (!%p3548_p0), %s4718_s14  ;;  %v3555_v43 = vadd.s32 (!%p3548_p0), 8, %v10329_v7  ;;  %v10330_v6 = vld [vmem:[#allocation41_spill] sm:$0xff] (!%p3548_p0) }
 0x4c7   : > { %v3621_v28 = vand.u32 (!%p3548_p0), 127, %v10328_v63  ;;  %v3587_v14 = vadd.s32 (!%p3548_p0), %v8628_v60, %v10329_v7  ;;  %v3557_v13 = vadd.s32 (!%p3548_p0), 24, %v10329_v7  ;;  %v3558_v3 = vadd.s32 (!%p3548_p0), 32, %v10329_v7 }
 0x4c8   : > { %v3589_v52 = vadd.s32 (!%p3548_p0), %v8628_v60, %v3556_v33  ;;  %v3588_v38 = vadd.s32 (!%p3548_p0), %v8628_v60, %v3555_v43  ;;  %v3559_v18 = vadd.s32 (!%p3548_p0), 40, %v10329_v7  ;;  %v3560_v63 = vadd.s32 (!%p3548_p0), 48, %v10329_v7 }
 0x4c9   : > { %v3622_v11 = vadd.s32 (!%p3548_p0), 128, %v3621_v28  ;;  %v8633_v44 = vadd.s32 (!%p3548_p0), %v3623_v5, %v3621_v28  ;;  %vm3690_vm2 = vcmp.lt.s32.totalorder (!%p3548_p0), %v3587_v14, 16  ;;  %v3590_v0 = vadd.s32 (!%p3548_p0), %v8628_v60, %v3557_v13 }
 0x4ca   : > { %vm3692_vm10 = vcmp.lt.s32.totalorder (!%p3548_p0), %v3589_v52, 16  ;;  %v3591_v31 = vadd.s32 (!%p3548_p0), %v8628_v60, %v3558_v3  ;;  %v3561_v33 = vadd.s32 (!%p3548_p0), 56, %v10329_v7  ;;  %v3562_v43 = vadd.s32 (!%p3548_p0), 64, %v10329_v7 }
 0x4cb   : > { %v8636_v39 = vadd.s32 (!%p3548_p0), %v3623_v5, %v3622_v11  ;;  %vm3626_vm1 = vcmp.lt.s32.totalorder (!%p3548_p0), %v3587_v14, %v8633_v44  ;;  %vm3850_vm3 = vcmp.lt.s32.totalorder (!%p3548_p0), %v8633_v44, 16  ;;  %vm3630_vm9 = vcmp.lt.s32.totalorder (!%p3548_p0), %v3589_v52, %v8633_v44  ;;  %v10332_v11 = vld [vmem:[#allocation44_spill] sm:$0xff] (!%p3548_p0) }
 0x4cc   : > { %vm3786_vm4 = vmand (!%p3548_p0), %vm3626_vm1, %vm3690_vm2  ;;  %vm3628_vm0 = vcmp.lt.s32.totalorder (!%p3548_p0), %v3588_v38, %v8633_v44  ;;  %vm3691_vm1 = vcmp.lt.s32.totalorder (!%p3548_p0), %v3588_v38, 16  ;;  %v3564_v13 = vadd.s32 (!%p3548_p0), 80, %v10329_v7 }
 0x4cd   : > { %vm3627_vm6 = vcmp.lt.s32.totalorder %v3587_v14, %v8636_v39  ;;  %vm3851_vm7 = vcmp.lt.s32.totalorder %v8636_v39, 16  ;;  %vm3856_vm8 = vmand %vm3786_vm4, %vm3850_vm3  ;;  %vm3631_vm12 = vcmp.lt.s32.totalorder %v3589_v52, %v8636_v39  ;;  %vm3629_vm4 = vcmp.lt.s32.totalorder %v3588_v38, %v8636_v39 }
 0x4ce   : > { %vm3787_vm11 = vmand %vm3627_vm6, %vm3690_vm2  ;;  %v3920_v51 = vsel %vm3856_vm8, %v10330_v6, 0.0  ;;  %v3563_v14 = vadd.s32 72, %v10329_v7  ;;  %v8690_v38 = vadd.s32 %v8628_v60, %v3561_v33  ;;  %v3570_v6 = vadd.s32 128, %v10329_v7 }
 0x4cf   : > { %vm3857_vm13 = vmand %vm3787_vm11, %vm3851_vm7  ;;  %vm3693_vm11 = vcmp.lt.s32.totalorder %v3590_v0, 16 }
 0x4d0   : > { %v3921_v29 = vsel %vm3857_vm13, %v10331_v56, 0.0  ;;  %vm3790_vm14 = vmand %vm3630_vm9, %vm3692_vm10  ;;  %vm3633_vm13 = vcmp.lt.s32.totalorder %v3590_v0, %v8636_v39  ;;  %v8701_v56 = vadd.s32 88, %v10329_v7 }
 0x4d1   : > { %v3984_v36 = vadd.f32 %v3921_v29, %v3920_v51  ;;  %vm3791_vm15 = vmand %vm3631_vm12, %vm3692_vm10  ;;  %vm3632_vm10 = vcmp.lt.s32.totalorder %v3590_v0, %v8633_v44  ;;  %v8704_v29 = vadd.s32 96, %v10329_v7  ;;  %v8717_v0 = vadd.s32 %v8628_v60, %v3570_v6  ;;  %v10340_v6 = vld [vmem:[#allocation47_spill] sm:$0xff] }
 0x4d2   : > { %vm3860_vm2 = vmand %vm3790_vm14, %vm3850_vm3 }
 0x4d3   : > { %3985 = vadd.xlane.f32.xlu0 %v3984_v36  ;;  %vm3861_vm6 = vmand %vm3791_vm15, %vm3851_vm7  ;;  %v3924_v59 = vsel %vm3860_vm2, %v7794_v53, 0.0  ;;  %vm3694_vm2 = vcmp.lt.s32.totalorder %v3591_v31, 16  ;;  %v8714_v36 = vadd.s32 %v8628_v60, %v3563_v14 }
 0x4d4   : > { %v3925_v27 = vsel %vm3861_vm6, %v7799_v21, 0.0  ;;  %vm3788_vm8 = vmand %vm3628_vm0, %vm3691_vm1  ;;  %v3592_v21 = vadd.s32 %v8628_v60, %v3559_v18  ;;  %vm3635_vm6 = vcmp.lt.s32.totalorder %v3591_v31, %v8636_v39  ;;  %v10335_v18 = vld [vmem:[#allocation25_spill] sm:$0xff] }
 0x4d5   : > { %v3990_v19 = vadd.f32 %v3925_v27, %v3924_v59  ;;  %vm3789_vm9 = vmand %vm3629_vm4, %vm3691_vm1  ;;  %vm3634_vm1 = vcmp.lt.s32.totalorder %v3591_v31, %v8633_v44  ;;  %v3571_v59 = vadd.s32 136, %v10329_v7  ;;  %v3573_v31 = vadd.s32 152, %v10329_v7 }
 0x4d6   : > { %vm3858_vm12 = vmand %vm3788_vm8, %vm3850_vm3 }
 0x4d7   : > { %3991 = vadd.xlane.f32.xlu1 %v3990_v19  ;;  %vm3859_vm14 = vmand %vm3789_vm9, %vm3851_vm7  ;;  %v3922_v53 = vsel %vm3858_vm12, %v7776_v25, 0.0  ;;  %v3593_v25 = vadd.s32 %v8628_v60, %v3560_v63  ;;  %vm3636_vm9 = vcmp.lt.s32.totalorder %v3592_v21, %v8633_v44  ;;  %v3572_v19 = vadd.s32 144, %v10329_v7 }
 0x4d8   : > { %v3923_v28 = vsel %vm3859_vm14, %v7782_v46, 0.0  ;;  %vm3792_vm15 = vmand %vm3632_vm10, %vm3693_vm11  ;;  %vm3637_vm10 = vcmp.lt.s32.totalorder %v3592_v21, %v8636_v39  ;;  %v3574_v63 = vadd.s32 160, %v10329_v7 }
 0x4d9   : > { %v3987_v5 = vadd.f32 %v3923_v28, %v3922_v53  ;;  %vm3793_vm0 = vmand %vm3633_vm13, %vm3693_vm11  ;;  %vm3695_vm11 = vcmp.lt.s32.totalorder %v3592_v21, 16  ;;  %v10336_v53 = vld [vmem:[#allocation114_spill] sm:$0xff]  ;;  %v8756_v21 = vadd.s32 %v8628_v60, %v3571_v59 }
 0x4da   : > { %vm3862_vm4 = vmand %vm3792_vm15, %vm3850_vm3  ;;  %vm3638_vm15 = vcmp.lt.s32.totalorder %v3593_v25, %v8633_v44 }
 0x4db   : > { %3988 = vadd.xlane.f32.xlu0 %v3987_v5  ;;  %vm3863_vm8 = vmand %vm3793_vm0, %vm3851_vm7  ;;  %v3926_v46 = vsel %vm3862_vm4, %v7814_v32, 0.0  ;;  %v8698_v32 = vadd.s32 %v8628_v60, %v3562_v43  ;;  %vm3696_vm4 = vcmp.lt.s32.totalorder %v3593_v25, 16  ;;  %v10339_v43 = vld [vmem:[#allocation45_spill] sm:$0xff]  ;;  %v8832_v5 = vadd.s32 %v8628_v60, %v8701_v56 }
 0x4dc   : > { %v3927_v52 = vsel %vm3863_vm8, %v10332_v11, 0.0  ;;  %vm3794_vm12 = vmand %vm3634_vm1, %vm3694_vm2  ;;  %v8767_v11 = vadd.s32 %v8628_v60, %v3573_v31  ;;  %v10344_v31 = vld [vmem:[#allocation50_spill] sm:$0xff] }
 0x4dd   : > { %v3993_v51 = vadd.f32 %v3927_v52, %v3926_v46  ;;  %vm3795_vm13 = vmand %vm3635_vm6, %vm3694_vm2  ;;  %vm3639_vm2 = vcmp.lt.s32.totalorder %v3593_v25, %v8636_v39  ;;  %vm3640_vm6 = vcmp.lt.s32.totalorder %v8690_v38, %v8633_v44  ;;  %v8764_v46 = vadd.s32 %v8628_v60, %v3572_v19  ;;  %v10343_v25 = vld [vmem:[#allocation48_spill] sm:$0xff] }
 0x4de   : > { %vm8708_vm14 = vmand %vm3794_vm12, %vm3850_vm3  ;;  %vm3641_vm12 = vcmp.lt.s32.totalorder %v8690_v38, %v8636_v39  ;;  %v8770_v52 = vadd.s32 %v8628_v60, %v3574_v63  ;;  %v3575_v19 = vadd.s32 168, %v10329_v7 }
 0x4df   : > { %3994 = vadd.xlane.f32.xlu1 %v3993_v51  ;;  %vm3865_vm0 = vmand %vm3795_vm13, %vm3851_vm7  ;;  %v3928_v27 = vsel %vm8708_vm14, %v10335_v18, 0.0  ;;  %vm3697_vm13 = vcmp.lt.s32.totalorder %v8690_v38, 16  ;;  %vm3642_vm14 = vcmp.lt.s32.totalorder %v8698_v32, %v8633_v44 }
 0x4e0   : > { %v3929_v28 = vsel %vm3865_vm0, %v10336_v53, 0.0  ;;  %vm3796_vm1 = vmand %vm3636_vm9, %vm3695_vm11  ;;  %vm3665_vm0 = vcmp.lt.s32.totalorder %v8767_v11, %v8636_v39  ;;  %v3576_v53 = vadd.s32 176, %v10329_v7 }
 0x4e1   : > { %v3996_v33 = vadd.f32 %v3929_v28, %v3928_v27  ;;  %vm3797_vm8 = vmand %vm3637_vm10, %vm3695_vm11  ;;  %vm3645_vm11 = vcmp.lt.s32.totalorder %v8714_v36, %v8636_v39  ;;  %v8811_v27 = vadd.s32 %v8628_v60, %v3564_v13  ;;  %v3577_v28 = vadd.s32 184, %v10329_v7 }
 0x4e2   : > { %vm8745_vm9 = vmand %vm3796_vm1, %vm3850_vm3  ;;  %v3578_v13 = vadd.s32 192, %v10329_v7 }
 0x4e3   : > { %3997 = vadd.xlane.f32.xlu0 %v3996_v33  ;;  %vm3867_vm5 = vmand %vm3797_vm8, %vm3851_vm7  ;;  %v3930_v14 = vsel %vm8745_vm9, %v10339_v43, 0.0  ;;  %vm3698_vm8 = vcmp.lt.s32.totalorder %v8698_v32, 16  ;;  %v8835_v43 = vadd.s32 %v8628_v60, %v3575_v19  ;;  %v8848_v38 = vadd.s32 %v8628_v60, %v3577_v28 }
 0x4e4   : > { %v3931_v51 = vsel %vm3867_vm5, %v10340_v6, 0.0  ;;  %vm3798_vm1 = vmand %vm3638_vm15, %vm3696_vm4  ;;  %vm3644_vm5 = vcmp.lt.s32.totalorder %v8714_v36, %v8633_v44  ;;  %v8851_v56 = vadd.s32 %v8628_v60, %v3578_v13  ;;  %v8872_v19 = vadd.s32 %v8628_v60, %v8704_v29 }
 0x4e5   : > { %v3999_v3 = vadd.f32 %v3931_v51, %v3930_v14  ;;  %vm3799_vm10 = vmand %vm3639_vm2, %vm3696_vm4  ;;  %vm3699_vm2 = vcmp.lt.s32.totalorder %v8714_v36, 16  ;;  %v3579_v14 = vadd.s32 200, %v10329_v7  ;;  %v8845_v51 = vadd.s32 %v8628_v60, %v3576_v53 }
 0x4e6   : > { %vm8792_vm9 = vmand %vm3798_vm1, %vm3850_vm3  ;;  %v3582_v28 = vadd.s32 224, %v10329_v7  ;;  %v3584_v6 = vadd.s32 240, %v10329_v7 }
 0x4e7   : > { %4000 = vadd.xlane.f32.xlu1 %v3999_v3  ;;  %vm3869_vm1 = vmand %vm3799_vm10, %vm3851_vm7  ;;  %v3932_v18 = vsel %vm8792_vm9, %v10343_v25, 0.0  ;;  %v3580_v3 = vadd.s32 208, %v10329_v7  ;;  %v3581_v25 = vadd.s32 216, %v10329_v7 }
 0x4e8   : > { %v3933_v63 = vsel %vm3869_vm1, %v10344_v31, 0.0  ;;  %vm3800_vm10 = vmand %vm3640_vm6, %vm3697_vm13  ;;  %v8950_v36 = vadd.s32 %v8628_v60, %v3582_v28  ;;  %v3568_v28 = vadd.s32 112, %v10329_v7 }
 0x4e9   : > { %v4002_v33 = vadd.f32 %v3933_v63, %v3932_v18  ;;  %vm3801_vm9 = vmand %vm3641_vm12, %vm3697_vm13  ;;  %v8909_v63 = vadd.s32 %v8628_v60, %v3580_v3  ;;  %v8912_v53 = vadd.s32 %v8628_v60, %v3581_v25  ;;  %v3585_v3 = vadd.s32 248, %v10329_v7 }
 0x4ea   : > { %vm8840_vm6 = vmand %vm3800_vm10, %vm3850_vm3  ;;  %v8980_v25 = vadd.s32 %v8628_v60, %v3584_v6 }
 0x4eb   : > { %4003 = vadd.xlane.f32.xlu0 %v4002_v33  ;;  %vm3871_vm12 = vmand %vm3801_vm9, %vm3851_vm7  ;;  %v3934_v59 = vsel %vm8840_vm6, %v7952_v62, 0.0  ;;  %vm3646_vm6 = vcmp.lt.s32.totalorder %v8811_v27, %v8633_v44 }
 0x4ec   : > { %v3935_v18 = vsel %vm3871_vm12, %v7957_v2, 0.0  ;;  %vm3802_vm10 = vmand %vm3642_vm14, %vm3698_vm8  ;;  %vm10347_vm12 = vcmp.lt.s32.totalorder %v8698_v32, %v8636_v39  ;;  %v3567_v2 = vadd.s32 104, %v10329_v7  ;;  %v8901_v32 = vadd.s32 %v8628_v60, %v3579_v14 }
 0x4ed   : > { %v4005_v62 = vadd.f32 %v3935_v18, %v3934_v59  ;;  %vm3803_vm1 = vmand %vm10347_vm12, %vm3698_vm8  ;;  %vm3700_vm8 = vcmp.lt.s32.totalorder %v8811_v27, 16  ;;  %vm3648_vm12 = vcmp.lt.s32.totalorder %v8832_v5, %v8633_v44  ;;  %v3583_v14 = vadd.s32 232, %v10329_v7 }
 0x4ee   : > { %vm8890_vm9 = vmand %vm3802_vm10, %vm3850_vm3  ;;  %vm3647_vm10 = vcmp.lt.s32.totalorder %v8811_v27, %v8636_v39  ;;  %v8983_v18 = vadd.s32 %v8628_v60, %v3585_v3 }
 0x4ef   : > { %4006 = vadd.xlane.f32.xlu1 %v4005_v62  ;;  %vm3873_vm13 = vmand %vm3803_vm1, %vm3851_vm7  ;;  %v3936_v31 = vsel %vm8890_vm9, %v7962_v17, 0.0  ;;  %v10352_v62 = vld [vmem:[#allocation51_spill] sm:$0xff] }
 0x4f0   : > { %v3937_v13 = vsel %vm3873_vm13, %v7966_v57, 0.0  ;;  %vm3804_vm1 = vmand %vm3644_vm5, %vm3699_vm2  ;;  %v3569_v57 = vadd.s32 120, %v10329_v7 }
 0x4f1   : > { %v4008_v17 = vadd.f32 %v3937_v13, %v3936_v31  ;;  %vm3805_vm13 = vmand %vm3645_vm11, %vm3699_vm2  ;;  %vm3650_vm2 = vcmp.lt.s32.totalorder %v8872_v19, %v8633_v44  ;;  %v3600_v31 = vadd.s32 %v8628_v60, %v3567_v2  ;;  %v10354_v13 = vld [vmem:[#allocation54_spill] sm:$0xff] }
 0x4f2   : > { %vm8939_vm9 = vmand %vm3804_vm1, %vm3850_vm3  ;;  %v3602_v3 = vadd.s32 %v8628_v60, %v3569_v57  ;;  %v10363_v57 = vld [vmem:[#allocation57_spill] sm:$0xff] }
 0x4f3   : > { %4009 = vadd.xlane.f32.xlu0 %v4008_v17  ;;  %vm3875_vm14 = vmand %vm3805_vm13, %vm3851_vm7  ;;  %v3938_v33 = vsel %vm8939_vm9, %v7975_v34, 0.0  ;;  %vm3701_vm13 = vcmp.lt.s32.totalorder %v8832_v5, 16  ;;  %vm3649_vm9 = vcmp.lt.s32.totalorder %v8832_v5, %v8636_v39  ;;  %v10353_v5 = vld [vmem:[#allocation53_spill] sm:$0xff] }
 0x4f4   : > { %v3939_v59 = vsel %vm3875_vm14, %v7984_v55, 0.0  ;;  %vm3806_vm1 = vmand %vm3646_vm6, %vm3700_vm8  ;;  %v8977_v55 = vadd.s32 %v8628_v60, %v3583_v14  ;;  %v3601_v14 = vadd.s32 %v8628_v60, %v3568_v28  ;;  %v10356_v60 = vld [vmem:[#allocation116_spill] sm:$0xff]  ;;  %v10359_v28 = vld [vmem:[#allocation65_spill] sm:$0xff] }
 0x4f5   : > { %v4011_v34 = vadd.f32 %v3939_v59, %v3938_v33  ;;  %vm3807_vm14 = vmand %vm3647_vm10, %vm3700_vm8  ;;  %vm3702_vm10 = vcmp.lt.s32.totalorder %v8872_v19, 16 }
 0x4f6   : > { %vm3876_vm6 = vmand %vm3806_vm1, %vm3850_vm3  ;;  %vm3655_vm4 = vcmp.lt.s32.totalorder %v3601_v14, %v8636_v39 }
 0x4f7   : > { %4012 = vadd.xlane.f32.xlu1 %v4011_v34  ;;  %vm3877_vm8 = vmand %vm3807_vm14, %vm3851_vm7  ;;  %v3940_v27 = vsel %vm3876_vm6, %v8001_v20, 0.0  ;;  %vm3651_vm14 = vcmp.lt.s32.totalorder %v8872_v19, %v8636_v39 }
 0x4f8   : > { %v3941_v29 = vsel %vm3877_vm8, %v10352_v62, 0.0  ;;  %vm3808_vm5 = vmand %vm3648_vm12, %vm3701_vm13  ;;  %vm3703_vm12 = vcmp.lt.s32.totalorder %v3600_v31, 16  ;;  %vm3704_vm8 = vcmp.lt.s32.totalorder %v3601_v14, 16 }
 0x4f9   : > { %v4014_v20 = vadd.f32 %v3941_v29, %v3940_v27  ;;  %vm3809_vm1 = vmand %vm3649_vm9, %vm3701_vm13  ;;  %vm3652_vm9 = vcmp.lt.s32.totalorder %v3600_v31, %v8633_v44 }
 0x4fa   : > { %vm3878_vm11 = vmand %vm3808_vm5, %vm3850_vm3 }
 0x4fb   : > { %4015 = vadd.xlane.f32.xlu0 %v4014_v20  ;;  %vm3879_vm6 = vmand %vm3809_vm1, %vm3851_vm7  ;;  %v3942_v2 = vsel %vm3878_vm11, %v10353_v5, 0.0  ;;  %vm3653_vm1 = vcmp.lt.s32.totalorder %v3600_v31, %v8636_v39  ;;  %v10358_v31 = vld [vmem:[#allocation56_spill] sm:$0xff] }
 0x4fc   : > { %v3943_v17 = vsel %vm3879_vm6, %v10354_v13, 0.0  ;;  %vm3810_vm13 = vmand %vm3650_vm2, %vm3702_vm10  ;;  %v10362_v13 = vld [vmem:[#allocation66_spill] sm:$0xff] }
 0x4fd   : > { %v4017_v33 = vadd.f32 %v3943_v17, %v3942_v2  ;;  %vm3811_vm5 = vmand %vm3651_vm14, %vm3702_vm10  ;;  %vm3654_vm14 = vcmp.lt.s32.totalorder %v3601_v14, %v8633_v44 }
 0x4fe   : > { %vm3880_vm11 = vmand %vm3810_vm13, %vm3850_vm3 }
 0x4ff   : > { %4018 = vadd.xlane.f32.xlu1 %v4017_v33  ;;  %vm3881_vm2 = vmand %vm3811_vm5, %vm3851_vm7  ;;  %v3944_v7 = vsel %vm3880_vm11, %v8086_v45, 0.0  ;;  %vm3656_vm11 = vcmp.lt.s32.totalorder %v3602_v3, %v8633_v44 }
 0x500   : > { %v3945_v6 = vsel %vm3881_vm2, %v8095_v48, 0.0  ;;  %vm3812_vm6 = vmand %vm3652_vm9, %vm3703_vm12  ;;  %v10355_v48 = vld [vmem:[#allocation113_spill] sm:$0xff] }
 0x501   : > { %v4020_v19 = vadd.f32 %v3945_v6, %v3944_v7  ;;  %vm3813_vm10 = vmand %vm3653_vm1, %vm3703_vm12  ;;  %vm3705_vm1 = vcmp.lt.s32.totalorder %v3602_v3, 16 }
 0x502   : > { %vm3882_vm13 = vmand %vm3812_vm6, %vm3850_vm3  ;;  %vm3657_vm6 = vcmp.lt.s32.totalorder %v3602_v3, %v8636_v39 }
 0x503   : > { %4021 = vadd.xlane.f32.xlu0 %v4020_v19  ;;  %vm3883_vm5 = vmand %vm3813_vm10, %vm3851_vm7  ;;  %v3946_v45 = vsel %vm3882_vm13, %v8102_v47, 0.0  ;;  %v10357_v47 = vld [vmem:[#allocation55_spill] sm:$0xff] }
 0x504   : > { %v3947_v59 = vsel %vm3883_vm5, %v10355_v48, 0.0  ;;  %vm3814_vm9 = vmand %vm3654_vm14, %vm3704_vm8  ;;  %vm10360_vm5 = vcmp.lt.s32.totalorder %v8717_v0, %v8633_v44  ;;  %v10374_v48 = vld [vmem:[#allocation60_spill] sm:$0xff] }
 0x505   : > { %v4023_v34 = vadd.f32 %v3947_v59, %v3946_v45  ;;  %vm3815_vm12 = vmand %vm3655_vm4, %vm3704_vm8  ;;  %vm3706_vm4 = vcmp.lt.s32.totalorder %v8717_v0, 16 }
 0x506   : > { %vm3884_vm2 = vmand %vm3814_vm9, %vm3850_vm3  ;;  %vm10361_vm9 = vcmp.lt.s32.totalorder %v8717_v0, %v8636_v39 }
 0x507   : > { %4024 = vadd.xlane.f32.xlu1 %v4023_v34  ;;  %vm3885_vm15 = vmand %vm3815_vm12, %vm3851_vm7  ;;  %v3948_v27 = vsel %vm3884_vm2, %v10356_v60, 0.0 }
 0x508   : > { %v3949_v62 = vsel %vm3885_vm15, %v10357_v47, 0.0  ;;  %vm3816_vm10 = vmand %vm3656_vm11, %vm3705_vm1  ;;  %vm3707_vm11 = vcmp.lt.s32.totalorder %v8756_v21, 16 }
 0x509   : > { %v4026_v29 = vadd.f32 %v3949_v62, %v3948_v27  ;;  %vm3817_vm14 = vmand %vm3657_vm6, %vm3705_vm1  ;;  %vm10364_vm6 = vcmp.lt.s32.totalorder %v8756_v21, %v8633_v44  ;;  %v10378_v27 = vld [vmem:[#allocation68_spill] sm:$0xff] }
 0x50a   : > { %vm3886_vm8 = vmand %vm3816_vm10, %vm3850_vm3 }
 0x50b   : > { %4027 = vadd.xlane.f32.xlu0 %v4026_v29  ;;  %vm3887_vm13 = vmand %vm3817_vm14, %vm3851_vm7  ;;  %v3950_v20 = vsel %vm3886_vm8, %v10358_v31, 0.0  ;;  %vm10365_vm14 = vcmp.lt.s32.totalorder %v8756_v21, %v8636_v39  ;;  %vm3708_vm8 = vcmp.lt.s32.totalorder %v8764_v46, 16  ;;  %v10381_v29 = vld [vmem:[#allocation62_spill] sm:$0xff] }
 0x50c   : > { %v3951_v5 = vsel %vm3887_vm13, %v10359_v28, 0.0  ;;  %vm3818_vm15 = vmand %vm10360_vm5, %vm3706_vm4 }
 0x50d   : > { %v4029_v2 = vadd.f32 %v3951_v5, %v3950_v20  ;;  %vm3819_vm12 = vmand %vm10361_vm9, %vm3706_vm4 }
 0x50e   : > { %vm3888_vm1 = vmand %vm3818_vm15, %vm3850_vm3  ;;  %vm10366_vm15 = vcmp.lt.s32.totalorder %v8764_v46, %v8633_v44 }
 0x50f   : > { %4030 = vadd.xlane.f32.xlu1 %v4029_v2  ;;  %vm3889_vm2 = vmand %vm3819_vm12, %vm3851_vm7  ;;  %v3952_v17 = vsel %vm3888_vm1, %v10362_v13, 0.0  ;;  %vm10367_vm12 = vcmp.lt.s32.totalorder %v8764_v46, %v8636_v39  ;;  %vm3709_vm1 = vcmp.lt.s32.totalorder %v8767_v11, 16  ;;  %v10370_v46 = vld [vmem:[#allocation59_spill] sm:$0xff] }
 0x510   : > { %v3953_v33 = vsel %vm3889_vm2, %v10363_v57, 0.0  ;;  %vm3820_vm10 = vmand %vm10364_vm6, %vm3707_vm11 }
 0x511   : > { %v4032_v14 = vadd.f32 %v3953_v33, %v3952_v17  ;;  %vm3821_vm4 = vmand %vm10365_vm14, %vm3707_vm11 }
 0x512   : > { %vm3890_vm13 = vmand %vm3820_vm10, %vm3850_vm3  ;;  %vm10368_vm10 = vcmp.lt.s32.totalorder %v8767_v11, %v8633_v44  ;;  %v10373_v11 = vld [vmem:[#allocation67_spill] sm:$0xff] }
 0x513   : > { %4033 = vadd.xlane.f32.xlu0 %v4032_v14  ;;  %vm3891_vm5 = vmand %vm3821_vm4, %vm3851_vm7  ;;  %v3954_v0 = vsel %vm3890_vm13, %v8255_v35, 0.0 }
 0x514   : > { %v3955_v7 = vsel %vm3891_vm5, %v8262_v26, 0.0  ;;  %vm3822_vm9 = vmand %vm10366_vm15, %vm3708_vm8  ;;  %vm10371_vm15 = vcmp.lt.s32.totalorder %v8770_v52, %v8633_v44 }
 0x515   : > { %v4035_v6 = vadd.f32 %v3955_v7, %v3954_v0  ;;  %vm3823_vm11 = vmand %vm10367_vm12, %vm3708_vm8  ;;  %vm3710_vm8 = vcmp.lt.s32.totalorder %v8770_v52, 16 }
 0x516   : > { %vm3892_vm2 = vmand %vm3822_vm9, %vm3850_vm3 }
 0x517   : > { %4036 = vadd.xlane.f32.xlu1 %v4035_v6  ;;  %vm3893_vm6 = vmand %vm3823_vm11, %vm3851_vm7  ;;  %v3956_v35 = vsel %vm3892_vm2, %v8267_v12, 0.0  ;;  %v10369_v12 = vld [vmem:[#allocation58_spill] sm:$0xff]  ;;  %vm3711_vm11 = vcmp.lt.s32.totalorder %v8835_v43, 16 }
 0x518   : > { %v3957_v26 = vsel %vm3893_vm6, %v8273_v1, 0.0  ;;  %vm3824_vm14 = vmand %vm10368_vm10, %vm3709_vm1  ;;  %vm10375_vm6 = vcmp.lt.s32.totalorder %v8835_v43, %v8633_v44 }
 0x519   : > { %v4038_v21 = vadd.f32 %v3957_v26, %v3956_v35  ;;  %vm3825_vm4 = vmand %vm3665_vm0, %vm3709_vm1  ;;  %vm10372_vm0 = vcmp.lt.s32.totalorder %v8770_v52, %v8636_v39  ;;  %v10377_v52 = vld [vmem:[#allocation61_spill] sm:$0xff] }
 0x51a   : > { %vm3894_vm13 = vmand %vm3824_vm14, %vm3850_vm3  ;;  %vm10376_vm14 = vcmp.lt.s32.totalorder %v8835_v43, %v8636_v39 }
 0x51b   : > { %4039 = vadd.xlane.f32.xlu0 %v4038_v21  ;;  %vm3895_vm5 = vmand %vm3825_vm4, %vm3851_vm7  ;;  %v3958_v1 = vsel %vm3894_vm13, %v10369_v12, 0.0 }
 0x51c   : > { %v3959_v19 = vsel %vm3895_vm5, %v10370_v46, 0.0  ;;  %vm3826_vm9 = vmand %vm10371_vm15, %vm3710_vm8  ;;  %vm10379_vm15 = vcmp.lt.s32.totalorder %v8845_v51, %v8633_v44 }
 0x51d   : > { %v4041_v3 = vadd.f32 %v3959_v19, %v3958_v1  ;;  %vm3827_vm12 = vmand %vm10372_vm0, %vm3710_vm8  ;;  %vm3712_vm8 = vcmp.lt.s32.totalorder %v8845_v51, 16  ;;  %vm10380_vm0 = vcmp.lt.s32.totalorder %v8845_v51, %v8636_v39 }
 0x51e   : > { %vm3896_vm1 = vmand %vm3826_vm9, %vm3850_vm3 }
 0x51f   : > { %4042 = vadd.xlane.f32.xlu1 %v4041_v3  ;;  %vm3897_vm2 = vmand %vm3827_vm12, %vm3851_vm7  ;;  %v3960_v45 = vsel %vm3896_vm1, %v10373_v11, 0.0 }
 0x520   : > { %v3961_v59 = vsel %vm3897_vm2, %v10374_v48, 0.0  ;;  %vm3828_vm10 = vmand %vm10375_vm6, %vm3711_vm11  ;;  %vm10382_vm6 = vcmp.lt.s32.totalorder %v8848_v38, %v8633_v44 }
 0x521   : > { %v4044_v34 = vadd.f32 %v3961_v59, %v3960_v45  ;;  %vm3829_vm4 = vmand %vm10376_vm14, %vm3711_vm11  ;;  %vm3713_vm11 = vcmp.lt.s32.totalorder %v8848_v38, 16  ;;  %vm10383_vm14 = vcmp.lt.s32.totalorder %v8848_v38, %v8636_v39 }
 0x522   : > { %vm3898_vm13 = vmand %vm3828_vm10, %vm3850_vm3 }
 0x523   : > { %4045 = vadd.xlane.f32.xlu0 %v4044_v34  ;;  %vm3899_vm5 = vmand %vm3829_vm4, %vm3851_vm7  ;;  %v3962_v60 = vsel %vm3898_vm13, %v10377_v52, 0.0 }
 0x524   : > { %v3963_v47 = vsel %vm3899_vm5, %v10378_v27, 0.0  ;;  %vm3830_vm9 = vmand %vm10379_vm15, %vm3712_vm8  ;;  %vm10384_vm15 = vcmp.lt.s32.totalorder %v8851_v56, %v8633_v44 }
 0x525   : > { %v4047_v62 = vadd.f32 %v3963_v47, %v3962_v60  ;;  %vm3831_vm12 = vmand %vm10380_vm0, %vm3712_vm8  ;;  %vm3714_vm8 = vcmp.lt.s32.totalorder %v8851_v56, 16  ;;  %vm10385_vm0 = vcmp.lt.s32.totalorder %v8851_v56, %v8636_v39 }
 0x526   : > { %vm3900_vm1 = vmand %vm3830_vm9, %vm3850_vm3 }
 0x527   : > { %4048 = vadd.xlane.f32.xlu1 %v4047_v62  ;;  %vm3901_vm2 = vmand %vm3831_vm12, %vm3851_vm7  ;;  %v3964_v43 = vsel %vm3900_vm1, %v8403_v23, 0.0 }
 0x528   : > { %v3965_v31 = vsel %vm3901_vm2, %v10381_v29, 0.0  ;;  %vm3832_vm10 = vmand %vm10382_vm6, %vm3713_vm11  ;;  %vm10386_vm6 = vcmp.lt.s32.totalorder %v8901_v32, %v8633_v44 }
 0x529   : > { %v4050_v20 = vadd.f32 %v3965_v31, %v3964_v43  ;;  %vm3833_vm4 = vmand %vm10383_vm14, %vm3713_vm11  ;;  %vm3715_vm11 = vcmp.lt.s32.totalorder %v8901_v32, 16  ;;  %vm10387_vm14 = vcmp.lt.s32.totalorder %v8901_v32, %v8636_v39 }
 0x52a   : > { %vm3902_vm13 = vmand %vm3832_vm10, %vm3850_vm3 }
 0x52b   : > { %4051 = vadd.xlane.f32.xlu0 %v4050_v20  ;;  %vm3903_vm5 = vmand %vm3833_vm4, %vm3851_vm7  ;;  %v3966_v23 = vsel %vm3902_vm13, %v8434_v22, 0.0 }
 0x52c   : > { %v3967_v51 = vsel %vm3903_vm5, %v8440_v49, 0.0  ;;  %vm3834_vm9 = vmand %vm10384_vm15, %vm3714_vm8  ;;  %vm10388_vm15 = vcmp.lt.s32.totalorder %v8909_v63, %v8633_v44 }
 0x52d   : > { %v4053_v28 = vadd.f32 %v3967_v51, %v3966_v23  ;;  %vm3835_vm12 = vmand %vm10385_vm0, %vm3714_vm8  ;;  %vm3716_vm8 = vcmp.lt.s32.totalorder %v8909_v63, 16  ;;  %vm10389_vm0 = vcmp.lt.s32.totalorder %v8909_v63, %v8636_v39 }
 0x52e   : > { %vm3904_vm1 = vmand %vm3834_vm9, %vm3850_vm3 }
 0x52f   : > { %4054 = vadd.xlane.f32.xlu1 %v4053_v28  ;;  %vm3905_vm2 = vmand %vm3835_vm12, %vm3851_vm7  ;;  %v3968_v22 = vsel %vm3904_vm1, %v8445_v54, 0.0 }
 0x530   : > { %v3969_v49 = vsel %vm3905_vm2, %v8452_v10, 0.0  ;;  %vm3836_vm10 = vmand %vm10386_vm6, %vm3715_vm11  ;;  %vm10390_vm6 = vcmp.lt.s32.totalorder %v8912_v53, %v8633_v44 }
 0x531   : > { %v4056_v38 = vadd.f32 %v3969_v49, %v3968_v22  ;;  %vm3837_vm4 = vmand %vm10387_vm14, %vm3715_vm11  ;;  %vm3717_vm11 = vcmp.lt.s32.totalorder %v8912_v53, 16  ;;  %vm10391_vm14 = vcmp.lt.s32.totalorder %v8912_v53, %v8636_v39 }
 0x532   : > { %vm3906_vm13 = vmand %vm3836_vm10, %vm3850_vm3 }
 0x533   : > { %4057 = vadd.xlane.f32.xlu0 %v4056_v38  ;;  %vm3907_vm5 = vmand %vm3837_vm4, %vm3851_vm7  ;;  %v3970_v54 = vsel %vm3906_vm13, %v8468_v24, 0.0 }
 0x534   : > { %v3971_v10 = vsel %vm3907_vm5, %v8477_v50, 0.0  ;;  %vm3838_vm9 = vmand %vm10388_vm15, %vm3716_vm8  ;;  %vm10392_vm15 = vcmp.lt.s32.totalorder %v8950_v36, %v8633_v44 }
 0x535   : > { %v4059_v56 = vadd.f32 %v3971_v10, %v3970_v54  ;;  %vm3839_vm12 = vmand %vm10389_vm0, %vm3716_vm8  ;;  %vm3718_vm8 = vcmp.lt.s32.totalorder %v8950_v36, 16  ;;  %vm10393_vm0 = vcmp.lt.s32.totalorder %v8950_v36, %v8636_v39 }
 0x536   : > { %vm3908_vm1 = vmand %vm3838_vm9, %vm3850_vm3 }
 0x537   : > { %4060 = vadd.xlane.f32.xlu1 %v4059_v56  ;;  %vm3909_vm2 = vmand %vm3839_vm12, %vm3851_vm7  ;;  %v3972_v24 = vsel %vm3908_vm1, %v8482_v40, 0.0 }
 0x538   : > { %v3973_v50 = vsel %vm3909_vm2, %v8490_v16, 0.0  ;;  %vm3840_vm10 = vmand %vm10390_vm6, %vm3717_vm11  ;;  %vm10394_vm6 = vcmp.lt.s32.totalorder %v8977_v55, %v8633_v44 }
 0x539   : > { %v4062_v32 = vadd.f32 %v3973_v50, %v3972_v24  ;;  %vm3841_vm4 = vmand %vm10391_vm14, %vm3717_vm11  ;;  %vm3719_vm11 = vcmp.lt.s32.totalorder %v8977_v55, 16  ;;  %vm10395_vm14 = vcmp.lt.s32.totalorder %v8977_v55, %v8636_v39 }
 0x53a   : > { %vm3910_vm13 = vmand %vm3840_vm10, %vm3850_vm3 }
 0x53b   : > { %4063 = vadd.xlane.f32.xlu0 %v4062_v32  ;;  %vm3911_vm5 = vmand %vm3841_vm4, %vm3851_vm7  ;;  %v3974_v40 = vsel %vm3910_vm13, %v8520_v9, 0.0 }
 0x53c   : > { %v3975_v16 = vsel %vm3911_vm5, %v8523_v8, 0.0  ;;  %vm3842_vm9 = vmand %vm10392_vm15, %vm3718_vm8  ;;  %vm10396_vm15 = vcmp.lt.s32.totalorder %v8980_v25, %v8633_v44 }
 0x53d   : > { %v4065_v63 = vadd.f32 %v3975_v16, %v3974_v40  ;;  %vm3843_vm12 = vmand %vm10393_vm0, %vm3718_vm8  ;;  %vm3720_vm8 = vcmp.lt.s32.totalorder %v8980_v25, 16  ;;  %vm10397_vm0 = vcmp.lt.s32.totalorder %v8980_v25, %v8636_v39 }
 0x53e   : > { %vm3912_vm1 = vmand %vm3842_vm9, %vm3850_vm3 }
 0x53f   : > { %4066 = vadd.xlane.f32.xlu1 %v4065_v63  ;;  %vm3913_vm2 = vmand %vm3843_vm12, %vm3851_vm7  ;;  %v3976_v9 = vsel %vm3912_vm1, %v8531_v41, 0.0 }
 0x540   : > { %v3977_v8 = vsel %vm3913_vm2, %v8533_v58, 0.0  ;;  %vm3844_vm10 = vmand %vm10394_vm6, %vm3719_vm11  ;;  %vm10398_vm6 = vcmp.lt.s32.totalorder %v8983_v18, %v8633_v44 }
 0x541   : > { %v4068_v53 = vadd.f32 %v3977_v8, %v3976_v9  ;;  %vm3845_vm4 = vmand %vm10395_vm14, %vm3719_vm11  ;;  %vm3721_vm11 = vcmp.lt.s32.totalorder %v8983_v18, 16  ;;  %vm10399_vm14 = vcmp.lt.s32.totalorder %v8983_v18, %v8636_v39 }
 0x542   : > { %vm3914_vm13 = vmand %vm3844_vm10, %vm3850_vm3 }
 0x543   : > { %4069 = vadd.xlane.f32.xlu0 %v4068_v53  ;;  %vm3915_vm5 = vmand %vm3845_vm4, %vm3851_vm7  ;;  %v3978_v41 = vsel %vm3914_vm13, %v8538_v61, 0.0 }
 0x544   : > { %v3979_v58 = vsel %vm3915_vm5, %v8541_v42, 0.0  ;;  %vm3846_vm9 = vmand %vm10396_vm15, %vm3720_vm8 }
 0x545   : > { %v4071_v36 = vadd.f32 %v3979_v58, %v3978_v41  ;;  %vm3847_vm12 = vmand %vm10397_vm0, %vm3720_vm8 }
 0x546   : > { %vm3916_vm1 = vmand %vm3846_vm9, %vm3850_vm3 }
 0x547   : > { %4072 = vadd.xlane.f32.xlu1 %v4071_v36  ;;  %vm3917_vm2 = vmand %vm3847_vm12, %vm3851_vm7  ;;  %v3980_v61 = vsel %vm3916_vm1, %v8545_v15, 0.0 }
 0x548   : > { %v3981_v42 = vsel %vm3917_vm2, %v8547_v37, 0.0  ;;  %vm3848_vm10 = vmand %vm10398_vm6, %vm3721_vm11 }
 0x549   : > { %v4074_v55 = vadd.f32 %v3981_v42, %v3980_v61  ;;  %vm3849_vm4 = vmand %vm10399_vm14, %vm3721_vm11 }
 0x54a   : > { %vm3918_vm8 = vmand %vm3848_vm10, %vm3850_vm3  ;;  %vm10400_vm3 = vcmask 0  }
 0x54b   : > { %4075 = vadd.xlane.f32.xlu0 %v4074_v55  ;;  %vm3919_vm13 = vmand %vm3849_vm4, %vm3851_vm7  ;;  %v3982_v15 = vsel %vm3918_vm8, %v8549_v4, 0.0 }
 0x54c   : > { %v3983_v37 = vsel %vm3919_vm13, %v8551_v30, 0.0 }
 0x54d   : > { %v4077_v25 = vadd.f32 %v3983_v37, %v3982_v15 }
 0x54f   : > { %4078 = vadd.xlane.f32.xlu1 %v4077_v25 }
 0x560   : > { %v3986_v5 = vpop.xlane.xlu0 %3985 }
 0x564   : > { %v3992_v2 = vpop.xlane.xlu1 %3991 }
 0x568   : > { %v3989_v13 = vpop.xlane.xlu0 %3988 }
 0x569   : > { %v4080_v17 = vadd.f32 %v3989_v13, %v3986_v5 }
 0x56b   : > { %v4081_v57 = vadd.f32 %v4080_v17, %v3992_v2 }
 0x56c   : > { %v3995_v18 = vpop.xlane.xlu1 %3994 }
 0x56d   : > { %v4082_v33 = vadd.f32 %v4081_v57, %v3995_v18  ;;  %v4117_v18 = vld [vmem:[#allocation2] sm:$0x1] }
 0x570   : > { %v3998_v14 = vpop.xlane.xlu0 %3997 }
 0x571   : > { %v4083_v44 = vadd.f32 %v4082_v33, %v3998_v14 }
 0x574   : > { %v4001_v0 = vpop.xlane.xlu1 %4000 }
 0x575   : > { %v4084_v7 = vadd.f32 %v4083_v44, %v4001_v0 }
 0x578   : > { %v4004_v6 = vpop.xlane.xlu0 %4003 }
 0x579   : > { %v4085_v39 = vadd.f32 %v4084_v7, %v4004_v6 }
 0x57c   : > { %v4007_v35 = vpop.xlane.xlu1 %4006 }
 0x57d   : > { %v4086_v26 = vadd.f32 %v4085_v39, %v4007_v35 }
 0x580   : > { %v4010_v4 = vpop.xlane.xlu0 %4009 }
 0x581   : > { %v4087_v21 = vadd.f32 %v4086_v26, %v4010_v4 }
 0x584   : > { %v4013_v30 = vpop.xlane.xlu1 %4012 }
 0x585   : > { %v4088_v12 = vadd.f32 %v4087_v21, %v4013_v30 }
 0x588   : > { %v4016_v1 = vpop.xlane.xlu0 %4015 }
 0x589   : > { %v4089_v46 = vadd.f32 %v4088_v12, %v4016_v1 }
 0x58c   : > { %v4019_v19 = vpop.xlane.xlu1 %4018 }
 0x58d   : > { %v4090_v3 = vadd.f32 %v4089_v46, %v4019_v19 }
 0x590   : > { %v4022_v11 = vpop.xlane.xlu0 %4021 }
 0x591   : > { %v4091_v45 = vadd.f32 %v4090_v3, %v4022_v11 }
 0x594   : > { %v4025_v48 = vpop.xlane.xlu1 %4024 }
 0x595   : > { %v4092_v59 = vadd.f32 %v4091_v45, %v4025_v48 }
 0x598   : > { %v4028_v34 = vpop.xlane.xlu0 %4027 }
 0x599   : > { %v4093_v52 = vadd.f32 %v4092_v59, %v4028_v34 }
 0x59c   : > { %v4031_v60 = vpop.xlane.xlu1 %4030 }
 0x59d   : > { %v4094_v27 = vadd.f32 %v4093_v52, %v4031_v60 }
 0x5a0   : > { %v4034_v47 = vpop.xlane.xlu0 %4033 }
 0x5a1   : > { %v4095_v62 = vadd.f32 %v4094_v27, %v4034_v47 }
 0x5a4   : > { %v4037_v43 = vpop.xlane.xlu1 %4036 }
 0x5a5   : > { %v4096_v29 = vadd.f32 %v4095_v62, %v4037_v43 }
 0x5a8   : > { %v4040_v31 = vpop.xlane.xlu0 %4039 }
 0x5a9   : > { %v4097_v20 = vadd.f32 %v4096_v29, %v4040_v31 }
 0x5ac   : > { %v4043_v23 = vpop.xlane.xlu1 %4042 }
 0x5ad   : > { %v4098_v51 = vadd.f32 %v4097_v20, %v4043_v23 }
 0x5b0   : > { %v4046_v28 = vpop.xlane.xlu0 %4045 }
 0x5b1   : > { %v4099_v22 = vadd.f32 %v4098_v51, %v4046_v28 }
 0x5b4   : > { %v4049_v49 = vpop.xlane.xlu1 %4048 }
 0x5b5   : > { %v4100_v38 = vadd.f32 %v4099_v22, %v4049_v49 }
 0x5b8   : > { %v4052_v54 = vpop.xlane.xlu0 %4051 }
 0x5b9   : > { %v4101_v10 = vadd.f32 %v4100_v38, %v4052_v54 }
 0x5bc   : > { %v4055_v56 = vpop.xlane.xlu1 %4054 }
 0x5bd   : > { %v4102_v24 = vadd.f32 %v4101_v10, %v4055_v56 }
 0x5c0   : > { %v4058_v50 = vpop.xlane.xlu0 %4057 }
 0x5c1   : > { %v4103_v32 = vadd.f32 %v4102_v24, %v4058_v50 }
 0x5c4   : > { %v4061_v40 = vpop.xlane.xlu1 %4060 }
 0x5c5   : > { %v4104_v16 = vadd.f32 %v4103_v32, %v4061_v40 }
 0x5c8   : > { %v4064_v63 = vpop.xlane.xlu0 %4063 }
 0x5c9   : > { %v4105_v9 = vadd.f32 %v4104_v16, %v4064_v63 }
 0x5cc   : > { %v4067_v8 = vpop.xlane.xlu1 %4066 }
 0x5cd   : > { %v4106_v53 = vadd.f32 %v4105_v9, %v4067_v8 }
 0x5d0   : > { %v4070_v41 = vpop.xlane.xlu0 %4069 }
 0x5d1   : > { %v4107_v58 = vadd.f32 %v4106_v53, %v4070_v41 }
 0x5d4   : > { %v4073_v36 = vpop.xlane.xlu1 %4072 }
 0x5d5   : > { %v4108_v61 = vadd.f32 %v4107_v58, %v4073_v36 }
 0x5d8   : > { %v4076_v42 = vpop.xlane.xlu0 %4075 }
 0x5d9   : > { %v4109_v55 = vadd.f32 %v4108_v61, %v4076_v42 }
 0x5dc   : > { %v4079_v15 = vpop.xlane.xlu1 %4078 }
 0x5dd   : > { %v4110_v37 = vadd.f32 %v4109_v55, %v4079_v15 }
 0x5df   : > { %v4111_v25 = vrot.slane %v4110_v37, 4 }
 0x5e1   : > { %v4112_v5 = vadd.f32 %v4111_v25, %v4110_v37 }
 0x5e3   : > { %v4113_v2 = vrot.slane %v4112_v5, 2 }
 0x5e5   : > { %v4114_v13 = vadd.f32 %v4113_v2, %v4112_v5 }
 0x5e7   : > { %v4115_v17 = vrot.slane %v4114_v13, 1 }
 0x5e9   : > { %v4116_v57 = vadd.f32 %v4115_v17, %v4114_v13 }
 0x5eb   : > { %v4118_v33 = vmul.f32 0.004166667, %v4116_v57 }
 0x5ed   : > { %v4119_v14 = vadd.f32 %v4118_v33, %v4117_v18 }
 0x5ef   : > { %4121 = vst.msk [vmem:[#allocation2] sm:$0x1] %vm10400_vm3, %v4119_v14 }
 0x5f0 PF: > { %p4122_p1 = scmp.eq.s32.totalorder %s5189_s15, 0 }
 0x5f2   : > { %p4123_p2 = pnand %p4122_p1, %p342_p8 }
 0x5f3   : > { %v4127_v44 = vld [vmem:[%s9398_s3] sm:$0xff] (!%p4123_p2)  ;;  %v5115_v7 = vmov (!%p4123_p2), 0   ;;  %v5116_v6 = vmov (!%p4123_p2), 1   ;;  %s5117_s20 = smov (!%p4123_p2), 126   ;;  %s5118_s15 = smov (!%p4123_p2), 127   ;;  %v10404_v60 = vld [vmem:[#allocation109_spill] sm:$0xff] (!%p4123_p2) }
 0x5f4   : > { %4126 = sbr.rel (%p4123_p2) target bundleno = 2199 (0x897), region = 48  ;;  %v4128_v0 = vmul.f32 (!%p4123_p2), 0.5, %v4127_v44  ;;  %5032 = vset.pattern.permute.xlu1 (!%p4123_p2), %v5115_v7  ;;  %5033 = vset.pattern.permute.xlu0 (!%p4123_p2), %v5116_v6  ;;  %v10401_v11 = vld [vmem:[#allocation111_spill] sm:$0xff] (!%p4123_p2)  ;;  %v10402_v48 = vld [vmem:[#allocation112_spill] sm:$0xff] (!%p4123_p2)  ;;  %v10405_v47 = vld [vmem:[#allocation26_spill] sm:$0xff] (!%p4123_p2)  ;;  %s4731_s17 = sshll.u32 (!%p4123_p2), %s5192_s16, 8 }
 0x5f5   : > { %v10403_v34 = vld [vmem:[#allocation108_spill] sm:$0xff] (!%p4123_p2)  ;;  %v10406_v43 = vld [vmem:[#allocation115_spill] sm:$0xff] (!%p4123_p2)  ;;  %v10408_v23 = vld [vmem:[#allocation18_spill] sm:$0xff] (!%p4123_p2) }
 0x5f6   : > { %4130 = vrot.lane.b32.xlu0 (!%p4123_p2), %v4128_v0, %s5117_s20  ;;  %v10407_v31 = vld [vmem:[#allocation24_spill] sm:$0xff] (!%p4123_p2)  ;;  %v10409_v53 = vld [vmem:[#allocation33_spill] sm:$0xff] (!%p4123_p2)  ;;  %v10410_v58 = vld [vmem:[#allocation34_spill] sm:$0xff] (!%p4123_p2) }
 0x668   : > { %v4131_v39 = vpop.permute.xlu0 %4130 }
 0x669   : > { %v4133_v35 = vsub.f32 %v4127_v44, %v4131_v39  ;;  %v4134_v26 = vadd.f32 %v4131_v39, %v4127_v44 }
 0x66b   : > { %4137 = vperm.xlu1 %5032, %v4134_v26   ;;  %v4175_v4 = vsub.f32 %v4134_v26, %v4133_v35 }
 0x66d   : > { %v4176_v21 = vadd.f32 1.0, %v4175_v4 }
 0x66f   : > { %4144 = vperm.xlu1 %5032, %v4133_v35   ;;  %4178 = vrot.lane.b32.xlu0 %v4176_v21, %s5118_s15 }
 0x673   : > { %5034 = vset.pattern.permute.xlu1 %v5116_v6  ;;  %4156 = vperm.xlu0 %5033, %v4134_v26  }
 0x674   : > { %4162 = vperm.xlu1 %5034, %v4133_v35  }
 0x677   : > { %5036 = vset.pattern.permute.xlu0 %v5115_v7 }
 0x678   : > { %5035 = vset.pattern.permute.xlu1 %v5115_v7 }
 0x6e1   : > { %v4179_v30 = vpop.permute.xlu0 %4178 }
 0x6e2   : > { %v4181_v12 = vmul.f32 %v4179_v30, %v4176_v21 }
 0x6e4   : > { %4184 = vperm.xlu1 %5035, %v4181_v12   ;;  %v10411_v12 = vld [vmem:[#allocation13_spill] sm:$0xff] }
 0x6ea   : > { %v9280_v1 = vpop.permute.xlu1 %4137 }
 0x6eb   : > { %v4140_v20 = vmin.f32 %v9280_v1, %v10407_v31  ;;  %v4141_v51 = vmin.f32 %v9280_v1, %v10408_v23  ;;  %v5119_v23 = vmov 0.0  }
 0x6ee   : > { %v9282_v46 = vpop.permute.xlu1 %4144 }
 0x6ef   : > { %v4147_v62 = vmax.f32 %v9282_v46, %v10405_v47  ;;  %v4148_v29 = vmax.f32 %v9282_v46, %v10406_v43 }
 0x6f1   : > { %v4149_v49 = vsub.f32 %v4140_v20, %v4147_v62  ;;  %v4150_v38 = vsub.f32 %v4141_v51, %v4148_v29 }
 0x6f2   : > { %v9284_v19 = vpop.permute.xlu0 %4156 }
 0x6f3   : > { %v9286_v3 = vpop.permute.xlu1 %4162  ;;  %v4159_v52 = vmin.f32 %v9284_v19, %v10403_v34  ;;  %v4160_v27 = vmin.f32 %v9284_v19, %v10404_v60  ;;  %v4151_v56 = vadd.f32 1.0, %v4149_v49  ;;  %v4152_v24 = vadd.f32 1.0, %v4150_v38 }
 0x6f4   : > { %v4165_v45 = vmax.f32 %v9286_v3, %v10401_v11  ;;  %v4166_v59 = vmax.f32 %v9286_v3, %v10402_v48 }
 0x6f5   : > { %v4153_v40 = vmax.f32 %v4151_v56, 0.0  ;;  %v4154_v16 = vmax.f32 %v4152_v24, 0.0 }
 0x6f6   : > { %v4167_v28 = vsub.f32 %v4159_v52, %v4165_v45  ;;  %v4168_v22 = vsub.f32 %v4160_v27, %v4166_v59 }
 0x6f8   : > { %v4169_v54 = vadd.f32 1.0, %v4167_v28  ;;  %v4170_v10 = vadd.f32 1.0, %v4168_v22 }
 0x6fa   : > { %v4171_v50 = vmax.f32 %v4169_v54, 0.0  ;;  %v4172_v32 = vmax.f32 %v4170_v10, 0.0 }
 0x6fc   : > { %v4173_v9 = vmul.f32 %v4171_v50, %v4153_v40  ;;  %v4174_v8 = vmul.f32 %v4172_v32, %v4154_v16 }
 0x763   : > { %v4185_v63 = vpop.permute.xlu1 %4184 }
 0x764   : > { %v4187_v41 = vadd.f32 %v4185_v63, %v10409_v53  ;;  %v4188_v36 = vadd.f32 %v4185_v63, %v10410_v58 }
 0x766   : > { %v4189_v61 = vsub.f32 %v4187_v41, %v4173_v9  ;;  %v4190_v42 = vsub.f32 %v4188_v36, %v4174_v8 }
 0x768   : > { %v4191_v55 = vmax.f32 %v4189_v61, 1e-07  ;;  %v4192_v15 = vmax.f32 %v4190_v42, 1e-07 }
 0x76a   : > { %5037 = vrcp.f32 %v4191_v55 }
 0x76b   : > { %5039 = vrcp.f32 %v4192_v15 }
 0x774   : > { %v5038_v37 = vpop.eup %5037 }
 0x775   : > { %v5040_v25 = vpop.eup %5039  ;;  %v4195_v5 = vmul.f32 %v5038_v37, %v4173_v9 }
 0x776   : > { %v4196_v2 = vmul.f32 %v5040_v25, %v4174_v8 }
 0x777   : > { %v4197_v13 = vmax.f32 %v4195_v5, 1e-07 }
 0x778   : > { %v4198_v17 = vmax.f32 %v4196_v2, 1e-07 }
 0x779   : > { %v4199_v57 = vmin.f32 %v4197_v13, 1.0 }
 0x77a   : > { %v9306_v18 = vmin.f32 %v4198_v17, 1.0 }
 0x77b   : > { %v4203_v33 = vrot.slane %v4199_v57, 4 }
 0x77c   : > { %v4209_v14 = vrot.slane %v9306_v18, 4 }
 0x77d   : > { %v4204_v44 = vmax.f32 %v4199_v57, %v4203_v33 }
 0x77e   : > { %v4210_v0 = vmax.f32 %v9306_v18, %v4209_v14 }
 0x77f   : > { %v4205_v7 = vrot.slane %v4204_v44, 2 }
 0x780   : > { %v4211_v6 = vrot.slane %v4210_v0, 2 }
 0x781   : > { %v4206_v39 = vmax.f32 %v4204_v44, %v4205_v7 }
 0x782   : > { %v4212_v35 = vmax.f32 %v4210_v0, %v4211_v6 }
 0x783   : > { %v4207_v26 = vrot.slane %v4206_v39, 1 }
 0x784   : > { %v4213_v4 = vrot.slane %v4212_v35, 1 }
 0x785   : > { %v4208_v21 = vmax.f32 %v4206_v39, %v4207_v26 }
 0x786   : > { %v4214_v30 = vmax.f32 %v4212_v35, %v4213_v4 }
 0x787   : > { %vm4215_vm7 = vcmp.eq.f32.partialorder %v4199_v57, %v4208_v21 }
 0x788   : > { %vm4216_vm5 = vcmp.eq.f32.partialorder %v9306_v18, %v4214_v30  ;;  %v4217_v11 = vsel %vm4215_vm7, %v10411_v12, 8 }
 0x789   : > { %v4218_v45 = vsel %vm4216_vm5, %v10411_v12, 8  ;;  %v4219_v48 = vrot.slane %v4217_v11, 4 }
 0x78a   : > { %v4228_v59 = vrot.slane %v4218_v45, 4 }
 0x78b   : > { %vm4220_vm15 = vcmp.lt.s32.totalorder %v4217_v11, %v4219_v48 }
 0x78c   : > { %v4221_v34 = vsel %vm4220_vm15, %v4217_v11, %v4219_v48  ;;  %vm4229_vm9 = vcmp.lt.s32.totalorder %v4218_v45, %v4228_v59 }
 0x78d   : > { %v4222_v52 = vrot.slane %v4221_v34, 2  ;;  %v4230_v60 = vsel %vm4229_vm9, %v4218_v45, %v4228_v59 }
 0x78e   : > { %v4231_v27 = vrot.slane %v4230_v60, 2 }
 0x78f   : > { %vm4223_vm0 = vcmp.lt.s32.totalorder %v4221_v34, %v4222_v52 }
 0x790   : > { %v4224_v47 = vsel %vm4223_vm0, %v4221_v34, %v4222_v52  ;;  %vm4232_vm12 = vcmp.lt.s32.totalorder %v4230_v60, %v4231_v27 }
 0x791   : > { %v4225_v62 = vrot.slane %v4224_v47, 1  ;;  %v4233_v43 = vsel %vm4232_vm12, %v4230_v60, %v4231_v27 }
 0x792   : > { %v4234_v29 = vrot.slane %v4233_v43, 1 }
 0x793   : > { %vm4226_vm11 = vcmp.lt.s32.totalorder %v4224_v47, %v4225_v62 }
 0x794   : > { %v4227_v31 = vsel %vm4226_vm11, %v4224_v47, %v4225_v62  ;;  %vm4235_vm1 = vcmp.lt.s32.totalorder %v4233_v43, %v4234_v29 }
 0x795   : > { %v4236_v20 = vsel %vm4235_vm1, %v4233_v43, %v4234_v29  ;;  %vm4237_vm2 = vcmp.eq.s32.totalorder %v10411_v12, %v4227_v31 }
 0x796   : > { %vm4238_vm6 = vcmp.eq.s32.totalorder %v10411_v12, %v4236_v20  ;;  %v4719_v51 = vsel %vm4237_vm2, 1.0, %v5119_v23  ;;  %v9316_v28 = vsel %vm4237_vm2, 0.0, %v4199_v57 }
 0x797   : > { %v4720_v22 = vsel %vm4238_vm6, 1.0, %v5119_v23  ;;  %v4243_v49 = vmul.f32 %v4719_v51, %v9282_v46  ;;  %v4257_v38 = vmul.f32 %v4719_v51, %v9286_v3  ;;  %v4271_v54 = vmul.f32 %v4719_v51, %v9280_v1 }
 0x798   : > { %v4244_v10 = vmul.f32 %v4720_v22, %v9282_v46  ;;  %v4258_v56 = vmul.f32 %v4720_v22, %v9286_v3  ;;  %v4272_v24 = vmul.f32 %v4720_v22, %v9280_v1  ;;  %v4285_v50 = vmul.f32 %v4719_v51, %v9284_v19 }
 0x799   : > { %v4245_v32 = vrot.slane %v4243_v49, 4  ;;  %v4259_v40 = vrot.slane %v4257_v38, 4  ;;  %v4273_v16 = vrot.slane %v4271_v54, 4  ;;  %v4286_v63 = vmul.f32 %v4720_v22, %v9284_v19 }
 0x79a   : > { %v4251_v9 = vrot.slane %v4244_v10, 4  ;;  %v4265_v8 = vrot.slane %v4258_v56, 4  ;;  %v4279_v53 = vrot.slane %v4272_v24, 4  ;;  %v4287_v41 = vrot.slane %v4285_v50, 4 }
 0x79b   : > { %v4246_v58 = vadd.f32 %v4245_v32, %v4243_v49  ;;  %v4260_v36 = vadd.f32 %v4259_v40, %v4257_v38  ;;  %v4274_v61 = vadd.f32 %v4273_v16, %v4271_v54  ;;  %v4293_v42 = vrot.slane %v4286_v63, 4 }
 0x79c   : > { %v4252_v55 = vadd.f32 %v4251_v9, %v4244_v10  ;;  %v4266_v15 = vadd.f32 %v4265_v8, %v4258_v56  ;;  %v4280_v37 = vadd.f32 %v4279_v53, %v4272_v24  ;;  %v4288_v25 = vadd.f32 %v4287_v41, %v4285_v50  ;;  %v10412_v9 = vld [vmem:[#allocation23_spill] sm:$0xff] }
 0x79d   : > { %v4247_v5 = vrot.slane %v4246_v58, 2  ;;  %v4261_v2 = vrot.slane %v4260_v36, 2  ;;  %v4275_v13 = vrot.slane %v4274_v61, 2  ;;  %v4294_v17 = vadd.f32 %v4293_v42, %v4286_v63 }
 0x79e   : > { %v4253_v57 = vrot.slane %v4252_v55, 2  ;;  %v4267_v33 = vrot.slane %v4266_v15, 2  ;;  %v4281_v14 = vrot.slane %v4280_v37, 2  ;;  %v4289_v44 = vrot.slane %v4288_v25, 2 }
 0x79f   : > { %v4248_v0 = vadd.f32 %v4247_v5, %v4246_v58  ;;  %v4262_v7 = vadd.f32 %v4261_v2, %v4260_v36  ;;  %v4295_v6 = vrot.slane %v4294_v17, 2  ;;  %v4300_v39 = vsel %vm4238_vm6, 0.0, %v9306_v18  ;;  %v10413_v36 = vld [vmem:[#allocation14_spill] sm:$0xff] }
 0x7a0   : > { %v4254_v35 = vadd.f32 %v4253_v57, %v4252_v55  ;;  %v4268_v26 = vadd.f32 %v4267_v33, %v4266_v15  ;;  %v4301_v4 = vrot.slane %v9316_v28, 4  ;;  %v4307_v21 = vrot.slane %v4300_v39, 4 }
 0x7a1   : > { %v4263_v30 = vrot.slane %v4262_v7, 1  ;;  %v4249_v11 = vrot.slane %v4248_v0, 1  ;;  %v4276_v45 = vadd.f32 %v4275_v13, %v4274_v61  ;;  %v4282_v48 = vadd.f32 %v4281_v14, %v4280_v37 }
 0x7a2   : > { %v4269_v59 = vrot.slane %v4268_v26, 1  ;;  %v4302_v34 = vmax.f32 %v9316_v28, %v4301_v4  ;;  %v4308_v52 = vmax.f32 %v4300_v39, %v4307_v21  ;;  %v4255_v60 = vrot.slane %v4254_v35, 1 }
 0x7a3   : > { %v4250_v27 = vadd.f32 %v4249_v11, %v4248_v0  ;;  %v4264_v47 = vadd.f32 %v4263_v30, %v4262_v7  ;;  %v4277_v62 = vrot.slane %v4276_v45, 1  ;;  %v4283_v43 = vrot.slane %v4282_v48, 1 }
 0x7a4   : > { %v4303_v29 = vrot.slane %v4302_v34, 2  ;;  %v4309_v18 = vrot.slane %v4308_v52, 2  ;;  %v4256_v31 = vadd.f32 %v4255_v60, %v4254_v35  ;;  %v4270_v20 = vadd.f32 %v4269_v59, %v4268_v26 }
 0x7a5   : > { %v4278_v51 = vadd.f32 %v4277_v62, %v4276_v45  ;;  %v4284_v22 = vadd.f32 %v4283_v43, %v4282_v48  ;;  %v4290_v49 = vadd.f32 %v4289_v44, %v4288_v25  ;;  %v4296_v38 = vadd.f32 %v4295_v6, %v4294_v17 }
 0x7a6   : > { %v4304_v54 = vmax.f32 %v4302_v34, %v4303_v29  ;;  %v4310_v10 = vmax.f32 %v4308_v52, %v4309_v18  ;;  %v4399_v56 = vcombine.low %v4250_v27, %v4256_v31  ;;  %v4410_v24 = vcombine.low %v4264_v47, %v4270_v20 }
 0x7a7   : > { %v4291_v50 = vrot.slane %v4290_v49, 1  ;;  %v4297_v32 = vrot.slane %v4296_v38, 1  ;;  %v4427_v40 = vcombine.low %v4278_v51, %v4284_v22  ;;  %v10414_v25 = vlaneseq }
 0x7a8   : > { %v4305_v16 = vrot.slane %v4304_v54, 1  ;;  %v4311_v63 = vrot.slane %v4310_v10, 1  ;;  %v4401_v8 = vsub.f32 %v10412_v9, %v4399_v56  ;;  %v4411_v53 = vrot.slane %v4410_v24, 7 }
 0x7a9   : > { %v4292_v41 = vadd.f32 %v4291_v50, %v4290_v49  ;;  %v4298_v58 = vadd.f32 %v4297_v32, %v4296_v38  ;;  %v4429_v61 = vsub.f32 %v10413_v36, %v4427_v40  ;;  %v4512_v5 = vand.u32 127, %v10414_v25 }
 0x7aa   : > { %v4306_v42 = vmax.f32 %v4304_v54, %v4305_v16  ;;  %v4312_v55 = vmax.f32 %v4310_v10, %v4311_v63  ;;  %v4402_v15 = vand.u32 2147483647, %v4401_v8  ;;  %v4413_v37 = vsub.f32 %v10412_v9, %v4411_v53 }
 0x7ab   : > { %v4514_v13 = vstv %s4731_s17  ;;  %v4430_v14 = vand.u32 2147483647, %v4429_v61  ;;  %v4439_v7 = vcombine.low %v4292_v41, %v4298_v58  ;;  %v4513_v35 = vadd.s32 128, %v4512_v5 }
 0x7ac   : > { %vm4313_vm10 = vcmp.eq.f32.partialorder %v9316_v28, %v4306_v42  ;;  %vm4314_vm14 = vcmp.eq.f32.partialorder %v4300_v39, %v4312_v55  ;;  %v4404_v2 = vmul.f32 0.5, %v4402_v15  ;;  %v4414_v33 = vand.u32 2147483647, %v4413_v37 }
 0x7ad   : > { %v4315_v17 = vsel %vm4313_vm10, %v10411_v12, 8  ;;  %v4316_v57 = vsel %vm4314_vm14, %v10411_v12, 8  ;;  %v9342_v26 = vadd.s32 %v4514_v13, %v4512_v5  ;;  %v4432_v11 = vmul.f32 0.5, %v4430_v14 }
 0x7ae   : > { %v4317_v44 = vrot.slane %v4315_v17, 4  ;;  %v4326_v0 = vrot.slane %v4316_v57, 4  ;;  %v4416_v6 = vmul.f32 0.5, %v4414_v33  ;;  %v4405_v4 = vmul.f32 %v4404_v2, %v4402_v15 }
 0x7af   : > { %v4724_v28 = vadd.f32 -0.5, %v4414_v33  ;;  %vm4415_vm13 = vcmp.lt.f32.partialorder %v4414_v33, 1.0  ;;  %v4440_v59 = vrot.slane %v4439_v7, 7  ;;  %vm4403_vm3 = vcmp.lt.f32.partialorder %v4402_v15, 1.0 }
 0x7b0   : > { %vm4318_vm4 = vcmp.lt.s32.totalorder %v4315_v17, %v4317_v44  ;;  %vm4327_vm8 = vcmp.lt.s32.totalorder %v4316_v57, %v4326_v0  ;;  %v4417_v30 = vmul.f32 %v4416_v6, %v4414_v33  ;;  %v4723_v34 = vadd.f32 -0.5, %v4402_v15  ;;  %v10416_v6 = vld [vmem:[#allocation49_spill] sm:$0xff] }
 0x7b1   : > { %v4319_v39 = vsel %vm4318_vm4, %v4315_v17, %v4317_v44  ;;  %v4328_v21 = vsel %vm4327_vm8, %v4316_v57, %v4326_v0  ;;  %v9344_v60 = vadd.s32 %v4514_v13, %v4513_v35  ;;  %v4442_v47 = vsub.f32 %v10413_v36, %v4440_v59 }
 0x7b2   : > { %v4320_v45 = vrot.slane %v4319_v39, 2  ;;  %v4329_v48 = vrot.slane %v4328_v21, 2  ;;  %v4419_v52 = vsel %vm4415_vm13, %v4417_v30, %v4724_v28  ;;  %v4407_v29 = vsel %vm4403_vm3, %v4405_v4, %v4723_v34 }
 0x7b3   : > { %v4725_v27 = vrot.slane %v4419_v52, 9  ;;  %v4433_v18 = vmul.f32 %v4432_v11, %v4430_v14  ;;  %v4443_v22 = vand.u32 2147483647, %v4442_v47  ;;  %v4726_v49 = vadd.f32 -0.5, %v4430_v14 }
 0x7b4   : > { %vm4321_vm7 = vcmp.lt.s32.totalorder %v4319_v39, %v4320_v45  ;;  %vm4330_vm5 = vcmp.lt.s32.totalorder %v4328_v21, %v4329_v48  ;;  %vm4431_vm0 = vcmp.lt.f32.partialorder %v4430_v14, 1.0  ;;  %vm4517_vm12 = vcmp.lt.s32.totalorder %v9342_v26, 16 }
 0x7b5   : > { %v4322_v62 = vsel %vm4321_vm7, %v4319_v39, %v4320_v45  ;;  %v4331_v43 = vsel %vm4330_vm5, %v4328_v21, %v4329_v48  ;;  %v4424_v51 = vadd.f32 %v4725_v27, %v4407_v29  ;;  %v4435_v10 = vsel %vm4431_vm0, %v4433_v18, %v4726_v49 }
 0x7b6   : > { %v4323_v31 = vrot.slane %v4322_v62, 1  ;;  %v4332_v20 = vrot.slane %v4331_v43, 1  ;;  %v4445_v56 = vmul.f32 0.5, %v4443_v22  ;;  %vm4518_vm11 = vcmp.lt.s32.totalorder %v9344_v60, 16 }
 0x7b7   : > { %v4436_v24 = vadd.f32 %v4435_v10, %v4424_v51  ;;  %vm4444_vm6 = vcmp.lt.f32.partialorder %v4443_v22, 1.0  ;;  %vm4545_vm10 = vcmask 1040384   ;;  %v4727_v16 = vadd.f32 -0.5, %v4443_v22 }
 0x7b8   : > { %vm4324_vm15 = vcmp.lt.s32.totalorder %v4322_v62, %v4323_v31  ;;  %vm4333_vm9 = vcmp.lt.s32.totalorder %v4331_v43, %v4332_v20  ;;  %v4446_v40 = vmul.f32 %v4445_v56, %v4443_v22  ;;  %vm10417_vm4 = vcmask 0  }
 0x7b9   : > { %v4325_v38 = vsel %vm4324_vm15, %v4322_v62, %v4323_v31  ;;  %v4334_v54 = vsel %vm4333_vm9, %v4331_v43, %v4332_v20 }
 0x7ba   : > { %vm4335_vm1 = vcmp.eq.s32.totalorder %v10411_v12, %v4325_v38  ;;  %vm4336_vm2 = vcmp.eq.s32.totalorder %v10411_v12, %v4334_v54  ;;  %v4448_v58 = vsel %vm4444_vm6, %v4446_v40, %v4727_v16 }
 0x7bb   : > { %v4721_v50 = vsel %vm4335_vm1, 1.0, %v5119_v23  ;;  %v4722_v32 = vsel %vm4336_vm2, 1.0, %v5119_v23  ;;  %v4728_v55 = vrot.slane %v4448_v58, 9 }
 0x7bc   : > { %v4341_v63 = vmul.f32 %v4721_v50, %v9282_v46  ;;  %v4342_v8 = vmul.f32 %v4722_v32, %v9282_v46  ;;  %v4355_v53 = vmul.f32 %v4721_v50, %v9286_v3  ;;  %v4356_v41 = vmul.f32 %v4722_v32, %v9286_v3 }
 0x7bd   : > { %v4369_v12 = vmul.f32 %v4721_v50, %v9280_v1  ;;  %v4370_v61 = vmul.f32 %v4722_v32, %v9280_v1  ;;  %v4383_v42 = vmul.f32 %v4721_v50, %v9284_v19  ;;  %v4384_v46 = vmul.f32 %v4722_v32, %v9284_v19  ;;  %v10415_v1 = vld [vmem:[#allocation46_spill] sm:$0xff] }
 0x7be   : > { %v4343_v15 = vrot.slane %v4341_v63, 4  ;;  %v4349_v23 = vrot.slane %v4342_v8, 4  ;;  %v4357_v37 = vrot.slane %v4355_v53, 4  ;;  %v4363_v25 = vrot.slane %v4356_v41, 4 }
 0x7bf   : > { %v4371_v5 = vrot.slane %v4369_v12, 4  ;;  %v4377_v2 = vrot.slane %v4370_v61, 4  ;;  %v4453_v13 = vadd.f32 %v4728_v55, %v4436_v24  ;;  %v4385_v0 = vrot.slane %v4383_v42, 4 }
 0x7c0   : > { %v4344_v17 = vadd.f32 %v4343_v15, %v4341_v63  ;;  %v4350_v57 = vadd.f32 %v4349_v23, %v4342_v8  ;;  %v4358_v3 = vadd.f32 %v4357_v37, %v4355_v53  ;;  %v4364_v33 = vadd.f32 %v4363_v25, %v4356_v41 }
 0x7c1   : > { %v4372_v14 = vadd.f32 %v4371_v5, %v4369_v12  ;;  %v4378_v44 = vadd.f32 %v4377_v2, %v4370_v61  ;;  %v4523_v7 = vrot.slane %v4453_v13, %v10415_v1  ;;  %v4527_v35 = vrot.slane %v4453_v13, %v10416_v6 }
 0x7c2   : > { %v4345_v4 = vrot.slane %v4344_v17, 2  ;;  %v4351_v28 = vrot.slane %v4350_v57, 2  ;;  %v4359_v39 = vrot.slane %v4358_v3, 2  ;;  %v4365_v21 = vrot.slane %v4364_v33, 2 }
 0x7c3   : > { %v4373_v30 = vrot.slane %v4372_v14, 2  ;;  %v4379_v11 = vrot.slane %v4378_v44, 2  ;;  %v4530_v19 = vsel %vm4517_vm12, %v4523_v7, 0.0  ;;  %v4531_v45 = vsel %vm4518_vm11, %v4527_v35, 0.0 }
 0x7c4   : > { %v4346_v48 = vadd.f32 %v4345_v4, %v4344_v17  ;;  %v4352_v59 = vadd.f32 %v4351_v28, %v4350_v57  ;;  %v4546_v34 = vsel %vm4545_vm10, %v4530_v19, 0.0  ;;  %v4547_v52 = vsel %vm4545_vm10, %v4531_v45, 0.0 }
 0x7c5   : > { %v4360_v27 = vadd.f32 %v4359_v39, %v4358_v3  ;;  %v4366_v47 = vadd.f32 %v4365_v21, %v4364_v33  ;;  %v4548_v62 = vadd.f32 %v4547_v52, %v4546_v34  ;;  %v4374_v29 = vadd.f32 %v4373_v30, %v4372_v14 }
 0x7c6   : > { %v4347_v43 = vrot.slane %v4346_v48, 1  ;;  %v4380_v20 = vadd.f32 %v4379_v11, %v4378_v44  ;;  %v4386_v51 = vadd.f32 %v4385_v0, %v4383_v42  ;;  %v4353_v22 = vrot.slane %v4352_v59, 1 }
 0x7c7   : > { %v4361_v18 = vrot.slane %v4360_v27, 1  ;;  %v4367_v31 = vrot.slane %v4366_v47, 1  ;;  %4549 = vadd.xlane.f32.xlu0 %v4548_v62  ;;  %v4375_v49 = vrot.slane %v4374_v29, 1  ;;  %v4391_v38 = vrot.slane %v4384_v46, 4 }
 0x7c8   : > { %v4348_v54 = vadd.f32 %v4347_v43, %v4346_v48  ;;  %v4381_v10 = vrot.slane %v4380_v20, 1  ;;  %v4387_v56 = vrot.slane %v4386_v51, 2  ;;  %v4354_v63 = vadd.f32 %v4353_v22, %v4352_v59 }
 0x7c9   : > { %v4362_v24 = vadd.f32 %v4361_v18, %v4360_v27  ;;  %v4368_v50 = vadd.f32 %v4367_v31, %v4366_v47  ;;  %v4376_v32 = vadd.f32 %v4375_v49, %v4374_v29  ;;  %v4392_v40 = vadd.f32 %v4391_v38, %v4384_v46 }
 0x7ca   : > { %v4388_v16 = vadd.f32 %v4387_v56, %v4386_v51  ;;  %v4382_v8 = vadd.f32 %v4381_v10, %v4380_v20  ;;  %v4461_v0 = vcombine.low %v4348_v54, %v4354_v63 }
 0x7cb   : > { %v4393_v53 = vrot.slane %v4392_v40, 2  ;;  %v4474_v12 = vcombine.low %v4362_v24, %v4368_v50  ;;  %v4485_v61 = vsub.f32 %v4376_v32, %v4348_v54 }
 0x7cc   : > { %v4389_v41 = vrot.slane %v4388_v16, 1  ;;  %v4486_v15 = vsub.f32 %v4382_v8, %v4354_v63  ;;  %v4456_v44 = vcombine.low %v4376_v32, %v4382_v8  ;;  %v4463_v21 = vmax.f32 %v10412_v9, %v4461_v0 }
 0x7cd   : > { %v4394_v58 = vadd.f32 %v4393_v53, %v4392_v40  ;;  %v4475_v25 = vrot.slane %v4474_v12, 7  ;;  %v4487_v5 = vand.u32 2147483647, %v4485_v61 }
 0x7ce   : > { %v4390_v42 = vadd.f32 %v4389_v41, %v4388_v16  ;;  %v4488_v17 = vand.u32 2147483647, %v4486_v15  ;;  %v4458_v39 = vmin.f32 %v10413_v36, %v4456_v44 }
 0x7cf   : > { %v4395_v55 = vrot.slane %v4394_v58, 1  ;;  %v4477_v3 = vmax.f32 %v10412_v9, %v4475_v25 }
 0x7d0   : > { %v4489_v23 = vsub.f32 %v4390_v42, %v4362_v24  ;;  %v4464_v11 = vsub.f32 %v4458_v39, %v4463_v21 }
 0x7d1   : > { %v4396_v37 = vadd.f32 %v4395_v55, %v4394_v58 }
 0x7d2   : > { %v4491_v2 = vand.u32 2147483647, %v4489_v23  ;;  %v4465_v45 = vmax.f32 %v4464_v11, 0.0 }
 0x7d3   : > { %v4468_v13 = vcombine.low %v4390_v42, %v4396_v37  ;;  %v4490_v57 = vsub.f32 %v4396_v37, %v4368_v50  ;;  %v4556_v50 = vld [vmem:[#allocation2] sm:$0x1] }
 0x7d4   : > { %v4493_v14 = vmul.f32 %v4491_v2, %v4487_v5 }
 0x7d5   : > { %v4469_v46 = vrot.slane %v4468_v13, 7  ;;  %v4492_v33 = vand.u32 2147483647, %v4490_v57 }
 0x7d7   : > { %v4471_v7 = vmin.f32 %v10413_v36, %v4469_v46  ;;  %v4494_v35 = vmul.f32 %v4492_v33, %v4488_v17 }
 0x7d9   : > { %v4478_v4 = vsub.f32 %v4471_v7, %v4477_v3  ;;  %v4497_v28 = vcombine.low %v4493_v14, %v4494_v35 }
 0x7db   : > { %5041 = vrcp.f32 %v4497_v28  ;;  %v4479_v30 = vmax.f32 %v4478_v4, 0.0 }
 0x7dd   : > { %v4729_v19 = vrot.slane %v4479_v30, 9 }
 0x7df   : > { %v4484_v48 = vmul.f32 %v4729_v19, %v4465_v45 }
 0x7e5   : > { %v5042_v59 = vpop.eup %5041 }
 0x7e6   : > { %v4500_v34 = vmul.f32 %v5042_v59, %v4484_v48 }
 0x7e8   : > { %v4504_v52 = vsub.f32 1.0, %v4500_v34  ;;  %v4730_v47 = vadd.f32 -0.5, %v4500_v34  ;;  %vm4501_vm14 = vcmp.gt.f32.partialorder %v4500_v34, 0.5 }
 0x7ea   : > { %v4505_v27 = vmax.f32 %v4504_v52, 1e-07  ;;  %v4503_v29 = vmul.f32 0.83811957, %v4730_v47 }
 0x7ec   : > { %5043 = vlog2.f32 %v4505_v27 }
 0x7f6   : > { %v5044_v62 = vpop.eup %5043 }
 0x7f7   : > { %v4507_v43 = vmul.f32 0.6931472, %v5044_v62 }
 0x7f9   : > { %v4508_v18 = vsub.f32 0.0, %v4507_v43 }
 0x7fb   : > { %v4509_v36 = vsel %vm4501_vm14, %v4503_v29, %v4508_v18 }
 0x7fc   : > { %v4536_v9 = vrot.slane %v4509_v36, %v10415_v1  ;;  %v4540_v31 = vrot.slane %v4509_v36, %v10416_v6 }
 0x7fe   : > { %v4543_v20 = vsel %vm4517_vm12, %v4536_v9, 0.0  ;;  %v4544_v51 = vsel %vm4518_vm11, %v4540_v31, 0.0 }
 0x7ff   : > { %v4551_v22 = vsel %vm4545_vm10, %v4543_v20, 0.0  ;;  %v4552_v49 = vsel %vm4545_vm10, %v4544_v51, 0.0 }
 0x800   : > { %v4553_v38 = vadd.f32 %v4552_v49, %v4551_v22 }
 0x802   : > { %4554 = vadd.xlane.f32.xlu1 %v4553_v38 }
 0x854   : > { %v4550_v54 = vpop.xlane.xlu0 %4549 }
 0x855   : > { %v4557_v56 = vmul.f32 0.0625, %v4550_v54 }
 0x88f   : > { %v4555_v10 = vpop.xlane.xlu1 %4554 }
 0x890   : > { %v4558_v24 = vmul.f32 0.03125, %v4555_v10 }
 0x892   : > { %v4559_v1 = vadd.f32 %v4558_v24, %v4557_v56 }
 0x894   : > { %v4560_v32 = vadd.f32 %v4559_v1, %v4556_v50 }
 0x896   : > { %4562 = vst.msk [vmem:[#allocation2] sm:$0x1] %vm10417_vm4, %v4560_v32 }
 0x897 PF: > { %vm10418_vm8 = vcmask 0  }
 0x89d   : > { %v4566_v26 = vld [vmem:[#allocation2] sm:$0x1] }
 0x89e   : > { %4568 = vst.msk [vmem:[%s331_s9] sm:$0x1] %vm10418_vm8, %v4566_v26 }
 0x89f PF: > { %s30_s12 = sadd.s32 1, %s5105_s12   ;;  %s10419_s10 = smov %s5101_s11 }
 0x8a0   : > { %p27_p3 = scmp.ge.s32.totalorder %s30_s12, 4   ;;  %s10420_s11 = smov %s10422_s2 }
 0x8a2   :  { %29 = sbr.rel (!%p27_p3) target bundleno = 37 (0x25), region = 85 }

</bundles_post_ra>
